<compile_context>
chip_gen: v6e
topology: v6e:2x2x1
jax: 0.10.0
libtpu: 0.0.40
codegen_flags: <defaults>
</compile_context>

<pallas_src>
import functools
import math

import jax
import jax.numpy as jnp
from jax.experimental import pallas as pl
from jax.experimental.pallas import tpu as pltpu


# ----------------------------------------------------------------------------
# Fused Bottleneck kernel
# ----------------------------------------------------------------------------
def _bottleneck_kernel(*refs, N, H, W, Cin, width, out_c, stride,
                       has_downsample, eps):
    if has_downsample:
        (x_ref, w1_ref, g1_ref, b1_ref,
         w2_ref, g2_ref, b2_ref,
         w3_ref, g3_ref, b3_ref,
         wd_ref, gd_ref, bd_ref, o_ref) = refs
    else:
        (x_ref, w1_ref, g1_ref, b1_ref,
         w2_ref, g2_ref, b2_ref,
         w3_ref, g3_ref, b3_ref, o_ref) = refs

    f32 = jnp.float32
    bf16 = jnp.bfloat16
    OH = (H + 2 - 3) // stride + 1
    OW = (W + 2 - 3) // stride + 1

    def bn(y, g_ref, b_ref, relu):
        # Training-mode BatchNorm2d (biased batch variance), single data traversal:
        # per-channel sum and sum-of-squares, var = E[y^2] - mean^2 (all f32 math).
        inv_m = 1.0 / y.shape[0]
        mean = jnp.sum(y, axis=0, keepdims=True) * inv_m
        ex2 = jnp.sum(y * y, axis=0, keepdims=True) * inv_m
        var = ex2 - mean * mean
        scale = g_ref[...] * jax.lax.rsqrt(var + eps)
        out = y * scale + (b_ref[...] - mean * scale)
        return jnp.maximum(out, 0.0) if relu else out

    # ---- conv1 (1x1) + bn1 + relu -------------------------------------------
    h1 = jnp.dot(x_ref[...], w1_ref[...], preferred_element_type=f32)   # (M, width)
    h1 = bn(h1, g1_ref, b1_ref, relu=True)

    # ---- conv2 (3x3, pad=1, stride) + bn2 + relu -----------------------------
    # Zero-padded activation built once, already in bf16 (it only feeds the MXU).
    h1b = h1.astype(bf16).reshape(N, H, W, width)
    zr = jnp.zeros((N, 1, W, width), bf16)
    h1p = jnp.concatenate([zr, h1b, zr], axis=1)            # (N, H+2, W,   width)
    zc = jnp.zeros((N, H + 2, 1, width), bf16)
    h1p = jnp.concatenate([zc, h1p, zc], axis=2)            # (N, H+2, W+2, width)

    # Three column-shifted planes (the only sublane-misaligned copies); the three row
    # shifts per plane are cheap leading-dim slices.  For stride > 1, only the kept
    # output positions are gathered before the matmul.
    if stride > 1:
        planes = [h1p[:, :, j:j + W:stride, :] for j in range(3)]
    else:
        planes = [h1p[:, :, j:j + W, :] for j in range(3)]
    cols = []
    for i in range(3):          # (i, j) order matches w2's (kh, kw, cin) row layout
        for j in range(3):
            p = planes[j]
            patch = p[:, i:i + H:stride, :, :] if stride > 1 else p[:, i:i + H, :, :]
            cols.append(patch.reshape(N * OH * OW, width))
    patches = jnp.concatenate(cols, axis=-1)                # (Mout, 9*width) bf16

    h2 = jnp.dot(patches, w2_ref[...], preferred_element_type=f32)      # (Mout, width)
    h2 = bn(h2, g2_ref, b2_ref, relu=True)

    # ---- conv3 (1x1) + bn3 ----------------------------------------------------
    h3 = jnp.dot(h2.astype(bf16), w3_ref[...], preferred_element_type=f32)
    h3 = bn(h3, g3_ref, b3_ref, relu=False)                 # (Mout, out_c)

    # ---- identity / downsample (conv1x1 + BN) ---------------------------------
    if has_downsample:
        xs = x_ref[...]                                     # re-read at point of use
        if stride > 1:
            xs = xs.reshape(N, H, W, Cin)[:, ::stride, ::stride, :].reshape(-1, Cin)
        ident = jnp.dot(xs, wd_ref[...], preferred_element_type=f32)
        ident = bn(ident, gd_ref, bd_ref, relu=False)
    else:
        # stride == 1 and Cin == out_c; identity arrives in bf16 (the input DMA dtype).
        ident = x_ref[...].astype(f32)

    o_ref[...] = jnp.maximum(h3 + ident, 0.0)


# ----------------------------------------------------------------------------
# Wrappers
# ----------------------------------------------------------------------------
def bottleneck_forward_nhwc(params, x_nhwc, *, stride=1, eps=1e-5):
    """Primary (transpose-free) API: x (N,H,W,Cin) -> (N,OH,OW,planes*4) f32."""
    N, H, W, Cin = x_nhwc.shape
    width = params["w1"].shape[1]
    out_c = params["w3"].shape[1]
    has_ds = "wd" in params
    if not has_ds:
        assert stride == 1 and Cin == out_c, "identity path needs matching shapes"

    OH = (H + 2 - 3) // stride + 1
    OW = (W + 2 - 3) // stride + 1
    m_in, m_out = N * H * W, N * OH * OW

    # bf16 input DMA; the (N,H,W,C)->(M,C) reshape is free for NHWC.
    x2d = x_nhwc.astype(jnp.bfloat16).reshape(m_in, Cin)

    inputs = [x2d,
              params["w1"], params["g1"], params["b1"],
              params["w2"], params["g2"], params["b2"],
              params["w3"], params["g3"], params["b3"]]
    if has_ds:
        inputs += [params["wd"], params["gd"], params["bd"]]

    vmem = pl.BlockSpec(memory_space=pltpu.MemorySpace.VMEM)

    # Explicit VMEM budget (do not rely on the default scoped limit).
    est = (2 * m_in * Cin                               # x bf16
           + 4 * m_in * width                           # h1 f32
           + 2 * 2 * N * (H + 2) * (W + 2) * width      # padded act + column planes bf16
           + 2 * m_out * 9 * width                      # patches bf16
           + 4 * m_out * (2 * width + 3 * out_c)        # h2 / h3 / ident / out f32
           + sum(int(p.size) * p.dtype.itemsize for p in inputs[1:]))
    vmem_limit = int(min(60 * 2**20, max(32 * 2**20, 4 * est)))

    flops = (2 * m_in * Cin * width
             + 2 * m_out * (9 * width) * width
             + 2 * m_out * width * out_c
             + (2 * m_out * Cin * out_c if has_ds else 0))
    bytes_accessed = (sum(int(a.size) * a.dtype.itemsize for a in inputs)
                      + 4 * m_out * out_c)
    cost = pl.CostEstimate(flops=flops,
                           transcendentals=(3 + int(has_ds)) * max(width, out_c),
                           bytes_accessed=bytes_accessed)

    kernel = functools.partial(
        _bottleneck_kernel, N=N, H=H, W=W, Cin=Cin, width=width, out_c=out_c,
        stride=stride, has_downsample=has_ds, eps=eps)

    out2d = pl.pallas_call(
        kernel,
        out_shape=jax.ShapeDtypeStruct((m_out, out_c), jnp.float32),
        in_specs=[vmem] * len(inputs),
        out_specs=vmem,
        compiler_params=pltpu.CompilerParams(vmem_limit_bytes=vmem_limit),
        cost_estimate=cost,
    )(*inputs)

    return out2d.reshape(N, OH, OW, out_c)


def bottleneck_forward(params, x_nchw, *, stride=1, eps=1e-5):
    """NCHW drop-in matching the torch module. An NHWC-resident model should call
    bottleneck_forward_nhwc directly so no layout-transpose HBM passes are paid."""
    x_nhwc = jnp.transpose(x_nchw, (0, 2, 3, 1))
    out = bottleneck_forward_nhwc(params, x_nhwc, stride=stride, eps=eps)
    return jnp.transpose(out, (0, 3, 1, 2))


# ----------------------------------------------------------------------------
# Parameter construction (weights pre-transposed to matmul layout and pre-cast
# to bf16 once, at init; conv2 pre-flattened to a single (9*width, width) matrix).
# ----------------------------------------------------------------------------
def make_bottleneck_params(key, inplanes, planes, *, with_downsample,
                           base_width=64, groups=1):
    assert groups == 1  # TODO(synk): groups>1 / dilation>1 variants of conv2 not implemented.
    width = int(planes * (base_width / 64.0)) * groups
    out_c = planes * 4
    k1, k2, k3, k4 = jax.random.split(key, 4)

    def conv_w(k, fan_in, shape):
        std = math.sqrt(2.0 / fan_in)
        return (std * jax.random.normal(k, shape, jnp.float32)).astype(jnp.bfloat16)

    p = {
        "w1": conv_w(k1, inplanes, (inplanes, width)),                  # (Cin, width)
        "g1": jnp.ones((1, width), jnp.float32),
        "b1": jnp.zeros((1, width), jnp.float32),
        # rows ordered (kh, kw, cin) -> single K=9*width MXU matmul in the kernel
        "w2": conv_w(k2, 9 * width, (9 * width, width)),
        "g2": jnp.ones((1, width), jnp.float32),
        "b2": jnp.zeros((1, width), jnp.float32),
        "w3": conv_w(k3, width, (width, out_c)),                        # (width, out_c)
        "g3": jnp.ones((1, out_c), jnp.float32),
        "b3": jnp.zeros((1, out_c), jnp.float32),
    }
    if with_downsample:
        p["wd"] = conv_w(k4, inplanes, (inplanes, out_c))
        p["gd"] = jnp.ones((1, out_c), jnp.float32)
        p["bd"] = jnp.zeros((1, out_c), jnp.float32)
    return p


# ----------------------------------------------------------------------------
# Pure-JAX reference (f32 activations, same bf16 weights) for correctness check.
# ----------------------------------------------------------------------------
def _reference_forward(params, x_nchw, *, stride=1, eps=1e-5):
    f32 = jnp.float32
    hi = jax.lax.Precision.HIGHEST
    x = jnp.transpose(x_nchw, (0, 2, 3, 1)).astype(f32)     # NHWC

    def bn(y, g, b):
        mean = jnp.mean(y, axis=(0, 1, 2))
        var = jnp.mean(jnp.square(y - mean), axis=(0, 1, 2))
        return (y - mean) * jax.lax.rsqrt(var + eps) * g.reshape(-1) + b.reshape(-1)

    w1 = params["w1"].astype(f32)
    width = w1.shape[1]
    h = jnp.einsum("nhwc,cf->nhwf", x, w1, precision=hi)
    h = jax.nn.relu(bn(h, params["g1"], params["b1"]))

    w2 = params["w2"].astype(f32).reshape(3, 3, width, width)           # HWIO
    h = jax.lax.conv_general_dilated(h, w2, window_strides=(stride, stride),
                                     padding=((1, 1), (1, 1)),
                                     dimension_numbers=("NHWC", "HWIO", "NHWC"),
                                     precision=hi)
    h = jax.nn.relu(bn(h, params["g2"], params["b2"]))

    h = jnp.einsum("nhwc,cf->nhwf", h, params["w3"].astype(f32), precision=hi)
    h = bn(h, params["g3"], params["b3"])

    if "wd" in params:
        ident = x[:, ::stride, ::stride, :]
        ident = jnp.einsum("nhwc,cf->nhwf", ident, params["wd"].astype(f32), precision=hi)
        ident = bn(ident, params["gd"], params["bd"])
    else:
        ident = x
    out = jax.nn.relu(h + ident)
    return jnp.transpose(out, (0, 3, 1, 2))


if __name__ == "__main__":
    key = jax.random.PRNGKey(0)
    k_params, k_x = jax.random.split(key)

    # Bottleneck(inplanes=64, planes=32): width=32, expansion output = 128 channels,
    # stride=1, downsample = conv1x1(64->128) + BN (required since 64 != 128).
    inplanes, planes, stride = 64, 32, 1
    params = make_bottleneck_params(k_params, inplanes, planes, with_downsample=True)

    x = jax.random.normal(k_x, (2, inplanes, 16, 16), jnp.float32)       # NCHW, like torch

    fwd = jax.jit(lambda inp: bottleneck_forward(params, inp, stride=stride))
    out = jax.block_until_ready(fwd(x))

    assert out.shape == (2, planes * 4, 16, 16) and out.dtype == jnp.float32
    assert bool(jnp.all(jnp.isfinite(out)))
    assert bool(jnp.all(out >= 0.0))                                     # final ReLU

    ref = _reference_forward(params, x, stride=stride)
    max_err = float(jnp.max(jnp.abs(out - ref)))
    assert max_err < 0.3, f"max |kernel - reference| = {max_err}"

    print("KERNEL_OK")
</pallas_src>

<mosaic_0001>
module attributes {stable_mosaic.version = 11 : i64} {
  func.func @_bottleneck_kernel(%arg0: memref<512x64xbf16, #tpu.memory_space<vmem>>, %arg1: memref<64x32xbf16, #tpu.memory_space<vmem>>, %arg2: memref<1x32xf32, #tpu.memory_space<vmem>>, %arg3: memref<1x32xf32, #tpu.memory_space<vmem>>, %arg4: memref<288x32xbf16, #tpu.memory_space<vmem>>, %arg5: memref<1x32xf32, #tpu.memory_space<vmem>>, %arg6: memref<1x32xf32, #tpu.memory_space<vmem>>, %arg7: memref<32x128xbf16, #tpu.memory_space<vmem>>, %arg8: memref<1x128xf32, #tpu.memory_space<vmem>>, %arg9: memref<1x128xf32, #tpu.memory_space<vmem>>, %arg10: memref<64x128xbf16, #tpu.memory_space<vmem>>, %arg11: memref<1x128xf32, #tpu.memory_space<vmem>>, %arg12: memref<1x128xf32, #tpu.memory_space<vmem>>, %arg13: memref<512x128xf32, #tpu.memory_space<vmem>>) attributes {dimension_semantics = [], scalar_prefetch = 0 : i64, scratch_operands = 0 : i64, tpu.core_type = #tpu.core_type<tc>} {
    %c0 = arith.constant 0 : index
    %c0_0 = arith.constant 0 : index
    %0 = vector.load %arg0[%c0, %c0_0] : memref<512x64xbf16, #tpu.memory_space<vmem>>, vector<512x64xbf16>
    %c0_1 = arith.constant 0 : index
    %c0_2 = arith.constant 0 : index
    %1 = vector.load %arg1[%c0_1, %c0_2] : memref<64x32xbf16, #tpu.memory_space<vmem>>, vector<64x32xbf16>
    %cst = arith.constant dense<0.000000e+00> : vector<512x32xf32>
    %2 = tpu.matmul %0, %1, %cst {dimension_numbers = #tpu.dot_dimension_numbers<[1], [0], [0], [1], [0, 0, 1, 1], [], []>} : vector<512x64xbf16>, vector<64x32xbf16>, vector<512x32xf32> -> vector<512x32xf32>
    %cst_3 = arith.constant dense<0.000000e+00> : vector<32xf32>
    %3 = vector.multi_reduction <add>, %2, %cst_3 [0] : vector<512x32xf32> to vector<32xf32>
    %4 = vector.shape_cast %3 : vector<32xf32> to vector<1x32xf32>
    %cst_4 = arith.constant 0.001953125 : f32
    %5 = vector.broadcast %cst_4 : f32 to vector<1x32xf32>
    %6 = arith.mulf %4, %5 : vector<1x32xf32>
    %7 = arith.mulf %2, %2 : vector<512x32xf32>
    %cst_5 = arith.constant dense<0.000000e+00> : vector<32xf32>
    %8 = vector.multi_reduction <add>, %7, %cst_5 [0] : vector<512x32xf32> to vector<32xf32>
    %9 = vector.shape_cast %8 : vector<32xf32> to vector<1x32xf32>
    %cst_6 = arith.constant 0.001953125 : f32
    %10 = vector.broadcast %cst_6 : f32 to vector<1x32xf32>
    %11 = arith.mulf %9, %10 : vector<1x32xf32>
    %12 = arith.mulf %6, %6 : vector<1x32xf32>
    %13 = arith.subf %11, %12 : vector<1x32xf32>
    %c0_7 = arith.constant 0 : index
    %c0_8 = arith.constant 0 : index
    %14 = vector.load %arg2[%c0_7, %c0_8] : memref<1x32xf32, #tpu.memory_space<vmem>>, vector<1x32xf32>
    %cst_9 = arith.constant 9.99999974E-6 : f32
    %15 = vector.broadcast %cst_9 : f32 to vector<1x32xf32>
    %16 = arith.addf %13, %15 : vector<1x32xf32>
    %17 = math.rsqrt %16 : vector<1x32xf32>
    %18 = arith.mulf %14, %17 : vector<1x32xf32>
    %19 = vector.broadcast %18 : vector<1x32xf32> to vector<512x32xf32>
    %20 = arith.mulf %2, %19 : vector<512x32xf32>
    %c0_10 = arith.constant 0 : index
    %c0_11 = arith.constant 0 : index
    %21 = vector.load %arg3[%c0_10, %c0_11] : memref<1x32xf32, #tpu.memory_space<vmem>>, vector<1x32xf32>
    %22 = arith.mulf %6, %18 : vector<1x32xf32>
    %23 = arith.subf %21, %22 : vector<1x32xf32>
    %24 = vector.broadcast %23 : vector<1x32xf32> to vector<512x32xf32>
    %25 = arith.addf %20, %24 : vector<512x32xf32>
    %cst_12 = arith.constant 0.000000e+00 : f32
    %26 = vector.broadcast %cst_12 : f32 to vector<512x32xf32>
    %27 = arith.maximumf %25, %26 : vector<512x32xf32>
    %28 = arith.truncf %27 : vector<512x32xf32> to vector<512x32xbf16>
    %29 = vector.shape_cast %28 : vector<512x32xbf16> to vector<2x16x16x32xbf16>
    %cst_13 = arith.constant 0.000000e+00 : bf16
    %30 = vector.broadcast %cst_13 : bf16 to vector<2x1x16x32xbf16>
    %31 = tpu.concatenate %30, %29, %30 in 1 : vector<2x1x16x32xbf16>, vector<2x16x16x32xbf16>, vector<2x1x16x32xbf16> -> vector<2x18x16x32xbf16>
    %cst_14 = arith.constant 0.000000e+00 : bf16
    %32 = vector.broadcast %cst_14 : bf16 to vector<2x18x1x32xbf16>
    %33 = tpu.concatenate %32, %31, %32 in 2 : vector<2x18x1x32xbf16>, vector<2x18x16x32xbf16>, vector<2x18x1x32xbf16> -> vector<2x18x18x32xbf16>
    %34 = vector.extract_strided_slice %33 {offsets = [0, 0, 0, 0], sizes = [2, 18, 16, 32], strides = [1, 1, 1, 1]} : vector<2x18x18x32xbf16> to vector<2x18x16x32xbf16>
    %35 = vector.extract_strided_slice %33 {offsets = [0, 0, 1, 0], sizes = [2, 18, 16, 32], strides = [1, 1, 1, 1]} : vector<2x18x18x32xbf16> to vector<2x18x16x32xbf16>
    %36 = vector.extract_strided_slice %33 {offsets = [0, 0, 2, 0], sizes = [2, 18, 16, 32], strides = [1, 1, 1, 1]} : vector<2x18x18x32xbf16> to vector<2x18x16x32xbf16>
    %37 = vector.extract_strided_slice %34 {offsets = [0, 0, 0, 0], sizes = [2, 16, 16, 32], strides = [1, 1, 1, 1]} : vector<2x18x16x32xbf16> to vector<2x16x16x32xbf16>
    %38 = vector.shape_cast %37 : vector<2x16x16x32xbf16> to vector<512x32xbf16>
    %39 = vector.extract_strided_slice %35 {offsets = [0, 0, 0, 0], sizes = [2, 16, 16, 32], strides = [1, 1, 1, 1]} : vector<2x18x16x32xbf16> to vector<2x16x16x32xbf16>
    %40 = vector.shape_cast %39 : vector<2x16x16x32xbf16> to vector<512x32xbf16>
    %41 = vector.extract_strided_slice %36 {offsets = [0, 0, 0, 0], sizes = [2, 16, 16, 32], strides = [1, 1, 1, 1]} : vector<2x18x16x32xbf16> to vector<2x16x16x32xbf16>
    %42 = vector.shape_cast %41 : vector<2x16x16x32xbf16> to vector<512x32xbf16>
    %43 = vector.extract_strided_slice %34 {offsets = [0, 1, 0, 0], sizes = [2, 16, 16, 32], strides = [1, 1, 1, 1]} : vector<2x18x16x32xbf16> to vector<2x16x16x32xbf16>
    %44 = vector.shape_cast %43 : vector<2x16x16x32xbf16> to vector<512x32xbf16>
    %45 = vector.extract_strided_slice %35 {offsets = [0, 1, 0, 0], sizes = [2, 16, 16, 32], strides = [1, 1, 1, 1]} : vector<2x18x16x32xbf16> to vector<2x16x16x32xbf16>
    %46 = vector.shape_cast %45 : vector<2x16x16x32xbf16> to vector<512x32xbf16>
    %47 = vector.extract_strided_slice %36 {offsets = [0, 1, 0, 0], sizes = [2, 16, 16, 32], strides = [1, 1, 1, 1]} : vector<2x18x16x32xbf16> to vector<2x16x16x32xbf16>
    %48 = vector.shape_cast %47 : vector<2x16x16x32xbf16> to vector<512x32xbf16>
    %49 = vector.extract_strided_slice %34 {offsets = [0, 2, 0, 0], sizes = [2, 16, 16, 32], strides = [1, 1, 1, 1]} : vector<2x18x16x32xbf16> to vector<2x16x16x32xbf16>
    %50 = vector.shape_cast %49 : vector<2x16x16x32xbf16> to vector<512x32xbf16>
    %51 = vector.extract_strided_slice %35 {offsets = [0, 2, 0, 0], sizes = [2, 16, 16, 32], strides = [1, 1, 1, 1]} : vector<2x18x16x32xbf16> to vector<2x16x16x32xbf16>
    %52 = vector.shape_cast %51 : vector<2x16x16x32xbf16> to vector<512x32xbf16>
    %53 = vector.extract_strided_slice %36 {offsets = [0, 2, 0, 0], sizes = [2, 16, 16, 32], strides = [1, 1, 1, 1]} : vector<2x18x16x32xbf16> to vector<2x16x16x32xbf16>
    %54 = vector.shape_cast %53 : vector<2x16x16x32xbf16> to vector<512x32xbf16>
    %55 = tpu.concatenate %38, %40, %42, %44, %46, %48, %50, %52, %54 in 1 : vector<512x32xbf16>, vector<512x32xbf16>, vector<512x32xbf16>, vector<512x32xbf16>, vector<512x32xbf16>, vector<512x32xbf16>, vector<512x32xbf16>, vector<512x32xbf16>, vector<512x32xbf16> -> vector<512x288xbf16>
    %c0_15 = arith.constant 0 : index
    %c0_16 = arith.constant 0 : index
    %56 = vector.load %arg4[%c0_15, %c0_16] : memref<288x32xbf16, #tpu.memory_space<vmem>>, vector<288x32xbf16>
    %cst_17 = arith.constant dense<0.000000e+00> : vector<512x32xf32>
    %57 = tpu.matmul %55, %56, %cst_17 {dimension_numbers = #tpu.dot_dimension_numbers<[1], [0], [0], [1], [0, 0, 1, 1], [], []>} : vector<512x288xbf16>, vector<288x32xbf16>, vector<512x32xf32> -> vector<512x32xf32>
    %cst_18 = arith.constant dense<0.000000e+00> : vector<32xf32>
    %58 = vector.multi_reduction <add>, %57, %cst_18 [0] : vector<512x32xf32> to vector<32xf32>
    %59 = vector.shape_cast %58 : vector<32xf32> to vector<1x32xf32>
    %cst_19 = arith.constant 0.001953125 : f32
    %60 = vector.broadcast %cst_19 : f32 to vector<1x32xf32>
    %61 = arith.mulf %59, %60 : vector<1x32xf32>
    %62 = arith.mulf %57, %57 : vector<512x32xf32>
    %cst_20 = arith.constant dense<0.000000e+00> : vector<32xf32>
    %63 = vector.multi_reduction <add>, %62, %cst_20 [0] : vector<512x32xf32> to vector<32xf32>
    %64 = vector.shape_cast %63 : vector<32xf32> to vector<1x32xf32>
    %cst_21 = arith.constant 0.001953125 : f32
    %65 = vector.broadcast %cst_21 : f32 to vector<1x32xf32>
    %66 = arith.mulf %64, %65 : vector<1x32xf32>
    %67 = arith.mulf %61, %61 : vector<1x32xf32>
    %68 = arith.subf %66, %67 : vector<1x32xf32>
    %c0_22 = arith.constant 0 : index
    %c0_23 = arith.constant 0 : index
    %69 = vector.load %arg5[%c0_22, %c0_23] : memref<1x32xf32, #tpu.memory_space<vmem>>, vector<1x32xf32>
    %cst_24 = arith.constant 9.99999974E-6 : f32
    %70 = vector.broadcast %cst_24 : f32 to vector<1x32xf32>
    %71 = arith.addf %68, %70 : vector<1x32xf32>
    %72 = math.rsqrt %71 : vector<1x32xf32>
    %73 = arith.mulf %69, %72 : vector<1x32xf32>
    %74 = vector.broadcast %73 : vector<1x32xf32> to vector<512x32xf32>
    %75 = arith.mulf %57, %74 : vector<512x32xf32>
    %c0_25 = arith.constant 0 : index
    %c0_26 = arith.constant 0 : index
    %76 = vector.load %arg6[%c0_25, %c0_26] : memref<1x32xf32, #tpu.memory_space<vmem>>, vector<1x32xf32>
    %77 = arith.mulf %61, %73 : vector<1x32xf32>
    %78 = arith.subf %76, %77 : vector<1x32xf32>
    %79 = vector.broadcast %78 : vector<1x32xf32> to vector<512x32xf32>
    %80 = arith.addf %75, %79 : vector<512x32xf32>
    %cst_27 = arith.constant 0.000000e+00 : f32
    %81 = vector.broadcast %cst_27 : f32 to vector<512x32xf32>
    %82 = arith.maximumf %80, %81 : vector<512x32xf32>
    %83 = arith.truncf %82 : vector<512x32xf32> to vector<512x32xbf16>
    %c0_28 = arith.constant 0 : index
    %c0_29 = arith.constant 0 : index
    %84 = vector.load %arg7[%c0_28, %c0_29] : memref<32x128xbf16, #tpu.memory_space<vmem>>, vector<32x128xbf16>
    %cst_30 = arith.constant dense<0.000000e+00> : vector<512x128xf32>
    %85 = tpu.matmul %83, %84, %cst_30 {dimension_numbers = #tpu.dot_dimension_numbers<[1], [0], [0], [1], [0, 0, 1, 1], [], []>} : vector<512x32xbf16>, vector<32x128xbf16>, vector<512x128xf32> -> vector<512x128xf32>
    %cst_31 = arith.constant dense<0.000000e+00> : vector<128xf32>
    %86 = vector.multi_reduction <add>, %85, %cst_31 [0] : vector<512x128xf32> to vector<128xf32>
    %87 = vector.shape_cast %86 : vector<128xf32> to vector<1x128xf32>
    %cst_32 = arith.constant 0.001953125 : f32
    %88 = vector.broadcast %cst_32 : f32 to vector<1x128xf32>
    %89 = arith.mulf %87, %88 : vector<1x128xf32>
    %90 = arith.mulf %85, %85 : vector<512x128xf32>
    %cst_33 = arith.constant dense<0.000000e+00> : vector<128xf32>
    %91 = vector.multi_reduction <add>, %90, %cst_33 [0] : vector<512x128xf32> to vector<128xf32>
    %92 = vector.shape_cast %91 : vector<128xf32> to vector<1x128xf32>
    %cst_34 = arith.constant 0.001953125 : f32
    %93 = vector.broadcast %cst_34 : f32 to vector<1x128xf32>
    %94 = arith.mulf %92, %93 : vector<1x128xf32>
    %95 = arith.mulf %89, %89 : vector<1x128xf32>
    %96 = arith.subf %94, %95 : vector<1x128xf32>
    %c0_35 = arith.constant 0 : index
    %c0_36 = arith.constant 0 : index
    %97 = vector.load %arg8[%c0_35, %c0_36] : memref<1x128xf32, #tpu.memory_space<vmem>>, vector<1x128xf32>
    %cst_37 = arith.constant 9.99999974E-6 : f32
    %98 = vector.broadcast %cst_37 : f32 to vector<1x128xf32>
    %99 = arith.addf %96, %98 : vector<1x128xf32>
    %100 = math.rsqrt %99 : vector<1x128xf32>
    %101 = arith.mulf %97, %100 : vector<1x128xf32>
    %102 = vector.broadcast %101 : vector<1x128xf32> to vector<512x128xf32>
    %103 = arith.mulf %85, %102 : vector<512x128xf32>
    %c0_38 = arith.constant 0 : index
    %c0_39 = arith.constant 0 : index
    %104 = vector.load %arg9[%c0_38, %c0_39] : memref<1x128xf32, #tpu.memory_space<vmem>>, vector<1x128xf32>
    %105 = arith.mulf %89, %101 : vector<1x128xf32>
    %106 = arith.subf %104, %105 : vector<1x128xf32>
    %107 = vector.broadcast %106 : vector<1x128xf32> to vector<512x128xf32>
    %108 = arith.addf %103, %107 : vector<512x128xf32>
    %c0_40 = arith.constant 0 : index
    %c0_41 = arith.constant 0 : index
    %109 = vector.load %arg0[%c0_40, %c0_41] : memref<512x64xbf16, #tpu.memory_space<vmem>>, vector<512x64xbf16>
    %c0_42 = arith.constant 0 : index
    %c0_43 = arith.constant 0 : index
    %110 = vector.load %arg10[%c0_42, %c0_43] : memref<64x128xbf16, #tpu.memory_space<vmem>>, vector<64x128xbf16>
    %cst_44 = arith.constant dense<0.000000e+00> : vector<512x128xf32>
    %111 = tpu.matmul %109, %110, %cst_44 {dimension_numbers = #tpu.dot_dimension_numbers<[1], [0], [0], [1], [0, 0, 1, 1], [], []>} : vector<512x64xbf16>, vector<64x128xbf16>, vector<512x128xf32> -> vector<512x128xf32>
    %cst_45 = arith.constant dense<0.000000e+00> : vector<128xf32>
    %112 = vector.multi_reduction <add>, %111, %cst_45 [0] : vector<512x128xf32> to vector<128xf32>
    %113 = vector.shape_cast %112 : vector<128xf32> to vector<1x128xf32>
    %cst_46 = arith.constant 0.001953125 : f32
    %114 = vector.broadcast %cst_46 : f32 to vector<1x128xf32>
    %115 = arith.mulf %113, %114 : vector<1x128xf32>
    %116 = arith.mulf %111, %111 : vector<512x128xf32>
    %cst_47 = arith.constant dense<0.000000e+00> : vector<128xf32>
    %117 = vector.multi_reduction <add>, %116, %cst_47 [0] : vector<512x128xf32> to vector<128xf32>
    %118 = vector.shape_cast %117 : vector<128xf32> to vector<1x128xf32>
    %cst_48 = arith.constant 0.001953125 : f32
    %119 = vector.broadcast %cst_48 : f32 to vector<1x128xf32>
    %120 = arith.mulf %118, %119 : vector<1x128xf32>
    %121 = arith.mulf %115, %115 : vector<1x128xf32>
    %122 = arith.subf %120, %121 : vector<1x128xf32>
    %c0_49 = arith.constant 0 : index
    %c0_50 = arith.constant 0 : index
    %123 = vector.load %arg11[%c0_49, %c0_50] : memref<1x128xf32, #tpu.memory_space<vmem>>, vector<1x128xf32>
    %cst_51 = arith.constant 9.99999974E-6 : f32
    %124 = vector.broadcast %cst_51 : f32 to vector<1x128xf32>
    %125 = arith.addf %122, %124 : vector<1x128xf32>
    %126 = math.rsqrt %125 : vector<1x128xf32>
    %127 = arith.mulf %123, %126 : vector<1x128xf32>
    %128 = vector.broadcast %127 : vector<1x128xf32> to vector<512x128xf32>
    %129 = arith.mulf %111, %128 : vector<512x128xf32>
    %c0_52 = arith.constant 0 : index
    %c0_53 = arith.constant 0 : index
    %130 = vector.load %arg12[%c0_52, %c0_53] : memref<1x128xf32, #tpu.memory_space<vmem>>, vector<1x128xf32>
    %131 = arith.mulf %115, %127 : vector<1x128xf32>
    %132 = arith.subf %130, %131 : vector<1x128xf32>
    %133 = vector.broadcast %132 : vector<1x128xf32> to vector<512x128xf32>
    %134 = arith.addf %129, %133 : vector<512x128xf32>
    %135 = arith.addf %108, %134 : vector<512x128xf32>
    %cst_54 = arith.constant 0.000000e+00 : f32
    %136 = vector.broadcast %cst_54 : f32 to vector<512x128xf32>
    %137 = arith.maximumf %135, %136 : vector<512x128xf32>
    %c0_55 = arith.constant 0 : index
    %c0_56 = arith.constant 0 : index
    %138 = vector.load %arg13[%c0_55, %c0_56] : memref<512x128xf32, #tpu.memory_space<vmem>>, vector<512x128xf32>
    tpu.vector_store %arg13[%c0_55, %c0_56], %137 {strides = array<i32>} : memref<512x128xf32, #tpu.memory_space<vmem>>, vector<512x128xf32>,
    return
  }
}

</mosaic_0001>

<bundles_post_ra>
// kernel: _lambda_.1
= control target key start
LH: loop header
LB: loop body
LE: loop exit
PB: predicated region body
PF: predicated region fallthrough
CT: control target
= control target key end

     0   :  { %vm302_vm0 = vcmask 523264   ;;  %s12732_s0 = inlined_call_operand.vmem [shape: bf16[512,64], index: 0, kind: input, shape index: {}]   ;;  %s12733_s1 = inlined_call_operand.vmem [shape: bf16[64,32], index: 1, kind: input, shape index: {}]   ;;  %s12734_s2 = inlined_call_operand.vmem [shape: f32[1,32], index: 2, kind: input, shape index: {}, may-alias: {2,5}]   ;;  %s12735_s3 = inlined_call_operand.vmem [shape: f32[1,32], index: 3, kind: input, shape index: {}, may-alias: {3,6}]   ;;  %s12736_s4 = inlined_call_operand.vmem [shape: bf16[288,32], index: 4, kind: input, shape index: {}]   ;;  %s12737_s5 = inlined_call_operand.vmem [shape: f32[1,32], index: 5, kind: input, shape index: {}, may-alias: {2,5}]   ;;  %s12738_s6 = inlined_call_operand.vmem [shape: f32[1,32], index: 6, kind: input, shape index: {}, may-alias: {3,6}]   ;;  %s12739_s7 = inlined_call_operand.vmem [shape: bf16[32,128], index: 7, kind: input, shape index: {}]   ;;  %s12740_s8 = inlined_call_operand.vmem [shape: f32[1,128], index: 8, kind: input, shape index: {}, may-alias: {8,11}]   ;;  %s12741_s9 = inlined_call_operand.vmem [shape: f32[1,128], index: 9, kind: input, shape index: {}, may-alias: {9,12}]   ;;  %s12742_s10 = inlined_call_operand.vmem [shape: bf16[64,128], index: 10, kind: input, shape index: {}]   ;;  %s12743_s11 = inlined_call_operand.vmem [shape: f32[1,128], index: 11, kind: input, shape index: {}, may-alias: {8,11}]   ;;  %s12744_s12 = inlined_call_operand.vmem [shape: f32[1,128], index: 12, kind: input, shape index: {}, may-alias: {9,12}]   ;;  %s12745_s13 = inlined_call_operand.hbm [shape: f32[512,128], index: 13, kind: output, shape index: {}]  }
   0x1   :  { %v6726_v0 = vld [vmem:[%s12733_s1 + $0x18] sm:$0xff]   ;;  %v6727_v1 = vld [vmem:[%s12733_s1 + $0x10] sm:$0xff]   ;;  %v6728_v2 = vld [vmem:[%s12733_s1 + $0x8] sm:$0xff]  }
   0x2   :  { %6402 = vmatprep.subr.bf16.mxu0 %v6726_v0  ;;  %v6730_v3 = vld [vmem:[%s12732_s0] sm:$0xff]   ;;  %v6731_v5 = vld [vmem:[%s12732_s0 + $0x8] sm:$0xff]   ;;  %v6732_v6 = vld [vmem:[%s12732_s0 + $0x10] sm:$0xff]  }
   0x3   :  { %6403 = vmatpush3.bf16.msra.mxu0 %v6726_v0  ;;  %6410 = vmatprep.mubr.msk.bf16.mxu0 %vm302_vm0, %v6730_v3  ;;  %v6729_v4 = vld [vmem:[%s12733_s1] sm:$0xff]   ;;  %v6733_v7 = vld [vmem:[%s12732_s0 + $0x18] sm:$0xff]   ;;  %v6735_v9 = vld [vmem:[%s12732_s0 + $0x28] sm:$0xff]  }
   0x4   :  { %6404 = vmatprep.subr.bf16.mxu0 %v6727_v1  ;;  %v6734_v8 = vld [vmem:[%s12732_s0 + $0x20] sm:$0xff]   ;;  %v6736_v10 = vld [vmem:[%s12732_s0 + $0x30] sm:$0xff]   ;;  %v6737_v11 = vld [vmem:[%s12732_s0 + $0x38] sm:$0xff]  }
   0x5   :  { %v6738_v12 = vld [vmem:[%s12732_s0 + $0x40] sm:$0xff]   ;;  %v6739_v13 = vld [vmem:[%s12732_s0 + $0x48] sm:$0xff]   ;;  %v6740_v14 = vld [vmem:[%s12732_s0 + $0x50] sm:$0xff]  }
   0x7   :  { %6405 = vmatpush3.bf16.msra.mxu0 %v6727_v1 }
   0x8   :  { %6406 = vmatprep.subr.bf16.mxu0 %v6728_v2 }
   0xb   :  { %6407 = vmatpush3.bf16.msra.mxu0 %v6728_v2 }
   0xc   :  { %6408 = vmatprep.subr.bf16.mxu0 %v6729_v4 }
   0xf   :  { %6409 = vmatpush3.bf16.msra.mxu0 %v6729_v4 }
  0x12   :  { %6411 = vmatmul.mubr.msk.bf16.vlgmr.msra.gmra.mxu0 %vm302_vm0, %v6731_v5 }
  0x13   :  { %6414 = vmatprep.mubr.msk.bf16.mxu0 %vm302_vm0, %v6732_v6 }
  0x1a   :  { %6415 = vmatmul.mubr.msk.bf16.gmra.mxu0 %vm302_vm0, %v6733_v7 }
  0x1b   :  { %6418 = vmatprep.mubr.msk.bf16.mxu0 %vm302_vm0, %v6734_v8 }
  0x22   :  { %6419 = vmatmul.mubr.msk.bf16.gmra.mxu0 %vm302_vm0, %v6735_v9 }
  0x23   :  { %6422 = vmatprep.mubr.msk.bf16.mxu0 %vm302_vm0, %v6736_v10 }
  0x2a   :  { %6423 = vmatmul.mubr.msk.bf16.gmra.mxu0 %vm302_vm0, %v6737_v11 }
  0x2b   :  { %6426 = vmatprep.mubr.msk.bf16.mxu0 %vm302_vm0, %v6738_v12 }
  0x32   :  { %6427 = vmatmul.mubr.msk.bf16.gmra.mxu0 %vm302_vm0, %v6739_v13 }
  0x33   :  { %6430 = vmatprep.mubr.msk.bf16.mxu0 %vm302_vm0, %v6740_v14 }
  0x34   :  { %18 = vsyncpa [#allocation3], 0  ;;  %v6741_v15 = vld [vmem:[%s12732_s0 + $0x58] sm:$0xff]   ;;  %v6742_v16 = vld [vmem:[%s12732_s0 + $0x60] sm:$0xff]   ;;  %vm688_vm1 = vcmask 261120   ;;  %vm1563_vm2 = vcmask 1040384  }
  0x35   :  { %v6743_v17 = vld [vmem:[%s12732_s0 + $0x68] sm:$0xff]   ;;  %v6744_v18 = vld [vmem:[%s12732_s0 + $0x70] sm:$0xff]   ;;  %v6745_v19 = vld [vmem:[%s12732_s0 + $0x78] sm:$0xff]   ;;  %vm1564_vm3 = vsmask.f32 256  ;;  %vm2067_vm5 = vcmask 1046528  }
  0x36   :  { %v6746_v20 = vld [vmem:[%s12732_s0 + $0x80] sm:$0xff]   ;;  %v6747_v21 = vld [vmem:[%s12732_s0 + $0x88] sm:$0xff]   ;;  %v6748_v22 = vld [vmem:[%s12732_s0 + $0x90] sm:$0xff]   ;;  %s6849_s25 = smov 64   ;;  %vm1632_vm6 = vsmask.f32 7424 }
  0x37   :  { %v6749_v23 = vld [vmem:[%s12732_s0 + $0x98] sm:$0xff]   ;;  %v6750_v24 = vld [vmem:[%s12732_s0 + $0xa0] sm:$0xff]   ;;  %v6751_v25 = vld [vmem:[%s12732_s0 + $0xa8] sm:$0xff]   ;;  %s6850_s26 = smov 96   ;;  %s6851_s27 = smov 32   ;;  %vm2695_vm7 = vcmask 785408  }
  0x38   :  { %v6752_v26 = vld [vmem:[%s12732_s0 + $0xb0] sm:$0xff]   ;;  %v6753_v27 = vld [vmem:[%s12732_s0 + $0xb8] sm:$0xff]   ;;  %v6754_v28 = vld [vmem:[%s12732_s0 + $0xc0] sm:$0xff]  }
  0x39   :  { %v6755_v29 = vld [vmem:[%s12732_s0 + $0xc8] sm:$0xff]   ;;  %v6756_v30 = vld [vmem:[%s12732_s0 + $0xd0] sm:$0xff]   ;;  %v6757_v31 = vld [vmem:[%s12732_s0 + $0xd8] sm:$0xff]  }
  0x3a   :  { %6431 = vmatmul.mubr.msk.bf16.gmra.mxu0 %vm302_vm0, %v6741_v15  ;;  %v6758_v32 = vld [vmem:[%s12732_s0 + $0xe0] sm:$0xff]   ;;  %v6759_v33 = vld [vmem:[%s12732_s0 + $0xe8] sm:$0xff]   ;;  %v6760_v34 = vld [vmem:[%s12732_s0 + $0xf0] sm:$0xff]  }
  0x3b   :  { %6434 = vmatprep.mubr.msk.bf16.mxu0 %vm302_vm0, %v6742_v16  ;;  %v6761_v35 = vld [vmem:[%s12732_s0 + $0xf8] sm:$0xff]   ;;  %vm7292_vm4 = vmand %vm1563_vm2, %vm1564_vm3 }
  0x42   :  { %6435 = vmatmul.mubr.msk.bf16.gmra.mxu0 %vm302_vm0, %v6743_v17 }
  0x43   :  { %6438 = vmatprep.mubr.msk.bf16.mxu0 %vm302_vm0, %v6744_v18 }
  0x4a   :  { %6439 = vmatmul.mubr.msk.bf16.gmra.mxu0 %vm302_vm0, %v6745_v19 }
  0x4b   :  { %6442 = vmatprep.mubr.msk.bf16.mxu0 %vm302_vm0, %v6746_v20 }
  0x52   :  { %6443 = vmatmul.mubr.msk.bf16.gmra.mxu0 %vm302_vm0, %v6747_v21 }
  0x53   :  { %6446 = vmatprep.mubr.msk.bf16.mxu0 %vm302_vm0, %v6748_v22 }
  0x5a   :  { %6447 = vmatmul.mubr.msk.bf16.gmra.mxu0 %vm302_vm0, %v6749_v23 }
  0x5b   :  { %6450 = vmatprep.mubr.msk.bf16.mxu0 %vm302_vm0, %v6750_v24 }
  0x62   :  { %6451 = vmatmul.mubr.msk.bf16.gmra.mxu0 %vm302_vm0, %v6751_v25 }
  0x63   :  { %6454 = vmatprep.mubr.msk.bf16.mxu0 %vm302_vm0, %v6752_v26 }
  0x6a   :  { %6455 = vmatmul.mubr.msk.bf16.gmra.mxu0 %vm302_vm0, %v6753_v27 }
  0x6b   :  { %6458 = vmatprep.mubr.msk.bf16.mxu0 %vm302_vm0, %v6754_v28 }
  0x72   :  { %6459 = vmatmul.mubr.msk.bf16.gmra.mxu0 %vm302_vm0, %v6755_v29 }
  0x73   :  { %6462 = vmatprep.mubr.msk.bf16.mxu0 %vm302_vm0, %v6756_v30 }
  0x7a   :  { %6463 = vmatmul.mubr.msk.bf16.gmra.mxu0 %vm302_vm0, %v6757_v31 }
  0x7b   :  { %6466 = vmatprep.mubr.msk.bf16.mxu0 %vm302_vm0, %v6758_v32 }
  0x82   :  { %6467 = vmatmul.mubr.msk.bf16.gmra.mxu0 %vm302_vm0, %v6759_v33 }
  0x83   :  { %6470 = vmatprep.mubr.msk.bf16.mxu0 %vm302_vm0, %v6760_v34 }
  0x8a   :  { %6471 = vmatmul.mubr.msk.bf16.gmra.mxu0 %vm302_vm0, %v6761_v35 }
  0xd2   :  { %v7065_v36 = vpop.f32.mrf.mxu0 }
  0xd3   :  { %12960 = vst [vmem:[#allocation5_spill] sm:$0xff] %v7065_v36  ;;  %v825_v41 = vmul.f32 %v7065_v36, %v7065_v36  ;;  %v692_v47 = vsel %vm688_vm1, %v7065_v36, 0.0 }
  0xd4   :  { %v7067_v37 = vpop.f32.mrf.mxu0 }
  0xd5   :  { %12961 = vst [vmem:[#allocation6_spill] sm:$0xff] %v7067_v37  ;;  %v823_v39 = vmul.f32 %v7067_v37, %v7067_v37  ;;  %v689_v42 = vsel %vm688_vm1, %v7067_v37, 0.0  ;;  %v890_v54 = vsel %vm688_vm1, %v825_v41, 0.0 }
  0xd6   :  { %v7069_v38 = vpop.f32.mrf.mxu0 }
  0xd7   :  { %12962 = vst [vmem:[#allocation7_spill] sm:$0xff] %v7069_v38  ;;  %v887_v48 = vsel %vm688_vm1, %v823_v39, 0.0  ;;  %v826_v49 = vmul.f32 %v7069_v38, %v7069_v38  ;;  %v694_v55 = vsel %vm688_vm1, %v7069_v38, 0.0 }
  0xd8   :  { %v7073_v40 = vpop.f32.mrf.mxu0 }
  0xd9   :  { %12963 = vst [vmem:[#allocation8_spill] sm:$0xff] %v7073_v40  ;;  %v690_v43 = vsel %vm688_vm1, %v7073_v40, 0.0  ;;  %v824_v44 = vmul.f32 %v7073_v40, %v7073_v40  ;;  %v892_v60 = vsel %vm688_vm1, %v826_v49, 0.0 }
  0xda   :  { %v691_v45 = vadd.f32 %v690_v43, %v689_v42  ;;  %v7083_v46 = vpop.f32.mrf.mxu0 }
  0xdb   :  { %v888_v50 = vsel %vm688_vm1, %v824_v44, 0.0  ;;  %v829_v1 = vmul.f32 %v7083_v46, %v7083_v46  ;;  %v700_v8 = vsel %vm688_vm1, %v7083_v46, 0.0 }
  0xdc   :  { %v889_v51 = vadd.f32 %v888_v50, %v887_v48  ;;  %v7091_v52 = vpop.f32.mrf.mxu0  ;;  %v693_v53 = vadd.f32 %v692_v47, %v691_v45 }
  0xdd   :  { %12964 = vst [vmem:[#allocation9_spill] sm:$0xff] %v7091_v52  ;;  %v827_v56 = vmul.f32 %v7091_v52, %v7091_v52  ;;  %v696_v61 = vsel %vm688_vm1, %v7091_v52, 0.0  ;;  %v898_v14 = vsel %vm688_vm1, %v829_v1, 0.0 }
  0xde   :  { %v695_v57 = vadd.f32 %v694_v55, %v693_v53  ;;  %v891_v58 = vadd.f32 %v890_v54, %v889_v51  ;;  %v7098_v59 = vpop.f32.mrf.mxu0 }
  0xdf   :  { %v894_v2 = vsel %vm688_vm1, %v827_v56, 0.0  ;;  %v830_v9 = vmul.f32 %v7098_v59, %v7098_v59  ;;  %v702_v15 = vsel %vm688_vm1, %v7098_v59, 0.0 }
  0xe0   :  { %v697_v62 = vadd.f32 %v696_v61, %v695_v57  ;;  %v893_v63 = vadd.f32 %v892_v60, %v891_v58  ;;  %v7103_v0 = vpop.f32.mrf.mxu0 }
  0xe1   :  { %12965 = vst [vmem:[#allocation10_spill] sm:$0xff] %v7103_v0  ;;  %v698_v3 = vsel %vm688_vm1, %v7103_v0, 0.0  ;;  %v828_v4 = vmul.f32 %v7103_v0, %v7103_v0  ;;  %v900_v20 = vsel %vm688_vm1, %v830_v9, 0.0 }
  0xe2   :  { %v895_v5 = vadd.f32 %v894_v2, %v893_v63  ;;  %v699_v6 = vadd.f32 %v698_v3, %v697_v62  ;;  %v7112_v7 = vpop.f32.mrf.mxu0 }
  0xe3   :  { %v896_v10 = vsel %vm688_vm1, %v828_v4, 0.0  ;;  %v833_v25 = vmul.f32 %v7112_v7, %v7112_v7  ;;  %v708_v32 = vsel %vm688_vm1, %v7112_v7, 0.0 }
  0xe4   :  { %v897_v11 = vadd.f32 %v896_v10, %v895_v5  ;;  %v7119_v12 = vpop.f32.mrf.mxu0  ;;  %v701_v13 = vadd.f32 %v700_v8, %v699_v6 }
  0xe5   :  { %v831_v16 = vmul.f32 %v7119_v12, %v7119_v12  ;;  %v704_v21 = vsel %vm688_vm1, %v7119_v12, 0.0  ;;  %v906_v42 = vsel %vm688_vm1, %v833_v25, 0.0 }
  0xe6   :  { %v703_v17 = vadd.f32 %v702_v15, %v701_v13  ;;  %v899_v18 = vadd.f32 %v898_v14, %v897_v11  ;;  %v7126_v19 = vpop.f32.mrf.mxu0 }
  0xe7   :  { %v902_v26 = vsel %vm688_vm1, %v831_v16, 0.0  ;;  %v834_v33 = vmul.f32 %v7126_v19, %v7126_v19  ;;  %v710_v43 = vsel %vm688_vm1, %v7126_v19, 0.0 }
  0xe8   :  { %v705_v22 = vadd.f32 %v704_v21, %v703_v17  ;;  %v901_v23 = vadd.f32 %v900_v20, %v899_v18  ;;  %v7131_v24 = vpop.f32.mrf.mxu0 }
  0xe9   :  { %v706_v27 = vsel %vm688_vm1, %v7131_v24, 0.0  ;;  %v832_v28 = vmul.f32 %v7131_v24, %v7131_v24  ;;  %v908_v49 = vsel %vm688_vm1, %v834_v33, 0.0 }
  0xea   :  { %v903_v29 = vadd.f32 %v902_v26, %v901_v23  ;;  %v707_v30 = vadd.f32 %v706_v27, %v705_v22  ;;  %v7140_v31 = vpop.f32.mrf.mxu0 }
  0xeb   :  { %12966 = vst [vmem:[#allocation11_spill] sm:$0xff] %v7140_v31  ;;  %v904_v34 = vsel %vm688_vm1, %v832_v28, 0.0  ;;  %v837_v55 = vmul.f32 %v7140_v31, %v7140_v31  ;;  %v716_v63 = vsel %vm688_vm1, %v7140_v31, 0.0 }
  0xec   :  { %v905_v35 = vadd.f32 %v904_v34, %v903_v29  ;;  %v7147_v39 = vpop.f32.mrf.mxu0  ;;  %v709_v41 = vadd.f32 %v708_v32, %v707_v30 }
  0xed   :  { %v835_v44 = vmul.f32 %v7147_v39, %v7147_v39  ;;  %v712_v50 = vsel %vm688_vm1, %v7147_v39, 0.0  ;;  %v914_v6 = vsel %vm688_vm1, %v837_v55, 0.0 }
  0xee   :  { %v711_v45 = vadd.f32 %v710_v43, %v709_v41  ;;  %v907_v47 = vadd.f32 %v906_v42, %v905_v35  ;;  %v7154_v48 = vpop.f32.mrf.mxu0 }
  0xef   :  { %12967 = vst [vmem:[#allocation12_spill] sm:$0xff] %v7154_v48  ;;  %v910_v56 = vsel %vm688_vm1, %v835_v44, 0.0  ;;  %v838_v1 = vmul.f32 %v7154_v48, %v7154_v48  ;;  %v718_v8 = vsel %vm688_vm1, %v7154_v48, 0.0 }
  0xf0   :  { %v713_v51 = vadd.f32 %v712_v50, %v711_v45  ;;  %v909_v53 = vadd.f32 %v908_v49, %v907_v47  ;;  %v7159_v54 = vpop.f32.mrf.mxu0 }
  0xf1   :  { %v714_v57 = vsel %vm688_vm1, %v7159_v54, 0.0  ;;  %v836_v58 = vmul.f32 %v7159_v54, %v7159_v54  ;;  %v916_v14 = vsel %vm688_vm1, %v838_v1, 0.0 }
  0xf2   :  { %v911_v60 = vadd.f32 %v910_v56, %v909_v53  ;;  %v715_v61 = vadd.f32 %v714_v57, %v713_v51  ;;  %v7168_v62 = vpop.f32.mrf.mxu0 }
  0xf3   :  { %12968 = vst [vmem:[#allocation13_spill] sm:$0xff] %v7168_v62  ;;  %v912_v2 = vsel %vm688_vm1, %v836_v58, 0.0  ;;  %v841_v20 = vmul.f32 %v7168_v62, %v7168_v62  ;;  %v724_v28 = vsel %vm688_vm1, %v7168_v62, 0.0 }
  0xf4   :  { %v913_v3 = vadd.f32 %v912_v2, %v911_v60  ;;  %v7175_v4 = vpop.f32.mrf.mxu0  ;;  %v717_v5 = vadd.f32 %v716_v63, %v715_v61 }
  0xf5   :  { %12969 = vst [vmem:[#allocation14_spill] sm:$0xff] %v7175_v4  ;;  %v839_v9 = vmul.f32 %v7175_v4, %v7175_v4  ;;  %v720_v15 = vsel %vm688_vm1, %v7175_v4, 0.0  ;;  %v922_v35 = vsel %vm688_vm1, %v841_v20, 0.0 }
  0xf6   :  { %v719_v10 = vadd.f32 %v718_v8, %v717_v5  ;;  %v915_v11 = vadd.f32 %v914_v6, %v913_v3  ;;  %v7182_v13 = vpop.f32.mrf.mxu0 }
  0xf7   :  { %12970 = vst [vmem:[#allocation15_spill] sm:$0xff] %v7182_v13  ;;  %v918_v21 = vsel %vm688_vm1, %v839_v9, 0.0  ;;  %v842_v29 = vmul.f32 %v7182_v13, %v7182_v13  ;;  %v726_v41 = vsel %vm688_vm1, %v7182_v13, 0.0 }
  0xf8   :  { %v721_v16 = vadd.f32 %v720_v15, %v719_v10  ;;  %v917_v17 = vadd.f32 %v916_v14, %v915_v11  ;;  %v7187_v18 = vpop.f32.mrf.mxu0 }
  0xf9   :  { %12971 = vst [vmem:[#allocation16_spill] sm:$0xff] %v7187_v18  ;;  %v722_v22 = vsel %vm688_vm1, %v7187_v18, 0.0  ;;  %v840_v23 = vmul.f32 %v7187_v18, %v7187_v18  ;;  %v924_v47 = vsel %vm688_vm1, %v842_v29, 0.0 }
  0xfa   :  { %v919_v25 = vadd.f32 %v918_v21, %v917_v17  ;;  %v723_v26 = vadd.f32 %v722_v22, %v721_v16  ;;  %v7196_v27 = vpop.f32.mrf.mxu0 }
  0xfb   :  { %12972 = vst [vmem:[#allocation17_spill] sm:$0xff] %v7196_v27  ;;  %v920_v30 = vsel %vm688_vm1, %v840_v23, 0.0  ;;  %v845_v55 = vmul.f32 %v7196_v27, %v7196_v27  ;;  %v732_v1 = vsel %vm688_vm1, %v7196_v27, 0.0 }
  0xfc   :  { %v921_v32 = vadd.f32 %v920_v30, %v919_v25  ;;  %v7203_v33 = vpop.f32.mrf.mxu0  ;;  %v725_v34 = vadd.f32 %v724_v28, %v723_v26 }
  0xfd   :  { %12973 = vst [vmem:[#allocation18_spill] sm:$0xff] %v7203_v33  ;;  %v843_v42 = vmul.f32 %v7203_v33, %v7203_v33  ;;  %v728_v49 = vsel %vm688_vm1, %v7203_v33, 0.0  ;;  %v930_v9 = vsel %vm688_vm1, %v845_v55, 0.0 }
  0xfe   :  { %v727_v43 = vadd.f32 %v726_v41, %v725_v34  ;;  %v923_v44 = vadd.f32 %v922_v35, %v921_v32  ;;  %v7210_v45 = vpop.f32.mrf.mxu0 }
  0xff   :  { %12974 = vst [vmem:[#allocation19_spill] sm:$0xff] %v7210_v45  ;;  %v926_v56 = vsel %vm688_vm1, %v843_v42, 0.0  ;;  %v846_v2 = vmul.f32 %v7210_v45, %v7210_v45  ;;  %v734_v10 = vsel %vm688_vm1, %v7210_v45, 0.0 }
 0x100   :  { %v729_v50 = vadd.f32 %v728_v49, %v727_v43  ;;  %v925_v51 = vadd.f32 %v924_v47, %v923_v44  ;;  %v7215_v53 = vpop.f32.mrf.mxu0 }
 0x101   :  { %12975 = vst [vmem:[#allocation20_spill] sm:$0xff] %v7215_v53  ;;  %v730_v57 = vsel %vm688_vm1, %v7215_v53, 0.0  ;;  %v844_v58 = vmul.f32 %v7215_v53, %v7215_v53  ;;  %v932_v17 = vsel %vm688_vm1, %v846_v2, 0.0 }
 0x102   :  { %v927_v60 = vadd.f32 %v926_v56, %v925_v51  ;;  %v731_v61 = vadd.f32 %v730_v57, %v729_v50  ;;  %v7224_v63 = vpop.f32.mrf.mxu0 }
 0x103   :  { %12976 = vst [vmem:[#allocation21_spill] sm:$0xff] %v7224_v63  ;;  %v928_v3 = vsel %vm688_vm1, %v844_v58, 0.0  ;;  %v849_v25 = vmul.f32 %v7224_v63, %v7224_v63  ;;  %v740_v35 = vsel %vm688_vm1, %v7224_v63, 0.0 }
 0x104   :  { %v929_v5 = vadd.f32 %v928_v3, %v927_v60  ;;  %v7231_v6 = vpop.f32.mrf.mxu0  ;;  %v733_v8 = vadd.f32 %v732_v1, %v731_v61 }
 0x105   :  { %12977 = vst [vmem:[#allocation22_spill] sm:$0xff] %v7231_v6  ;;  %v847_v11 = vmul.f32 %v7231_v6, %v7231_v6  ;;  %v736_v20 = vsel %vm688_vm1, %v7231_v6, 0.0  ;;  %v938_v49 = vsel %vm688_vm1, %v849_v25, 0.0 }
 0x106   :  { %v735_v14 = vadd.f32 %v734_v10, %v733_v8  ;;  %v931_v15 = vadd.f32 %v930_v9, %v929_v5  ;;  %v7238_v16 = vpop.f32.mrf.mxu0  ;;  %v12746_v10 = vmov 0  }
 0x107   :  { %12978 = vst [vmem:[#allocation23_spill] sm:$0xff] %v7238_v16  ;;  %v934_v26 = vsel %vm688_vm1, %v847_v11, 0.0  ;;  %v850_v41 = vmul.f32 %v7238_v16, %v7238_v16  ;;  %v742_v50 = vsel %vm688_vm1, %v7238_v16, 0.0  ;;  %v1269_v11 = vrot.slane %v12746_v10, 7  ;;  %6682 = vmatprep.subr.bf16.mxu1 %v12746_v10  ;;  %3283 = vmatprep.subr.bf16.mxu0 %v12746_v10 }
 0x108   :  { %v737_v21 = vadd.f32 %v736_v20, %v735_v14  ;;  %v933_v22 = vadd.f32 %v932_v17, %v931_v15  ;;  %v7243_v23 = vpop.f32.mrf.mxu0 }
 0x109   :  { %12979 = vst [vmem:[#allocation24_spill] sm:$0xff] %v7243_v23  ;;  %v738_v28 = vsel %vm688_vm1, %v7243_v23, 0.0  ;;  %v848_v29 = vmul.f32 %v7243_v23, %v7243_v23  ;;  %v940_v58 = vsel %vm688_vm1, %v850_v41, 0.0 }
 0x10a   :  { %v935_v30 = vadd.f32 %v934_v26, %v933_v22  ;;  %v739_v32 = vadd.f32 %v738_v28, %v737_v21  ;;  %v7252_v34 = vpop.f32.mrf.mxu0  ;;  %v12984_v26 = vmov 0 }
 0x10b   :  { %12980 = vst [vmem:[#allocation25_spill] sm:$0xff] %v7252_v34  ;;  %v936_v42 = vsel %vm688_vm1, %v848_v29, 0.0  ;;  %v853_v60 = vmul.f32 %v7252_v34, %v7252_v34  ;;  %v748_v20 = vsel %vm688_vm1, %v7252_v34, 0.0  ;;  %v12985_v26 = vsel %vm7292_vm4, 4294967295, %v12984_v26 }
 0x10c   :  { %v937_v43 = vadd.f32 %v936_v42, %v935_v30  ;;  %v7259_v44 = vpop.f32.mrf.mxu0  ;;  %v741_v47 = vadd.f32 %v740_v35, %v739_v32  ;;  %12986 = vst [vmem:[#allocation29_spill] sm:$0xff] %v12985_v26  ;;  %v7300_v32 = vsel %vm7292_vm4, 0, %v1269_v11  ;;  %v1599_v35 = vsel %vm7292_vm4, %v1269_v11, 0 }
 0x10d   :  { %12981 = vst [vmem:[#allocation26_spill] sm:$0xff] %v7259_v44  ;;  %v851_v51 = vmul.f32 %v7259_v44, %v7259_v44  ;;  %v744_v61 = vsel %vm688_vm1, %v7259_v44, 0.0  ;;  %v946_v21 = vsel %vm688_vm1, %v853_v60, 0.0  ;;  %12987 = vst [vmem:[#allocation30_spill] sm:$0xff] %v7300_v32 }
 0x10e   :  { %v743_v55 = vadd.f32 %v742_v50, %v741_v47  ;;  %v939_v56 = vadd.f32 %v938_v49, %v937_v43  ;;  %v7266_v57 = vpop.f32.mrf.mxu0  ;;  %v2068_v43 = vrot.slane %v7300_v32, 1 }
 0x10f   :  { %12982 = vst [vmem:[#allocation27_spill] sm:$0xff] %v7266_v57  ;;  %v942_v5 = vsel %vm688_vm1, %v851_v51, 0.0  ;;  %v854_v22 = vmul.f32 %v7266_v57, %v7266_v57  ;;  %v750_v41 = vsel %vm688_vm1, %v7266_v57, 0.0  ;;  %v2069_v51 = vrot.slane %v1599_v35, 1 }
 0x110   :  { %v745_v1 = vadd.f32 %v744_v61, %v743_v55  ;;  %v941_v2 = vadd.f32 %v940_v58, %v939_v56  ;;  %v7273_v3 = vpop.f32.mrf.mxu0 }
 0x111   :  { %12983 = vst [vmem:[#allocation28_spill] sm:$0xff] %v7273_v3  ;;  %v746_v8 = vsel %vm688_vm1, %v7273_v3, 0.0  ;;  %v852_v9 = vmul.f32 %v7273_v3, %v7273_v3  ;;  %v948_v55 = vsel %vm688_vm1, %v854_v22, 0.0 }
 0x112   :  { %v943_v14 = vadd.f32 %v942_v5, %v941_v2  ;;  %v747_v15 = vadd.f32 %v746_v8, %v745_v1  ;;  %v7283_v17 = vpop.f32.mrf.mxu0  ;;  %v7319_v2 = vsel %vm2067_vm5, %v2068_v43, %v2069_v51 }
 0x113   :  { %v944_v25 = vsel %vm688_vm1, %v852_v9, 0.0  ;;  %v857_v58 = vmul.f32 %v7283_v17, %v7283_v17  ;;  %12988 = vst [vmem:[#allocation31_spill] sm:$0xff] %v7319_v2  ;;  %v6721_v11 = vpack.i.bf16 %v7300_v32, %v7319_v2 }
 0x114   :  { %v945_v28 = vadd.f32 %v944_v25, %v943_v14  ;;  %v7296_v29 = vpop.f32.mrf.mxu0  ;;  %v749_v30 = vadd.f32 %v748_v20, %v747_v15 }
 0x115   :  { %v855_v42 = vmul.f32 %v7296_v29, %v7296_v29  ;;  %v752_v56 = vsel %vm688_vm1, %v7296_v29, 0.0  ;;  %6722 = vrot.lane.b32.xlu1 %v6721_v11, %s6849_s25  ;;  %v1636_v11 = vshll.u32 %v7300_v32, 16 }
 0x116   :  { %v751_v47 = vadd.f32 %v750_v41, %v749_v30  ;;  %v947_v49 = vadd.f32 %v946_v21, %v945_v28  ;;  %v7309_v50 = vpop.f32.mrf.mxu0  ;;  %v756_v21 = vsel %vm688_vm1, %v7283_v17, 0.0 }
 0x117   :  { %v950_v5 = vsel %vm688_vm1, %v855_v42, 0.0  ;;  %v858_v22 = vmul.f32 %v7309_v50, %v7309_v50  ;;  %v954_v42 = vsel %vm688_vm1, %v857_v58, 0.0  ;;  %v758_v43 = vsel %vm688_vm1, %v7309_v50, 0.0 }
 0x118   :  { %v753_v60 = vadd.f32 %v752_v56, %v751_v47  ;;  %v949_v61 = vadd.f32 %v948_v55, %v947_v49  ;;  %v7316_v1 = vpop.f32.mrf.mxu0 }
 0x119   :  { %v754_v8 = vsel %vm688_vm1, %v7316_v1, 0.0  ;;  %v856_v9 = vmul.f32 %v7316_v1, %v7316_v1  ;;  %v956_v56 = vsel %vm688_vm1, %v858_v22, 0.0  ;;  %v1641_v22 = vshll.u32 %v1599_v35, 16 }
 0x11a   :  { %v951_v14 = vadd.f32 %v950_v5, %v949_v61  ;;  %v755_v15 = vadd.f32 %v754_v8, %v753_v60  ;;  %v7328_v20 = vpop.f32.mrf.mxu0 }
 0x11b   :  { %v952_v25 = vsel %vm688_vm1, %v856_v9, 0.0  ;;  %v861_v60 = vmul.f32 %v7328_v20, %v7328_v20  ;;  %v1634_v9 = vshrl.u32 %v7300_v32, 16 }
 0x11c   :  { %v953_v28 = vadd.f32 %v952_v25, %v951_v14  ;;  %v7336_v30 = vpop.f32.mrf.mxu0  ;;  %v757_v41 = vadd.f32 %v756_v21, %v755_v15  ;;  %v764_v25 = vsel %vm688_vm1, %v7328_v20, 0.0 }
 0x11d   :  { %v859_v47 = vmul.f32 %v7336_v30, %v7336_v30  ;;  %v760_v61 = vsel %vm688_vm1, %v7336_v30, 0.0  ;;  %v962_v2 = vsel %vm688_vm1, %v861_v60, 0.0 }
 0x11e   :  { %v759_v49 = vadd.f32 %v758_v43, %v757_v41  ;;  %v955_v51 = vadd.f32 %v954_v42, %v953_v28  ;;  %v7343_v55 = vpop.f32.mrf.mxu0  ;;  %v1638_v43 = vrot.slane %v1636_v11, 1 }
 0x11f   :  { %v958_v14 = vsel %vm688_vm1, %v859_v47, 0.0 }
 0x120   :  { %v761_v5 = vadd.f32 %v760_v61, %v759_v49  ;;  %v957_v58 = vadd.f32 %v956_v56, %v955_v51  ;;  %v7350_v8 = vpop.f32.mrf.mxu0  ;;  %v862_v49 = vmul.f32 %v7343_v55, %v7343_v55  ;;  %v1643_v51 = vrot.slane %v1641_v22, 1 }
 0x121   :  { %v762_v15 = vsel %vm688_vm1, %v7350_v8, 0.0  ;;  %v860_v21 = vmul.f32 %v7350_v8, %v7350_v8  ;;  %v1639_v35 = vor.u32 %v1638_v43, %v1634_v9 }
 0x122   :  { %v959_v28 = vadd.f32 %v958_v14, %v957_v58  ;;  %v763_v41 = vadd.f32 %v762_v15, %v761_v5  ;;  %v7361_v42 = vpop.f32.mrf.mxu0  ;;  %v766_v5 = vsel %vm688_vm1, %v7343_v55, 0.0  ;;  %v964_v22 = vsel %vm688_vm1, %v862_v49, 0.0 }
 0x123   :  { %v960_v47 = vsel %vm688_vm1, %v860_v21, 0.0  ;;  %v1644_v21 = vsel %vm1632_vm6, %v1639_v35, %v1643_v51 }
 0x124   :  { %v961_v56 = vadd.f32 %v960_v47, %v959_v28  ;;  %v7366_v61 = vpop.f32.mrf.mxu0  ;;  %v765_v10 = vadd.f32 %v764_v25, %v763_v41  ;;  %2539 = vrot.lane.b32.xlu1 %v1644_v21, %s6850_s26  ;;  %2195 = vrot.lane.b32.xlu0 %v1644_v21, %s6851_s27 }
 0x125   :  { %v863_v58 = vmul.f32 %v7366_v61, %v7366_v61  ;;  %v768_v25 = vsel %vm688_vm1, %v7366_v61, 0.0 }
 0x126   :  { %v767_v11 = vadd.f32 %v766_v5, %v765_v10  ;;  %v963_v14 = vadd.f32 %v962_v2, %v961_v56  ;;  %v7373_v15 = vpop.f32.mrf.mxu0  ;;  %v865_v10 = vmul.f32 %v7361_v42, %v7361_v42  ;;  %v772_v56 = vsel %vm688_vm1, %v7361_v42, 0.0 }
 0x127   :  { %v966_v2 = vsel %vm688_vm1, %v863_v58, 0.0  ;;  %v866_v35 = vmul.f32 %v7373_v15, %v7373_v15 }
 0x128   :  { %v769_v60 = vadd.f32 %v768_v25, %v767_v11  ;;  %v965_v9 = vadd.f32 %v964_v22, %v963_v14  ;;  %v7380_v28 = vpop.f32.mrf.mxu0  ;;  %v970_v22 = vsel %vm688_vm1, %v865_v10, 0.0  ;;  %v774_v25 = vsel %vm688_vm1, %v7373_v15, 0.0 }
 0x129   :  { %v770_v41 = vsel %vm688_vm1, %v7380_v28, 0.0  ;;  %v864_v43 = vmul.f32 %v7380_v28, %v7380_v28  ;;  %v972_v32 = vsel %vm688_vm1, %v866_v35, 0.0 }
 0x12a   :  { %v967_v49 = vadd.f32 %v966_v2, %v965_v9  ;;  %v771_v47 = vadd.f32 %v770_v41, %v769_v60  ;;  %v7389_v51 = vpop.f32.mrf.mxu0 }
 0x12b   :  { %v968_v5 = vsel %vm688_vm1, %v864_v43, 0.0  ;;  %v869_v10 = vmul.f32 %v7389_v51, %v7389_v51 }
 0x12c   :  { %v969_v11 = vadd.f32 %v968_v5, %v967_v49  ;;  %v7396_v58 = vpop.f32.mrf.mxu0  ;;  %v773_v14 = vadd.f32 %v772_v56, %v771_v47 }
 0x12d   :  { %v867_v60 = vmul.f32 %v7396_v58, %v7396_v58  ;;  %v776_v43 = vsel %vm688_vm1, %v7396_v58, 0.0  ;;  %v978_v0 = vsel %vm688_vm1, %v869_v10, 0.0 }
 0x12e   :  { %v775_v9 = vadd.f32 %v774_v25, %v773_v14  ;;  %v971_v2 = vadd.f32 %v970_v22, %v969_v11  ;;  %v7403_v41 = vpop.f32.mrf.mxu0 }
 0x12f   :  { %v974_v56 = vsel %vm688_vm1, %v867_v60, 0.0  ;;  %v870_v21 = vmul.f32 %v7403_v41, %v7403_v41 }
 0x130   :  { %v777_v49 = vadd.f32 %v776_v43, %v775_v9  ;;  %v973_v5 = vadd.f32 %v972_v32, %v971_v2  ;;  %v7408_v47 = vpop.f32.mrf.mxu0  ;;  %v780_v32 = vsel %vm688_vm1, %v7389_v51, 0.0 }
 0x131   :  { %v778_v11 = vsel %vm688_vm1, %v7408_v47, 0.0  ;;  %v868_v35 = vmul.f32 %v7408_v47, %v7408_v47  ;;  %v980_v3 = vsel %vm688_vm1, %v870_v21, 0.0 }
 0x132   :  { %v975_v14 = vadd.f32 %v974_v56, %v973_v5  ;;  %v779_v22 = vadd.f32 %v778_v11, %v777_v49  ;;  %v7418_v25 = vpop.f32.mrf.mxu0  ;;  %v782_v5 = vsel %vm688_vm1, %v7403_v41, 0.0 }
 0x133   :  { %v976_v9 = vsel %vm688_vm1, %v868_v35, 0.0  ;;  %v873_v10 = vmul.f32 %v7418_v25, %v7418_v25 }
 0x134   :  { %v977_v2 = vadd.f32 %v976_v9, %v975_v14  ;;  %v7425_v60 = vpop.f32.mrf.mxu0  ;;  %v781_v43 = vadd.f32 %v780_v32, %v779_v22 }
 0x135   :  { %v871_v49 = vmul.f32 %v7425_v60, %v7425_v60  ;;  %v784_v35 = vsel %vm688_vm1, %v7425_v60, 0.0  ;;  %v986_v37 = vsel %vm688_vm1, %v873_v10, 0.0 }
 0x136   :  { %v783_v56 = vadd.f32 %v782_v5, %v781_v43  ;;  %v979_v11 = vadd.f32 %v978_v0, %v977_v2  ;;  %v7432_v52 = vpop.f32.mrf.mxu0 }
 0x137   :  { %v982_v32 = vsel %vm688_vm1, %v871_v49, 0.0 }
 0x138   :  { %v785_v14 = vadd.f32 %v784_v35, %v783_v56  ;;  %v981_v9 = vadd.f32 %v980_v3, %v979_v11  ;;  %v7437_v22 = vpop.f32.mrf.mxu0  ;;  %v788_v3 = vsel %vm688_vm1, %v7418_v25, 0.0  ;;  %v874_v56 = vmul.f32 %v7432_v52, %v7432_v52 }
 0x139   :  { %v786_v43 = vsel %vm688_vm1, %v7437_v22, 0.0  ;;  %v872_v0 = vmul.f32 %v7437_v22, %v7437_v22 }
 0x13a   :  { %v983_v2 = vadd.f32 %v982_v32, %v981_v9  ;;  %v787_v21 = vadd.f32 %v786_v43, %v785_v14  ;;  %v7446_v5 = vpop.f32.mrf.mxu0  ;;  %v790_v9 = vsel %vm688_vm1, %v7432_v52, 0.0  ;;  %v988_v38 = vsel %vm688_vm1, %v874_v56, 0.0 }
 0x13b   :  { %v984_v11 = vsel %vm688_vm1, %v872_v0, 0.0  ;;  %v877_v10 = vmul.f32 %v7446_v5, %v7446_v5 }
 0x13c   :  { %v985_v35 = vadd.f32 %v984_v11, %v983_v2  ;;  %v7453_v49 = vpop.f32.mrf.mxu0  ;;  %v789_v40 = vadd.f32 %v788_v3, %v787_v21 }
 0x13d   :  { %v875_v14 = vmul.f32 %v7453_v49, %v7453_v49  ;;  %v792_v0 = vsel %vm688_vm1, %v7453_v49, 0.0  ;;  %v994_v36 = vsel %vm688_vm1, %v877_v10, 0.0 }
 0x13e   :  { %v791_v32 = vadd.f32 %v790_v9, %v789_v40  ;;  %v987_v43 = vadd.f32 %v986_v37, %v985_v35  ;;  %v7460_v44 = vpop.f32.mrf.mxu0 }
 0x13f   :  { %v990_v3 = vsel %vm688_vm1, %v875_v14, 0.0 }
 0x140   :  { %v793_v2 = vadd.f32 %v792_v0, %v791_v32  ;;  %v989_v11 = vadd.f32 %v988_v38, %v987_v43  ;;  %v7465_v21 = vpop.f32.mrf.mxu0  ;;  %v796_v38 = vsel %vm688_vm1, %v7446_v5, 0.0  ;;  %v878_v32 = vmul.f32 %v7460_v44, %v7460_v44 }
 0x141   :  { %v794_v40 = vsel %vm688_vm1, %v7465_v21, 0.0  ;;  %v876_v37 = vmul.f32 %v7465_v21, %v7465_v21 }
 0x142   :  { %v991_v35 = vadd.f32 %v990_v3, %v989_v11  ;;  %v795_v56 = vadd.f32 %v794_v40, %v793_v2  ;;  %v7474_v9 = vpop.f32.mrf.mxu0  ;;  %v798_v11 = vsel %vm688_vm1, %v7460_v44, 0.0  ;;  %v996_v34 = vsel %vm688_vm1, %v878_v32, 0.0 }
 0x143   :  { %v992_v43 = vsel %vm688_vm1, %v876_v37, 0.0  ;;  %v881_v10 = vmul.f32 %v7474_v9, %v7474_v9 }
 0x144   :  { %v993_v0 = vadd.f32 %v992_v43, %v991_v35  ;;  %v7481_v14 = vpop.f32.mrf.mxu0  ;;  %v797_v16 = vadd.f32 %v796_v38, %v795_v56 }
 0x145   :  { %v879_v2 = vmul.f32 %v7481_v14, %v7481_v14  ;;  %v800_v37 = vsel %vm688_vm1, %v7481_v14, 0.0  ;;  %v1002_v23 = vsel %vm688_vm1, %v881_v10, 0.0 }
 0x146   :  { %v799_v3 = vadd.f32 %v798_v11, %v797_v16  ;;  %v995_v40 = vadd.f32 %v994_v36, %v993_v0  ;;  %v7488_v57 = vpop.f32.mrf.mxu0 }
 0x147   :  { %v998_v38 = vsel %vm688_vm1, %v879_v2, 0.0  ;;  %v806_v6 = vsel %vm688_vm1, %v7488_v57, 0.0 }
 0x148   :  { %v801_v35 = vadd.f32 %v800_v37, %v799_v3  ;;  %v997_v43 = vadd.f32 %v996_v34, %v995_v40  ;;  %v7493_v56 = vpop.f32.mrf.mxu0  ;;  %v804_v34 = vsel %vm688_vm1, %v7474_v9, 0.0  ;;  %v882_v3 = vmul.f32 %v7488_v57, %v7488_v57 }
 0x149   :  { %v802_v16 = vsel %vm688_vm1, %v7493_v56, 0.0  ;;  %v880_v36 = vmul.f32 %v7493_v56, %v7493_v56 }
 0x14a   :  { %v999_v0 = vadd.f32 %v998_v38, %v997_v43  ;;  %v803_v32 = vadd.f32 %v802_v16, %v801_v35  ;;  %v7502_v11 = vpop.f32.mrf.mxu0  ;;  %v1004_v45 = vsel %vm688_vm1, %v882_v3, 0.0 }
 0x14b   :  { %v1000_v40 = vsel %vm688_vm1, %v880_v36, 0.0 }
 0x14c   :  { %v1001_v37 = vadd.f32 %v1000_v40, %v999_v0  ;;  %v673_v2 = vpop.f32.mrf.mxu0  ;;  %v805_v63 = vadd.f32 %v804_v34, %v803_v32  ;;  %v885_v0 = vmul.f32 %v7502_v11, %v7502_v11 }
 0x14d   :  { %v883_v43 = vmul.f32 %v673_v2, %v673_v2  ;;  %v808_v27 = vsel %vm688_vm1, %v673_v2, 0.0 }
 0x14e   :  { %v807_v35 = vadd.f32 %v806_v6, %v805_v63  ;;  %v1003_v38 = vadd.f32 %v1002_v23, %v1001_v37  ;;  %v7512_v16 = vpop.f32.mrf.mxu0  ;;  %v812_v6 = vsel %vm688_vm1, %v7502_v11, 0.0  ;;  %v1010_v37 = vsel %vm688_vm1, %v885_v0, 0.0 }
 0x14f   :  { %v1006_v10 = vsel %vm688_vm1, %v883_v43, 0.0  ;;  %v886_v23 = vmul.f32 %v7512_v16, %v7512_v16  ;;  %v814_v43 = vsel %vm688_vm1, %v7512_v16, 0.0 }
 0x150   :  { %v809_v53 = vadd.f32 %v808_v27, %v807_v35  ;;  %v1005_v33 = vadd.f32 %v1004_v45, %v1003_v38  ;;  %v676_v36 = vpop.f32.mrf.mxu0 }
 0x151   :  { %v810_v32 = vsel %vm688_vm1, %v676_v36, 0.0  ;;  %v884_v34 = vmul.f32 %v676_v36, %v676_v36 }
 0x152   :  { %v1007_v40 = vadd.f32 %v1006_v10, %v1005_v33  ;;  %v811_v63 = vadd.f32 %v810_v32, %v809_v53  ;;  %v1012_v33 = vsel %vm688_vm1, %v886_v23, 0.0  ;;  %v1028_v23 = vlaneseq }
 0x153   :  { %v1008_v27 = vsel %vm688_vm1, %v884_v34, 0.0 }
 0x154   :  { %v813_v45 = vadd.f32 %v812_v6, %v811_v63  ;;  %v1009_v3 = vadd.f32 %v1008_v27, %v1007_v40 }
 0x156   :  { %v815_v35 = vadd.f32 %v814_v43, %v813_v45  ;;  %v1011_v38 = vadd.f32 %v1010_v37, %v1009_v3  ;;  %v1029_v37 = vshrl.u32 %v1028_v23, 7  ;;  %v1023_v43 = vld [vmem:[%s12734_s2] sm:$0x1] }
 0x158   :  { %v816_v53 = vrot.slane %v815_v35, 4  ;;  %v1013_v10 = vadd.f32 %v1012_v33, %v1011_v38 }
 0x15a   :  { %v817_v32 = vadd.f32 %v816_v53, %v815_v35  ;;  %v1014_v13 = vrot.slane %v1013_v10, 4 }
 0x15c   :  { %v818_v62 = vrot.slane %v817_v32, 2  ;;  %v1015_v26 = vadd.f32 %v1014_v13, %v1013_v10  ;;  %v7532_v13 = vsub.s32 0, %v1029_v37 }
 0x15e   :  { %v819_v18 = vadd.f32 %v818_v62, %v817_v32  ;;  %v1016_v4 = vrot.slane %v1015_v26, 2  ;;  %12989 = vst [vmem:[#allocation32_spill] sm:$0xff] %v7532_v13 }
 0x160   :  { %v820_v34 = vrot.slane %v819_v18, 1  ;;  %v1017_v63 = vadd.f32 %v1016_v4, %v1015_v26  ;;  %v1097_v4 = vld [vmem:[%s12735_s3] sm:$0x1] }
 0x162   :  { %v821_v40 = vadd.f32 %v820_v34, %v819_v18  ;;  %v1018_v6 = vrot.slane %v1017_v63, 1 }
 0x164   :  { %v822_v0 = vmul.f32 0.001953125, %v821_v40  ;;  %v1019_v27 = vadd.f32 %v1018_v6, %v1017_v63 }
 0x166   :  { %v1020_v48 = vmul.f32 0.001953125, %v1019_v27  ;;  %v1021_v31 = vmul.f32 %v822_v0, %v822_v0 }
 0x168   :  { %v1022_v45 = vsub.f32 %v1020_v48, %v1021_v31 }
 0x16a   :  { %v1024_v3 = vadd.f32 1e-05, %v1022_v45 }
 0x16c   :  { %6786 = vrsqrt.f32 %v1024_v3 }
 0x179   :  { %v6787_v62 = vpop.eup %6786 }
 0x17a   :  { %v1026_v35 = vmul.f32 %v6787_v62, %v1023_v43 }
 0x17c   :  { %v7538_v18 = vrot.slane %v1026_v35, %v7532_v13  ;;  %v1098_v31 = vmul.f32 %v1026_v35, %v822_v0 }
 0x17e   :  { %v1093_v48 = vmul.f32 %v7538_v18, %v673_v2  ;;  %v1099_v26 = vsub.f32 %v1097_v4, %v1098_v31  ;;  %v1094_v38 = vmul.f32 %v7538_v18, %v676_v36  ;;  %v1065_v40 = vmul.f32 %v7538_v18, %v7296_v29 }
 0x17f   :  { %v1066_v2 = vmul.f32 %v7538_v18, %v7316_v1  ;;  %v1067_v36 = vmul.f32 %v7283_v17, %v7538_v18  ;;  %v1068_v6 = vmul.f32 %v7309_v50, %v7538_v18  ;;  %v1069_v0 = vmul.f32 %v7538_v18, %v7336_v30 }
 0x180   :  { %v7543_v33 = vrot.slane %v1099_v26, %v7532_v13  ;;  %v1070_v27 = vmul.f32 %v7538_v18, %v7350_v8  ;;  %v1071_v45 = vmul.f32 %v7328_v20, %v7538_v18  ;;  %v1072_v29 = vmul.f32 %v7343_v55, %v7538_v18 }
 0x181   :  { %v1073_v1 = vmul.f32 %v7538_v18, %v7366_v61  ;;  %v1074_v17 = vmul.f32 %v7538_v18, %v7380_v28  ;;  %v1075_v50 = vmul.f32 %v7361_v42, %v7538_v18  ;;  %v1076_v30 = vmul.f32 %v7373_v15, %v7538_v18 }
 0x182   :  { %v1166_v53 = vadd.f32 %v7543_v33, %v1093_v48  ;;  %v1167_v10 = vadd.f32 %v7543_v33, %v1094_v38  ;;  %v1077_v8 = vmul.f32 %v7538_v18, %v7396_v58  ;;  %v1078_v20 = vmul.f32 %v7538_v18, %v7408_v47 }
 0x183   :  { %v1079_v55 = vmul.f32 %v7389_v51, %v7538_v18  ;;  %v1080_v61 = vmul.f32 %v7403_v41, %v7538_v18  ;;  %v1081_v28 = vmul.f32 %v7538_v18, %v7425_v60  ;;  %v1082_v42 = vmul.f32 %v7538_v18, %v7437_v22 }
 0x184   :  { %v1230_v32 = vmax.f32 %v1166_v53, 0.0  ;;  %v1231_v34 = vmax.f32 %v1167_v10, 0.0  ;;  %v1083_v15 = vmul.f32 %v7418_v25, %v7538_v18  ;;  %v1084_v58 = vmul.f32 %v7432_v52, %v7538_v18 }
 0x185   :  { %v1085_v47 = vmul.f32 %v7538_v18, %v7453_v49  ;;  %v1086_v51 = vmul.f32 %v7538_v18, %v7465_v21  ;;  %v1087_v41 = vmul.f32 %v7446_v5, %v7538_v18  ;;  %v1088_v60 = vmul.f32 %v7460_v44, %v7538_v18 }
 0x186   :  { %v7547_v63 = vpack.c.bf16 %v1231_v34, %v1230_v32  ;;  %v1089_v22 = vmul.f32 %v7538_v18, %v7481_v14  ;;  %v1090_v25 = vmul.f32 %v7538_v18, %v7493_v56  ;;  %v1091_v52 = vmul.f32 %v7474_v9, %v7538_v18 }
 0x187   :  { %v1092_v49 = vmul.f32 %v7488_v57, %v7538_v18  ;;  %v1095_v21 = vmul.f32 %v7502_v11, %v7538_v18  ;;  %v1096_v5 = vmul.f32 %v7512_v16, %v7538_v18  ;;  %v7610_v44 = vadd.f32 %v7543_v33, %v1065_v40 }
 0x188   :  { %12990 = vst [vmem:[#allocation33_spill] sm:$0xff] %v7547_v63  ;;  %v7613_v14 = vadd.f32 %v7543_v33, %v1066_v2  ;;  %v7616_v56 = vadd.f32 %v7543_v33, %v1067_v36  ;;  %v7619_v9 = vadd.f32 %v7543_v33, %v1068_v6  ;;  %v7622_v57 = vadd.f32 %v7543_v33, %v1069_v0 }
 0x189   :  { %v7625_v11 = vadd.f32 %v7543_v33, %v1070_v27  ;;  %v7628_v16 = vadd.f32 %v7543_v33, %v1071_v45  ;;  %v7631_v3 = vadd.f32 %v7543_v33, %v1072_v29  ;;  %v7634_v23 = vadd.f32 %v7543_v33, %v1073_v1 }
 0x18a   :  { %v7637_v37 = vadd.f32 %v7543_v33, %v1074_v17  ;;  %v7640_v43 = vadd.f32 %v7543_v33, %v1075_v50  ;;  %v7643_v62 = vadd.f32 %v7543_v33, %v1076_v30  ;;  %v7646_v35 = vadd.f32 %v7543_v33, %v1077_v8 }
 0x18b   :  { %v7649_v4 = vadd.f32 %v7543_v33, %v1078_v20  ;;  %v7652_v31 = vadd.f32 %v7543_v33, %v1079_v55  ;;  %v7655_v48 = vadd.f32 %v7543_v33, %v1080_v61  ;;  %v7658_v26 = vadd.f32 %v7543_v33, %v1081_v28  ;;  %v12991_v28 = vld [vmem:[#allocation11_spill] sm:$0xff] }
 0x18c   :  { %v7661_v38 = vadd.f32 %v7543_v33, %v1082_v42  ;;  %v7664_v53 = vadd.f32 %v7543_v33, %v1083_v15  ;;  %v7667_v10 = vadd.f32 %v7543_v33, %v1084_v58  ;;  %v7670_v32 = vadd.f32 %v7543_v33, %v1085_v47 }
 0x18d   :  { %v7673_v34 = vadd.f32 %v7543_v33, %v1086_v51  ;;  %v7676_v40 = vadd.f32 %v7543_v33, %v1087_v41  ;;  %v7679_v2 = vadd.f32 %v7543_v33, %v1088_v60  ;;  %v7682_v36 = vadd.f32 %v7543_v33, %v1089_v22 }
 0x18e   :  { %v7685_v6 = vadd.f32 %v7543_v33, %v1090_v25  ;;  %v7688_v0 = vadd.f32 %v7543_v33, %v1091_v52  ;;  %v7691_v27 = vadd.f32 %v7543_v33, %v1092_v49  ;;  %v7694_v45 = vadd.f32 %v7543_v33, %v1095_v21 }
 0x18f   :  { %v7697_v29 = vadd.f32 %v7543_v33, %v1096_v5  ;;  %v1043_v1 = vmul.f32 %v7112_v7, %v7538_v18  ;;  %v1044_v17 = vmul.f32 %v7126_v19, %v7538_v18  ;;  %v1039_v8 = vmul.f32 %v7083_v46, %v7538_v18  ;;  %v12992_v46 = vld [vmem:[#allocation12_spill] sm:$0xff] }
 0x190   :  { %v1040_v20 = vmul.f32 %v7098_v59, %v7538_v18  ;;  %v1041_v55 = vmul.f32 %v7538_v18, %v7119_v12  ;;  %v1042_v61 = vmul.f32 %v7538_v18, %v7131_v24  ;;  %v1045_v7 = vmul.f32 %v7538_v18, %v7147_v39 }
 0x191   :  { %v1116_v50 = vadd.f32 %v7543_v33, %v1043_v1  ;;  %v1117_v30 = vadd.f32 %v7543_v33, %v1044_v17  ;;  %v1046_v19 = vmul.f32 %v7538_v18, %v7159_v54  ;;  %v1047_v42 = vmul.f32 %v12991_v28, %v7538_v18 }
 0x192   :  { %v1048_v15 = vmul.f32 %v12992_v46, %v7538_v18  ;;  %v7722_v59 = vadd.f32 %v7543_v33, %v1039_v8  ;;  %v7725_v12 = vadd.f32 %v7543_v33, %v1040_v20  ;;  %v7728_v24 = vadd.f32 %v7543_v33, %v1041_v55 }
 0x193   :  { %v7731_v39 = vadd.f32 %v7543_v33, %v1042_v61  ;;  %v1180_v58 = vmax.f32 %v1116_v50, 0.0  ;;  %v1181_v54 = vmax.f32 %v1117_v30, 0.0  ;;  %v1202_v47 = vmax.f32 %v7610_v44, 0.0 }
 0x194   :  { %v1203_v51 = vmax.f32 %v7613_v14, 0.0  ;;  %v1204_v41 = vmax.f32 %v7616_v56, 0.0  ;;  %v1205_v60 = vmax.f32 %v7619_v9, 0.0  ;;  %v1206_v22 = vmax.f32 %v7622_v57, 0.0 }
 0x195   :  { %v1207_v25 = vmax.f32 %v7625_v11, 0.0  ;;  %v1208_v52 = vmax.f32 %v7628_v16, 0.0  ;;  %v1209_v49 = vmax.f32 %v7631_v3, 0.0  ;;  %v1210_v21 = vmax.f32 %v7634_v23, 0.0 }
 0x196   :  { %v1211_v5 = vmax.f32 %v7637_v37, 0.0  ;;  %v1212_v44 = vmax.f32 %v7640_v43, 0.0  ;;  %v1213_v14 = vmax.f32 %v7643_v62, 0.0  ;;  %v1214_v56 = vmax.f32 %v7646_v35, 0.0 }
 0x197   :  { %v1215_v9 = vmax.f32 %v7649_v4, 0.0  ;;  %v1216_v57 = vmax.f32 %v7652_v31, 0.0  ;;  %v1217_v11 = vmax.f32 %v7655_v48, 0.0  ;;  %v1218_v16 = vmax.f32 %v7658_v26, 0.0 }
 0x198   :  { %v1219_v3 = vmax.f32 %v7661_v38, 0.0  ;;  %v1220_v23 = vmax.f32 %v7664_v53, 0.0  ;;  %v1221_v37 = vmax.f32 %v7667_v10, 0.0  ;;  %v1222_v43 = vmax.f32 %v7670_v32, 0.0 }
 0x199   :  { %v1223_v62 = vmax.f32 %v7673_v34, 0.0  ;;  %v1224_v35 = vmax.f32 %v7676_v40, 0.0  ;;  %v1225_v4 = vmax.f32 %v7679_v2, 0.0  ;;  %v1226_v31 = vmax.f32 %v7682_v36, 0.0 }
 0x19a   :  { %v1227_v48 = vmax.f32 %v7685_v6, 0.0  ;;  %v1228_v26 = vmax.f32 %v7688_v0, 0.0  ;;  %v1229_v38 = vmax.f32 %v7691_v27, 0.0  ;;  %v1232_v53 = vmax.f32 %v7694_v45, 0.0 }
 0x19b   :  { %v1233_v10 = vmax.f32 %v7697_v29, 0.0  ;;  %v1239_v1 = vpack.c.bf16 %v1181_v54, %v1180_v58  ;;  %v7763_v32 = vpack.c.bf16 %v1203_v51, %v1202_v47  ;;  %v7765_v34 = vpack.c.bf16 %v1205_v60, %v1204_v41  ;;  %v12997_v60 = vld [vmem:[#allocation14_spill] sm:$0xff] }
 0x19c   :  { %v7767_v40 = vpack.c.bf16 %v1207_v25, %v1206_v22  ;;  %v7769_v2 = vpack.c.bf16 %v1209_v49, %v1208_v52  ;;  %v7771_v36 = vpack.c.bf16 %v1211_v5, %v1210_v21  ;;  %v7773_v6 = vpack.c.bf16 %v1213_v14, %v1212_v44  ;;  %v12998_v25 = vld [vmem:[#allocation16_spill] sm:$0xff] }
 0x19d   :  { %v7775_v0 = vpack.c.bf16 %v1215_v9, %v1214_v56  ;;  %v7777_v27 = vpack.c.bf16 %v1217_v11, %v1216_v57  ;;  %v7779_v45 = vpack.c.bf16 %v1219_v3, %v1218_v16  ;;  %v7781_v29 = vpack.c.bf16 %v1221_v37, %v1220_v23  ;;  %v13000_v9 = vld [vmem:[#allocation13_spill] sm:$0xff] }
 0x19e   :  { %v7783_v17 = vpack.c.bf16 %v1223_v62, %v1222_v43  ;;  %v7785_v50 = vpack.c.bf16 %v1225_v4, %v1224_v35  ;;  %v7787_v30 = vpack.c.bf16 %v1227_v48, %v1226_v31  ;;  %v7789_v8 = vpack.c.bf16 %v1229_v38, %v1228_v26  ;;  %v13002_v43 = vld [vmem:[#allocation18_spill] sm:$0xff]  ;;  %v13003_v48 = vld [vmem:[#allocation20_spill] sm:$0xff] }
 0x19f   :  { %v7791_v20 = vpack.c.bf16 %v1233_v10, %v1232_v53  ;;  %v1309_v55 = vshrl.u32 %v1239_v1, 16  ;;  %v1118_v61 = vadd.f32 %v7543_v33, %v1045_v7  ;;  %v1119_v28 = vadd.f32 %v7543_v33, %v1046_v19  ;;  %v13004_v53 = vld [vmem:[#allocation17_spill] sm:$0xff] }
 0x1a0   :  { %12993 = vst [vmem:[#allocation11_spill] sm:$0xff] %v7785_v50  ;;  %12994 = vst [vmem:[#allocation12_spill] sm:$0xff] %v7787_v30  ;;  %v1120_v46 = vadd.f32 %v7543_v33, %v1047_v42  ;;  %v1121_v58 = vadd.f32 %v7543_v33, %v1048_v15  ;;  %v1178_v54 = vmax.f32 %v7728_v24, 0.0  ;;  %v1179_v47 = vmax.f32 %v7731_v39, 0.0 }
 0x1a1   :  { %12995 = vst [vmem:[#allocation34_spill] sm:$0xff] %v7789_v8  ;;  %12996 = vst [vmem:[#allocation35_spill] sm:$0xff] %v7791_v20  ;;  %v7799_v51 = vrot.slane %v1309_v55, 7  ;;  %v1312_v41 = vshll.u32 %v1239_v1, 16  ;;  %v1049_v22 = vmul.f32 %v7538_v18, %v12997_v60  ;;  %v1050_v52 = vmul.f32 %v7538_v18, %v12998_v25  ;;  %v13005_v1 = vld [vmem:[#allocation19_spill] sm:$0xff]  ;;  %v13006_v25 = vld [vmem:[#allocation22_spill] sm:$0xff] }
 0x1a2   :  { %v1176_v7 = vmax.f32 %v7722_v59, 0.0  ;;  %v1177_v19 = vmax.f32 %v7725_v12, 0.0  ;;  %v1182_v39 = vmax.f32 %v1118_v61, 0.0  ;;  %v1183_v49 = vmax.f32 %v1119_v28, 0.0  ;;  %v13001_v12 = vld [vmem:[#allocation15_spill] sm:$0xff] }
 0x1a3   :  { %v1314_v42 = vor.u32 %v1312_v41, %v7799_v51  ;;  %v1122_v15 = vadd.f32 %v7543_v33, %v1049_v22  ;;  %v1123_v24 = vadd.f32 %v7543_v33, %v1050_v52  ;;  %v1184_v21 = vmax.f32 %v1120_v46, 0.0 }
 0x1a4   :  { %v1185_v5 = vmax.f32 %v1121_v58, 0.0  ;;  %v1238_v44 = vpack.c.bf16 %v1179_v47, %v1178_v54  ;;  %v1051_v59 = vmul.f32 %v13000_v9, %v7538_v18  ;;  %v1052_v57 = vmul.f32 %v13001_v12, %v7538_v18 }
 0x1a5   :  { %v7812_v56 = vsel %vm7292_vm4, 0, %v1314_v42  ;;  %v1237_v11 = vpack.c.bf16 %v1177_v19, %v1176_v7  ;;  %v1186_v23 = vmax.f32 %v1122_v15, 0.0  ;;  %v1187_v37 = vmax.f32 %v1123_v24, 0.0  ;;  %v13007_v7 = vld [vmem:[#allocation24_spill] sm:$0xff] }
 0x1a6   :  { %2455 = vrot.lane.b32.xlu0 %v7812_v56, %s6849_s25  ;;  %v1124_v16 = vadd.f32 %v7543_v33, %v1051_v59  ;;  %v1125_v3 = vadd.f32 %v7543_v33, %v1052_v57  ;;  %v1053_v62 = vmul.f32 %v7538_v18, %v13002_v43  ;;  %v1240_v35 = vpack.c.bf16 %v1183_v49, %v1182_v39 }
 0x1a7   :  { %v1241_v4 = vpack.c.bf16 %v1185_v5, %v1184_v21  ;;  %v1302_v31 = vshrl.u32 %v1238_v44, 16  ;;  %v1054_v26 = vmul.f32 %v7538_v18, %v13003_v48  ;;  %v1295_v38 = vshrl.u32 %v1237_v11, 16 }
 0x1a8   :  { %v1055_v10 = vmul.f32 %v13004_v53, %v7538_v18  ;;  %v1056_v55 = vmul.f32 %v13005_v1, %v7538_v18  ;;  %v1126_v61 = vadd.f32 %v7543_v33, %v1053_v62  ;;  %v1188_v46 = vmax.f32 %v1124_v16, 0.0  ;;  %v13010_v62 = vld [vmem:[#allocation27_spill] sm:$0xff] }
 0x1a9   :  { %v1127_v28 = vadd.f32 %v7543_v33, %v1054_v26  ;;  %v1189_v58 = vmax.f32 %v1125_v3, 0.0  ;;  %v1242_v54 = vpack.c.bf16 %v1187_v37, %v1186_v23  ;;  %v1305_v47 = vshll.u32 %v1238_v44, 16  ;;  %v13008_v3 = vld [vmem:[#allocation21_spill] sm:$0xff] }
 0x1aa   :  { %v1316_v41 = vshrl.u32 %v1240_v35, 16  ;;  %v1323_v60 = vshrl.u32 %v1241_v4, 16  ;;  %v7832_v22 = vrot.slane %v1302_v31, 7  ;;  %v1057_v52 = vmul.f32 %v7538_v18, %v13006_v25  ;;  %v13009_v37 = vld [vmem:[#allocation25_spill] sm:$0xff] }
 0x1ab   :  { %v1058_v19 = vmul.f32 %v7538_v18, %v13007_v7  ;;  %v7838_v42 = vrot.slane %v1295_v38, 7  ;;  %v1128_v15 = vadd.f32 %v7543_v33, %v1055_v10  ;;  %v1129_v24 = vadd.f32 %v7543_v33, %v1056_v55 }
 0x1ac   :  { %v1190_v39 = vmax.f32 %v1126_v61, 0.0  ;;  %v1307_v49 = vor.u32 %v1305_v47, %v7832_v22  ;;  %v1191_v21 = vmax.f32 %v1127_v28, 0.0  ;;  %v1243_v5 = vpack.c.bf16 %v1189_v58, %v1188_v46 }
 0x1ad   :  { %v1298_v44 = vshll.u32 %v1237_v11, 16  ;;  %v1319_v9 = vshll.u32 %v1240_v35, 16  ;;  %v1330_v59 = vshrl.u32 %v1242_v54, 16  ;;  %v7847_v57 = vrot.slane %v1323_v60, 7 }
 0x1ae   :  { %v7845_v12 = vsel %vm7292_vm4, 0, %v1307_v49  ;;  %v7849_v16 = vrot.slane %v1316_v41, 7  ;;  %v1059_v23 = vmul.f32 %v13008_v3, %v7538_v18  ;;  %v1063_v43 = vmul.f32 %v13009_v37, %v7538_v18  ;;  %v13013_v41 = vld [vmem:[#allocation23_spill] sm:$0xff]  ;;  %v13016_v37 = vld [vmem:[#allocation26_spill] sm:$0xff] }
 0x1af   :  { %v1064_v31 = vmul.f32 %v13010_v62, %v7538_v18  ;;  %2453 = vrot.lane.b32.xlu1 %v7845_v12, %s6849_s25  ;;  %v1300_v11 = vor.u32 %v1298_v44, %v7838_v42  ;;  %v1130_v35 = vadd.f32 %v7543_v33, %v1057_v52  ;;  %v1131_v48 = vadd.f32 %v7543_v33, %v1058_v19  ;;  %v13015_v3 = vld [vmem:[#allocation7_spill] sm:$0xff] }
 0x1b0   :  { %v1326_v26 = vshll.u32 %v1241_v4, 16  ;;  %v1321_v38 = vor.u32 %v1319_v9, %v7849_v16  ;;  %v1192_v53 = vmax.f32 %v1128_v15, 0.0  ;;  %v1193_v10 = vmax.f32 %v1129_v24, 0.0  ;;  %v13012_v4 = vld [vmem:[#allocation5_spill] sm:$0xff] }
 0x1b1   :  { %v1244_v1 = vpack.c.bf16 %v1191_v21, %v1190_v39  ;;  %v1337_v55 = vshrl.u32 %v1243_v5, 16  ;;  %v7869_v28 = vsel %vm7292_vm4, 0, %v1300_v11  ;;  %v7872_v58 = vrot.slane %v1330_v59, 7 }
 0x1b2   :  { %v7865_v61 = vsel %vm7292_vm4, 0, %v1321_v38  ;;  %13011 = vst [vmem:[#allocation14_spill] sm:$0xff] %v7869_v28  ;;  %v1328_v46 = vor.u32 %v1326_v26, %v7847_v57  ;;  %v1035_v47 = vmul.f32 %v13012_v4, %v7538_v18  ;;  %v1060_v60 = vmul.f32 %v13013_v41, %v7538_v18  ;;  %v13018_v4 = vld [vmem:[#allocation6_spill] sm:$0xff]  ;;  %v13019_v41 = vld [vmem:[#allocation8_spill] sm:$0xff] }
 0x1b3   :  { %2457 = vrot.lane.b32.xlu0 %v7865_v61, %s6849_s25  ;;  %2325 = vrot.lane.b32.xlu1 %v7869_v28, %s6850_s26  ;;  %v1132_v25 = vadd.f32 %v7543_v33, %v1059_v23  ;;  %v1136_v52 = vadd.f32 %v7543_v33, %v1063_v43  ;;  %v1137_v7 = vadd.f32 %v7543_v33, %v1064_v31  ;;  %v1333_v19 = vshll.u32 %v1242_v54, 16 }
 0x1b4   :  { %v1133_v15 = vadd.f32 %v7543_v33, %v1060_v60  ;;  %v1194_v24 = vmax.f32 %v1130_v35, 0.0  ;;  %v1195_v39 = vmax.f32 %v1131_v48, 0.0  ;;  %v1245_v49 = vpack.c.bf16 %v1193_v10, %v1192_v53  ;;  %v13020_v60 = vld [vmem:[#allocation28_spill] sm:$0xff] }
 0x1b5   :  { %v1344_v21 = vshrl.u32 %v1244_v1, 16  ;;  %v7886_v44 = vrot.slane %v1337_v55, 7  ;;  %v7890_v9 = vsel %vm7292_vm4, 0, %v1328_v46  ;;  %v1335_v59 = vor.u32 %v1333_v19, %v7872_v58 }
 0x1b6   :  { %13014 = vst [vmem:[#allocation16_spill] sm:$0xff] %v7890_v9  ;;  %v1036_v23 = vmul.f32 %v13015_v3, %v7538_v18  ;;  %v1061_v54 = vmul.f32 %v7538_v18, %v13016_v37  ;;  %v1108_v43 = vadd.f32 %v7543_v33, %v1035_v47  ;;  %v1200_v62 = vmax.f32 %v1136_v52, 0.0  ;;  %v13021_v52 = vld [vmem:[#allocation9_spill] sm:$0xff] }
 0x1b7   :  { %2459 = vrot.lane.b32.xlu0 %v7890_v9, %s6849_s25  ;;  %2327 = vrot.lane.b32.xlu1 %v7845_v12, %s6850_s26  ;;  %v1201_v31 = vmax.f32 %v1137_v7, 0.0  ;;  %v1340_v11 = vshll.u32 %v1243_v5, 16  ;;  %v1196_v48 = vmax.f32 %v1132_v25, 0.0  ;;  %v1197_v26 = vmax.f32 %v1133_v15, 0.0 }
 0x1b8   :  { %v1109_v35 = vadd.f32 %v7543_v33, %v1036_v23  ;;  %v1246_v38 = vpack.c.bf16 %v1195_v39, %v1194_v24  ;;  %v1351_v53 = vshrl.u32 %v1245_v49, 16  ;;  %v7905_v10 = vsel %vm7292_vm4, 0, %v1335_v59 }
 0x1b9   :  { %13017 = vst [vmem:[#allocation29_spill] sm:$0xff] %v7905_v10  ;;  %v1342_v55 = vor.u32 %v1340_v11, %v7886_v44  ;;  %v7908_v46 = vrot.slane %v1344_v21, 7  ;;  %v1033_v47 = vmul.f32 %v7538_v18, %v13018_v4  ;;  %v1034_v5 = vmul.f32 %v7538_v18, %v13019_v41  ;;  %v13023_v41 = vld [vmem:[#allocation10_spill] sm:$0xff] }
 0x1ba   :  { %v1062_v25 = vmul.f32 %v7538_v18, %v13020_v60  ;;  %v1037_v7 = vmul.f32 %v7538_v18, %v13021_v52  ;;  %v1134_v19 = vadd.f32 %v7543_v33, %v1061_v54  ;;  %v1249_v15 = vpack.c.bf16 %v1201_v31, %v1200_v62 }
 0x1bb   :  { %2461 = vrot.lane.b32.xlu0 %v7905_v10, %s6849_s25  ;;  %2329 = vrot.lane.b32.xlu1 %v7812_v56, %s6850_s26  ;;  %v1347_v24 = vshll.u32 %v1244_v1, 16  ;;  %v1172_v21 = vmax.f32 %v1108_v43, 0.0  ;;  %v1173_v59 = vmax.f32 %v1109_v35, 0.0  ;;  %v1247_v3 = vpack.c.bf16 %v1197_v26, %v1196_v48 }
 0x1bc   :  { %v1135_v39 = vadd.f32 %v7543_v33, %v1062_v25  ;;  %v1358_v23 = vshrl.u32 %v1246_v38, 16  ;;  %v7924_v37 = vrot.slane %v1351_v53, 7  ;;  %v7928_v11 = vsel %vm7292_vm4, 0, %v1342_v55 }
 0x1bd   :  { %13022 = vst [vmem:[#allocation13_spill] sm:$0xff] %v7928_v11  ;;  %v1349_v4 = vor.u32 %v1347_v24, %v7908_v46  ;;  %v1038_v60 = vmul.f32 %v7538_v18, %v13023_v41  ;;  %v1106_v54 = vadd.f32 %v7543_v33, %v1033_v47  ;;  %v1107_v1 = vadd.f32 %v7543_v33, %v1034_v5 }
 0x1be   :  { %v1110_v43 = vadd.f32 %v7543_v33, %v1037_v7  ;;  %v1354_v62 = vshll.u32 %v1245_v49, 16  ;;  %v1379_v31 = vshrl.u32 %v1249_v15, 16  ;;  %v1198_v48 = vmax.f32 %v1134_v19, 0.0 }
 0x1bf   :  { %2463 = vrot.lane.b32.xlu0 %v7928_v11, %s6849_s25  ;;  %2331 = vrot.lane.b32.xlu1 %v7865_v61, %s6850_s26  ;;  %v1111_v35 = vadd.f32 %v7543_v33, %v1038_v60  ;;  %v1199_v26 = vmax.f32 %v1135_v39, 0.0  ;;  %v1235_v53 = vpack.c.bf16 %v1173_v59, %v1172_v21  ;;  %v1365_v18 = vshrl.u32 %v1247_v3, 16 }
 0x1c0   :  { %v7943_v55 = vsel %vm7292_vm4, 0, %v1349_v4  ;;  %v1356_v47 = vor.u32 %v1354_v62, %v7924_v37  ;;  %v7946_v25 = vrot.slane %v1358_v23, 7  ;;  %v1170_v49 = vmax.f32 %v1106_v54, 0.0 }
 0x1c1   :  { %13024 = vst [vmem:[#allocation15_spill] sm:$0xff] %v7943_v55  ;;  %v1171_v33 = vmax.f32 %v1107_v1, 0.0  ;;  %v1361_v5 = vshll.u32 %v1246_v38, 16  ;;  %v1381_v52 = vrot.slane %v1379_v31, 7  ;;  %v1174_v7 = vmax.f32 %v1110_v43, 0.0 }
 0x1c2   :  { %v1175_v19 = vmax.f32 %v1111_v35, 0.0  ;;  %v1248_v24 = vpack.c.bf16 %v1199_v26, %v1198_v48  ;;  %v1281_v39 = vshrl.u32 %v1235_v53, 16  ;;  %v7952_v21 = vrot.slane %v1365_v18, 7 }
 0x1c3   :  { %2465 = vrot.lane.b32.xlu0 %v7943_v55, %s6849_s25  ;;  %2333 = vrot.lane.b32.xlu1 %v7890_v9, %s6850_s26  ;;  %v7956_v59 = vsel %vm7292_vm4, 0, %v1356_v47  ;;  %v1363_v23 = vor.u32 %v1361_v5, %v7946_v25  ;;  %v1382_v4 = vshll.u32 %v1249_v15, 16  ;;  %v1368_v38 = vshll.u32 %v1247_v3, 16 }
 0x1c4   :  { %13025 = vst [vmem:[#allocation18_spill] sm:$0xff] %v7956_v59  ;;  %v1234_v60 = vpack.c.bf16 %v1171_v33, %v1170_v49  ;;  %v1236_v54 = vpack.c.bf16 %v1175_v19, %v1174_v7  ;;  %v1372_v1 = vshrl.u32 %v1248_v24, 16  ;;  %v7963_v43 = vrot.slane %v1281_v39, 7 }
 0x1c5   :  { %v1384_v41 = vor.u32 %v1382_v4, %v1381_v52  ;;  %v7967_v62 = vsel %vm7292_vm4, 0, %v1363_v23  ;;  %v1370_v31 = vor.u32 %v1368_v38, %v7952_v21  ;;  %v1284_v15 = vshll.u32 %v1235_v53, 16 }
 0x1c6   :  { %13026 = vst [vmem:[#allocation20_spill] sm:$0xff] %v7967_v62  ;;  %v1288_v35 = vshrl.u32 %v1236_v54, 16  ;;  %v7980_v48 = vsel %vm7292_vm4, %v1381_v52, 0  ;;  %v7987_v47 = vrot.slane %v1372_v1, 7  ;;  %v1274_v49 = vshrl.u32 %v1234_v60, 16 }
 0x1c7   :  { %2467 = vrot.lane.b32.xlu0 %v7956_v59, %s6849_s25  ;;  %2335 = vrot.lane.b32.xlu1 %v7905_v10, %s6850_s26  ;;  %v7976_v3 = vsel %vm7292_vm4, 0, %v1384_v41  ;;  %v7984_v26 = vsel %vm7292_vm4, 0, %v1370_v31  ;;  %v1286_v18 = vor.u32 %v1284_v15, %v7963_v43  ;;  %v2190_v33 = vrot.slane %v7980_v48, 1 }
 0x1c8   :  { %13027 = vst [vmem:[#allocation17_spill] sm:$0xff] %v7984_v26  ;;  %v2189_v53 = vrot.slane %v7976_v3, 1  ;;  %v1375_v5 = vshll.u32 %v1248_v24, 16  ;;  %v1290_v39 = vrot.slane %v1288_v35, 7  ;;  %v8003_v23 = vrot.slane %v1274_v49, 7 }
 0x1c9   :  { %v8000_v7 = vsel %vm7292_vm4, 0, %v1286_v18  ;;  %v1291_v4 = vshll.u32 %v1236_v54, 16  ;;  %v1277_v24 = vshll.u32 %v1234_v60, 16  ;;  %v1393_v54 = vshrl.u32 %v7765_v34, 16 }
 0x1ca   :  { %v7996_v52 = vsel %vm2067_vm5, %v2189_v53, %v2190_v33  ;;  %13029 = vst [vmem:[#allocation22_spill] sm:$0xff] %v8000_v7  ;;  %v1377_v19 = vor.u32 %v1375_v5, %v7987_v47  ;;  %v1400_v15 = vshrl.u32 %v7767_v40, 16  ;;  %v1386_v18 = vshrl.u32 %v7763_v32, 16 }
 0x1cb   :  { %2469 = vrot.lane.b32.xlu0 %v7967_v62, %s6849_s25  ;;  %2337 = vrot.lane.b32.xlu1 %v7928_v11, %s6850_s26  ;;  %13028 = vst [vmem:[#allocation19_spill] sm:$0xff] %v7996_v52  ;;  %v1293_v41 = vor.u32 %v1291_v4, %v1290_v39  ;;  %v1279_v1 = vor.u32 %v1277_v24, %v8003_v23  ;;  %v8036_v35 = vrot.slane %v1393_v54, 7  ;;  %v1396_v49 = vshll.u32 %v7765_v34, 16 }
 0x1cc   :  { %v8011_v38 = vsel %vm7292_vm4, 0, %v1377_v19  ;;  %v8045_v33 = vrot.slane %v1386_v18, 7  ;;  %v8047_v5 = vrot.slane %v1400_v15, 7  ;;  %v1403_v19 = vshll.u32 %v7767_v40, 16 }
 0x1cd   :  { %13030 = vst [vmem:[#allocation24_spill] sm:$0xff] %v8011_v38  ;;  %v8020_v31 = vsel %vm7292_vm4, 0, %v1293_v41  ;;  %v8024_v60 = vsel %vm7292_vm4, 0, %v1279_v1  ;;  %v1398_v53 = vor.u32 %v1396_v49, %v8036_v35  ;;  %v1389_v4 = vshll.u32 %v7763_v32, 16 }
 0x1ce   :  { %13031 = vst [vmem:[#allocation21_spill] sm:$0xff] %v8024_v60  ;;  %v1405_v41 = vor.u32 %v1403_v19, %v8047_v5  ;;  %v8068_v40 = vsel %vm7292_vm4, %v7838_v42, 0  ;;  %v2080_v32 = vrot.slane %v7869_v28, 1  ;;  %v8073_v1 = vsel %vm7292_vm4, %v1290_v39, 0  ;;  %v6762_v39 = vld [vmem:[%s12736_s4 + $0x38] sm:$0xff]  }
 0x1cf   :  { %2471 = vrot.lane.b32.xlu0 %v7984_v26, %s6849_s25  ;;  %2339 = vrot.lane.b32.xlu1 %v7943_v55, %s6850_s26  ;;  %v8057_v24 = vsel %vm7292_vm4, 0, %v1398_v53  ;;  %v1391_v34 = vor.u32 %v1389_v4, %v8045_v33  ;;  %v2077_v18 = vrot.slane %v8020_v31, 1  ;;  %v2081_v42 = vrot.slane %v8068_v40, 1 }
 0x1d0   :  { %13032 = vst [vmem:[#allocation25_spill] sm:$0xff] %v8057_v24  ;;  %v8081_v15 = vsel %vm7292_vm4, 0, %v1405_v41  ;;  %v2078_v49 = vrot.slane %v8073_v1, 1  ;;  %v2169_v53 = vshll.u32 %v7980_v48, 16  ;;  %v2164_v19 = vshll.u32 %v7976_v3, 16  ;;  %6698 = vmatpush1.bf16.msra.mxu1 %v6762_v39  ;;  %3284 = vmatpush1.bf16.msra.mxu0 %v6762_v39 }
 0x1d1   :  { %v8077_v54 = vsel %vm7292_vm4, 0, %v1391_v34  ;;  %13033 = vst [vmem:[#allocation27_spill] sm:$0xff] %v8081_v15  ;;  %v8096_v4 = vsel %vm2067_vm5, %v2080_v32, %v2081_v42  ;;  %v8101_v34 = vsel %vm7292_vm4, %v7832_v22, 0  ;;  %v2083_v13 = vrot.slane %v7845_v12, 1  ;;  %v6763_v22 = vld [vmem:[%s12736_s4 + $0x30] sm:$0xff]  }
 0x1d2   :  { %13034 = vst [vmem:[#allocation5_spill] sm:$0xff] %v8096_v4  ;;  %v8104_v41 = vsel %vm2067_vm5, %v2077_v18, %v2078_v49  ;;  %v13036_v20 = vmov 0   ;;  %v2162_v48 = vshrl.u32 %v7976_v3, 16  ;;  %v2166_v32 = vrot.slane %v2164_v19, 1 }
 0x1d3   :  { %2341 = vrot.lane.b32.xlu1 %v7956_v59, %s6850_s26  ;;  %2447 = vrot.lane.b32.xlu0 %v8000_v7, %s6849_s25  ;;  %13035 = vst [vmem:[#allocation23_spill] sm:$0xff] %v8104_v41  ;;  %v2084_v18 = vrot.slane %v8101_v34, 1  ;;  %v2171_v39 = vrot.slane %v2169_v53, 1  ;;  %v8121_v49 = vsel %vm7292_vm4, %v7799_v51, 0  ;;  %v2086_v19 = vrot.slane %v7812_v56, 1 }
 0x1d4   :  { %6683 = vmatprep.subr.bf16.mxu1 %v13036_v20  ;;  %3285 = vmatprep.subr.bf16.mxu0 %v13036_v20  ;;  %v2167_v42 = vor.u32 %v2166_v32, %v2162_v48  ;;  %v2087_v51 = vrot.slane %v8121_v49, 1  ;;  %v8143_v53 = vsel %vm7292_vm4, %v7849_v16, 0  ;;  %v2089_v32 = vrot.slane %v7865_v61, 1  ;;  %v6765_v16 = vld [vmem:[%s12736_s4 + $0x20] sm:$0xff]  }
 0x1d5   :  { %6699 = vmatpush1.bf16.msra.mxu1 %v6763_v22  ;;  %3286 = vmatpush1.bf16.msra.mxu0 %v6763_v22  ;;  %v2090_v22 = vrot.slane %v8143_v53, 1  ;;  %v8386_v8 = vsel %vm7292_vm4, %v8036_v35, 0  ;;  %v2119_v30 = vrot.slane %v8057_v24, 1  ;;  %v1672_v50 = vshll.u32 %v8020_v31, 16  ;;  %v6777_v35 = vld [vmem:[%s12736_s4 + $0x40] sm:$0xff]  }
 0x1d6   :  { %6684 = vmatprep.subr.bf16.mxu1 %v13036_v20  ;;  %3287 = vmatprep.subr.bf16.mxu0 %v13036_v20  ;;  %v8130_v63 = vsel %vm1632_vm6, %v2167_v42, %v2171_v39  ;;  %v8146_v48 = vsel %vm2067_vm5, %v2086_v19, %v2087_v51  ;;  %v2092_v39 = vrot.slane %v7890_v9, 1 }
 0x1d7   :  { %2343 = vrot.lane.b32.xlu1 %v7967_v62, %s6850_s26  ;;  %2473 = vrot.lane.b32.xlu0 %v8011_v38, %s6849_s25  ;;  %13038 = vst [vmem:[#allocation26_spill] sm:$0xff] %v8130_v63  ;;  %13039 = vst [vmem:[#allocation6_spill] sm:$0xff] %v8146_v48  ;;  %v8165_v42 = vsel %vm2067_vm5, %v2089_v32, %v2090_v22  ;;  %v2095_v32 = vrot.slane %v7905_v10, 1  ;;  %v8200_v22 = vsel %vm7292_vm4, %v7886_v44, 0  ;;  %v6768_v44 = vld [vmem:[%s12736_s4 + $0x8] sm:$0xff]  }
 0x1d8   :  { %13040 = vst [vmem:[#allocation8_spill] sm:$0xff] %v8165_v42 }
 0x1db   :  { %2449 = vrot.lane.b32.xlu0 %v8020_v31, %s6849_s25  ;;  %2319 = vrot.lane.b32.xlu1 %v8024_v60, %s6850_s26 }
 0x1df   :  { %2475 = vrot.lane.b32.xlu0 %v7976_v3, %s6849_s25  ;;  %2345 = vrot.lane.b32.xlu1 %v7984_v26, %s6850_s26 }
 0x1e3   :  { %2451 = vrot.lane.b32.xlu0 %v7869_v28, %s6849_s25  ;;  %2321 = vrot.lane.b32.xlu1 %v8000_v7, %s6850_s26 }
 0x1e7   :  { %2349 = vrot.lane.b32.xlu0 %v7976_v3, %s6850_s26  ;;  %2347 = vrot.lane.b32.xlu1 %v8011_v38, %s6850_s26  ;;  %v8124_v3 = vsel %vm2067_vm5, %v2083_v13, %v2084_v18  ;;  %v6764_v13 = vld [vmem:[%s12736_s4 + $0x28] sm:$0xff]   ;;  %v8162_v18 = vsel %vm7292_vm4, %v7847_v57, 0  ;;  %v6766_v57 = vld [vmem:[%s12736_s4 + $0x18] sm:$0xff]  }
 0x1e8   :  { %13037 = vst [vmem:[#allocation7_spill] sm:$0xff] %v8124_v3  ;;  %6700 = vmatpush1.bf16.msra.mxu1 %v6764_v13  ;;  %3288 = vmatpush1.bf16.msra.mxu0 %v6764_v13  ;;  %v2093_v19 = vrot.slane %v8162_v18, 1  ;;  %v8181_v13 = vsel %vm7292_vm4, %v7872_v58, 0  ;;  %v6767_v58 = vld [vmem:[%s12736_s4 + $0x10] sm:$0xff]  }
 0x1e9   :  { %6685 = vmatprep.subr.bf16.mxu1 %v13036_v20  ;;  %3289 = vmatprep.subr.bf16.mxu0 %v13036_v20 }
 0x1ea   :  { %v8184_v51 = vsel %vm2067_vm5, %v2092_v39, %v2093_v19  ;;  %v2099_v19 = vrot.slane %v8200_v22, 1 }
 0x1eb   :  { %2479 = vrot.lane.b32.xlu0 %v8057_v24, %s6849_s25  ;;  %2323 = vrot.lane.b32.xlu1 %v8020_v31, %s6850_s26  ;;  %13041 = vst [vmem:[#allocation28_spill] sm:$0xff] %v8184_v51 }
 0x1ec   :  { %6701 = vmatpush1.bf16.msra.mxu1 %v6765_v16  ;;  %3290 = vmatpush1.bf16.msra.mxu0 %v6765_v16  ;;  %v2096_v16 = vrot.slane %v8181_v13, 1 }
 0x1ed   :  { %6686 = vmatprep.subr.bf16.mxu1 %v13036_v20  ;;  %3291 = vmatprep.subr.bf16.mxu0 %v13036_v20 }
 0x1ee   :  { %v8203_v39 = vsel %vm2067_vm5, %v2095_v32, %v2096_v16  ;;  %v8219_v32 = vsel %vm7292_vm4, %v7908_v46, 0  ;;  %v2101_v16 = vrot.slane %v7943_v55, 1  ;;  %v6769_v46 = vld [vmem:[%s12736_s4] sm:$0xff]  }
 0x1ef   :  { %2351 = vrot.lane.b32.xlu0 %v8077_v54, %s6850_s26  ;;  %2481 = vrot.lane.b32.xlu1 %v8081_v15, %s6849_s25  ;;  %13042 = vst [vmem:[#allocation9_spill] sm:$0xff] %v8203_v39 }
 0x1f0   :  { %6702 = vmatpush1.bf16.msra.mxu1 %v6766_v57  ;;  %3292 = vmatpush1.bf16.msra.mxu0 %v6766_v57  ;;  %v2098_v57 = vrot.slane %v7928_v11, 1 }
 0x1f1   :  { %6687 = vmatprep.subr.bf16.mxu1 %v13036_v20  ;;  %3293 = vmatprep.subr.bf16.mxu0 %v13036_v20 }
 0x1f3   :  { %2389 = vrot.lane.b32.xlu0 %v8096_v4, %s6851_s27  ;;  %2263 = vrot.lane.b32.xlu1 %v8104_v41, %s6849_s25 }
 0x1f4   :  { %6703 = vmatpush1.bf16.msra.mxu1 %v6767_v58  ;;  %3294 = vmatpush1.bf16.msra.mxu0 %v6767_v58  ;;  %v8222_v58 = vsel %vm2067_vm5, %v2098_v57, %v2099_v19  ;;  %v8238_v57 = vsel %vm7292_vm4, %v7924_v37, 0  ;;  %v6770_v37 = vld [vmem:[%s12736_s4 + $0x78] sm:$0xff]  }
 0x1f5   :  { %6688 = vmatprep.subr.bf16.mxu1 %v13036_v20  ;;  %3295 = vmatprep.subr.bf16.mxu0 %v13036_v20  ;;  %13043 = vst [vmem:[#allocation10_spill] sm:$0xff] %v8222_v58 }
 0x1f7   :  { %2391 = vrot.lane.b32.xlu0 %v8124_v3, %s6851_s27  ;;  %2265 = vrot.lane.b32.xlu1 %v8096_v4, %s6849_s25  ;;  %v2113_v4 = vrot.slane %v8011_v38, 1 }
 0x1f8   :  { %6704 = vmatpush1.bf16.msra.mxu1 %v6768_v44  ;;  %3296 = vmatpush1.bf16.msra.mxu0 %v6768_v44  ;;  %v2102_v44 = vrot.slane %v8219_v32, 1 }
 0x1f9   :  { %6689 = vmatprep.subr.bf16.mxu1 %v13036_v20  ;;  %3297 = vmatprep.subr.bf16.mxu0 %v13036_v20 }
 0x1fa   :  { %v8241_v19 = vsel %vm2067_vm5, %v2101_v16, %v2102_v44  ;;  %v8257_v16 = vsel %vm7292_vm4, %v7946_v25, 0  ;;  %v6771_v25 = vld [vmem:[%s12736_s4 + $0x70] sm:$0xff]  }
 0x1fb   :  { %2393 = vrot.lane.b32.xlu0 %v8146_v48, %s6851_s27  ;;  %2267 = vrot.lane.b32.xlu1 %v8124_v3, %s6849_s25  ;;  %13044 = vst [vmem:[#allocation36_spill] sm:$0xff] %v8241_v19 }
 0x1fc   :  { %6705 = vmatpush1.bf16.msra.mxu1 %v6769_v46  ;;  %3298 = vmatpush1.bf16.msra.mxu0 %v6769_v46  ;;  %v2105_v46 = vrot.slane %v8238_v57, 1 }
 0x1fd   :  { %6690 = vmatprep.subr.bf16.mxu1 %v13036_v20  ;;  %3299 = vmatprep.subr.bf16.mxu0 %v13036_v20 }
 0x1ff   :  { %2395 = vrot.lane.b32.xlu0 %v8165_v42, %s6851_s27  ;;  %2269 = vrot.lane.b32.xlu1 %v8146_v48, %s6849_s25  ;;  %v2110_v48 = vrot.slane %v7984_v26, 1 }
 0x200   :  { %6706 = vmatpush2.bf16.msra.mxu1 %v6770_v37  ;;  %3300 = vmatpush2.bf16.msra.mxu0 %v6770_v37  ;;  %v2108_v37 = vrot.slane %v8257_v16, 1 }
 0x201   :  { %6691 = vmatprep.subr.bf16.mxu1 %v13036_v20  ;;  %3301 = vmatprep.subr.bf16.mxu0 %v13036_v20 }
 0x203   :  { %2397 = vrot.lane.b32.xlu0 %v8184_v51, %s6851_s27  ;;  %2271 = vrot.lane.b32.xlu1 %v8165_v42, %s6849_s25 }
 0x204   :  { %6707 = vmatpush2.bf16.msra.mxu1 %v6771_v25  ;;  %3302 = vmatpush2.bf16.msra.mxu0 %v6771_v25 }
 0x205   :  { %6692 = vmatprep.subr.bf16.mxu1 %v13036_v20  ;;  %3303 = vmatprep.subr.bf16.mxu0 %v13036_v20 }
 0x207   :  { %2399 = vrot.lane.b32.xlu0 %v8203_v39, %s6851_s27  ;;  %2273 = vrot.lane.b32.xlu1 %v8184_v51, %s6849_s25  ;;  %v2104_v51 = vrot.slane %v7956_v59, 1 }
 0x209   :  { %v8260_v44 = vsel %vm2067_vm5, %v2104_v51, %v2105_v46  ;;  %v8273_v51 = vpop.permute.xlu1 %6722  ;;  %v8278_v46 = vsel %vm7292_vm4, %v8003_v23, 0  ;;  %v6772_v23 = vld [vmem:[%s12736_s4 + $0x68] sm:$0xff]  }
 0x20a   :  { %13045 = vst [vmem:[#allocation37_spill] sm:$0xff] %v8260_v44  ;;  %13046 = vst [vmem:[#allocation38_spill] sm:$0xff] %v8273_v51  ;;  %v2072_v25 = vrot.slane %v8278_v46, 1  ;;  %6708 = vmatpush2.bf16.msra.mxu1 %v6772_v23  ;;  %3304 = vmatpush2.bf16.msra.mxu0 %v6772_v23  ;;  %v1684_v51 = vshll.u32 %v7869_v28, 16 }
 0x20b   :  { %2401 = vrot.lane.b32.xlu0 %v8222_v58, %s6851_s27  ;;  %2275 = vrot.lane.b32.xlu1 %v8203_v39, %s6849_s25  ;;  %v2107_v39 = vrot.slane %v7967_v62, 1 }
 0x20c   :  { %6693 = vmatprep.subr.bf16.mxu1 %v13036_v20  ;;  %3305 = vmatprep.subr.bf16.mxu0 %v13036_v20 }
 0x20f   :  { %2403 = vrot.lane.b32.xlu0 %v8241_v19, %s6851_s27  ;;  %2277 = vrot.lane.b32.xlu1 %v8222_v58, %s6849_s25  ;;  %v8281_v58 = vsel %vm2067_vm5, %v2107_v39, %v2108_v37  ;;  %v8294_v39 = vpop.permute.xlu0 %2195  ;;  %v8299_v37 = vsel %vm7292_vm4, %v7952_v21, 0  ;;  %v6773_v21 = vld [vmem:[%s12736_s4 + $0x60] sm:$0xff]  }
 0x210   :  { %13047 = vst [vmem:[#allocation39_spill] sm:$0xff] %v8281_v58  ;;  %13048 = vst [vmem:[#allocation40_spill] sm:$0xff] %v8294_v39  ;;  %v2111_v23 = vrot.slane %v8299_v37, 1  ;;  %6709 = vmatpush2.bf16.msra.mxu1 %v6773_v21  ;;  %3306 = vmatpush2.bf16.msra.mxu0 %v6773_v21  ;;  %v2116_v39 = vrot.slane %v8077_v54, 1 }
 0x211   :  { %6694 = vmatprep.subr.bf16.mxu1 %v13036_v20  ;;  %3307 = vmatprep.subr.bf16.mxu0 %v13036_v20 }
 0x213   :  { %2405 = vrot.lane.b32.xlu0 %v8260_v44, %s6851_s27  ;;  %2279 = vrot.lane.b32.xlu1 %v8241_v19, %s6849_s25  ;;  %v2071_v19 = vrot.slane %v8024_v60, 1 }
 0x215   :  { %v2073_v42 = vsel %vm2067_vm5, %v2071_v19, %v2072_v25  ;;  %v8317_v19 = vsel %vm7292_vm4, %v7963_v43, 0  ;;  %v8320_v25 = vsel %vm2067_vm5, %v2110_v48, %v2111_v23  ;;  %v6774_v43 = vld [vmem:[%s12736_s4 + $0x58] sm:$0xff]   ;;  %v8339_v23 = vsel %vm7292_vm4, %v7987_v47, 0  ;;  %v6775_v47 = vld [vmem:[%s12736_s4 + $0x50] sm:$0xff]  }
 0x216   :  { %13050 = vst [vmem:[#allocation42_spill] sm:$0xff] %v8320_v25  ;;  %v2075_v48 = vrot.slane %v8317_v19, 1  ;;  %6710 = vmatpush2.bf16.msra.mxu1 %v6774_v43  ;;  %3308 = vmatpush2.bf16.msra.mxu0 %v6774_v43  ;;  %v2114_v43 = vrot.slane %v8339_v23, 1 }
 0x217   :  { %2407 = vrot.lane.b32.xlu0 %v8281_v58, %s6851_s27  ;;  %2281 = vrot.lane.b32.xlu1 %v8260_v44, %s6849_s25  ;;  %v8308_v44 = vpop.permute.xlu1 %2539 }
 0x218   :  { %13049 = vst [vmem:[#allocation41_spill] sm:$0xff] %v8308_v44  ;;  %v8328_v3 = vpop.permute.xlu0 %2455  ;;  %6695 = vmatprep.subr.bf16.mxu1 %v13036_v20  ;;  %3309 = vmatprep.subr.bf16.mxu0 %v13036_v20  ;;  %v8362_v44 = vsel %vm7292_vm4, %v8045_v33, 0  ;;  %v6776_v33 = vld [vmem:[%s12736_s4 + $0x48] sm:$0xff]  }
 0x219   :  { %13051 = vst [vmem:[#allocation43_spill] sm:$0xff] %v8328_v3  ;;  %v1674_v3 = vrot.slane %v1672_v50, 1 }
 0x21a   :  { %6711 = vmatpush2.bf16.msra.mxu1 %v6775_v47  ;;  %3310 = vmatpush2.bf16.msra.mxu0 %v6775_v47 }
 0x21b   :  { %2283 = vrot.lane.b32.xlu1 %v8281_v58, %s6849_s25  ;;  %2383 = vrot.lane.b32.xlu0 %v2073_v42, %s6851_s27  ;;  %v2074_v58 = vrot.slane %v8000_v7, 1 }
 0x21c   :  { %6696 = vmatprep.subr.bf16.mxu1 %v13036_v20  ;;  %3311 = vmatprep.subr.bf16.mxu0 %v13036_v20 }
 0x21e   :  { %6712 = vmatpush2.bf16.msra.mxu1 %v6776_v33  ;;  %3312 = vmatpush2.bf16.msra.mxu0 %v6776_v33  ;;  %v1689_v33 = vshll.u32 %v8068_v40, 16 }
 0x21f   :  { %2259 = vrot.lane.b32.xlu1 %v2073_v42, %s6849_s25  ;;  %2409 = vrot.lane.b32.xlu0 %v8320_v25, %s6851_s27  ;;  %v8342_v42 = vsel %vm2067_vm5, %v2074_v58, %v2075_v48  ;;  %v13202_v14 = vld [vmem:[#allocation41_spill] sm:$0xff] }
 0x220   :  { %13052 = vst [vmem:[#allocation44_spill] sm:$0xff] %v8342_v42  ;;  %6697 = vmatprep.subr.bf16.mxu1 %v13036_v20  ;;  %3313 = vmatprep.subr.bf16.mxu0 %v13036_v20  ;;  %v1691_v40 = vrot.slane %v1689_v33, 1 }
 0x221   :  { %v8334_v21 = vpop.permute.xlu1 %2453 }
 0x222   :  { %6713 = vmatpush2.bf16.msra.mxu1 %v6777_v35  ;;  %3314 = vmatpush2.bf16.msra.mxu0 %v6777_v35  ;;  %v1670_v35 = vshrl.u32 %v8020_v31, 16 }
 0x223   :  { %2285 = vrot.lane.b32.xlu1 %v8320_v25, %s6849_s25  ;;  %2385 = vrot.lane.b32.xlu0 %v8342_v42, %s6851_s27  ;;  %v8365_v25 = vsel %vm2067_vm5, %v2113_v4, %v2114_v43  ;;  %v2117_v4 = vrot.slane %v8362_v44, 1 }
 0x224   :  { %13055 = vst [vmem:[#allocation47_spill] sm:$0xff] %v8365_v25  ;;  %v1675_v33 = vor.u32 %v1674_v3, %v1670_v35 }
 0x225   :  { %v8355_v58 = vpop.permute.xlu0 %2457  ;;  %v8357_v48 = vpop.permute.xlu1 %2325 }
 0x226   :  { %13053 = vst [vmem:[#allocation45_spill] sm:$0xff] %v8355_v58  ;;  %13054 = vst [vmem:[#allocation46_spill] sm:$0xff] %v8357_v48  ;;  %v1686_v58 = vrot.slane %v1684_v51, 1  ;;  %v1682_v51 = vshrl.u32 %v7869_v28, 16  ;;  %v1696_v48 = vshll.u32 %v7845_v12, 16 }
 0x227   :  { %2261 = vrot.lane.b32.xlu1 %v8342_v42, %s6849_s25  ;;  %2411 = vrot.lane.b32.xlu0 %v8365_v25, %s6851_s27  ;;  %v8389_v42 = vsel %vm2067_vm5, %v2116_v39, %v2117_v4  ;;  %v2120_v39 = vrot.slane %v8386_v8, 1  ;;  %v1407_v4 = vshrl.u32 %v7769_v2, 16 }
 0x229   :  { %v8379_v47 = vpop.permute.xlu0 %2459  ;;  %v8381_v43 = vpop.permute.xlu1 %2327 }
 0x22a   :  { %13056 = vst [vmem:[#allocation48_spill] sm:$0xff] %v8379_v47  ;;  %13057 = vst [vmem:[#allocation49_spill] sm:$0xff] %v8381_v43  ;;  %v1687_v43 = vor.u32 %v1686_v58, %v1682_v51  ;;  %v1409_v51 = vrot.slane %v1407_v4, 7  ;;  %v1701_v4 = vshll.u32 %v8101_v34, 16 }
 0x22b   :  { %2415 = vrot.lane.b32.xlu1 %v8389_v42, %s6851_s27  ;;  %2387 = vrot.lane.b32.xlu0 %v8104_v41, %s6851_s27  ;;  %v8411_v41 = vsel %vm2067_vm5, %v2119_v30, %v2120_v39  ;;  %v1677_v30 = vshll.u32 %v8073_v1, 16  ;;  %v2122_v39 = vrot.slane %v8081_v15, 1  ;;  %v1410_v1 = vshll.u32 %v7769_v2, 16 }
 0x22c   :  { %13060 = vst [vmem:[#allocation52_spill] sm:$0xff] %v8411_v41  ;;  %v1703_v2 = vrot.slane %v1701_v4, 1  ;;  %v1414_v4 = vshrl.u32 %v7771_v36, 16 }
 0x22d   :  { %v8406_v47 = vpop.permute.xlu0 %2461  ;;  %v8408_v20 = vpop.permute.xlu1 %2329 }
 0x22e   :  { %13058 = vst [vmem:[#allocation50_spill] sm:$0xff] %v8406_v47  ;;  %13059 = vst [vmem:[#allocation51_spill] sm:$0xff] %v8408_v20  ;;  %v8421_v47 = vsel %vm7292_vm4, %v8047_v5, 0  ;;  %v8431_v20 = vsel %vm1632_vm6, %v1687_v43, %v1691_v40  ;;  %v1412_v40 = vor.u32 %v1410_v1, %v1409_v51 }
 0x22f   :  { %2417 = vrot.lane.b32.xlu1 %v8411_v41, %s6851_s27  ;;  %2413 = vrot.lane.b32.xlu0 %v7996_v52, %s6851_s27  ;;  %v1698_v52 = vrot.slane %v1696_v48, 1  ;;  %v2123_v5 = vrot.slane %v8421_v47, 1 }
 0x231   :  { %v8425_v58 = vpop.permute.xlu0 %2463  ;;  %v8427_v50 = vpop.permute.xlu1 %2331  ;;  %v8446_v3 = vsel %vm2067_vm5, %v2122_v39, %v2123_v5  ;;  %v8462_v39 = vsel %vm7292_vm4, 0, %v1412_v40 }
 0x232   :  { %13061 = vst [vmem:[#allocation53_spill] sm:$0xff] %v8425_v58  ;;  %13062 = vst [vmem:[#allocation54_spill] sm:$0xff] %v8427_v50  ;;  %v1679_v58 = vrot.slane %v1677_v30, 1  ;;  %v1694_v50 = vshrl.u32 %v7845_v12, 16 }
 0x233   :  { %2203 = vrot.lane.b32.xlu1 %v8431_v20, %s6851_s27  ;;  %2287 = vrot.lane.b32.xlu0 %v8365_v25, %s6849_s25  ;;  %13065 = vst [vmem:[#allocation57_spill] sm:$0xff] %v8446_v3  ;;  %v1708_v25 = vshll.u32 %v7812_v56, 16 }
 0x234   :  { %v8449_v48 = vsel %vm1632_vm6, %v1675_v33, %v1679_v58  ;;  %v1699_v35 = vor.u32 %v1698_v52, %v1694_v50  ;;  %v1706_v50 = vshrl.u32 %v7812_v56, 16  ;;  %v1713_v33 = vshll.u32 %v8121_v49, 16 }
 0x235   :  { %v8441_v28 = vpop.permute.xlu0 %2465  ;;  %v8443_v43 = vpop.permute.xlu1 %2333  ;;  %13066 = vst [vmem:[#allocation58_spill] sm:$0xff] %v8449_v48  ;;  %v1710_v52 = vrot.slane %v1708_v25, 1  ;;  %v8489_v49 = vsel %vm7292_vm4, %v1409_v51, 0  ;;  %v1718_v51 = vshrl.u32 %v7865_v61, 16 }
 0x236   :  { %13063 = vst [vmem:[#allocation55_spill] sm:$0xff] %v8441_v28  ;;  %13064 = vst [vmem:[#allocation56_spill] sm:$0xff] %v8443_v43  ;;  %v8465_v58 = vsel %vm1632_vm6, %v1699_v35, %v1703_v2  ;;  %v1720_v35 = vshll.u32 %v7865_v61, 16  ;;  %v1715_v25 = vrot.slane %v1713_v33, 1  ;;  %v2126_v33 = vrot.slane %v8489_v49, 1 }
 0x237   :  { %2419 = vrot.lane.b32.xlu1 %v8446_v3, %s6851_s27  ;;  %2201 = vrot.lane.b32.xlu0 %v8449_v48, %s6851_s27  ;;  %v1711_v40 = vor.u32 %v1710_v52, %v1706_v50  ;;  %v2125_v52 = vrot.slane %v8462_v39, 1  ;;  %v1416_v50 = vrot.slane %v1414_v4, 7  ;;  %v1732_v28 = vshll.u32 %v7890_v9, 16 }
 0x239   :  { %v8456_v34 = vpop.permute.xlu0 %2467  ;;  %v8458_v30 = vpop.permute.xlu1 %2335  ;;  %v8508_v4 = vsel %vm2067_vm5, %v2125_v52, %v2126_v33 }
 0x23a   :  { %13067 = vst [vmem:[#allocation59_spill] sm:$0xff] %v8456_v34  ;;  %13068 = vst [vmem:[#allocation60_spill] sm:$0xff] %v8458_v30 }
 0x23b   :  { %2483 = vrot.lane.b32.xlu1 %v8462_v39, %s6849_s25  ;;  %2515 = vrot.lane.b32.xlu0 %v8465_v58, %s6850_s26  ;;  %13075 = vst [vmem:[#allocation67_spill] sm:$0xff] %v8508_v4 }
 0x23d   :  { %v8473_v5 = vpop.permute.xlu0 %2469  ;;  %v8475_v1 = vpop.permute.xlu1 %2337 }
 0x23e   :  { %13069 = vst [vmem:[#allocation61_spill] sm:$0xff] %v8473_v5  ;;  %13070 = vst [vmem:[#allocation62_spill] sm:$0xff] %v8475_v1  ;;  %v8492_v5 = vsel %vm1632_vm6, %v1711_v40, %v1715_v25  ;;  %v1722_v1 = vrot.slane %v1720_v35, 1 }
 0x23f   :  { %2205 = vrot.lane.b32.xlu1 %v8465_v58, %s6851_s27  ;;  %2289 = vrot.lane.b32.xlu0 %v8389_v42, %s6849_s25  ;;  %v1417_v42 = vshll.u32 %v7771_v36, 16 }
 0x241   :  { %v8483_v2 = vpop.permute.xlu0 %2471  ;;  %v8485_v34 = vpop.permute.xlu1 %2339  ;;  %v1419_v35 = vor.u32 %v1417_v42, %v1416_v50  ;;  %v1737_v42 = vshll.u32 %v8162_v18, 16  ;;  %v8548_v18 = vsel %vm7292_vm4, %v1416_v50, 0  ;;  %v1742_v50 = vshrl.u32 %v7905_v10, 16 }
 0x242   :  { %13071 = vst [vmem:[#allocation63_spill] sm:$0xff] %v8483_v2  ;;  %13072 = vst [vmem:[#allocation64_spill] sm:$0xff] %v8485_v34  ;;  %v1725_v2 = vshll.u32 %v8143_v53, 16  ;;  %v1723_v34 = vor.u32 %v1722_v1, %v1718_v51  ;;  %v1734_v1 = vrot.slane %v1732_v28, 1 }
 0x243   :  { %2207 = vrot.lane.b32.xlu1 %v8492_v5, %s6851_s27  ;;  %2517 = vrot.lane.b32.xlu0 %v8492_v5, %s6850_s26  ;;  %v1739_v28 = vrot.slane %v1737_v42, 1  ;;  %v1424_v42 = vshll.u32 %v7773_v6, 16 }
 0x244   :  { %v1727_v36 = vrot.slane %v1725_v2, 1  ;;  %v1730_v2 = vshrl.u32 %v7890_v9, 16  ;;  %v1438_v9 = vshll.u32 %v7777_v27, 16 }
 0x245   :  { %v8503_v40 = vpop.permute.xlu1 %2341  ;;  %v8505_v25 = vpop.permute.xlu0 %2447 }
 0x246   :  { %13073 = vst [vmem:[#allocation65_spill] sm:$0xff] %v8503_v40  ;;  %13074 = vst [vmem:[#allocation66_spill] sm:$0xff] %v8505_v25  ;;  %v8521_v25 = vsel %vm7292_vm4, 0, %v1419_v35  ;;  %v8524_v52 = vsel %vm1632_vm6, %v1723_v34, %v1727_v36  ;;  %v1421_v35 = vshrl.u32 %v7773_v6, 16  ;;  %v1744_v34 = vshll.u32 %v7905_v10, 16 }
 0x247   :  { %2421 = vrot.lane.b32.xlu1 %v8508_v4, %s6851_s27  ;;  %2353 = vrot.lane.b32.xlu0 %v8057_v24, %s6850_s26  ;;  %v1756_v40 = vshll.u32 %v7928_v11, 16 }
 0x249   :  { %v8515_v30 = vpop.permute.xlu1 %2343  ;;  %v8517_v53 = vpop.permute.xlu0 %2473 }
 0x24a   :  { %13076 = vst [vmem:[#allocation68_spill] sm:$0xff] %v8515_v30  ;;  %13077 = vst [vmem:[#allocation69_spill] sm:$0xff] %v8517_v53  ;;  %v1735_v53 = vor.u32 %v1734_v1, %v1730_v2  ;;  %v2128_v2 = vrot.slane %v8521_v25, 1 }
 0x24b   :  { %2485 = vrot.lane.b32.xlu1 %v8521_v25, %s6849_s25  ;;  %2519 = vrot.lane.b32.xlu0 %v8524_v52, %s6850_s26 }
 0x24c   :  { %v8551_v1 = vsel %vm1632_vm6, %v1735_v53, %v1739_v28 }
 0x24d   :  { %v8532_v33 = vpop.permute.xlu0 %2449  ;;  %v8534_v51 = vpop.permute.xlu1 %2319  ;;  %13082 = vst [vmem:[#allocation74_spill] sm:$0xff] %v8551_v1 }
 0x24e   :  { %13078 = vst [vmem:[#allocation70_spill] sm:$0xff] %v8532_v33  ;;  %13079 = vst [vmem:[#allocation71_spill] sm:$0xff] %v8534_v51  ;;  %v1423_v33 = vrot.slane %v1421_v35, 7  ;;  %v1746_v51 = vrot.slane %v1744_v34, 1  ;;  %v1749_v35 = vshll.u32 %v8181_v13, 16 }
 0x24f   :  { %2209 = vrot.lane.b32.xlu1 %v8524_v52, %s6851_s27  ;;  %2291 = vrot.lane.b32.xlu0 %v8411_v41, %s6849_s25  ;;  %v2129_v41 = vrot.slane %v8548_v18, 1 }
 0x250   :  { %v1426_v28 = vor.u32 %v1424_v42, %v1423_v33  ;;  %v1751_v6 = vrot.slane %v1749_v35, 1  ;;  %v1761_v42 = vshll.u32 %v8200_v22, 16  ;;  %v8607_v22 = vsel %vm7292_vm4, %v1423_v33, 0 }
 0x251   :  { %v8542_v36 = vpop.permute.xlu0 %2475  ;;  %v8544_v30 = vpop.permute.xlu1 %2345  ;;  %v8567_v34 = vsel %vm2067_vm5, %v2128_v2, %v2129_v41  ;;  %v1754_v2 = vshrl.u32 %v7928_v11, 16  ;;  %v1766_v33 = vshrl.u32 %v7943_v55, 16 }
 0x252   :  { %13080 = vst [vmem:[#allocation72_spill] sm:$0xff] %v8542_v36  ;;  %13081 = vst [vmem:[#allocation73_spill] sm:$0xff] %v8544_v30  ;;  %v1747_v30 = vor.u32 %v1746_v51, %v1742_v50  ;;  %v1758_v51 = vrot.slane %v1756_v40, 1  ;;  %v1763_v40 = vrot.slane %v1761_v42, 1  ;;  %v1431_v42 = vshll.u32 %v7775_v0, 16 }
 0x253   :  { %2211 = vrot.lane.b32.xlu1 %v8551_v1, %s6851_s27  ;;  %2521 = vrot.lane.b32.xlu0 %v8551_v1, %s6850_s26  ;;  %13085 = vst [vmem:[#allocation77_spill] sm:$0xff] %v8567_v34 }
 0x254   :  { %v8583_v41 = vsel %vm1632_vm6, %v1747_v30, %v1751_v6  ;;  %v1768_v30 = vshll.u32 %v7943_v55, 16 }
 0x255   :  { %v8562_v36 = vpop.permute.xlu0 %2451  ;;  %v8564_v53 = vpop.permute.xlu1 %2321  ;;  %13088 = vst [vmem:[#allocation80_spill] sm:$0xff] %v8583_v41 }
 0x256   :  { %13083 = vst [vmem:[#allocation75_spill] sm:$0xff] %v8562_v36  ;;  %13084 = vst [vmem:[#allocation76_spill] sm:$0xff] %v8564_v53  ;;  %v8580_v36 = vsel %vm7292_vm4, 0, %v1426_v28  ;;  %v1428_v28 = vshrl.u32 %v7775_v0, 16  ;;  %v1780_v53 = vshll.u32 %v7956_v59, 16 }
 0x257   :  { %2423 = vrot.lane.b32.xlu1 %v8567_v34, %s6851_s27  ;;  %2355 = vrot.lane.b32.xlu0 %v8081_v15, %s6850_s26 }
 0x259   :  { %v8574_v10 = vpop.permute.xlu0 %2349  ;;  %v8576_v13 = vpop.permute.xlu1 %2347 }
 0x25a   :  { %13086 = vst [vmem:[#allocation78_spill] sm:$0xff] %v8574_v10  ;;  %13087 = vst [vmem:[#allocation79_spill] sm:$0xff] %v8576_v13  ;;  %v1759_v10 = vor.u32 %v1758_v51, %v1754_v2  ;;  %v2131_v51 = vrot.slane %v8580_v36, 1  ;;  %v1430_v2 = vrot.slane %v1428_v28, 7 }
 0x25b   :  { %2487 = vrot.lane.b32.xlu1 %v8580_v36, %s6849_s25  ;;  %2523 = vrot.lane.b32.xlu0 %v8583_v41, %s6850_s26 }
 0x25d   :  { %v8591_v50 = vpop.permute.xlu0 %2479  ;;  %v8593_v35 = vpop.permute.xlu1 %2323 }
 0x25e   :  { %13089 = vst [vmem:[#allocation81_spill] sm:$0xff] %v8591_v50  ;;  %13090 = vst [vmem:[#allocation82_spill] sm:$0xff] %v8593_v35  ;;  %v8610_v50 = vsel %vm1632_vm6, %v1759_v10, %v1763_v40  ;;  %v1770_v35 = vrot.slane %v1768_v30, 1  ;;  %v1433_v30 = vor.u32 %v1431_v42, %v1430_v2  ;;  %v1778_v42 = vshrl.u32 %v7956_v59, 16 }
 0x25f   :  { %2213 = vrot.lane.b32.xlu1 %v8583_v41, %s6851_s27  ;;  %2293 = vrot.lane.b32.xlu0 %v8446_v3, %s6849_s25  ;;  %13093 = vst [vmem:[#allocation85_spill] sm:$0xff] %v8610_v50  ;;  %v2132_v3 = vrot.slane %v8607_v22, 1  ;;  %v1792_v41 = vshll.u32 %v7967_v62, 16 }
 0x261   :  { %v8601_v6 = vpop.permute.xlu0 %2351  ;;  %v8603_v13 = vpop.permute.xlu1 %2481  ;;  %v8626_v28 = vsel %vm2067_vm5, %v2131_v51, %v2132_v3  ;;  %v8640_v3 = vsel %vm7292_vm4, 0, %v1433_v30  ;;  %v1782_v51 = vrot.slane %v1780_v53, 1 }
 0x262   :  { %13091 = vst [vmem:[#allocation83_spill] sm:$0xff] %v8601_v6  ;;  %13092 = vst [vmem:[#allocation84_spill] sm:$0xff] %v8603_v13  ;;  %v1773_v13 = vshll.u32 %v8219_v32, 16  ;;  %v1771_v6 = vor.u32 %v1770_v35, %v1766_v33  ;;  %v1435_v32 = vshrl.u32 %v7777_v27, 16  ;;  %v2134_v53 = vrot.slane %v8640_v3, 1 }
 0x263   :  { %2215 = vrot.lane.b32.xlu1 %v8610_v50, %s6851_s27  ;;  %2525 = vrot.lane.b32.xlu0 %v8610_v50, %s6850_s26  ;;  %13094 = vst [vmem:[#allocation86_spill] sm:$0xff] %v8626_v28  ;;  %13095 = vst [vmem:[#allocation87_spill] sm:$0xff] %v8640_v3 }
 0x264   :  { %v1775_v0 = vrot.slane %v1773_v13, 1  ;;  %v1785_v13 = vshll.u32 %v8238_v57, 16  ;;  %v8651_v33 = vrot.slane %v1435_v32, 7 }
 0x265   :  { %v8621_v10 = vpop.permute.xlu0 %2389  ;;  %v8623_v40 = vpop.permute.xlu1 %2263 }
 0x266   :  { %v8643_v35 = vsel %vm1632_vm6, %v1771_v6, %v1775_v0  ;;  %v8659_v6 = vsel %vm7292_vm4, %v1430_v2, 0  ;;  %v1783_v0 = vor.u32 %v1782_v51, %v1778_v42  ;;  %v1787_v32 = vrot.slane %v1785_v13, 1 }
 0x267   :  { %2425 = vrot.lane.b32.xlu1 %v8626_v28, %s6851_s27  ;;  %2357 = vrot.lane.b32.xlu0 %v8462_v39, %s6850_s26  ;;  %13096 = vst [vmem:[#allocation88_spill] sm:$0xff] %v8643_v35  ;;  %v2135_v57 = vrot.slane %v8659_v6, 1  ;;  %v1440_v43 = vor.u32 %v1438_v9, %v8651_v33  ;;  %v1794_v42 = vrot.slane %v1792_v41, 1  ;;  %v1797_v13 = vshll.u32 %v8257_v16, 16 }
 0x268   :  { %v8678_v27 = vsel %vm1632_vm6, %v1783_v0, %v1787_v32  ;;  %v1809_v16 = vshll.u32 %v8299_v37, 16 }
 0x269   :  { %v8634_v55 = vpop.permute.xlu0 %2391  ;;  %v8636_v11 = vpop.permute.xlu1 %2265  ;;  %v8675_v51 = vsel %vm2067_vm5, %v2134_v53, %v2135_v57  ;;  %13098 = vst [vmem:[#allocation90_spill] sm:$0xff] %v8678_v27  ;;  %v8693_v0 = vsel %vm7292_vm4, 0, %v1440_v43  ;;  %v1799_v32 = vrot.slane %v1797_v13, 1 }
 0x26a   :  { %13097 = vst [vmem:[#allocation89_spill] sm:$0xff] %v8675_v51  ;;  %13100 = vst [vmem:[#allocation92_spill] sm:$0xff] %v8693_v0  ;;  %v1811_v37 = vrot.slane %v1809_v16, 1  ;;  %v1665_v16 = vshll.u32 %v8317_v19, 16  ;;  %v1653_v19 = vshll.u32 %v8278_v46, 16 }
 0x26b   :  { %2489 = vrot.lane.b32.xlu1 %v8640_v3, %s6849_s25  ;;  %2527 = vrot.lane.b32.xlu0 %v8643_v35, %s6850_s26 }
 0x26d   :  { %v8653_v50 = vpop.permute.xlu0 %2393  ;;  %v8655_v30 = vpop.permute.xlu1 %2267 }
 0x26f   :  { %2217 = vrot.lane.b32.xlu1 %v8643_v35, %s6851_s27  ;;  %2295 = vrot.lane.b32.xlu0 %v8508_v4, %s6849_s25  ;;  %v1804_v35 = vshll.u32 %v7984_v26, 16  ;;  %v1790_v4 = vshrl.u32 %v7967_v62, 16  ;;  %v1802_v62 = vshrl.u32 %v7984_v26, 16 }
 0x271   :  { %v8669_v59 = vpop.permute.xlu0 %2395  ;;  %v8671_v2 = vpop.permute.xlu1 %2269  ;;  %v1795_v41 = vor.u32 %v1794_v42, %v1790_v4  ;;  %v1806_v57 = vrot.slane %v1804_v35, 1  ;;  %v1816_v35 = vshll.u32 %v8011_v38, 16  ;;  %v1660_v42 = vshll.u32 %v8000_v7, 16 }
 0x273   :  { %2427 = vrot.lane.b32.xlu1 %v8675_v51, %s6851_s27  ;;  %2529 = vrot.lane.b32.xlu0 %v8678_v27, %s6850_s26  ;;  %v8706_v43 = vsel %vm1632_vm6, %v1795_v41, %v1799_v32  ;;  %v1807_v4 = vor.u32 %v1806_v57, %v1802_v62  ;;  %v8721_v41 = vld [vmem:[%s12736_s4 + $0x88] sm:$0xff]   ;;  %v1818_v57 = vrot.slane %v1816_v35, 1  ;;  %v1662_v32 = vrot.slane %v1660_v42, 1 }
 0x274   :  { %13105 = vst [vmem:[#allocation97_spill] sm:$0xff] %v8721_v41  ;;  %6474 = vmatprep.subr.bf16.mxu0 %v8721_v41 }
 0x275   :  { %v8687_v9 = vpop.permute.xlu0 %2397  ;;  %v8689_v53 = vpop.permute.xlu1 %2271  ;;  %v8724_v62 = vsel %vm1632_vm6, %v1807_v4, %v1811_v37 }
 0x276   :  { %13099 = vst [vmem:[#allocation91_spill] sm:$0xff] %v8689_v53  ;;  %13106 = vst [vmem:[#allocation98_spill] sm:$0xff] %v8724_v62 }
 0x277   :  { %2491 = vrot.lane.b32.xlu1 %v8693_v0, %s6849_s25  ;;  %2359 = vrot.lane.b32.xlu0 %v8521_v25, %s6850_s26 }
 0x279   :  { %v8701_v1 = vpop.permute.xlu0 %2399  ;;  %v8703_v53 = vpop.permute.xlu1 %2273 }
 0x27a   :  { %13101 = vst [vmem:[#allocation93_spill] sm:$0xff] %v8701_v1  ;;  %13102 = vst [vmem:[#allocation94_spill] sm:$0xff] %v8703_v53  ;;  %v1658_v53 = vshrl.u32 %v8000_v7, 16 }
 0x27b   :  { %2219 = vrot.lane.b32.xlu1 %v8678_v27, %s6851_s27  ;;  %2531 = vrot.lane.b32.xlu0 %v8706_v43, %s6850_s26  ;;  %v1648_v27 = vshll.u32 %v8024_v60, 16 }
 0x27c   :  { %v1663_v37 = vor.u32 %v1662_v32, %v1658_v53 }
 0x27d   :  { %v8714_v13 = vpop.permute.xlu0 %2401  ;;  %v8716_v26 = vpop.permute.xlu1 %2275  ;;  %v1650_v1 = vrot.slane %v1648_v27, 1 }
 0x27e   :  { %13103 = vst [vmem:[#allocation95_spill] sm:$0xff] %v8714_v13  ;;  %13104 = vst [vmem:[#allocation96_spill] sm:$0xff] %v8716_v26  ;;  %v1821_v26 = vshll.u32 %v8339_v23, 16  ;;  %v1814_v13 = vshrl.u32 %v8011_v38, 16  ;;  %v1646_v38 = vshrl.u32 %v8024_v60, 16 }
 0x27f   :  { %2533 = vrot.lane.b32.xlu1 %v8724_v62, %s6850_s26  ;;  %2297 = vrot.lane.b32.xlu0 %v8567_v34, %s6849_s25  ;;  %v1667_v34 = vrot.slane %v1665_v16, 1 }
 0x280   :  { %v1819_v42 = vor.u32 %v1818_v57, %v1814_v13  ;;  %v1823_v23 = vrot.slane %v1821_v26, 1  ;;  %v1651_v53 = vor.u32 %v1650_v1, %v1646_v38  ;;  %v1655_v26 = vrot.slane %v1653_v19, 1 }
 0x281   :  { %v8736_v4 = vpop.permute.xlu0 %2403  ;;  %v8738_v35 = vpop.permute.xlu1 %2277  ;;  %v8754_v27 = vsel %vm1632_vm6, %v1663_v37, %v1667_v34  ;;  %v1442_v34 = vshrl.u32 %v7779_v45, 16  ;;  %v8787_v37 = vsel %vm7292_vm4, %v8651_v33, 0  ;;  %v2137_v19 = vrot.slane %v8693_v0, 1 }
 0x282   :  { %v8751_v13 = vsel %vm1632_vm6, %v1819_v42, %v1823_v23  ;;  %13108 = vst [vmem:[#allocation100_spill] sm:$0xff] %v8754_v27  ;;  %v8765_v32 = vsel %vm1632_vm6, %v1651_v53, %v1655_v26  ;;  %v1840_v53 = vshll.u32 %v8057_v24, 16  ;;  %v1445_v26 = vshll.u32 %v7779_v45, 16 }
 0x283   :  { %2221 = vrot.lane.b32.xlu1 %v8706_v43, %s6851_s27  ;;  %2361 = vrot.lane.b32.xlu0 %v8580_v36, %s6850_s26  ;;  %13107 = vst [vmem:[#allocation99_spill] sm:$0xff] %v8751_v13  ;;  %13109 = vst [vmem:[#allocation101_spill] sm:$0xff] %v8765_v32  ;;  %v1444_v23 = vrot.slane %v1442_v34, 7  ;;  %v1838_v45 = vshrl.u32 %v8057_v24, 16  ;;  %v1828_v24 = vshll.u32 %v8077_v54, 16 }
 0x284   :  { %v1842_v60 = vrot.slane %v1840_v53, 1  ;;  %v1852_v53 = vshll.u32 %v8081_v15, 16 }
 0x285   :  { %v8746_v7 = vpop.permute.xlu0 %2405  ;;  %v8748_v41 = vpop.permute.xlu1 %2279  ;;  %v1447_v34 = vor.u32 %v1445_v26, %v1444_v23  ;;  %v1449_v26 = vshrl.u32 %v7781_v29, 16 }
 0x287   :  { %2535 = vrot.lane.b32.xlu1 %v8751_v13, %s6850_s26  ;;  %2509 = vrot.lane.b32.xlu0 %v8754_v27, %s6850_s26 }
 0x289   :  { %v8760_v46 = vpop.permute.xlu0 %2407  ;;  %v8762_v57 = vpop.permute.xlu1 %2281 }
 0x28b   :  { %2223 = vrot.lane.b32.xlu1 %v8724_v62, %s6851_s27  ;;  %2197 = vrot.lane.b32.xlu0 %v8765_v32, %s6851_s27  ;;  %v1864_v62 = vshll.u32 %v8462_v39, 16  ;;  %v1826_v32 = vshrl.u32 %v8077_v54, 16 }
 0x28d   :  { %v8771_v38 = vpop.permute.xlu1 %2283  ;;  %v8773_v1 = vpop.permute.xlu0 %2383 }
 0x28e   :  { %13110 = vst [vmem:[#allocation102_spill] sm:$0xff] %v8771_v38 }
 0x28f   :  { %2537 = vrot.lane.b32.xlu1 %v8130_v63, %s6850_s26  ;;  %2511 = vrot.lane.b32.xlu0 %v8449_v48, %s6850_s26  ;;  %v2138_v48 = vrot.slane %v8787_v37, 1 }
 0x291   :  { %v8780_v16 = vpop.permute.xlu1 %2259  ;;  %v8782_v42 = vpop.permute.xlu0 %2409  ;;  %v8802_v33 = vsel %vm2067_vm5, %v2137_v19, %v2138_v48  ;;  %v8816_v48 = vsel %vm7292_vm4, 0, %v1447_v34  ;;  %v1843_v19 = vor.u32 %v1842_v60, %v1838_v45  ;;  %v8831_v60 = vsel %vm7292_vm4, %v1444_v23, 0 }
 0x292   :  { %13111 = vst [vmem:[#allocation103_spill] sm:$0xff] %v8780_v16  ;;  %13112 = vst [vmem:[#allocation104_spill] sm:$0xff] %v8782_v42  ;;  %v2140_v45 = vrot.slane %v8816_v48, 1  ;;  %v1451_v23 = vrot.slane %v1449_v26, 7  ;;  %v1452_v42 = vshll.u32 %v7781_v29, 16  ;;  %v1866_v29 = vrot.slane %v1864_v62, 1 }
 0x293   :  { %2225 = vrot.lane.b32.xlu1 %v8751_v13, %s6851_s27  ;;  %2199 = vrot.lane.b32.xlu0 %v8754_v27, %s6851_s27  ;;  %13115 = vst [vmem:[#allocation107_spill] sm:$0xff] %v8802_v33  ;;  %v1845_v13 = vshll.u32 %v8386_v8, 16  ;;  %13118 = vst [vmem:[#allocation110_spill] sm:$0xff] %v8816_v48 }
 0x295   :  { %v8797_v63 = vpop.permute.xlu1 %2285  ;;  %v8799_v16 = vpop.permute.xlu0 %2385  ;;  %v1847_v8 = vrot.slane %v1845_v13, 1  ;;  %v1857_v13 = vshll.u32 %v8421_v47, 16  ;;  %v1833_v47 = vshll.u32 %v8362_v44, 16  ;;  %v1869_v44 = vshll.u32 %v8489_v49, 16 }
 0x296   :  { %13113 = vst [vmem:[#allocation105_spill] sm:$0xff] %v8797_v63  ;;  %13114 = vst [vmem:[#allocation106_spill] sm:$0xff] %v8799_v16  ;;  %v1854_v16 = vrot.slane %v1852_v53, 1 }
 0x297   :  { %2429 = vrot.lane.b32.xlu1 %v8802_v33, %s6851_s27  ;;  %2513 = vrot.lane.b32.xlu0 %v8431_v20, %s6850_s26  ;;  %v8834_v34 = vsel %vm1632_vm6, %v1843_v19, %v1847_v8 }
 0x299   :  { %v8810_v27 = vpop.permute.xlu1 %2261  ;;  %v8812_v63 = vpop.permute.xlu0 %2411 }
 0x29a   :  { %13116 = vst [vmem:[#allocation108_spill] sm:$0xff] %v8810_v27  ;;  %13117 = vst [vmem:[#allocation109_spill] sm:$0xff] %v8812_v63 }
 0x29b   :  { %2493 = vrot.lane.b32.xlu1 %v8816_v48, %s6849_s25  ;;  %2299 = vrot.lane.b32.xlu0 %v8626_v28, %s6849_s25  ;;  %v2141_v28 = vrot.slane %v8831_v60, 1 }
 0x29d   :  { %v8825_v27 = vpop.permute.xlu1 %2415  ;;  %v8827_v63 = vpop.permute.xlu0 %2387  ;;  %v8849_v53 = vsel %vm2067_vm5, %v2140_v45, %v2141_v28  ;;  %v1835_v45 = vrot.slane %v1833_v47, 1 }
 0x29e   :  { %13119 = vst [vmem:[#allocation111_spill] sm:$0xff] %v8825_v27  ;;  %13120 = vst [vmem:[#allocation112_spill] sm:$0xff] %v8827_v63  ;;  %v1850_v27 = vshrl.u32 %v8081_v15, 16  ;;  %v1830_v63 = vrot.slane %v1828_v24, 1  ;;  %v1859_v24 = vrot.slane %v1857_v13, 1  ;;  %v1862_v13 = vshrl.u32 %v8462_v39, 16 }
 0x29f   :  { %2541 = vrot.lane.b32.xlu1 %v8834_v34, %s6850_s26  ;;  %2363 = vrot.lane.b32.xlu0 %v8640_v3, %s6850_s26  ;;  %13121 = vst [vmem:[#allocation113_spill] sm:$0xff] %v8849_v53 }
 0x2a0   :  { %v1855_v8 = vor.u32 %v1854_v16, %v1850_v27  ;;  %v1831_v26 = vor.u32 %v1830_v63, %v1826_v32  ;;  %v1454_v27 = vor.u32 %v1452_v42, %v1451_v23  ;;  %v1867_v49 = vor.u32 %v1866_v29, %v1862_v13 }
 0x2a1   :  { %v8844_v38 = vpop.permute.xlu1 %2417  ;;  %v8846_v19 = vpop.permute.xlu0 %2413  ;;  %v1456_v13 = vshrl.u32 %v7783_v17, 16 }
 0x2a2   :  { %v8862_v16 = vsel %vm1632_vm6, %v1855_v8, %v1859_v24  ;;  %v8871_v63 = vsel %vm1632_vm6, %v1831_v26, %v1835_v45  ;;  %v8877_v62 = vsel %vm7292_vm4, 0, %v1454_v27  ;;  %v2803_v8 = vsel %vm688_vm1, %v8431_v20, %v8621_v10 }
 0x2a3   :  { %2431 = vrot.lane.b32.xlu1 %v8849_v53, %s6851_s27  ;;  %2301 = vrot.lane.b32.xlu0 %v8675_v51, %s6849_s25  ;;  %13122 = vst [vmem:[#allocation114_spill] sm:$0xff] %v8877_v62  ;;  %v1876_v24 = vshll.u32 %v8521_v25, 16  ;;  %v1871_v26 = vrot.slane %v1869_v44, 1  ;;  %v8893_v45 = vsel %vm7292_vm4, %v1451_v23, 0  ;;  %v2895_v10 = vsel %vm302_vm0, %v2803_v8, %v8334_v21  ;;  %v13123_v23 = vld [vmem:[#allocation46_spill] sm:$0xff] }
 0x2a4   :  { %v2143_v29 = vrot.slane %v8877_v62, 1  ;;  %v2144_v51 = vrot.slane %v8893_v45, 1  ;;  %v1881_v21 = vshll.u32 %v8548_v18, 16  ;;  %v1874_v8 = vshrl.u32 %v8521_v25, 16 }
 0x2a5   :  { %v2204_v15 = vpop.permute.xlu1 %2203  ;;  %v8859_v28 = vpop.permute.xlu0 %2287  ;;  %v8902_v44 = vsel %vm1632_vm6, %v1867_v49, %v1871_v26  ;;  %v13124_v49 = vld [vmem:[#allocation14_spill] sm:$0xff] }
 0x2a7   :  { %2543 = vrot.lane.b32.xlu1 %v8862_v16, %s6850_s26  ;;  %2365 = vrot.lane.b32.xlu0 %v8693_v0, %s6850_s26 }
 0x2a9   :  { %v8873_v32 = vpop.permute.xlu1 %2419  ;;  %v2202_v42 = vpop.permute.xlu0 %2201 }
 0x2aa   :  { %v2578_v47 = vsel %vm688_vm1, %v8020_v31, %v2202_v42  ;;  %v1878_v42 = vrot.slane %v1876_v24, 1  ;;  %v2580_v24 = vsel %vm688_vm1, %v13124_v49, %v2204_v15  ;;  %v1883_v15 = vrot.slane %v1881_v21, 1 }
 0x2ab   :  { %2495 = vrot.lane.b32.xlu1 %v8877_v62, %s6849_s25  ;;  %2227 = vrot.lane.b32.xlu0 %v8871_v63, %s6851_s27  ;;  %v2640_v27 = vsel %vm302_vm0, %v2578_v47, %v8623_v40 }
 0x2ac   :  { %v2706_v47 = vsel %vm2695_vm7, %v2640_v27, %v13123_v23  ;;  %v2806_v27 = vsel %vm688_vm1, %v8465_v58, %v8634_v55  ;;  %v1879_v18 = vor.u32 %v1878_v42, %v1874_v8  ;;  %v1888_v23 = vshll.u32 %v8580_v36, 16 }
 0x2ad   :  { %v8895_v20 = vpop.permute.xlu1 %2483  ;;  %v2516_v31 = vpop.permute.xlu0 %2515 }
 0x2ae   :  { %v2961_v40 = vsel %vm2695_vm7, %v2895_v10, %v2516_v31  ;;  %v8919_v10 = vsel %vm2067_vm5, %v2143_v29, %v2144_v51  ;;  %v2642_v51 = vsel %vm302_vm0, %v2580_v24, %v8636_v11  ;;  %v8935_v58 = vsel %vm1632_vm6, %v1879_v18, %v1883_v15 }
 0x2af   :  { %2545 = vrot.lane.b32.xlu1 %v8902_v44, %s6850_s26  ;;  %3339 = vmatprep.mubr.bf16.mxu1 %v2961_v40  ;;  %13125 = vst [vmem:[#allocation46_spill] sm:$0xff] %v8919_v10  ;;  %v1458_v40 = vrot.slane %v1456_v13, 7  ;;  %v1890_v8 = vrot.slane %v1888_v23, 1  ;;  %v1893_v11 = vshll.u32 %v8607_v22, 16  ;;  %v2809_v23 = vsel %vm688_vm1, %v8492_v5, %v8653_v50 }
 0x2b0   :  { %2303 = vrot.lane.b32.xlu0 %v8802_v33, %s6849_s25  ;;  %3340 = vmatmul.mubr.bf16.vlgmr.msra.gmra.mxu1 %v2706_v47  ;;  %v1459_v47 = vshll.u32 %v7783_v17, 16  ;;  %v13126_v33 = vld [vmem:[#allocation43_spill] sm:$0xff]  ;;  %v13127_v17 = vld [vmem:[#allocation49_spill] sm:$0xff]  ;;  %v1900_v15 = vshll.u32 %v8640_v3, 16 }
 0x2b1   :  { %v2206_v26 = vpop.permute.xlu1 %2205  ;;  %v8916_v31 = vpop.permute.xlu0 %2289  ;;  %v2897_v55 = vsel %vm302_vm0, %v2806_v27, %v13126_v33  ;;  %v2709_v21 = vsel %vm2695_vm7, %v2642_v51, %v13127_v17  ;;  %v1886_v33 = vshrl.u32 %v8580_v36, 16  ;;  %v13129_v51 = vld [vmem:[#allocation11_spill] sm:$0xff] }
 0x2b2   :  { %v1461_v42 = vor.u32 %v1459_v47, %v1458_v40  ;;  %v2582_v24 = vsel %vm688_vm1, %v7845_v12, %v2206_v26  ;;  %v1895_v12 = vrot.slane %v1893_v11, 1  ;;  %v13131_v11 = vld [vmem:[#allocation51_spill] sm:$0xff] }
 0x2b3   :  { %2433 = vrot.lane.b32.xlu1 %v8919_v10, %s6851_s27  ;;  %v1891_v47 = vor.u32 %v1890_v8, %v1886_v33  ;;  %v2644_v26 = vsel %vm302_vm0, %v2582_v24, %v8655_v30  ;;  %v1902_v30 = vrot.slane %v1900_v15, 1  ;;  %v1898_v24 = vshrl.u32 %v8640_v3, 16 }
 0x2b4   :  { %2229 = vrot.lane.b32.xlu0 %v8834_v34, %s6851_s27  ;;  %v8957_v22 = vsel %vm7292_vm4, 0, %v1461_v42  ;;  %v8973_v42 = vsel %vm7292_vm4, %v1458_v40, 0  ;;  %v2712_v33 = vsel %vm2695_vm7, %v2644_v26, %v13131_v11  ;;  %v2812_v26 = vsel %vm688_vm1, %v8524_v52, %v8669_v59  ;;  %v13133_v52 = vld [vmem:[#allocation48_spill] sm:$0xff] }
 0x2b5   :  { %v2208_v29 = vpop.permute.xlu1 %2207  ;;  %v2518_v49 = vpop.permute.xlu0 %2517  ;;  %13128 = vst [vmem:[#allocation14_spill] sm:$0xff] %v8957_v22  ;;  %v8976_v8 = vsel %vm1632_vm6, %v1891_v47, %v1895_v12  ;;  %v2147_v40 = vrot.slane %v8973_v42, 1  ;;  %v1466_v11 = vshll.u32 %v13129_v51, 16 }
 0x2b6   :  { %v2964_v13 = vsel %vm2695_vm7, %v2897_v55, %v2518_v49  ;;  %v1463_v49 = vshrl.u32 %v13129_v51, 16  ;;  %v13130_v55 = vld [vmem:[#allocation45_spill] sm:$0xff]  ;;  %v2584_v15 = vsel %vm688_vm1, %v7812_v56, %v2208_v29 }
 0x2b7   :  { %2547 = vrot.lane.b32.xlu1 %v8935_v58, %s6850_s26  ;;  %3347 = vmatprep.mubr.bf16.mxu1 %v2964_v13  ;;  %v2899_v13 = vsel %vm302_vm0, %v2809_v23, %v13130_v55  ;;  %v1905_v23 = vshll.u32 %v8659_v6, 16  ;;  %v2646_v6 = vsel %vm302_vm0, %v2584_v15, %v8671_v2  ;;  %v1910_v2 = vshrl.u32 %v8693_v0, 16 }
 0x2b8   :  { %2367 = vrot.lane.b32.xlu0 %v8816_v48, %s6850_s26  ;;  %3348 = vmatmul.mubr.bf16.gmra.mxu1 %v2709_v21  ;;  %v2146_v21 = vrot.slane %v8957_v22, 1  ;;  %v1465_v47 = vrot.slane %v1463_v49, 7  ;;  %v2901_v49 = vsel %vm302_vm0, %v2812_v26, %v13133_v52 }
 0x2b9   :  { %v8948_v27 = vpop.permute.xlu1 %2421  ;;  %v8950_v18 = vpop.permute.xlu0 %2353  ;;  %v1907_v56 = vrot.slane %v1905_v23, 1  ;;  %v1917_v23 = vshll.u32 %v8787_v37, 16  ;;  %v1924_v37 = vshll.u32 %v8816_v48, 16 }
 0x2ba   :  { %v8997_v55 = vsel %vm2067_vm5, %v2146_v21, %v2147_v40  ;;  %v1468_v21 = vor.u32 %v1466_v11, %v1465_v47  ;;  %v13134_v40 = vld [vmem:[#allocation54_spill] sm:$0xff] }
 0x2bb   :  { %2497 = vrot.lane.b32.xlu1 %v8957_v22, %s6849_s25  ;;  %13132 = vst [vmem:[#allocation43_spill] sm:$0xff] %v8997_v55  ;;  %v13136_v11 = vld [vmem:[#allocation74_spill] sm:$0xff] }
 0x2bc   :  { %2231 = vrot.lane.b32.xlu0 %v8862_v16, %s6851_s27 }
 0x2bd   :  { %v8967_v5 = vpop.permute.xlu1 %2485  ;;  %v2520_v50 = vpop.permute.xlu0 %2519 }
 0x2be   :  { %v2967_v17 = vsel %vm2695_vm7, %v2899_v13, %v2520_v50  ;;  %v1903_v13 = vor.u32 %v1902_v30, %v1898_v24  ;;  %v2715_v24 = vsel %vm2695_vm7, %v2646_v6, %v13134_v40  ;;  %v13139_v40 = vld [vmem:[#allocation50_spill] sm:$0xff] }
 0x2bf   :  { %2549 = vrot.lane.b32.xlu1 %v8976_v8, %s6850_s26  ;;  %3355 = vmatprep.mubr.bf16.mxu1 %v2967_v17  ;;  %v1912_v17 = vshll.u32 %v8693_v0, 16  ;;  %v13180_v0 = vld [vmem:[#allocation69_spill] sm:$0xff] }
 0x2c0   :  { %2305 = vrot.lane.b32.xlu0 %v8849_v53, %s6849_s25  ;;  %3356 = vmatmul.mubr.bf16.gmra.mxu1 %v2712_v33  ;;  %v9010_v30 = vsel %vm1632_vm6, %v1903_v13, %v1907_v56  ;;  %v2815_v56 = vsel %vm688_vm1, %v13136_v11, %v8687_v9  ;;  %v13140_v11 = vld [vmem:[#allocation56_spill] sm:$0xff] }
 0x2c1   :  { %v2210_v12 = vpop.permute.xlu1 %2209  ;;  %v8991_v50 = vpop.permute.xlu0 %2291  ;;  %v1914_v33 = vrot.slane %v1912_v17, 1  ;;  %v9027_v17 = vsel %vm7292_vm4, 0, %v1468_v21 }
 0x2c2   :  { %v2586_v15 = vsel %vm688_vm1, %v7865_v61, %v2210_v12  ;;  %13135 = vst [vmem:[#allocation49_spill] sm:$0xff] %v9027_v17  ;;  %v1919_v61 = vrot.slane %v1917_v23, 1  ;;  %v13137_v12 = vld [vmem:[#allocation91_spill] sm:$0xff] }
 0x2c3   :  { %2435 = vrot.lane.b32.xlu1 %v8997_v55, %s6851_s27  ;;  %v2648_v52 = vsel %vm302_vm0, %v2586_v15, %v13137_v12  ;;  %v1926_v15 = vrot.slane %v1924_v37, 1 }
 0x2c4   :  { %2233 = vrot.lane.b32.xlu0 %v8902_v44, %s6851_s27 }
 0x2c5   :  { %v2212_v29 = vpop.permute.xlu1 %2211  ;;  %v2522_v59 = vpop.permute.xlu0 %2521 }
 0x2c6   :  { %v2970_v51 = vsel %vm2695_vm7, %v2901_v49, %v2522_v59  ;;  %v1915_v59 = vor.u32 %v1914_v33, %v1910_v2  ;;  %v13138_v49 = vld [vmem:[#allocation12_spill] sm:$0xff]  ;;  %v9046_v33 = vsel %vm7292_vm4, %v1465_v47, 0  ;;  %v2149_v2 = vrot.slane %v9027_v17, 1 }
 0x2c7   :  { %2551 = vrot.lane.b32.xlu1 %v9010_v30, %s6850_s26  ;;  %3363 = vmatprep.mubr.bf16.mxu1 %v2970_v51  ;;  %v1470_v21 = vshrl.u32 %v13138_v49, 16  ;;  %v2150_v47 = vrot.slane %v9046_v33, 1 }
 0x2c8   :  { %2369 = vrot.lane.b32.xlu0 %v8877_v62, %s6850_s26  ;;  %3364 = vmatmul.mubr.bf16.gmra.mxu1 %v2715_v24  ;;  %v2903_v24 = vsel %vm302_vm0, %v2815_v56, %v13139_v40  ;;  %v2718_v56 = vsel %vm2695_vm7, %v2648_v52, %v13140_v11  ;;  %v13142_v40 = vld [vmem:[#allocation93_spill] sm:$0xff] }
 0x2c9   :  { %v2424_v26 = vpop.permute.xlu1 %2423  ;;  %v9023_v13 = vpop.permute.xlu0 %2355 }
 0x2ca   :  { %v2854_v6 = vsel %vm688_vm1, %v8935_v58, %v2424_v26 }
 0x2cb   :  { %2499 = vrot.lane.b32.xlu1 %v9027_v17, %s6849_s25 }
 0x2cc   :  { %2235 = vrot.lane.b32.xlu0 %v8935_v58, %s6851_s27  ;;  %v9053_v58 = vsel %vm1632_vm6, %v1915_v59, %v1919_v61  ;;  %v1929_v59 = vshll.u32 %v8831_v60, 16  ;;  %v13141_v61 = vld [vmem:[#allocation16_spill] sm:$0xff] }
 0x2cd   :  { %v2488_v51 = vpop.permute.xlu1 %2487  ;;  %v2524_v9 = vpop.permute.xlu0 %2523  ;;  %v2588_v37 = vsel %vm688_vm1, %v13141_v61, %v2212_v29  ;;  %v13145_v29 = vld [vmem:[#allocation94_spill] sm:$0xff] }
 0x2ce   :  { %v9050_v26 = vsel %vm302_vm0, %v2854_v6, %v2488_v51  ;;  %v2973_v23 = vsel %vm2695_vm7, %v2903_v24, %v2524_v9  ;;  %v1922_v6 = vshrl.u32 %v8816_v48, 16  ;;  %v1472_v9 = vrot.slane %v1470_v21, 7  ;;  %v13143_v24 = vld [vmem:[#allocation80_spill] sm:$0xff] }
 0x2cf   :  { %2553 = vrot.lane.b32.xlu1 %v9053_v58, %s6850_s26  ;;  %3371 = vmatprep.mubr.bf16.mxu1 %v2973_v23  ;;  %v2818_v52 = vsel %vm688_vm1, %v13143_v24, %v13142_v40  ;;  %v9073_v23 = vsel %vm2067_vm5, %v2149_v2, %v2150_v47  ;;  %v1931_v60 = vrot.slane %v1929_v59, 1  ;;  %v2650_v21 = vsel %vm302_vm0, %v2588_v37, %v13145_v29  ;;  %v13146_v24 = vld [vmem:[#allocation53_spill] sm:$0xff]  ;;  %v13148_v59 = vld [vmem:[#allocation60_spill] sm:$0xff] }
 0x2d0   :  { %2307 = vrot.lane.b32.xlu0 %v8919_v10, %s6849_s25  ;;  %3372 = vmatmul.mubr.bf16.gmra.mxu1 %v2718_v56  ;;  %13144 = vst [vmem:[#allocation11_spill] sm:$0xff] %v9073_v23  ;;  %v1927_v11 = vor.u32 %v1926_v15, %v1922_v6  ;;  %v1936_v56 = vshll.u32 %v8877_v62, 16  ;;  %v1473_v10 = vshll.u32 %v13138_v49, 16  ;;  %v2905_v2 = vsel %vm302_vm0, %v2818_v52, %v13146_v24  ;;  %v13149_v52 = vld [vmem:[#allocation29_spill] sm:$0xff]  ;;  %v13177_v48 = vld [vmem:[#allocation40_spill] sm:$0xff] }
 0x2d1   :  { %v2214_v12 = vpop.permute.xlu1 %2213  ;;  %v9067_v51 = vpop.permute.xlu0 %2293  ;;  %v2721_v53 = vsel %vm2695_vm7, %v2650_v21, %v13148_v59  ;;  %v1934_v37 = vshrl.u32 %v8877_v62, 16  ;;  %v13152_v21 = vld [vmem:[#allocation85_spill] sm:$0xff]  ;;  %v13154_v59 = vld [vmem:[#allocation34_spill] sm:$0xff] }
 0x2d2   :  { %v1475_v15 = vor.u32 %v1473_v10, %v1472_v9  ;;  %v9086_v47 = vsel %vm1632_vm6, %v1927_v11, %v1931_v60  ;;  %v1938_v6 = vrot.slane %v1936_v56, 1  ;;  %v1941_v10 = vshll.u32 %v8893_v45, 16 }
 0x2d3   :  { %2437 = vrot.lane.b32.xlu1 %v9073_v23, %s6851_s27  ;;  %13147 = vst [vmem:[#allocation45_spill] sm:$0xff] %v9086_v47  ;;  %v2590_v11 = vsel %vm688_vm1, %v13149_v52, %v2214_v12  ;;  %v1948_v45 = vshll.u32 %v8957_v22, 16  ;;  %v1477_v52 = vshrl.u32 %v13154_v59, 16 }
 0x2d4   :  { %2237 = vrot.lane.b32.xlu0 %v8976_v8, %s6851_s27  ;;  %v9103_v29 = vsel %vm7292_vm4, 0, %v1475_v15  ;;  %v1943_v12 = vrot.slane %v1941_v10, 1 }
 0x2d5   :  { %v2216_v61 = vpop.permute.xlu1 %2215  ;;  %v2526_v40 = vpop.permute.xlu0 %2525  ;;  %13150 = vst [vmem:[#allocation51_spill] sm:$0xff] %v9103_v29 }
 0x2d6   :  { %v2976_v49 = vsel %vm2695_vm7, %v2905_v2, %v2526_v40  ;;  %v13151_v40 = vld [vmem:[#allocation95_spill] sm:$0xff]  ;;  %v1939_v2 = vor.u32 %v1938_v6, %v1934_v37  ;;  %v9122_v6 = vsel %vm7292_vm4, %v1472_v9, 0  ;;  %v2152_v37 = vrot.slane %v9103_v29, 1 }
 0x2d7   :  { %2555 = vrot.lane.b32.xlu1 %v9086_v47, %s6850_s26  ;;  %3379 = vmatprep.mubr.bf16.mxu1 %v2976_v49  ;;  %v2821_v24 = vsel %vm688_vm1, %v13152_v21, %v13151_v40  ;;  %v13153_v49 = vld [vmem:[#allocation96_spill] sm:$0xff]  ;;  %v13155_v21 = vld [vmem:[#allocation55_spill] sm:$0xff]  ;;  %v1946_v9 = vshrl.u32 %v8957_v22, 16 }
 0x2d8   :  { %2371 = vrot.lane.b32.xlu0 %v8957_v22, %s6850_s26  ;;  %3380 = vmatmul.mubr.bf16.gmra.mxu1 %v2721_v53  ;;  %v2652_v15 = vsel %vm302_vm0, %v2590_v11, %v13153_v49  ;;  %v9129_v10 = vsel %vm1632_vm6, %v1939_v2, %v1943_v12  ;;  %v1950_v49 = vrot.slane %v1948_v45, 1  ;;  %v1479_v2 = vrot.slane %v1477_v52, 7  ;;  %v13158_v12 = vld [vmem:[#allocation13_spill] sm:$0xff] }
 0x2d9   :  { %v2426_v60 = vpop.permute.xlu1 %2425  ;;  %v9099_v56 = vpop.permute.xlu0 %2357  ;;  %13156 = vst [vmem:[#allocation48_spill] sm:$0xff] %v9129_v10  ;;  %v2592_v45 = vsel %vm688_vm1, %v13158_v12, %v2216_v61  ;;  %v1480_v22 = vshll.u32 %v13154_v59, 16  ;;  %v13161_v12 = vld [vmem:[#allocation59_spill] sm:$0xff] }
 0x2da   :  { %v2857_v53 = vsel %vm688_vm1, %v8976_v8, %v2426_v60  ;;  %v2907_v8 = vsel %vm302_vm0, %v2821_v24, %v13155_v21  ;;  %v13157_v24 = vld [vmem:[#allocation62_spill] sm:$0xff]  ;;  %v2654_v61 = vsel %vm302_vm0, %v2592_v45, %v8738_v35  ;;  %v13163_v35 = vld [vmem:[#allocation64_spill] sm:$0xff]  ;;  %v13164_v45 = vld [vmem:[#allocation15_spill] sm:$0xff] }
 0x2db   :  { %2501 = vrot.lane.b32.xlu1 %v9103_v29, %s6849_s25  ;;  %v2724_v21 = vsel %vm2695_vm7, %v2652_v15, %v13157_v24 }
 0x2dc   :  { %2239 = vrot.lane.b32.xlu0 %v9010_v30, %s6851_s27 }
 0x2dd   :  { %v2490_v62 = vpop.permute.xlu1 %2489  ;;  %v2528_v40 = vpop.permute.xlu0 %2527 }
 0x2de   :  { %v9126_v60 = vsel %vm302_vm0, %v2857_v53, %v2490_v62  ;;  %v2979_v11 = vsel %vm2695_vm7, %v2907_v8, %v2528_v40  ;;  %v2153_v62 = vrot.slane %v9122_v6, 1  ;;  %v1953_v53 = vshll.u32 %v8973_v42, 16 }
 0x2df   :  { %2557 = vrot.lane.b32.xlu1 %v9129_v10, %s6850_s26  ;;  %3387 = vmatprep.mubr.bf16.mxu1 %v2979_v11  ;;  %v13159_v11 = vld [vmem:[#allocation88_spill] sm:$0xff] }
 0x2e0   :  { %2309 = vrot.lane.b32.xlu0 %v8997_v55, %s6849_s25  ;;  %3388 = vmatmul.mubr.bf16.gmra.mxu1 %v2724_v21  ;;  %v2824_v15 = vsel %vm688_vm1, %v13159_v11, %v8736_v4  ;;  %v9149_v24 = vsel %vm2067_vm5, %v2152_v37, %v2153_v62  ;;  %v1951_v21 = vor.u32 %v1950_v49, %v1946_v9  ;;  %v1960_v55 = vshll.u32 %v9027_v17, 16 }
 0x2e1   :  { %v2218_v40 = vpop.permute.xlu1 %2217  ;;  %v9143_v8 = vpop.permute.xlu0 %2295  ;;  %13160 = vst [vmem:[#allocation54_spill] sm:$0xff] %v9149_v24  ;;  %v1955_v42 = vrot.slane %v1953_v53, 1  ;;  %v2909_v37 = vsel %vm302_vm0, %v2824_v15, %v13161_v12  ;;  %v1482_v49 = vor.u32 %v1480_v22, %v1479_v2  ;;  %v2727_v53 = vsel %vm2695_vm7, %v2654_v61, %v13163_v35  ;;  %v13165_v61 = vld [vmem:[#allocation90_spill] sm:$0xff] }
 0x2e2   :  { %v1962_v11 = vrot.slane %v1960_v55, 1  ;;  %v1958_v22 = vshrl.u32 %v9027_v17, 16  ;;  %v2594_v15 = vsel %vm688_vm1, %v13164_v45, %v2218_v40  ;;  %v2830_v45 = vsel %vm688_vm1, %v8706_v43, %v8760_v46 }
 0x2e3   :  { %2439 = vrot.lane.b32.xlu1 %v9149_v24, %s6851_s27  ;;  %v9164_v59 = vsel %vm1632_vm6, %v1951_v21, %v1955_v42  ;;  %v9181_v42 = vsel %vm7292_vm4, 0, %v1482_v49  ;;  %v2656_v49 = vsel %vm302_vm0, %v2594_v15, %v8748_v41  ;;  %v13168_v15 = vld [vmem:[#allocation65_spill] sm:$0xff]  ;;  %v1970_v43 = vshrl.u32 %v9103_v29, 16 }
 0x2e4   :  { %2241 = vrot.lane.b32.xlu0 %v9053_v58, %s6851_s27  ;;  %13162 = vst [vmem:[#allocation74_spill] sm:$0xff] %v9164_v59  ;;  %v1963_v12 = vor.u32 %v1962_v11, %v1958_v22  ;;  %v1629_v11 = vsel %vm7292_vm4, %v1479_v2, 0  ;;  %v2155_v22 = vrot.slane %v9181_v42, 1  ;;  %v1977_v46 = vshll.u32 %v9122_v6, 16 }
 0x2e5   :  { %v2428_v52 = vpop.permute.xlu1 %2427  ;;  %v2530_v4 = vpop.permute.xlu0 %2529 }
 0x2e6   :  { %v2860_v62 = vsel %vm688_vm1, %v9010_v30, %v2428_v52  ;;  %v2982_v9 = vsel %vm2695_vm7, %v2909_v37, %v2530_v4  ;;  %v1965_v30 = vshll.u32 %v9046_v33, 16  ;;  %v2827_v52 = vsel %vm688_vm1, %v13165_v61, %v8746_v7  ;;  %v13166_v37 = vld [vmem:[#allocation33_spill] sm:$0xff] }
 0x2e7   :  { %2559 = vrot.lane.b32.xlu1 %v9164_v59, %s6850_s26  ;;  %3395 = vmatprep.mubr.bf16.mxu1 %v2982_v9  ;;  %v1972_v33 = vshll.u32 %v9103_v29, 16  ;;  %v1484_v9 = vshrl.u32 %v13166_v37, 16  ;;  %v2730_v61 = vsel %vm2695_vm7, %v2656_v49, %v13168_v15 }
 0x2e8   :  { %2373 = vrot.lane.b32.xlu0 %v9027_v17, %s6850_s26  ;;  %3396 = vmatmul.mubr.bf16.gmra.mxu1 %v2727_v53  ;;  %v1967_v40 = vrot.slane %v1965_v30, 1  ;;  %v13167_v53 = vld [vmem:[#allocation61_spill] sm:$0xff] }
 0x2e9   :  { %v2492_v21 = vpop.permute.xlu1 %2491  ;;  %v9177_v55 = vpop.permute.xlu0 %2359  ;;  %v1974_v41 = vrot.slane %v1972_v33, 1  ;;  %v1486_v2 = vrot.slane %v1484_v9, 7  ;;  %v1487_v33 = vshll.u32 %v13166_v37, 16 }
 0x2ea   :  { %v9187_v4 = vsel %vm302_vm0, %v2860_v62, %v2492_v21  ;;  %v2911_v62 = vsel %vm302_vm0, %v2827_v52, %v13167_v53  ;;  %v9206_v21 = vsel %vm1632_vm6, %v1963_v12, %v1967_v40  ;;  %v2156_v52 = vrot.slane %v1629_v11, 1  ;;  %v13169_v40 = vld [vmem:[#allocation35_spill] sm:$0xff]  ;;  %v13170_v53 = vld [vmem:[#allocation18_spill] sm:$0xff] }
 0x2eb   :  { %2503 = vrot.lane.b32.xlu1 %v9181_v42, %s6849_s25  ;;  %v1984_v12 = vshll.u32 %v9181_v42, 16  ;;  %v1975_v17 = vor.u32 %v1974_v41, %v1970_v43  ;;  %v1489_v37 = vor.u32 %v1487_v33, %v1486_v2  ;;  %v13173_v41 = vld [vmem:[#allocation101_spill] sm:$0xff]  ;;  %v13174_v33 = vld [vmem:[#allocation104_spill] sm:$0xff] }
 0x2ec   :  { %2243 = vrot.lane.b32.xlu0 %v9086_v47, %s6851_s27  ;;  %v2794_v43 = vsel %vm688_vm1, %v13173_v41, %v8773_v1  ;;  %v1989_v1 = vshll.u32 %v1629_v11, 16  ;;  %v1494_v41 = vshll.u32 %v13169_v40, 16  ;;  %v13181_v11 = vld [vmem:[#allocation66_spill] sm:$0xff] }
 0x2ed   :  { %v2220_v35 = vpop.permute.xlu1 %2219  ;;  %v2532_v7 = vpop.permute.xlu0 %2531 }
 0x2ee   :  { %v2985_v30 = vsel %vm2695_vm7, %v2911_v62, %v2532_v7  ;;  %v1491_v7 = vshrl.u32 %v13169_v40, 16  ;;  %v2596_v62 = vsel %vm688_vm1, %v13170_v53, %v2220_v35  ;;  %v1979_v35 = vrot.slane %v1977_v46, 1 }
 0x2ef   :  { %2561 = vrot.lane.b32.xlu1 %v9206_v21, %s6850_s26  ;;  %3403 = vmatprep.mubr.bf16.mxu1 %v2985_v30  ;;  %v13171_v30 = vld [vmem:[#allocation63_spill] sm:$0xff]  ;;  %v2658_v53 = vsel %vm302_vm0, %v2596_v62, %v8762_v57  ;;  %v1982_v57 = vshrl.u32 %v9181_v42, 16  ;;  %v9257_v62 = vsel %vm7292_vm4, 0, %v1489_v37  ;;  %v2889_v40 = vsel %vm302_vm0, %v2794_v43, %v13181_v11  ;;  %v6779_v43 = vld [vmem:[%s12736_s4 + $0x80] sm:$0xff]   ;;  %v13185_v11 = vld [vmem:[#allocation100_spill] sm:$0xff] }
 0x2f0   :  { %2311 = vrot.lane.b32.xlu0 %v9073_v23, %s6849_s25  ;;  %3404 = vmatmul.mubr.bf16.gmra.mxu1 %v2730_v61  ;;  %v2913_v15 = vsel %vm302_vm0, %v2830_v45, %v13171_v30  ;;  %v9227_v61 = vsel %vm2067_vm5, %v2155_v22, %v2156_v52  ;;  %v1986_v23 = vrot.slane %v1984_v12, 1  ;;  %v13172_v45 = vld [vmem:[#allocation38_spill] sm:$0xff]  ;;  %v9248_v46 = vsel %vm1632_vm6, %v1975_v17, %v1979_v35  ;;  %v13176_v12 = vld [vmem:[#allocation68_spill] sm:$0xff] }
 0x2f1   :  { %v2534_v49 = vpop.permute.xlu1 %2533  ;;  %v9222_v9 = vpop.permute.xlu0 %2297  ;;  %v6724_v30 = vunpack.i.l.bf16 %v13172_v45 }
 0x2f2   :  { %v2988_v6 = vsel %vm2695_vm7, %v2913_v15, %v2534_v49  ;;  %v9239_v49 = vrot.slane %v1491_v7, 7  ;;  %v13175_v15 = vld [vmem:[#allocation98_spill] sm:$0xff]  ;;  %v2733_v7 = vsel %vm2695_vm7, %v2658_v53, %v13176_v12  ;;  %v1987_v35 = vor.u32 %v1986_v23, %v1982_v57 }
 0x2f3   :  { %2441 = vrot.lane.b32.xlu1 %v9227_v61, %s6851_s27  ;;  %3411 = vmatprep.mubr.bf16.mxu1 %v2988_v6  ;;  %v2833_v6 = vsel %vm688_vm1, %v13175_v15, %v13174_v33  ;;  %v13178_v33 = vld [vmem:[#allocation30_spill] sm:$0xff]  ;;  %v13179_v15 = vld [vmem:[#allocation20_spill] sm:$0xff]  ;;  %v1630_v23 = vsel %vm7292_vm4, %v1486_v2, 0  ;;  %v1996_v57 = vshll.u32 %v9257_v62, 16 }
 0x2f4   :  { %2245 = vrot.lane.b32.xlu0 %v9129_v10, %s6851_s27  ;;  %v2572_v17 = vsel %vm688_vm1, %v13178_v33, %v13177_v48  ;;  %v2915_v37 = vsel %vm302_vm0, %v2833_v6, %v13180_v0  ;;  %v1496_v47 = vor.u32 %v1494_v41, %v9239_v49  ;;  %v1991_v0 = vrot.slane %v1989_v1, 1  ;;  %v13182_v6 = vld [vmem:[#allocation71_spill] sm:$0xff]  ;;  %v13183_v2 = vld [vmem:[#allocation102_spill] sm:$0xff] }
 0x2f5   :  { %v2222_v22 = vpop.permute.xlu1 %2221  ;;  %v9237_v52 = vpop.permute.xlu0 %2361  ;;  %v2158_v41 = vrot.slane %v9257_v62, 1 }
 0x2f6   :  { %v2598_v10 = vsel %vm688_vm1, %v13179_v15, %v2222_v22  ;;  %v9278_v22 = vsel %vm302_vm0, %v2572_v17, %v6724_v30  ;;  %v9294_v15 = vsel %vm1632_vm6, %v1987_v35, %v1991_v0  ;;  %v1998_v35 = vrot.slane %v1996_v57, 1  ;;  %v13190_v0 = vld [vmem:[#allocation73_spill] sm:$0xff] }
 0x2f7   :  { %2563 = vrot.lane.b32.xlu1 %v9248_v46, %s6850_s26  ;;  %v2660_v30 = vsel %vm302_vm0, %v2598_v10, %v13183_v2  ;;  %v13189_v2 = vld [vmem:[#allocation97_spill] sm:$0xff] }
 0x2f8   :  { %2375 = vrot.lane.b32.xlu0 %v9103_v29, %s6850_s26  ;;  %3412 = vmatmul.mubr.bf16.gmra.mxu1 %v2733_v7  ;;  %v2697_v7 = vsel %vm2695_vm7, %v9278_v22, %v13182_v6  ;;  %v13188_v6 = vld [vmem:[#allocation21_spill] sm:$0xff]  ;;  %v13192_v29 = vld [vmem:[#allocation72_spill] sm:$0xff] }
 0x2f9   :  { %v2536_v53 = vpop.permute.xlu1 %2535  ;;  %v2510_v12 = vpop.permute.xlu0 %2509  ;;  %v13191_v57 = vld [vmem:[#allocation17_spill] sm:$0xff] }
 0x2fa   :  { %v2991_v48 = vsel %vm2695_vm7, %v2915_v37, %v2536_v53  ;;  %v2952_v33 = vsel %vm2695_vm7, %v2889_v40, %v2510_v12  ;;  %v2159_v53 = vrot.slane %v1630_v23, 1  ;;  %v9298_v12 = vsel %vm7292_vm4, 0, %v1496_v47  ;;  %v13184_v37 = vld [vmem:[#allocation106_spill] sm:$0xff] }
 0x2fb   :  { %2505 = vrot.lane.b32.xlu1 %v9257_v62, %s6849_s25  ;;  %3419 = vmatprep.mubr.bf16.mxu1 %v2991_v48  ;;  %v2797_v40 = vsel %vm688_vm1, %v13185_v11, %v13184_v37  ;;  %v13186_v48 = vld [vmem:[#allocation109_spill] sm:$0xff]  ;;  %v2736_v47 = vsel %vm2695_vm7, %v2660_v30, %v13190_v0  ;;  %v1994_v11 = vshrl.u32 %v9257_v62, 16  ;;  %v13193_v0 = vld [vmem:[#allocation70_spill] sm:$0xff] }
 0x2fc   :  { %2247 = vrot.lane.b32.xlu0 %v9164_v59, %s6851_s27  ;;  %3315 = vmatprep.mubr.bf16.mxu0 %v2952_v33  ;;  %v13187_v33 = vld [vmem:[#allocation99_spill] sm:$0xff]  ;;  %v9316_v37 = vsel %vm2067_vm5, %v2158_v41, %v2159_v53  ;;  %v13195_v53 = vld [vmem:[#allocation26_spill] sm:$0xff] }
 0x2fd   :  { %3316 = vmatmul.mubr.bf16.vlgmr.msra.gmra.mxu0 %v2697_v7  ;;  %v2224_v17 = vpop.permute.xlu1 %2223  ;;  %v2198_v1 = vpop.permute.xlu0 %2197  ;;  %v2836_v10 = vsel %vm688_vm1, %v13187_v33, %v13186_v48  ;;  %v2176_v48 = vshll.u32 %v9298_v12, 16 }
 0x2fe   :  { %v2574_v7 = vsel %vm688_vm1, %v13188_v6, %v2198_v1  ;;  %6475 = vmatpush3.bf16.msra.mxu0 %v13189_v2  ;;  %v2001_v1 = vshll.u32 %v1630_v23, 16  ;;  %v2600_v33 = vsel %vm688_vm1, %v13191_v57, %v2224_v17  ;;  %v2917_v30 = vsel %vm302_vm0, %v2836_v10, %v13192_v29  ;;  %v13196_v29 = vld [vmem:[#allocation76_spill] sm:$0xff]  ;;  %v13197_v10 = vld [vmem:[#allocation105_spill] sm:$0xff] }
 0x2ff   :  { %2565 = vrot.lane.b32.xlu1 %v9294_v15, %s6850_s26  ;;  %6476 = vmatprep.subr.bf16.mxu0 %v6779_v43  ;;  %v2839_v23 = vsel %vm688_vm1, %v13195_v53, %v8846_v19  ;;  %v1999_v17 = vor.u32 %v1998_v35, %v1994_v11  ;;  %v6725_v57 = vunpack.i.h.bf16 %v13172_v45  ;;  %v13198_v11 = vld [vmem:[#allocation112_spill] sm:$0xff] }
 0x300   :  { %2313 = vrot.lane.b32.xlu0 %v9149_v24, %s6849_s25  ;;  %3420 = vmatmul.mubr.bf16.gmra.mxu1 %v2736_v47  ;;  %v2891_v24 = vsel %vm302_vm0, %v2797_v40, %v13193_v0  ;;  %v13194_v47 = vld [vmem:[#allocation103_spill] sm:$0xff]  ;;  %v2003_v19 = vrot.slane %v2001_v1, 1 }
 0x301   :  { %v2538_v6 = vpop.permute.xlu1 %2537  ;;  %v2512_v2 = vpop.permute.xlu0 %2511  ;;  %v2636_v41 = vsel %vm302_vm0, %v2574_v7, %v13194_v47  ;;  %v2662_v7 = vsel %vm302_vm0, %v2600_v33, %v13197_v10  ;;  %v2919_v35 = vsel %vm302_vm0, %v2839_v23, %v6725_v57  ;;  %v13201_v0 = vld [vmem:[#allocation79_spill] sm:$0xff]  ;;  %v13203_v23 = vld [vmem:[#allocation24_spill] sm:$0xff] }
 0x302   :  { %v2994_v59 = vsel %vm2695_vm7, %v2917_v30, %v2538_v6  ;;  %v2955_v3 = vsel %vm2695_vm7, %v2891_v24, %v2512_v2  ;;  %6477 = vmatpush3.bf16.msra.mxu0 %v6779_v43  ;;  %v2700_v40 = vsel %vm2695_vm7, %v2636_v41, %v13196_v29  ;;  %v13200_v2 = vld [vmem:[#allocation22_spill] sm:$0xff]  ;;  %v9354_v33 = vsel %vm1632_vm6, %v1999_v17, %v2003_v19  ;;  %v13205_v10 = vld [vmem:[#allocation108_spill] sm:$0xff] }
 0x303   :  { %2443 = vrot.lane.b32.xlu1 %v9316_v37, %s6851_s27  ;;  %3427 = vmatprep.mubr.bf16.mxu1 %v2994_v59  ;;  %v1631_v59 = vsel %vm7292_vm4, %v9239_v49, 0  ;;  %v2178_v30 = vrot.slane %v2176_v48, 1  ;;  %v2739_v47 = vsel %vm2695_vm7, %v2662_v7, %v13201_v0  ;;  %v2997_v49 = vsel %vm2695_vm7, %v2919_v35, %v13202_v14 }
 0x304   :  { %2249 = vrot.lane.b32.xlu0 %v9206_v21, %s6851_s27  ;;  %3323 = vmatprep.mubr.bf16.mxu0 %v2955_v3  ;;  %v13199_v3 = vld [vmem:[#allocation58_spill] sm:$0xff]  ;;  %v2174_v41 = vshrl.u32 %v9298_v12, 16  ;;  %v2181_v53 = vshll.u32 %v1631_v59, 16 }
 0x305   :  { %3324 = vmatmul.mubr.bf16.gmra.mxu0 %v2700_v40  ;;  %v2226_v24 = vpop.permute.xlu1 %2225  ;;  %v2200_v43 = vpop.permute.xlu0 %2199  ;;  %v2800_v6 = vsel %vm688_vm1, %v13199_v3, %v13198_v11  ;;  %v13204_v40 = vld [vmem:[#allocation75_spill] sm:$0xff] }
 0x306   :  { %v2576_v1 = vsel %vm688_vm1, %v13200_v2, %v2200_v43  ;;  %v2602_v17 = vsel %vm688_vm1, %v13203_v23, %v2226_v24  ;;  %v2893_v19 = vsel %vm302_vm0, %v2800_v6, %v13204_v40  ;;  %v2179_v11 = vor.u32 %v2178_v30, %v2174_v41  ;;  %v13206_v24 = vld [vmem:[#allocation82_spill] sm:$0xff]  ;;  %v13207_v30 = vld [vmem:[#allocation111_spill] sm:$0xff] }
 0x307   :  { %2567 = vrot.lane.b32.xlu1 %v9354_v33, %s6850_s26  ;;  %v2638_v7 = vsel %vm302_vm0, %v2576_v1, %v13205_v10  ;;  %v2183_v3 = vrot.slane %v2181_v53, 1  ;;  %v2664_v6 = vsel %vm302_vm0, %v2602_v17, %v8859_v28  ;;  %v2842_v0 = vsel %vm688_vm1, %v8871_v63, %v13207_v30  ;;  %v13209_v28 = vld [vmem:[#allocation78_spill] sm:$0xff] }
 0x308   :  { %2377 = vrot.lane.b32.xlu0 %v9181_v42, %s6850_s26  ;;  %3428 = vmatmul.mubr.bf16.gmra.mxu1 %v2739_v47  ;;  %v2703_v35 = vsel %vm2695_vm7, %v2638_v7, %v13206_v24  ;;  %v13208_v47 = vld [vmem:[#allocation44_spill] sm:$0xff]  ;;  %v2192_v41 = vrot.slane %v9298_v12, 1  ;;  %v2742_v53 = vsel %vm2695_vm7, %v2664_v6, %v13209_v28  ;;  %v2193_v23 = vrot.slane %v1631_v59, 1  ;;  %v13211_v7 = vld [vmem:[#allocation23_spill] sm:$0xff]  ;;  %v13212_v24 = vld [vmem:[#allocation5_spill] sm:$0xff] }
 0x309   :  { %v9367_v48 = vpop.permute.xlu1 %2429  ;;  %3435 = vmatprep.mubr.bf16.mxu1 %v2997_v49  ;;  %v2514_v29 = vpop.permute.xlu0 %2513  ;;  %v9392_v49 = vsel %vm1632_vm6, %v2179_v11, %v2183_v3  ;;  %v2845_v11 = vsel %vm688_vm1, %v8834_v34, %v8844_v38 }
 0x30a   :  { %v2958_v43 = vsel %vm2695_vm7, %v2893_v19, %v2514_v29  ;;  %v13210_v29 = vld [vmem:[#allocation81_spill] sm:$0xff]  ;;  %v9406_v19 = vsel %vm2067_vm5, %v2192_v41, %v2193_v23 }
 0x30b   :  { %2507 = vrot.lane.b32.xlu1 %v9298_v12, %s6849_s25  ;;  %3331 = vmatprep.mubr.bf16.mxu0 %v2958_v43  ;;  %v2921_v40 = vsel %vm302_vm0, %v2842_v0, %v13210_v29  ;;  %v13214_v0 = vld [vmem:[#allocation84_spill] sm:$0xff] }
 0x30c   :  { %2251 = vrot.lane.b32.xlu0 %v9248_v46, %s6851_s27  ;;  %v2923_v38 = vsel %vm302_vm0, %v2845_v11, %v13214_v0 }
 0x30d   :  { %3332 = vmatmul.mubr.bf16.gmra.mxu0 %v2703_v35  ;;  %v9382_v2 = vpop.permute.xlu1 %2493  ;;  %v9384_v1 = vpop.permute.xlu0 %2299  ;;  %v13213_v35 = vld [vmem:[#allocation83_spill] sm:$0xff] }
 0x30e   :  { %6478 = vmatprep.mubr.msk.bf16.mxu0 %vm688_vm1, %v13208_v47  ;;  %v2745_v3 = vsel %vm2695_vm7, %v9278_v22, %v13213_v35  ;;  %v13215_v47 = vld [vmem:[#allocation7_spill] sm:$0xff] }
 0x30f   :  { %2569 = vrot.lane.b32.xlu1 %v9392_v49, %s6850_s26 }
 0x310   :  { %2315 = vrot.lane.b32.xlu0 %v9227_v61, %s6849_s25  ;;  %3436 = vmatmul.mubr.bf16.gmra.mxu1 %v2742_v53  ;;  %v13216_v53 = vld [vmem:[#allocation6_spill] sm:$0xff] }
 0x311   :  { %v2542_v63 = vpop.permute.xlu1 %2541  ;;  %v9401_v17 = vpop.permute.xlu0 %2363 }
 0x312   :  { %v3000_v10 = vsel %vm2695_vm7, %v2921_v40, %v2542_v63  ;;  %v2848_v63 = vsel %vm688_vm1, %v8862_v16, %v8873_v32  ;;  %v6780_v16 = vld [vmem:[%s12742_s10 + $0x18] sm:$0xff]  }
 0x313   :  { %2445 = vrot.lane.b32.xlu1 %v9406_v19, %s6851_s27  ;;  %3443 = vmatprep.mubr.bf16.mxu1 %v3000_v10  ;;  %v2925_v40 = vsel %vm302_vm0, %v2848_v63, %v8895_v20  ;;  %v13217_v32 = vld [vmem:[#allocation8_spill] sm:$0xff]  ;;  %v13219_v20 = vld [vmem:[#allocation25_spill] sm:$0xff] }
 0x314   :  { %2253 = vrot.lane.b32.xlu0 %v9294_v15, %s6851_s27  ;;  %6610 = vmatprep.subr.bf16.mxu1 %v6780_v16 }
 0x315   :  { %6479 = vmatmul.mubr.msk.bf16.vlgmr.msra.gmra.mxu0 %vm688_vm1, %v13211_v7  ;;  %v9415_v59 = vpop.permute.xlu1 %2431  ;;  %v9417_v43 = vpop.permute.xlu0 %2301  ;;  %6611 = vmatpush3.bf16.msra.mxu1 %v6780_v16 }
 0x316   :  { %6482 = vmatprep.mubr.msk.bf16.mxu0 %vm688_vm1, %v13212_v24  ;;  %v2851_v24 = vsel %vm688_vm1, %v8902_v44, %v8948_v27 }
 0x317   :  { %2317 = vrot.lane.b32.xlu1 %v9316_v37, %s6849_s25 }
 0x318   :  { %2379 = vrot.lane.b32.xlu0 %v9257_v62, %s6850_s26  ;;  %3444 = vmatmul.mubr.bf16.gmra.mxu1 %v2745_v3  ;;  %v2927_v3 = vsel %vm302_vm0, %v2851_v24, %v8967_v5  ;;  %v13222_v5 = vld [vmem:[#allocation27_spill] sm:$0xff] }
 0x319   :  { %v2544_v6 = vpop.permute.xlu1 %2543  ;;  %v9431_v30 = vpop.permute.xlu0 %2365 }
 0x31a   :  { %v3003_v34 = vsel %vm2695_vm7, %v2923_v38, %v2544_v6 }
 0x31b   :  { %3451 = vmatprep.mubr.bf16.mxu1 %v3003_v34 }
 0x31c   :  { %2255 = vrot.lane.b32.xlu0 %v9354_v33, %s6851_s27 }
 0x31d   :  { %6483 = vmatmul.mubr.msk.bf16.gmra.mxu0 %vm688_vm1, %v13215_v47  ;;  %v9440_v22 = vpop.permute.xlu1 %2495  ;;  %v2228_v41 = vpop.permute.xlu0 %2227  ;;  %v13220_v47 = vld [vmem:[#allocation9_spill] sm:$0xff] }
 0x31e   :  { %v2604_v28 = vsel %vm688_vm1, %v8077_v54, %v2228_v41  ;;  %6486 = vmatprep.mubr.msk.bf16.mxu0 %vm688_vm1, %v13216_v53 }
 0x31f   :  { %v2666_v23 = vsel %vm302_vm0, %v2604_v28, %v8916_v31 }
 0x320   :  { %2381 = vrot.lane.b32.xlu0 %v9298_v12, %s6850_s26  ;;  %v2748_v29 = vsel %vm2695_vm7, %v2666_v23, %v8950_v18  ;;  %v13218_v12 = vld [vmem:[#allocation28_spill] sm:$0xff] }
 0x321   :  { %v2546_v54 = vpop.permute.xlu1 %2545  ;;  %3452 = vmatmul.mubr.bf16.gmra.mxu1 %v2748_v29  ;;  %v13223_v29 = vld [vmem:[#allocation36_spill] sm:$0xff] }
 0x322   :  { %v9457_v10 = vpop.permute.xlu0 %2303  ;;  %v3006_v7 = vsel %vm2695_vm7, %v2925_v40, %v2546_v54 }
 0x323   :  { %3459 = vmatprep.mubr.bf16.mxu1 %v3006_v7  ;;  %v13224_v7 = vld [vmem:[#allocation37_spill] sm:$0xff] }
 0x325   :  { %6487 = vmatmul.mubr.msk.bf16.gmra.mxu0 %vm688_vm1, %v13217_v32  ;;  %v9465_v31 = vpop.permute.xlu1 %2433 }
 0x326   :  { %v2230_v18 = vpop.permute.xlu0 %2229  ;;  %6490 = vmatprep.mubr.msk.bf16.mxu0 %vm688_vm1, %v13218_v12  ;;  %v13225_v12 = vld [vmem:[#allocation39_spill] sm:$0xff] }
 0x327   :  { %v2606_v11 = vsel %vm688_vm1, %v13219_v20, %v2230_v18 }
 0x328   :  { %v2668_v35 = vsel %vm302_vm0, %v2606_v11, %v8991_v50  ;;  %v13221_v50 = vld [vmem:[#allocation10_spill] sm:$0xff] }
 0x329   :  { %v2548_v6 = vpop.permute.xlu1 %2547  ;;  %v2751_v0 = vsel %vm2695_vm7, %v2668_v35, %v9023_v13  ;;  %v13226_v11 = vld [vmem:[#allocation42_spill] sm:$0xff] }
 0x32a   :  { %3460 = vmatmul.mubr.bf16.gmra.mxu1 %v2751_v0  ;;  %v9480_v38 = vpop.permute.xlu0 %2367  ;;  %v3009_v34 = vsel %vm2695_vm7, %v2927_v3, %v2548_v6  ;;  %v13227_v6 = vld [vmem:[#allocation47_spill] sm:$0xff] }
 0x32b   :  { %3467 = vmatprep.mubr.bf16.mxu1 %v3009_v34  ;;  %v13228_v34 = vld [vmem:[#allocation19_spill] sm:$0xff] }
 0x32d   :  { %6491 = vmatmul.mubr.msk.bf16.gmra.mxu0 %vm688_vm1, %v13220_v47  ;;  %v9485_v44 = vpop.permute.xlu1 %2497 }
 0x32e   :  { %v2232_v27 = vpop.permute.xlu0 %2231  ;;  %6494 = vmatprep.mubr.msk.bf16.mxu0 %vm688_vm1, %v13221_v50 }
 0x32f   :  { %v2608_v41 = vsel %vm688_vm1, %v13222_v5, %v2232_v27 }
 0x330   :  { %v2670_v13 = vsel %vm302_vm0, %v2608_v41, %v9067_v51 }
 0x331   :  { %v2550_v28 = vpop.permute.xlu1 %2549  ;;  %v2754_v53 = vsel %vm2695_vm7, %v2670_v13, %v9099_v56 }
 0x332   :  { %3468 = vmatmul.mubr.bf16.gmra.mxu1 %v2754_v53  ;;  %v9495_v23 = vpop.permute.xlu0 %2305  ;;  %v3012_v63 = vsel %vm2695_vm7, %v9050_v26, %v2550_v28  ;;  %v13232_v28 = vld [vmem:[#allocation45_spill] sm:$0xff] }
 0x333   :  { %3475 = vmatprep.mubr.bf16.mxu1 %v3012_v63 }
 0x335   :  { %6495 = vmatmul.mubr.msk.bf16.gmra.mxu0 %vm688_vm1, %v13223_v29  ;;  %v9501_v40 = vpop.permute.xlu1 %2435 }
 0x336   :  { %v2234_v54 = vpop.permute.xlu0 %2233  ;;  %6498 = vmatprep.mubr.msk.bf16.mxu0 %vm688_vm1, %v13224_v7 }
 0x337   :  { %v2610_v51 = vsel %vm688_vm1, %v8462_v39, %v2234_v54 }
 0x338   :  { %v2672_v56 = vsel %vm302_vm0, %v2610_v51, %v9143_v8 }
 0x339   :  { %v2552_v16 = vpop.permute.xlu1 %2551  ;;  %v2757_v26 = vsel %vm2695_vm7, %v2672_v56, %v9177_v55  ;;  %v13233_v56 = vld [vmem:[#allocation57_spill] sm:$0xff] }
 0x33a   :  { %3476 = vmatmul.mubr.bf16.gmra.mxu1 %v2757_v26  ;;  %v9511_v32 = vpop.permute.xlu0 %2369  ;;  %v3015_v18 = vsel %vm2695_vm7, %v9126_v60, %v2552_v16  ;;  %v13234_v26 = vld [vmem:[#allocation67_spill] sm:$0xff] }
 0x33b   :  { %3483 = vmatprep.mubr.bf16.mxu1 %v3015_v18  ;;  %v13236_v18 = vld [vmem:[#allocation48_spill] sm:$0xff] }
 0x33d   :  { %6499 = vmatmul.mubr.msk.bf16.gmra.mxu0 %vm688_vm1, %v13225_v12  ;;  %v9517_v20 = vpop.permute.xlu1 %2499 }
 0x33e   :  { %v2236_v39 = vpop.permute.xlu0 %2235  ;;  %6502 = vmatprep.mubr.msk.bf16.mxu0 %vm688_vm1, %v13226_v11 }
 0x33f   :  { %v2612_v8 = vsel %vm688_vm1, %v8521_v25, %v2236_v39 }
 0x340   :  { %v2674_v55 = vsel %vm302_vm0, %v2612_v8, %v9222_v9 }
 0x341   :  { %v2554_v24 = vpop.permute.xlu1 %2553  ;;  %v2760_v60 = vsel %vm2695_vm7, %v2674_v55, %v9237_v52  ;;  %v2863_v52 = vsel %vm688_vm1, %v9053_v58, %v9367_v48  ;;  %v13230_v48 = vld [vmem:[#allocation52_spill] sm:$0xff] }
 0x342   :  { %3484 = vmatmul.mubr.bf16.gmra.mxu1 %v2760_v60  ;;  %v9527_v35 = vpop.permute.xlu0 %2307  ;;  %v3018_v3 = vsel %vm2695_vm7, %v9187_v4, %v2554_v24  ;;  %v2935_v47 = vsel %vm302_vm0, %v2863_v52, %v9382_v2  ;;  %v6781_v60 = vld [vmem:[%s12742_s10 + $0x10] sm:$0xff]  }
 0x343   :  { %3491 = vmatprep.mubr.bf16.mxu1 %v3018_v3  ;;  %6612 = vmatprep.subr.bf16.mxu1 %v6781_v60 }
 0x344   :  { %6613 = vmatpush3.bf16.msra.mxu1 %v6781_v60  ;;  %v13249_v60 = vld [vmem:[#allocation49_spill] sm:$0xff] }
 0x345   :  { %6503 = vmatmul.mubr.msk.bf16.gmra.mxu0 %vm688_vm1, %v13227_v6  ;;  %v9533_v0 = vpop.permute.xlu1 %2437  ;;  %v13238_v6 = vld [vmem:[#allocation86_spill] sm:$0xff] }
 0x346   :  { %v2238_v25 = vpop.permute.xlu0 %2237  ;;  %6506 = vmatprep.mubr.msk.bf16.mxu0 %vm688_vm1, %v13228_v34 }
 0x347   :  { %v2614_v9 = vsel %vm688_vm1, %v8580_v36, %v2238_v25  ;;  %v13229_v36 = vld [vmem:[#allocation31_spill] sm:$0xff]  ;;  %v13240_v25 = vld [vmem:[#allocation74_spill] sm:$0xff] }
 0x348   :  { %v2676_v4 = vsel %vm302_vm0, %v2614_v9, %v9384_v1  ;;  %v13231_v1 = vld [vmem:[#allocation87_spill] sm:$0xff]  ;;  %v2872_v34 = vsel %vm688_vm1, %v13240_v25, %v9501_v40  ;;  %v13241_v40 = vld [vmem:[#allocation89_spill] sm:$0xff] }
 0x349   :  { %v2556_v27 = vpop.permute.xlu1 %2555  ;;  %v2763_v50 = vsel %vm2695_vm7, %v2676_v4, %v9401_v17  ;;  %v2866_v17 = vsel %vm688_vm1, %v13232_v28, %v9415_v59  ;;  %v2941_v52 = vsel %vm302_vm0, %v2872_v34, %v9517_v20  ;;  %v13242_v20 = vld [vmem:[#allocation107_spill] sm:$0xff] }
 0x34a   :  { %3492 = vmatmul.mubr.bf16.gmra.mxu1 %v2763_v50  ;;  %v2372_v5 = vpop.permute.xlu0 %2371  ;;  %v3021_v41 = vsel %vm2695_vm7, %v2935_v47, %v2556_v27  ;;  %v2937_v63 = vsel %vm302_vm0, %v2866_v17, %v9440_v22 }
 0x34b   :  { %3499 = vmatprep.mubr.bf16.mxu1 %v3021_v41  ;;  %v6782_v41 = vld [vmem:[%s12742_s10 + $0x8] sm:$0xff]  }
 0x34c   :  { %6614 = vmatprep.subr.bf16.mxu1 %v6782_v41 }
 0x34d   :  { %6507 = vmatmul.mubr.msk.bf16.gmra.mxu0 %vm688_vm1, %v13229_v36  ;;  %v2502_v13 = vpop.permute.xlu1 %2501  ;;  %6615 = vmatpush3.bf16.msra.mxu1 %v6782_v41 }
 0x34e   :  { %v2240_v58 = vpop.permute.xlu0 %2239  ;;  %6510 = vmatprep.mubr.msk.bf16.mxu0 %vm688_vm1, %v13230_v48 }
 0x34f   :  { %v2616_v2 = vsel %vm688_vm1, %v13231_v1, %v2240_v58  ;;  %v6783_v1 = vld [vmem:[%s12742_s10] sm:$0xff]  }
 0x350   :  { %v2678_v53 = vsel %vm302_vm0, %v2616_v2, %v9417_v43  ;;  %v13235_v43 = vld [vmem:[#allocation92_spill] sm:$0xff]  ;;  %v2875_v2 = vsel %vm688_vm1, %v9206_v21, %v9533_v0  ;;  %6616 = vmatprep.subr.bf16.mxu1 %v6783_v1  ;;  %v13245_v0 = vld [vmem:[#allocation46_spill] sm:$0xff] }
 0x351   :  { %v2558_v29 = vpop.permute.xlu1 %2557  ;;  %v2766_v54 = vsel %vm2695_vm7, %v2678_v53, %v9431_v30  ;;  %v2869_v30 = vsel %vm688_vm1, %v13236_v18, %v9465_v31  ;;  %v13237_v31 = vld [vmem:[#allocation77_spill] sm:$0xff]  ;;  %v2943_v17 = vsel %vm302_vm0, %v2875_v2, %v2502_v13  ;;  %6617 = vmatpush3.bf16.msra.mxu1 %v6783_v1 }
 0x352   :  { %3500 = vmatmul.mubr.bf16.gmra.mxu1 %v2766_v54  ;;  %v2310_v7 = vpop.permute.xlu0 %2309  ;;  %v3024_v51 = vsel %vm2695_vm7, %v2937_v63, %v2558_v29  ;;  %v2939_v39 = vsel %vm302_vm0, %v2869_v30, %v9485_v44  ;;  %v13239_v44 = vld [vmem:[#allocation110_spill] sm:$0xff] }
 0x353   :  { %3507 = vmatprep.mubr.bf16.mxu1 %v3024_v51  ;;  %v13244_v51 = vld [vmem:[#allocation113_spill] sm:$0xff] }
 0x355   :  { %6511 = vmatmul.mubr.msk.bf16.gmra.mxu0 %vm688_vm1, %v13233_v56  ;;  %v2440_v16 = vpop.permute.xlu1 %2439 }
 0x356   :  { %v2242_v59 = vpop.permute.xlu0 %2241  ;;  %6514 = vmatprep.mubr.msk.bf16.mxu0 %vm688_vm1, %v13234_v26 }
 0x357   :  { %v2618_v22 = vsel %vm688_vm1, %v13235_v43, %v2242_v59 }
 0x358   :  { %v2680_v12 = vsel %vm302_vm0, %v2618_v22, %v9457_v10 }
 0x359   :  { %v2560_v11 = vpop.permute.xlu1 %2559  ;;  %v2769_v8 = vsel %vm2695_vm7, %v2680_v12, %v9480_v38 }
 0x35a   :  { %3508 = vmatmul.mubr.bf16.gmra.mxu1 %v2769_v8  ;;  %v2374_v55 = vpop.permute.xlu0 %2373  ;;  %v3027_v24 = vsel %vm2695_vm7, %v2939_v39, %v2560_v11  ;;  %v13247_v8 = vld [vmem:[#allocation43_spill] sm:$0xff] }
 0x35b   :  { %3515 = vmatprep.mubr.bf16.mxu1 %v3027_v24  ;;  %v13248_v24 = vld [vmem:[#allocation11_spill] sm:$0xff] }
 0x35d   :  { %6515 = vmatmul.mubr.msk.bf16.gmra.mxu0 %vm688_vm1, %v13237_v31  ;;  %v2504_v10 = vpop.permute.xlu1 %2503 }
 0x35e   :  { %v2244_v3 = vpop.permute.xlu0 %2243  ;;  %6518 = vmatprep.mubr.msk.bf16.mxu0 %vm688_vm1, %v13238_v6 }
 0x35f   :  { %v2620_v38 = vsel %vm688_vm1, %v13239_v44, %v2244_v3 }
 0x360   :  { %v2682_v9 = vsel %vm302_vm0, %v2620_v38, %v9495_v23 }
 0x361   :  { %v2562_v4 = vpop.permute.xlu1 %2561  ;;  %v2772_v47 = vsel %vm2695_vm7, %v2682_v9, %v9511_v32  ;;  %v13243_v32 = vld [vmem:[#allocation114_spill] sm:$0xff] }
 0x362   :  { %3516 = vmatmul.mubr.bf16.gmra.mxu1 %v2772_v47  ;;  %v2312_v27 = vpop.permute.xlu0 %2311  ;;  %v3030_v50 = vsel %vm2695_vm7, %v2941_v52, %v2562_v4  ;;  %v13250_v4 = vld [vmem:[#allocation54_spill] sm:$0xff] }
 0x363   :  { %3523 = vmatprep.mubr.bf16.mxu1 %v3030_v50  ;;  %v13251_v50 = vld [vmem:[#allocation51_spill] sm:$0xff] }
 0x365   :  { %6519 = vmatmul.mubr.msk.bf16.gmra.mxu0 %vm688_vm1, %v13241_v40  ;;  %v2442_v23 = vpop.permute.xlu1 %2441 }
 0x366   :  { %v2246_v58 = vpop.permute.xlu0 %2245  ;;  %6522 = vmatprep.mubr.msk.bf16.mxu0 %vm688_vm1, %v13242_v20  ;;  %v2881_v31 = vsel %vm688_vm1, %v9294_v15, %v2442_v23 }
 0x367   :  { %v2622_v48 = vsel %vm688_vm1, %v13243_v32, %v2246_v58 }
 0x368   :  { %v2684_v28 = vsel %vm302_vm0, %v2622_v48, %v9527_v35  ;;  %v13246_v35 = vld [vmem:[#allocation14_spill] sm:$0xff] }
 0x369   :  { %v2564_v53 = vpop.permute.xlu1 %2563  ;;  %v2775_v63 = vsel %vm2695_vm7, %v2684_v28, %v2372_v5  ;;  %v2878_v5 = vsel %vm688_vm1, %v9248_v46, %v2440_v16 }
 0x36a   :  { %3524 = vmatmul.mubr.bf16.gmra.mxu1 %v2775_v63  ;;  %v2376_v29 = vpop.permute.xlu0 %2375  ;;  %v3033_v54 = vsel %vm2695_vm7, %v2943_v17, %v2564_v53  ;;  %v2945_v43 = vsel %vm302_vm0, %v2878_v5, %v2504_v10 }
 0x36b   :  { %3531 = vmatprep.mubr.bf16.mxu1 %v3033_v54 }
 0x36d   :  { %6523 = vmatmul.mubr.msk.bf16.gmra.mxu0 %vm688_vm1, %v13244_v51  ;;  %v2506_v56 = vpop.permute.xlu1 %2505 }
 0x36e   :  { %v2248_v21 = vpop.permute.xlu0 %2247  ;;  %6526 = vmatprep.mubr.msk.bf16.mxu0 %vm688_vm1, %v13245_v0  ;;  %v2947_v6 = vsel %vm302_vm0, %v2881_v31, %v2506_v56  ;;  %v6798_v31 = vld [vmem:[%s12732_s0 + $0x20] sm:$0xff]  }
 0x36f   :  { %v2624_v13 = vsel %vm688_vm1, %v13246_v35, %v2248_v21 }
 0x370   :  { %v9628_v59 = vpop.f32.mrf.mxu1  ;;  %v2686_v26 = vsel %vm302_vm0, %v2624_v13, %v2310_v7 }
 0x371   :  { %v2566_v22 = vpop.permute.xlu1 %2565  ;;  %v2778_v18 = vsel %vm2695_vm7, %v2686_v26, %v2374_v55 }
 0x372   :  { %3532 = vmatmul.mubr.bf16.gmra.mxu1 %v2778_v18  ;;  %v2314_v30 = vpop.permute.xlu0 %2313  ;;  %v3343_v12 = vpop.f32.mrf.mxu1  ;;  %v3036_v39 = vsel %vm2695_vm7, %v2945_v43, %v2566_v22 }
 0x373   :  { %3539 = vmatprep.mubr.bf16.mxu1 %v3036_v39 }
 0x374   :  { %v9634_v11 = vpop.f32.mrf.mxu1 }
 0x375   :  { %6527 = vmatmul.mubr.msk.bf16.gmra.mxu0 %vm688_vm1, %v13247_v8  ;;  %v2444_v46 = vpop.permute.xlu1 %2443  ;;  %v6795_v8 = vld [vmem:[%s12732_s0 + $0x8] sm:$0xff]  }
 0x376   :  { %v2250_v16 = vpop.permute.xlu0 %2249  ;;  %6530 = vmatprep.mubr.msk.bf16.mxu0 %vm688_vm1, %v13248_v24  ;;  %v3346_v7 = vpop.f32.mrf.mxu1  ;;  %v2884_v40 = vsel %vm688_vm1, %v9354_v33, %v2444_v46  ;;  %v6796_v46 = vld [vmem:[%s12732_s0 + $0x10] sm:$0xff]  }
 0x377   :  { %v2626_v55 = vsel %vm688_vm1, %v13249_v60, %v2250_v16 }
 0x378   :  { %v9644_v10 = vpop.f32.mrf.mxu1  ;;  %v2688_v3 = vsel %vm302_vm0, %v2626_v55, %v2312_v27  ;;  %v6797_v55 = vld [vmem:[%s12732_s0 + $0x18] sm:$0xff]  }
 0x379   :  { %v2568_v44 = vpop.permute.xlu1 %2567  ;;  %v2781_v38 = vsel %vm2695_vm7, %v2688_v3, %v2376_v29 }
 0x37a   :  { %3540 = vmatmul.mubr.bf16.gmra.mxu1 %v2781_v38  ;;  %v2378_v25 = vpop.permute.xlu0 %2377  ;;  %v3351_v34 = vpop.f32.mrf.mxu1  ;;  %v3039_v9 = vsel %vm2695_vm7, %v2947_v6, %v2568_v44 }
 0x37b   :  { %3547 = vmatprep.mubr.bf16.mxu1 %v3039_v9  ;;  %v6800_v34 = vld [vmem:[%s12732_s0 + $0x30] sm:$0xff]  }
 0x37c   :  { %v9650_v52 = vpop.f32.mrf.mxu1 }
 0x37d   :  { %6531 = vmatmul.mubr.msk.bf16.gmra.mxu0 %vm688_vm1, %v13250_v4  ;;  %v2508_v15 = vpop.permute.xlu1 %2507 }
 0x37e   :  { %v2252_v47 = vpop.permute.xlu0 %2251  ;;  %6534 = vmatprep.mubr.msk.bf16.mxu0 %vm688_vm1, %v9227_v61  ;;  %v3354_v27 = vpop.f32.mrf.mxu1  ;;  %v2949_v20 = vsel %vm302_vm0, %v2884_v40, %v2508_v15 }
 0x37f   :  { %v2628_v41 = vsel %vm688_vm1, %v13251_v50, %v2252_v47  ;;  %v6801_v27 = vld [vmem:[%s12732_s0 + $0x38] sm:$0xff]   ;;  %v6802_v50 = vld [vmem:[%s12732_s0 + $0x40] sm:$0xff]  }
 0x380   :  { %v9660_v23 = vpop.f32.mrf.mxu1  ;;  %v2690_v58 = vsel %vm302_vm0, %v2628_v41, %v2314_v30 }
 0x381   :  { %v2570_v32 = vpop.permute.xlu1 %2569  ;;  %v2784_v48 = vsel %vm2695_vm7, %v2690_v58, %v2378_v25  ;;  %v6799_v25 = vld [vmem:[%s12732_s0 + $0x28] sm:$0xff]  }
 0x382   :  { %3548 = vmatmul.mubr.bf16.gmra.mxu1 %v2784_v48  ;;  %v2316_v1 = vpop.permute.xlu0 %2315  ;;  %v3359_v2 = vpop.f32.mrf.mxu1  ;;  %v3042_v61 = vsel %vm2695_vm7, %v2949_v20, %v2570_v32  ;;  %v6803_v32 = vld [vmem:[%s12732_s0 + $0x48] sm:$0xff]  }
 0x383   :  { %3555 = vmatprep.mubr.bf16.mxu1 %v3042_v61 }
 0x384   :  { %v9666_v28 = vpop.f32.mrf.mxu1 }
 0x385   :  { %6535 = vmatmul.mubr.msk.bf16.gmra.mxu0 %vm688_vm1, %v9316_v37  ;;  %v2446_v33 = vpop.permute.xlu1 %2445 }
 0x386   :  { %v2887_v17 = vsel %vm688_vm1, %v9392_v49, %v2446_v33  ;;  %v2254_v53 = vpop.permute.xlu0 %2253  ;;  %6538 = vmatprep.mubr.msk.bf16.mxu0 %vm688_vm1, %v9406_v19  ;;  %v3362_v63 = vpop.f32.mrf.mxu1 }
 0x387   :  { %v2630_v29 = vsel %vm688_vm1, %v9181_v42, %v2254_v53  ;;  %v2950_v51 = vsel %vm302_vm0, %v2887_v17, %v6725_v57 }
 0x388   :  { %v9676_v54 = vpop.f32.mrf.mxu1  ;;  %v2692_v21 = vsel %vm302_vm0, %v2630_v29, %v2316_v1  ;;  %v3044_v19 = vsel %vm2695_vm7, %v2950_v51, %v13202_v14  ;;  %v6784_v14 = vld [vmem:[%s12739_s7 + $0x8] sm:$0xff]   ;;  %v6804_v1 = vld [vmem:[%s12732_s0 + $0x50] sm:$0xff]   ;;  %v6805_v51 = vld [vmem:[%s12732_s0 + $0x58] sm:$0xff]  }
 0x389   :  { %v2318_v13 = vpop.permute.xlu1 %2317  ;;  %6542 = vmatprep.subr.bf16.mxu0 %v6784_v14 }
 0x38a   :  { %v2380_v56 = vpop.permute.xlu0 %2379  ;;  %v3367_v37 = vpop.f32.mrf.mxu1  ;;  %6543 = vmatpush3.bf16.msra.mxu0 %v6784_v14 }
 0x38b   :  { %v2787_v49 = vsel %vm2695_vm7, %v2692_v21, %v2380_v56  ;;  %v6806_v37 = vld [vmem:[%s12732_s0 + $0x60] sm:$0xff]  }
 0x38c   :  { %3556 = vmatmul.mubr.bf16.gmra.mxu1 %v2787_v49  ;;  %v9683_v0 = vpop.f32.mrf.mxu1 }
 0x38d   :  { %3563 = vmatprep.mubr.bf16.mxu1 %v3044_v19  ;;  %6539 = vmatmul.mubr.msk.bf16.gmra.mxu0 %vm688_vm1, %v13229_v36 }
 0x38e   :  { %v2256_v42 = vpop.permute.xlu0 %2255  ;;  %v3370_v45 = vpop.f32.mrf.mxu1 }
 0x38f   :  { %v2632_v57 = vsel %vm688_vm1, %v9257_v62, %v2256_v42  ;;  %v6794_v62 = vld [vmem:[%s12732_s0] sm:$0xff]  }
 0x390   :  { %v9691_v35 = vpop.f32.mrf.mxu1  ;;  %v2694_v5 = vsel %vm302_vm0, %v2632_v57, %v2318_v13 }
 0x392   :  { %v2382_v26 = vpop.permute.xlu0 %2381  ;;  %v3375_v43 = vpop.f32.mrf.mxu1 }
 0x393   :  { %v2790_v22 = vsel %vm2695_vm7, %v2694_v5, %v2382_v26  ;;  %v6807_v5 = vld [vmem:[%s12732_s0 + $0x68] sm:$0xff]   ;;  %v6808_v43 = vld [vmem:[%s12732_s0 + $0x70] sm:$0xff]  }
 0x394   :  { %3564 = vmatmul.mubr.bf16.gmra.mxu1 %v2790_v22  ;;  %v9698_v36 = vpop.f32.mrf.mxu1 }
 0x395   :  { %6618 = vmatprep.mubr.msk.bf16.mxu1 %vm302_vm0, %v6794_v62 }
 0x396   :  { %v3378_v18 = vpop.f32.mrf.mxu1 }
 0x398   :  { %v9704_v30 = vpop.f32.mrf.mxu1 }
 0x39a   :  { %v3383_v12 = vpop.f32.mrf.mxu1 }
 0x39c   :  { %v9706_v39 = vpop.f32.mrf.mxu1  ;;  %6619 = vmatmul.mubr.msk.bf16.vlgmr.msra.gmra.mxu1 %vm302_vm0, %v6795_v8 }
 0x39d   :  { %6622 = vmatprep.mubr.msk.bf16.mxu1 %vm302_vm0, %v6796_v46  ;;  %v6785_v46 = vld [vmem:[%s12739_s7] sm:$0xff]  }
 0x39e   :  { %v3386_v16 = vpop.f32.mrf.mxu1  ;;  %6544 = vmatprep.subr.bf16.mxu0 %v6785_v46 }
 0x39f   :  { %6545 = vmatpush3.bf16.msra.mxu0 %v6785_v46 }
 0x3a0   :  { %v9716_v24 = vpop.f32.mrf.mxu1 }
 0x3a2   :  { %v3391_v7 = vpop.f32.mrf.mxu1 }
 0x3a3   :  { %v6809_v7 = vld [vmem:[%s12732_s0 + $0x78] sm:$0xff]  }
 0x3a4   :  { %v9718_v60 = vpop.f32.mrf.mxu1  ;;  %6623 = vmatmul.mubr.msk.bf16.gmra.mxu1 %vm302_vm0, %v6797_v55 }
 0x3a5   :  { %6626 = vmatprep.mubr.msk.bf16.mxu1 %vm302_vm0, %v6798_v31  ;;  %v6810_v31 = vld [vmem:[%s12732_s0 + $0x80] sm:$0xff]  }
 0x3a6   :  { %v3394_v3 = vpop.f32.mrf.mxu1 }
 0x3a8   :  { %v9728_v6 = vpop.f32.mrf.mxu1 }
 0x3aa   :  { %v3399_v44 = vpop.f32.mrf.mxu1 }
 0x3ac   :  { %v9730_v38 = vpop.f32.mrf.mxu1  ;;  %6627 = vmatmul.mubr.msk.bf16.gmra.mxu1 %vm302_vm0, %v6799_v25 }
 0x3ad   :  { %6630 = vmatprep.mubr.msk.bf16.mxu1 %vm302_vm0, %v6800_v34 }
 0x3ae   :  { %v3402_v9 = vpop.f32.mrf.mxu1 }
 0x3b0   :  { %v9740_v4 = vpop.f32.mrf.mxu1 }
 0x3b2   :  { %v3407_v15 = vpop.f32.mrf.mxu1 }
 0x3b4   :  { %v9742_v47 = vpop.f32.mrf.mxu1  ;;  %6631 = vmatmul.mubr.msk.bf16.gmra.mxu1 %vm302_vm0, %v6801_v27 }
 0x3b5   :  { %6634 = vmatprep.mubr.msk.bf16.mxu1 %vm302_vm0, %v6802_v50 }
 0x3b6   :  { %v3410_v41 = vpop.f32.mrf.mxu1 }
 0x3b8   :  { %v9752_v40 = vpop.f32.mrf.mxu1 }
 0x3ba   :  { %v3415_v58 = vpop.f32.mrf.mxu1 }
 0x3bc   :  { %v9754_v20 = vpop.f32.mrf.mxu1  ;;  %6635 = vmatmul.mubr.msk.bf16.gmra.mxu1 %vm302_vm0, %v6803_v32 }
 0x3bd   :  { %v3317_v48 = vpop.f32.mrf.mxu0  ;;  %6638 = vmatprep.mubr.msk.bf16.mxu1 %vm302_vm0, %v6804_v1 }
 0x3be   :  { %v3418_v2 = vpop.f32.mrf.mxu1 }
 0x3bf   :  { %v3319_v61 = vpop.f32.mrf.mxu0 }
 0x3c0   :  { %v9764_v33 = vpop.f32.mrf.mxu1  ;;  %v6812_v61 = vld [vmem:[%s12732_s0 + $0x90] sm:$0xff]  }
 0x3c1   :  { %v3320_v17 = vpop.f32.mrf.mxu0 }
 0x3c2   :  { %v3423_v53 = vpop.f32.mrf.mxu1 }
 0x3c3   :  { %v3322_v63 = vpop.f32.mrf.mxu0 }
 0x3c4   :  { %v9766_v29 = vpop.f32.mrf.mxu1  ;;  %6639 = vmatmul.mubr.msk.bf16.gmra.mxu1 %vm302_vm0, %v6805_v51 }
 0x3c5   :  { %v3325_v56 = vpop.f32.mrf.mxu0  ;;  %6642 = vmatprep.mubr.msk.bf16.mxu1 %vm302_vm0, %v6806_v37 }
 0x3c6   :  { %v3426_v21 = vpop.f32.mrf.mxu1 }
 0x3c7   :  { %v3327_v49 = vpop.f32.mrf.mxu0 }
 0x3c8   :  { %v9776_v19 = vpop.f32.mrf.mxu1 }
 0x3c9   :  { %v3328_v42 = vpop.f32.mrf.mxu0 }
 0x3ca   :  { %v3431_v45 = vpop.f32.mrf.mxu1 }
 0x3cb   :  { %v3330_v57 = vpop.f32.mrf.mxu0 }
 0x3cc   :  { %v9778_v13 = vpop.f32.mrf.mxu1  ;;  %6643 = vmatmul.mubr.msk.bf16.gmra.mxu1 %vm302_vm0, %v6807_v5 }
 0x3cd   :  { %v3333_v26 = vpop.f32.mrf.mxu0  ;;  %6646 = vmatprep.mubr.msk.bf16.mxu1 %vm302_vm0, %v6808_v43 }
 0x3ce   :  { %v3434_v22 = vpop.f32.mrf.mxu1 }
 0x3cf   :  { %v3335_v14 = vpop.f32.mrf.mxu0 }
 0x3d0   :  { %v9788_v62 = vpop.f32.mrf.mxu1 }
 0x3d1   :  { %v3336_v18 = vpop.f32.mrf.mxu0 }
 0x3d2   :  { %v3439_v12 = vpop.f32.mrf.mxu1 }
 0x3d3   :  { %v3338_v8 = vpop.f32.mrf.mxu0 }
 0x3d4   :  { %v9793_v16 = vpop.f32.mrf.mxu1  ;;  %6647 = vmatmul.mubr.msk.bf16.gmra.mxu1 %vm302_vm0, %v6809_v7 }
 0x3d5   :  { %v6480_v55 = vpop.f32.mrf.mxu0  ;;  %6650 = vmatprep.mubr.msk.bf16.mxu1 %vm302_vm0, %v6810_v31 }
 0x3d6   :  { %v3442_v3 = vpop.f32.mrf.mxu1  ;;  %v9807_v15 = vadd.f32 %v6480_v55, %v3325_v56 }
 0x3d7   :  { %v3606_v44 = vpop.f32.mrf.mxu0 }
 0x3d8   :  { %v9803_v25 = vadd.f32 %v3606_v44, %v3317_v48  ;;  %v9805_v34 = vpop.f32.mrf.mxu1  ;;  %v6811_v48 = vld [vmem:[%s12732_s0 + $0x88] sm:$0xff]   ;;  %v3997_v53 = vmul.f32 %v9807_v15, %v9807_v15  ;;  %v3864_v37 = vsel %vm688_vm1, %v9807_v15, 0.0 }
 0x3d9   :  { %v6481_v9 = vpop.f32.mrf.mxu0 }
 0x3da   :  { %v3447_v27 = vpop.f32.mrf.mxu1  ;;  %v3995_v41 = vmul.f32 %v9803_v25, %v9803_v25  ;;  %v9811_v58 = vadd.f32 %v6481_v9, %v3328_v42  ;;  %v4062_v8 = vsel %vm688_vm1, %v3997_v53, 0.0 }
 0x3db   :  { %v3609_v50 = vpop.f32.mrf.mxu0 }
 0x3dc   :  { %v9813_v32 = vadd.f32 %v3609_v50, %v3320_v17  ;;  %v9815_v1 = vpop.f32.mrf.mxu1  ;;  %6651 = vmatmul.mubr.msk.bf16.gmra.mxu1 %vm302_vm0, %v6811_v48  ;;  %v3861_v17 = vsel %vm688_vm1, %v9803_v25, 0.0  ;;  %v4059_v42 = vsel %vm688_vm1, %v3995_v41, 0.0  ;;  %v3998_v45 = vmul.f32 %v9811_v58, %v9811_v58 }
 0x3dd   :  { %v6484_v2 = vpop.f32.mrf.mxu0  ;;  %6654 = vmatprep.mubr.msk.bf16.mxu1 %vm302_vm0, %v6812_v61  ;;  %v3866_v46 = vsel %vm688_vm1, %v9811_v58, 0.0 }
 0x3de   :  { %v3862_v63 = vsel %vm688_vm1, %v9813_v32, 0.0  ;;  %v3996_v51 = vmul.f32 %v9813_v32, %v9813_v32  ;;  %v3450_v56 = vpop.f32.mrf.mxu1  ;;  %v9847_v7 = vadd.f32 %v6484_v2, %v9628_v59  ;;  %v4064_v9 = vsel %vm688_vm1, %v3998_v45, 0.0  ;;  %v6813_v59 = vld [vmem:[%s12732_s0 + $0x98] sm:$0xff]  }
 0x3df   :  { %v3863_v21 = vadd.f32 %v3862_v63, %v3861_v17  ;;  %v3622_v49 = vpop.f32.mrf.mxu0  ;;  %v6814_v17 = vld [vmem:[%s12732_s0 + $0xa0] sm:$0xff]  }
 0x3e0   :  { %v4060_v57 = vsel %vm688_vm1, %v3996_v51, 0.0  ;;  %v9839_v5 = vadd.f32 %v3622_v49, %v3333_v26 }
 0x3e1   :  { %v3865_v43 = vadd.f32 %v3864_v37, %v3863_v21  ;;  %v4061_v22 = vadd.f32 %v4060_v57, %v4059_v42  ;;  %v6485_v14 = vpop.f32.mrf.mxu0  ;;  %v9841_v12 = vpop.f32.mrf.mxu1  ;;  %v3872_v42 = vsel %vm688_vm1, %v9847_v7, 0.0 }
 0x3e2   :  { %v3999_v55 = vmul.f32 %v9839_v5, %v9839_v5  ;;  %v3868_v27 = vsel %vm688_vm1, %v9839_v5, 0.0  ;;  %v9855_v50 = vadd.f32 %v6485_v14, %v9634_v11  ;;  %v4001_v11 = vmul.f32 %v9847_v7, %v9847_v7 }
 0x3e3   :  { %v4063_v31 = vadd.f32 %v4062_v8, %v4061_v22  ;;  %v3867_v3 = vadd.f32 %v3866_v46, %v3865_v43  ;;  %v3625_v26 = vpop.f32.mrf.mxu0  ;;  %v3455_v44 = vpop.f32.mrf.mxu1 }
 0x3e4   :  { %v9857_v41 = vadd.f32 %v3625_v26, %v3336_v18  ;;  %6655 = vmatmul.mubr.msk.bf16.gmra.mxu1 %vm302_vm0, %v6813_v59  ;;  %v4066_v18 = vsel %vm688_vm1, %v3999_v55, 0.0  ;;  %v4002_v45 = vmul.f32 %v9855_v50, %v9855_v50  ;;  %v4070_v46 = vsel %vm688_vm1, %v4001_v11, 0.0 }
 0x3e5   :  { %v3869_v48 = vadd.f32 %v3868_v27, %v3867_v3  ;;  %v4065_v2 = vadd.f32 %v4064_v9, %v4063_v31  ;;  %v6488_v61 = vpop.f32.mrf.mxu0  ;;  %v9863_v53 = vpop.f32.mrf.mxu1  ;;  %6658 = vmatprep.mubr.msk.bf16.mxu1 %vm302_vm0, %v6814_v17  ;;  %v3874_v55 = vsel %vm688_vm1, %v9855_v50, 0.0 }
 0x3e6   :  { %v3870_v63 = vsel %vm688_vm1, %v9857_v41, 0.0  ;;  %v4000_v51 = vmul.f32 %v9857_v41, %v9857_v41  ;;  %v9888_v31 = vadd.f32 %v6488_v61, %v9660_v23  ;;  %v4072_v27 = vsel %vm688_vm1, %v4002_v45, 0.0  ;;  %v6815_v61 = vld [vmem:[%s12732_s0 + $0xa8] sm:$0xff]  }
 0x3e7   :  { %v4067_v56 = vadd.f32 %v4066_v18, %v4065_v2  ;;  %v3871_v37 = vadd.f32 %v3870_v63, %v3869_v48  ;;  %v3638_v21 = vpop.f32.mrf.mxu0  ;;  %v3458_v49 = vpop.f32.mrf.mxu1  ;;  %v6816_v63 = vld [vmem:[%s12732_s0 + $0xb0] sm:$0xff]  }
 0x3e8   :  { %v4068_v57 = vsel %vm688_vm1, %v4000_v51, 0.0  ;;  %v9882_v43 = vadd.f32 %v3638_v21, %v9644_v10  ;;  %v3880_v45 = vsel %vm688_vm1, %v9888_v31, 0.0 }
 0x3e9   :  { %v3873_v22 = vadd.f32 %v3872_v42, %v3871_v37  ;;  %v4069_v14 = vadd.f32 %v4068_v57, %v4067_v56  ;;  %v6489_v8 = vpop.f32.mrf.mxu0 }
 0x3ea   :  { %v4003_v3 = vmul.f32 %v9882_v43, %v9882_v43  ;;  %v9892_v26 = vpop.f32.mrf.mxu1  ;;  %v3876_v59 = vsel %vm688_vm1, %v9882_v43, 0.0  ;;  %v9898_v48 = vadd.f32 %v6489_v8, %v9666_v28 }
 0x3eb   :  { %v4071_v44 = vadd.f32 %v4070_v46, %v4069_v14  ;;  %v3875_v9 = vadd.f32 %v3874_v55, %v3873_v22  ;;  %v3641_v10 = vpop.f32.mrf.mxu0 }
 0x3ec   :  { %13252 = vst [vmem:[#allocation91_spill] sm:$0xff] %v9898_v48  ;;  %v9901_v2 = vadd.f32 %v3641_v10, %v9650_v52  ;;  %v3463_v23 = vpop.f32.mrf.mxu1  ;;  %6659 = vmatmul.mubr.msk.bf16.gmra.mxu1 %vm302_vm0, %v6815_v61  ;;  %v4005_v52 = vmul.f32 %v9888_v31, %v9888_v31  ;;  %v4074_v28 = vsel %vm688_vm1, %v4003_v3, 0.0  ;;  %v4006_v57 = vmul.f32 %v9898_v48, %v9898_v48 }
 0x3ed   :  { %v3877_v17 = vadd.f32 %v3876_v59, %v3875_v9  ;;  %v4073_v11 = vadd.f32 %v4072_v27, %v4071_v44  ;;  %v6492_v18 = vpop.f32.mrf.mxu0  ;;  %6662 = vmatprep.mubr.msk.bf16.mxu1 %vm302_vm0, %v6816_v63  ;;  %v3882_v9 = vsel %vm688_vm1, %v9898_v48, 0.0 }
 0x3ee   :  { %v3878_v51 = vsel %vm688_vm1, %v9901_v2, 0.0  ;;  %v4004_v56 = vmul.f32 %v9901_v2, %v9901_v2  ;;  %v9918_v37 = vpop.f32.mrf.mxu1  ;;  %v4078_v44 = vsel %vm688_vm1, %v4005_v52, 0.0  ;;  %v9932_v10 = vadd.f32 %v6492_v18, %v9691_v35  ;;  %v6817_v18 = vld [vmem:[%s12732_s0 + $0xb8] sm:$0xff]  }
 0x3ef   :  { %v4075_v21 = vadd.f32 %v4074_v28, %v4073_v11  ;;  %v3879_v49 = vadd.f32 %v3878_v51, %v3877_v17  ;;  %v3654_v42 = vpop.f32.mrf.mxu0  ;;  %v4080_v17 = vsel %vm688_vm1, %v4006_v57, 0.0 }
 0x3f0   :  { %v4076_v22 = vsel %vm688_vm1, %v4004_v56, 0.0  ;;  %v9926_v14 = vadd.f32 %v3654_v42, %v9676_v54  ;;  %v3466_v8 = vpop.f32.mrf.mxu1  ;;  %13254 = vst [vmem:[#allocation50_spill] sm:$0xff] %v9932_v10 }
 0x3f1   :  { %v3881_v46 = vadd.f32 %v3880_v45, %v3879_v49  ;;  %v4077_v55 = vadd.f32 %v4076_v22, %v4075_v21  ;;  %v6493_v3 = vpop.f32.mrf.mxu0  ;;  %v6818_v21 = vld [vmem:[%s12732_s0 + $0xc0] sm:$0xff]  }
 0x3f2   :  { %13253 = vst [vmem:[#allocation12_spill] sm:$0xff] %v9926_v14  ;;  %v4007_v27 = vmul.f32 %v9926_v14, %v9926_v14  ;;  %v9936_v59 = vpop.f32.mrf.mxu1  ;;  %v3884_v11 = vsel %vm688_vm1, %v9926_v14, 0.0  ;;  %v9942_v63 = vadd.f32 %v6493_v3, %v9698_v36 }
 0x3f3   :  { %v4079_v23 = vadd.f32 %v4078_v44, %v4077_v55  ;;  %v3883_v54 = vadd.f32 %v3882_v9, %v3881_v46  ;;  %v3657_v61 = vpop.f32.mrf.mxu0  ;;  %v3888_v46 = vsel %vm688_vm1, %v9932_v10, 0.0 }
 0x3f4   :  { %13255 = vst [vmem:[#allocation56_spill] sm:$0xff] %v9942_v63  ;;  %v9945_v52 = vadd.f32 %v3657_v61, %v9683_v0  ;;  %v3471_v35 = vpop.f32.mrf.mxu1  ;;  %6663 = vmatmul.mubr.msk.bf16.gmra.mxu1 %vm302_vm0, %v6817_v18  ;;  %v4009_v0 = vmul.f32 %v9932_v10, %v9932_v10  ;;  %v4082_v36 = vsel %vm688_vm1, %v4007_v27, 0.0  ;;  %v4010_v55 = vmul.f32 %v9942_v63, %v9942_v63 }
 0x3f5   :  { %v3885_v28 = vadd.f32 %v3884_v11, %v3883_v54  ;;  %v4081_v51 = vadd.f32 %v4080_v17, %v4079_v23  ;;  %v6496_v56 = vpop.f32.mrf.mxu0  ;;  %6666 = vmatprep.mubr.msk.bf16.mxu1 %vm302_vm0, %v6818_v21  ;;  %v3890_v17 = vsel %vm688_vm1, %v9942_v63, 0.0 }
 0x3f6   :  { %13256 = vst [vmem:[#allocation16_spill] sm:$0xff] %v9945_v52  ;;  %v3886_v49 = vsel %vm688_vm1, %v9945_v52, 0.0  ;;  %v4008_v42 = vmul.f32 %v9945_v52, %v9945_v52  ;;  %v9962_v45 = vpop.f32.mrf.mxu1  ;;  %v4086_v61 = vsel %vm688_vm1, %v4009_v0, 0.0  ;;  %v9976_v11 = vadd.f32 %v6496_v56, %v9716_v24  ;;  %v6819_v56 = vld [vmem:[%s12732_s0 + $0xc8] sm:$0xff]  }
 0x3f7   :  { %v4083_v57 = vadd.f32 %v4082_v36, %v4081_v51  ;;  %v3887_v22 = vadd.f32 %v3886_v49, %v3885_v28  ;;  %v3670_v8 = vpop.f32.mrf.mxu0  ;;  %v4088_v21 = vsel %vm688_vm1, %v4010_v55, 0.0 }
 0x3f8   :  { %v4084_v3 = vsel %vm688_vm1, %v4008_v42, 0.0  ;;  %v9970_v44 = vadd.f32 %v3670_v8, %v9704_v30  ;;  %v3474_v9 = vpop.f32.mrf.mxu1  ;;  %13258 = vst [vmem:[#allocation80_spill] sm:$0xff] %v9976_v11  ;;  %v6820_v8 = vld [vmem:[%s12732_s0 + $0xd0] sm:$0xff]  }
 0x3f9   :  { %v3889_v27 = vadd.f32 %v3888_v46, %v3887_v22  ;;  %v4085_v23 = vadd.f32 %v4084_v3, %v4083_v57  ;;  %v6497_v54 = vpop.f32.mrf.mxu0 }
 0x3fa   :  { %13257 = vst [vmem:[#allocation93_spill] sm:$0xff] %v9970_v44  ;;  %v4011_v35 = vmul.f32 %v9970_v44, %v9970_v44  ;;  %v9980_v18 = vpop.f32.mrf.mxu1  ;;  %v3892_v36 = vsel %vm688_vm1, %v9970_v44, 0.0  ;;  %v9986_v0 = vadd.f32 %v6497_v54, %v9718_v60  ;;  %v3896_v54 = vsel %vm688_vm1, %v9976_v11, 0.0 }
 0x3fb   :  { %v4087_v28 = vadd.f32 %v4086_v61, %v4085_v23  ;;  %v3891_v30 = vadd.f32 %v3890_v17, %v3889_v27  ;;  %v3673_v51 = vpop.f32.mrf.mxu0 }
 0x3fc   :  { %13259 = vst [vmem:[#allocation94_spill] sm:$0xff] %v9986_v0  ;;  %v9989_v49 = vadd.f32 %v3673_v51, %v9706_v39  ;;  %v3479_v24 = vpop.f32.mrf.mxu1  ;;  %6667 = vmatmul.mubr.msk.bf16.gmra.mxu1 %vm302_vm0, %v6819_v56  ;;  %v4013_v39 = vmul.f32 %v9976_v11, %v9976_v11  ;;  %v4090_v60 = vsel %vm688_vm1, %v4011_v35, 0.0  ;;  %v4014_v61 = vmul.f32 %v9986_v0, %v9986_v0 }
 0x3fd   :  { %v3893_v42 = vadd.f32 %v3892_v36, %v3891_v30  ;;  %v4089_v57 = vadd.f32 %v4088_v21, %v4087_v28  ;;  %v6500_v22 = vpop.f32.mrf.mxu0  ;;  %6670 = vmatprep.mubr.msk.bf16.mxu1 %vm302_vm0, %v6820_v8  ;;  %v3898_v24 = vsel %vm688_vm1, %v9986_v0, 0.0 }
 0x3fe   :  { %13260 = vst [vmem:[#allocation53_spill] sm:$0xff] %v9989_v49  ;;  %v3894_v46 = vsel %vm688_vm1, %v9989_v49, 0.0  ;;  %v4012_v55 = vmul.f32 %v9989_v49, %v9989_v49  ;;  %v10006_v3 = vpop.f32.mrf.mxu1  ;;  %v4094_v36 = vsel %vm688_vm1, %v4013_v39, 0.0  ;;  %v10020_v56 = vadd.f32 %v6500_v22, %v9740_v4  ;;  %v6821_v22 = vld [vmem:[%s12732_s0 + $0xd8] sm:$0xff]  }
 0x3ff   :  { %v4091_v9 = vadd.f32 %v4090_v60, %v4089_v57  ;;  %v3895_v27 = vadd.f32 %v3894_v46, %v3893_v42  ;;  %v3686_v23 = vpop.f32.mrf.mxu0  ;;  %v4096_v46 = vsel %vm688_vm1, %v4014_v61, 0.0  ;;  %v6822_v61 = vld [vmem:[%s12732_s0 + $0xe0] sm:$0xff]  }
 0x400   :  { %v4092_v17 = vsel %vm688_vm1, %v4012_v55, 0.0  ;;  %v10014_v35 = vadd.f32 %v3686_v23, %v9728_v6  ;;  %v3482_v28 = vpop.f32.mrf.mxu1  ;;  %13262 = vst [vmem:[#allocation29_spill] sm:$0xff] %v10020_v56 }
 0x401   :  { %v3897_v30 = vadd.f32 %v3896_v54, %v3895_v27  ;;  %v4093_v51 = vadd.f32 %v4092_v17, %v4091_v9  ;;  %v6501_v21 = vpop.f32.mrf.mxu0 }
 0x402   :  { %13261 = vst [vmem:[#allocation60_spill] sm:$0xff] %v10014_v35  ;;  %v4015_v42 = vmul.f32 %v10014_v35, %v10014_v35  ;;  %v10024_v57 = vpop.f32.mrf.mxu1  ;;  %v3900_v55 = vsel %vm688_vm1, %v10014_v35, 0.0  ;;  %v10030_v39 = vadd.f32 %v6501_v21, %v9742_v47 }
 0x403   :  { %v4095_v8 = vadd.f32 %v4094_v36, %v4093_v51  ;;  %v3899_v6 = vadd.f32 %v3898_v24, %v3897_v30  ;;  %v3689_v60 = vpop.f32.mrf.mxu0  ;;  %v3904_v24 = vsel %vm688_vm1, %v10020_v56, 0.0 }
 0x404   :  { %13263 = vst [vmem:[#allocation95_spill] sm:$0xff] %v10030_v39  ;;  %v10033_v9 = vadd.f32 %v3689_v60, %v9730_v38  ;;  %v3487_v4 = vpop.f32.mrf.mxu1  ;;  %6671 = vmatmul.mubr.msk.bf16.gmra.mxu1 %vm302_vm0, %v6821_v22  ;;  %v4017_v38 = vmul.f32 %v10020_v56, %v10020_v56  ;;  %v4098_v47 = vsel %vm688_vm1, %v4015_v42, 0.0 }
 0x405   :  { %v3901_v27 = vadd.f32 %v3900_v55, %v3899_v6  ;;  %v4097_v23 = vadd.f32 %v4096_v46, %v4095_v8  ;;  %v6504_v54 = vpop.f32.mrf.mxu0  ;;  %6674 = vmatprep.mubr.msk.bf16.mxu1 %vm302_vm0, %v6822_v61  ;;  %v4018_v8 = vmul.f32 %v10030_v39, %v10030_v39 }
 0x406   :  { %13264 = vst [vmem:[#allocation85_spill] sm:$0xff] %v10033_v9  ;;  %v3902_v17 = vsel %vm688_vm1, %v10033_v9, 0.0  ;;  %v4016_v28 = vmul.f32 %v10033_v9, %v10033_v9  ;;  %v10050_v30 = vpop.f32.mrf.mxu1  ;;  %v4102_v22 = vsel %vm688_vm1, %v4017_v38, 0.0 }
 0x407   :  { %v4099_v51 = vadd.f32 %v4098_v47, %v4097_v23  ;;  %v3903_v21 = vadd.f32 %v3902_v17, %v3901_v27  ;;  %v3702_v36 = vpop.f32.mrf.mxu0  ;;  %v3906_v27 = vsel %vm688_vm1, %v10030_v39, 0.0  ;;  %v10064_v23 = vadd.f32 %v6504_v54, %v9764_v33  ;;  %v6823_v54 = vld [vmem:[%s12732_s0 + $0xe8] sm:$0xff]  }
 0x408   :  { %v4100_v6 = vsel %vm688_vm1, %v4016_v28, 0.0  ;;  %v10058_v42 = vadd.f32 %v3702_v36, %v9752_v40  ;;  %v3490_v60 = vpop.f32.mrf.mxu1 }
 0x409   :  { %v3905_v46 = vadd.f32 %v3904_v24, %v3903_v21  ;;  %v4101_v55 = vadd.f32 %v4100_v6, %v4099_v51  ;;  %v6505_v4 = vpop.f32.mrf.mxu0  ;;  %13266 = vst [vmem:[#allocation34_spill] sm:$0xff] %v10064_v23  ;;  %v4104_v21 = vsel %vm688_vm1, %v4018_v8, 0.0  ;;  %v6824_v8 = vld [vmem:[%s12732_s0 + $0xf0] sm:$0xff]  }
 0x40a   :  { %13265 = vst [vmem:[#allocation96_spill] sm:$0xff] %v10058_v42  ;;  %v4019_v61 = vmul.f32 %v10058_v42, %v10058_v42  ;;  %v10068_v47 = vpop.f32.mrf.mxu1  ;;  %v3908_v51 = vsel %vm688_vm1, %v10058_v42, 0.0  ;;  %v10074_v38 = vadd.f32 %v6505_v4, %v9766_v29 }
 0x40b   :  { %v4103_v17 = vadd.f32 %v4102_v22, %v4101_v55  ;;  %v3907_v40 = vadd.f32 %v3906_v27, %v3905_v46  ;;  %v3705_v28 = vpop.f32.mrf.mxu0 }
 0x40c   :  { %13267 = vst [vmem:[#allocation55_spill] sm:$0xff] %v10074_v38  ;;  %v10077_v36 = vadd.f32 %v3705_v28, %v9754_v20  ;;  %v3495_v33 = vpop.f32.mrf.mxu1  ;;  %6675 = vmatmul.mubr.msk.bf16.gmra.mxu1 %vm302_vm0, %v6823_v54  ;;  %v4021_v20 = vmul.f32 %v10064_v23, %v10064_v23  ;;  %v4106_v29 = vsel %vm688_vm1, %v4019_v61, 0.0  ;;  %v4022_v28 = vmul.f32 %v10074_v38, %v10074_v38 }
 0x40d   :  { %v3909_v24 = vadd.f32 %v3908_v51, %v3907_v40  ;;  %v4105_v6 = vadd.f32 %v4104_v21, %v4103_v17  ;;  %v6508_v60 = vpop.f32.mrf.mxu0  ;;  %6678 = vmatprep.mubr.msk.bf16.mxu1 %vm302_vm0, %v6824_v8  ;;  %v3912_v40 = vsel %vm688_vm1, %v10064_v23, 0.0 }
 0x40e   :  { %13268 = vst [vmem:[#allocation62_spill] sm:$0xff] %v10077_v36  ;;  %v3910_v46 = vsel %vm688_vm1, %v10077_v36, 0.0  ;;  %v4020_v55 = vmul.f32 %v10077_v36, %v10077_v36  ;;  %v10094_v4 = vpop.f32.mrf.mxu1  ;;  %v4110_v36 = vsel %vm688_vm1, %v4021_v20, 0.0 }
 0x40f   :  { %v4107_v22 = vadd.f32 %v4106_v29, %v4105_v6  ;;  %v3911_v27 = vadd.f32 %v3910_v46, %v3909_v24  ;;  %v3718_v17 = vpop.f32.mrf.mxu0  ;;  %v3914_v24 = vsel %vm688_vm1, %v10074_v38, 0.0  ;;  %v10108_v6 = vadd.f32 %v6508_v60, %v9788_v62  ;;  %v6825_v60 = vld [vmem:[%s12732_s0 + $0xf8] sm:$0xff]  }
 0x410   :  { %v4108_v21 = vsel %vm688_vm1, %v4020_v55, 0.0  ;;  %v10102_v61 = vadd.f32 %v3718_v17, %v9776_v19  ;;  %v3498_v51 = vpop.f32.mrf.mxu1 }
 0x411   :  { %v3913_v33 = vadd.f32 %v3912_v40, %v3911_v27  ;;  %v4109_v54 = vadd.f32 %v4108_v21, %v4107_v22  ;;  %v6509_v8 = vpop.f32.mrf.mxu0  ;;  %13270 = vst [vmem:[#allocation88_spill] sm:$0xff] %v10108_v6  ;;  %v4112_v27 = vsel %vm688_vm1, %v4022_v28, 0.0  ;;  %v4025_v28 = vmul.f32 %v10108_v6, %v10108_v6 }
 0x412   :  { %13269 = vst [vmem:[#allocation13_spill] sm:$0xff] %v10102_v61  ;;  %v4023_v29 = vmul.f32 %v10102_v61, %v10102_v61  ;;  %v10112_v46 = vpop.f32.mrf.mxu1  ;;  %v3916_v22 = vsel %vm688_vm1, %v10102_v61, 0.0  ;;  %v10118_v20 = vadd.f32 %v6509_v8, %v9793_v16 }
 0x413   :  { %v4111_v55 = vadd.f32 %v4110_v36, %v4109_v54  ;;  %v3915_v19 = vadd.f32 %v3914_v24, %v3913_v33  ;;  %v3721_v17 = vpop.f32.mrf.mxu0  ;;  %v4118_v61 = vsel %vm688_vm1, %v4025_v28, 0.0 }
 0x414   :  { %13271 = vst [vmem:[#allocation59_spill] sm:$0xff] %v10118_v20  ;;  %v10121_v40 = vadd.f32 %v3721_v17, %v9778_v13  ;;  %v3503_v62 = vpop.f32.mrf.mxu1  ;;  %6679 = vmatmul.mubr.msk.bf16.gmra.mxu1 %vm302_vm0, %v6825_v60  ;;  %v4114_v33 = vsel %vm688_vm1, %v4023_v29, 0.0 }
 0x415   :  { %v3917_v36 = vadd.f32 %v3916_v22, %v3915_v19  ;;  %v4113_v21 = vadd.f32 %v4112_v27, %v4111_v55  ;;  %v6512_v51 = vpop.f32.mrf.mxu0  ;;  %v3920_v55 = vsel %vm688_vm1, %v10108_v6, 0.0  ;;  %v4026_v19 = vmul.f32 %v10118_v20, %v10118_v20 }
 0x416   :  { %13272 = vst [vmem:[#allocation64_spill] sm:$0xff] %v10121_v40  ;;  %v3918_v16 = vsel %vm688_vm1, %v10121_v40, 0.0  ;;  %v4024_v13 = vmul.f32 %v10121_v40, %v10121_v40  ;;  %v10134_v54 = vpop.f32.mrf.mxu1 }
 0x417   :  { %v4115_v8 = vadd.f32 %v4114_v33, %v4113_v21  ;;  %v3919_v24 = vadd.f32 %v3918_v16, %v3917_v36  ;;  %v3734_v17 = vpop.f32.mrf.mxu0  ;;  %v3922_v36 = vsel %vm688_vm1, %v10118_v20, 0.0  ;;  %v10148_v21 = vadd.f32 %v6512_v51, %v9841_v12 }
 0x418   :  { %v4116_v27 = vsel %vm688_vm1, %v4024_v13, 0.0  ;;  %v10142_v29 = vadd.f32 %v3734_v17, %v9805_v34  ;;  %v3506_v22 = vpop.f32.mrf.mxu1 }
 0x419   :  { %v3921_v62 = vadd.f32 %v3920_v55, %v3919_v24  ;;  %v4117_v60 = vadd.f32 %v4116_v27, %v4115_v8  ;;  %v6513_v40 = vpop.f32.mrf.mxu0  ;;  %v4120_v24 = vsel %vm688_vm1, %v4026_v19, 0.0 }
 0x41a   :  { %13273 = vst [vmem:[#allocation15_spill] sm:$0xff] %v10142_v29  ;;  %v4027_v33 = vmul.f32 %v10142_v29, %v10142_v29  ;;  %v10152_v16 = vpop.f32.mrf.mxu1  ;;  %v3924_v8 = vsel %vm688_vm1, %v10142_v29, 0.0  ;;  %v10158_v28 = vadd.f32 %v6513_v40, %v9863_v53 }
 0x41b   :  { %v4119_v13 = vadd.f32 %v4118_v61, %v4117_v60  ;;  %v3923_v34 = vadd.f32 %v3922_v36, %v3921_v62  ;;  %v3737_v17 = vpop.f32.mrf.mxu0  ;;  %v4029_v61 = vmul.f32 %v10148_v21, %v10148_v21 }
 0x41c   :  { %v10161_v55 = vadd.f32 %v3737_v17, %v9815_v1  ;;  %v3511_v12 = vpop.f32.mrf.mxu1  ;;  %v4122_v62 = vsel %vm688_vm1, %v4027_v33, 0.0 }
 0x41d   :  { %v3925_v51 = vadd.f32 %v3924_v8, %v3923_v34  ;;  %v4121_v27 = vadd.f32 %v4120_v24, %v4119_v13  ;;  %v6516_v22 = vpop.f32.mrf.mxu0  ;;  %v3928_v13 = vsel %vm688_vm1, %v10148_v21, 0.0  ;;  %v4030_v34 = vmul.f32 %v10158_v28, %v10158_v28 }
 0x41e   :  { %13274 = vst [vmem:[#allocation90_spill] sm:$0xff] %v10161_v55  ;;  %v3926_v19 = vsel %vm688_vm1, %v10161_v55, 0.0  ;;  %v4028_v60 = vmul.f32 %v10161_v55, %v10161_v55  ;;  %v10170_v53 = vpop.f32.mrf.mxu1  ;;  %v4126_v29 = vsel %vm688_vm1, %v4029_v61, 0.0 }
 0x41f   :  { %v4123_v40 = vadd.f32 %v4122_v62, %v4121_v27  ;;  %v3927_v1 = vadd.f32 %v3926_v19, %v3925_v51  ;;  %v3750_v36 = vpop.f32.mrf.mxu0  ;;  %v3930_v51 = vsel %vm688_vm1, %v10158_v28, 0.0  ;;  %v10184_v27 = vadd.f32 %v6516_v22, %v9936_v59 }
 0x420   :  { %v4124_v17 = vsel %vm688_vm1, %v4028_v60, 0.0  ;;  %v10178_v33 = vadd.f32 %v3750_v36, %v9892_v26  ;;  %v3514_v24 = vpop.f32.mrf.mxu1 }
 0x421   :  { %v3929_v8 = vadd.f32 %v3928_v13, %v3927_v1  ;;  %v4125_v12 = vadd.f32 %v4124_v17, %v4123_v40  ;;  %v6517_v55 = vpop.f32.mrf.mxu0  ;;  %v4128_v1 = vsel %vm688_vm1, %v4030_v34, 0.0 }
 0x422   :  { %v4031_v62 = vmul.f32 %v10178_v33, %v10178_v33  ;;  %v10188_v19 = vpop.f32.mrf.mxu1  ;;  %v3932_v40 = vsel %vm688_vm1, %v10178_v33, 0.0  ;;  %v10194_v61 = vadd.f32 %v6517_v55, %v9962_v45 }
 0x423   :  { %v4127_v60 = vadd.f32 %v4126_v29, %v4125_v12  ;;  %v3931_v26 = vadd.f32 %v3930_v51, %v3929_v8  ;;  %v3753_v36 = vpop.f32.mrf.mxu0  ;;  %v4033_v29 = vmul.f32 %v10184_v27, %v10184_v27 }
 0x424   :  { %v10197_v13 = vadd.f32 %v3753_v36, %v9918_v37  ;;  %v3519_v59 = vpop.f32.mrf.mxu1  ;;  %v4130_v8 = vsel %vm688_vm1, %v4031_v62, 0.0 }
 0x425   :  { %v3933_v22 = vadd.f32 %v3932_v40, %v3931_v26  ;;  %v4129_v17 = vadd.f32 %v4128_v1, %v4127_v60  ;;  %v6520_v24 = vpop.f32.mrf.mxu0  ;;  %v3936_v60 = vsel %vm688_vm1, %v10184_v27, 0.0  ;;  %v4034_v26 = vmul.f32 %v10194_v61, %v10194_v61 }
 0x426   :  { %v3934_v34 = vsel %vm688_vm1, %v10197_v13, 0.0  ;;  %v4032_v12 = vmul.f32 %v10197_v13, %v10197_v13  ;;  %v10206_v45 = vpop.f32.mrf.mxu1  ;;  %v4134_v6 = vsel %vm688_vm1, %v4033_v29, 0.0 }
 0x427   :  { %v4131_v55 = vadd.f32 %v4130_v8, %v4129_v17  ;;  %v3935_v37 = vadd.f32 %v3934_v34, %v3933_v22  ;;  %v3766_v51 = vpop.f32.mrf.mxu0  ;;  %v3938_v22 = vsel %vm688_vm1, %v10194_v61, 0.0  ;;  %v10220_v17 = vadd.f32 %v6520_v24, %v10024_v57 }
 0x428   :  { %v4132_v36 = vsel %vm688_vm1, %v4032_v12, 0.0  ;;  %v10214_v62 = vadd.f32 %v3766_v51, %v9980_v18  ;;  %v3522_v1 = vpop.f32.mrf.mxu1 }
 0x429   :  { %v3937_v40 = vadd.f32 %v3936_v60, %v3935_v37  ;;  %v4133_v59 = vadd.f32 %v4132_v36, %v4131_v55  ;;  %v6521_v20 = vpop.f32.mrf.mxu0  ;;  %v4136_v37 = vsel %vm688_vm1, %v4034_v26, 0.0 }
 0x42a   :  { %v4035_v8 = vmul.f32 %v10214_v62, %v10214_v62  ;;  %v10224_v34 = vpop.f32.mrf.mxu1  ;;  %v3940_v55 = vsel %vm688_vm1, %v10214_v62, 0.0  ;;  %v10230_v29 = vadd.f32 %v6521_v20, %v10050_v30 }
 0x42b   :  { %v4135_v12 = vadd.f32 %v4134_v6, %v4133_v59  ;;  %v3939_v18 = vadd.f32 %v3938_v22, %v3937_v40  ;;  %v3769_v51 = vpop.f32.mrf.mxu0  ;;  %v4037_v6 = vmul.f32 %v10220_v17, %v10220_v17 }
 0x42c   :  { %v10233_v60 = vadd.f32 %v3769_v51, %v10006_v3  ;;  %v3527_v57 = vpop.f32.mrf.mxu1  ;;  %v4138_v40 = vsel %vm688_vm1, %v4035_v8, 0.0 }
 0x42d   :  { %v3941_v24 = vadd.f32 %v3940_v55, %v3939_v18  ;;  %v4137_v36 = vadd.f32 %v4136_v37, %v4135_v12  ;;  %v6524_v1 = vpop.f32.mrf.mxu0  ;;  %v3944_v12 = vsel %vm688_vm1, %v10220_v17, 0.0  ;;  %v4038_v18 = vmul.f32 %v10230_v29, %v10230_v29 }
 0x42e   :  { %v3942_v26 = vsel %vm688_vm1, %v10233_v60, 0.0  ;;  %v4036_v59 = vmul.f32 %v10233_v60, %v10233_v60  ;;  %v10242_v30 = vpop.f32.mrf.mxu1  ;;  %v4142_v23 = vsel %vm688_vm1, %v4037_v6, 0.0 }
 0x42f   :  { %v4139_v20 = vadd.f32 %v4138_v40, %v4137_v36  ;;  %v3943_v3 = vadd.f32 %v3942_v26, %v3941_v24  ;;  %v3782_v22 = vpop.f32.mrf.mxu0  ;;  %v3946_v24 = vsel %vm688_vm1, %v10230_v29, 0.0  ;;  %v10256_v36 = vadd.f32 %v6524_v1, %v10112_v46 }
 0x430   :  { %v4140_v51 = vsel %vm688_vm1, %v4036_v59, 0.0  ;;  %v10250_v8 = vadd.f32 %v3782_v22, %v10068_v47  ;;  %v3530_v37 = vpop.f32.mrf.mxu1  ;;  %v4144_v22 = vsel %vm688_vm1, %v4038_v18, 0.0 }
 0x431   :  { %v3945_v55 = vadd.f32 %v3944_v12, %v3943_v3  ;;  %v4141_v57 = vadd.f32 %v4140_v51, %v4139_v20  ;;  %v6525_v38 = vpop.f32.mrf.mxu0 }
 0x432   :  { %v4039_v40 = vmul.f32 %v10250_v8, %v10250_v8  ;;  %v3533_v26 = vpop.f32.mrf.mxu1  ;;  %v3948_v20 = vsel %vm688_vm1, %v10250_v8, 0.0  ;;  %v10264_v6 = vadd.f32 %v6525_v38, %v10134_v54 }
 0x433   :  { %v4143_v59 = vadd.f32 %v4142_v23, %v4141_v57  ;;  %v3947_v42 = vadd.f32 %v3946_v24, %v3945_v55  ;;  %v3785_v47 = vpop.f32.mrf.mxu0  ;;  %v4041_v23 = vmul.f32 %v10256_v36, %v10256_v36 }
 0x434   :  { %v10267_v3 = vadd.f32 %v3785_v47, %v10094_v4  ;;  %v3535_v46 = vpop.f32.mrf.mxu1  ;;  %v4146_v37 = vsel %vm688_vm1, %v4039_v40, 0.0  ;;  %v4042_v24 = vmul.f32 %v10264_v6, %v10264_v6 }
 0x435   :  { %v3949_v1 = vadd.f32 %v3948_v20, %v3947_v42  ;;  %v4145_v12 = vadd.f32 %v4144_v22, %v4143_v59  ;;  %v6528_v51 = vpop.f32.mrf.mxu0  ;;  %v3952_v42 = vsel %vm688_vm1, %v10256_v36, 0.0  ;;  %v4150_v39 = vsel %vm688_vm1, %v4041_v23, 0.0 }
 0x436   :  { %v3950_v18 = vsel %vm688_vm1, %v10267_v3, 0.0  ;;  %v4040_v55 = vmul.f32 %v10267_v3, %v10267_v3  ;;  %v3536_v38 = vpop.f32.mrf.mxu1 }
 0x437   :  { %v4147_v54 = vadd.f32 %v4146_v37, %v4145_v12  ;;  %v3951_v57 = vadd.f32 %v3950_v18, %v3949_v1  ;;  %v3798_v4 = vpop.f32.mrf.mxu0  ;;  %v3954_v1 = vsel %vm688_vm1, %v10264_v6, 0.0  ;;  %v10288_v12 = vadd.f32 %v6528_v51, %v10188_v19 }
 0x438   :  { %v4148_v59 = vsel %vm688_vm1, %v4040_v55, 0.0  ;;  %v10282_v40 = vadd.f32 %v3798_v4, %v10152_v16  ;;  %v3538_v47 = vpop.f32.mrf.mxu1  ;;  %v4152_v4 = vsel %vm688_vm1, %v4042_v24, 0.0 }
 0x439   :  { %v3953_v22 = vadd.f32 %v3952_v42, %v3951_v57  ;;  %v4149_v20 = vadd.f32 %v4148_v59, %v4147_v54  ;;  %v6529_v46 = vpop.f32.mrf.mxu0 }
 0x43a   :  { %v4043_v37 = vmul.f32 %v10282_v40, %v10282_v40  ;;  %v3541_v18 = vpop.f32.mrf.mxu1  ;;  %v3956_v54 = vsel %vm688_vm1, %v10282_v40, 0.0  ;;  %v10296_v23 = vadd.f32 %v6529_v46, %v10206_v45 }
 0x43b   :  { %v4151_v55 = vadd.f32 %v4150_v39, %v4149_v20  ;;  %v3955_v56 = vadd.f32 %v3954_v1, %v3953_v22  ;;  %v3801_v16 = vpop.f32.mrf.mxu0  ;;  %v4045_v39 = vmul.f32 %v10288_v12, %v10288_v12 }
 0x43c   :  { %v10299_v57 = vadd.f32 %v3801_v16, %v10170_v53  ;;  %v3543_v19 = vpop.f32.mrf.mxu1  ;;  %v4154_v47 = vsel %vm688_vm1, %v4043_v37, 0.0  ;;  %v4046_v1 = vmul.f32 %v10296_v23, %v10296_v23 }
 0x43d   :  { %v3957_v51 = vadd.f32 %v3956_v54, %v3955_v56  ;;  %v4153_v42 = vadd.f32 %v4152_v4, %v4151_v55  ;;  %v6532_v59 = vpop.f32.mrf.mxu0  ;;  %v3960_v56 = vsel %vm688_vm1, %v10288_v12, 0.0  ;;  %v4158_v9 = vsel %vm688_vm1, %v4045_v39, 0.0 }
 0x43e   :  { %v3958_v24 = vsel %vm688_vm1, %v10299_v57, 0.0  ;;  %v4044_v22 = vmul.f32 %v10299_v57, %v10299_v57  ;;  %v3544_v45 = vpop.f32.mrf.mxu1 }
 0x43f   :  { %v4155_v20 = vadd.f32 %v4154_v47, %v4153_v42  ;;  %v3959_v46 = vadd.f32 %v3958_v24, %v3957_v51  ;;  %v3814_v53 = vpop.f32.mrf.mxu0  ;;  %v3962_v51 = vsel %vm688_vm1, %v10296_v23, 0.0  ;;  %v10319_v42 = vadd.f32 %v6532_v59, %v3533_v26 }
 0x440   :  { %v4156_v55 = vsel %vm688_vm1, %v4044_v22, 0.0  ;;  %v10314_v37 = vadd.f32 %v3814_v53, %v10224_v34  ;;  %v3546_v16 = vpop.f32.mrf.mxu1  ;;  %v4160_v34 = vsel %vm688_vm1, %v4046_v1, 0.0 }
 0x441   :  { %v3961_v4 = vadd.f32 %v3960_v56, %v3959_v46  ;;  %v4157_v54 = vadd.f32 %v4156_v55, %v4155_v20  ;;  %v6533_v19 = vpop.f32.mrf.mxu0  ;;  %v4049_v55 = vmul.f32 %v10319_v42, %v10319_v42 }
 0x442   :  { %v4047_v47 = vmul.f32 %v10314_v37, %v10314_v37  ;;  %v3549_v24 = vpop.f32.mrf.mxu1  ;;  %v3964_v20 = vsel %vm688_vm1, %v10314_v37, 0.0  ;;  %v10326_v46 = vadd.f32 %v6533_v19, %v3536_v38 }
 0x443   :  { %v4159_v35 = vadd.f32 %v4158_v9, %v4157_v54  ;;  %v3963_v22 = vadd.f32 %v3962_v51, %v3961_v4  ;;  %v3817_v0 = vpop.f32.mrf.mxu0 }
 0x444   :  { %v10329_v39 = vadd.f32 %v3817_v0, %v10242_v30  ;;  %v3551_v53 = vpop.f32.mrf.mxu1  ;;  %v4162_v9 = vsel %vm688_vm1, %v4047_v47, 0.0  ;;  %v3968_v30 = vsel %vm688_vm1, %v10319_v42, 0.0 }
 0x445   :  { %v3965_v26 = vadd.f32 %v3964_v20, %v3963_v22  ;;  %v4161_v59 = vadd.f32 %v4160_v34, %v4159_v35  ;;  %v6536_v56 = vpop.f32.mrf.mxu0  ;;  %v4050_v35 = vmul.f32 %v10326_v46, %v10326_v46  ;;  %v4166_v53 = vsel %vm688_vm1, %v4049_v55, 0.0 }
 0x446   :  { %v3966_v1 = vsel %vm688_vm1, %v10329_v39, 0.0  ;;  %v4048_v16 = vmul.f32 %v10329_v39, %v10329_v39  ;;  %v3552_v38 = vpop.f32.mrf.mxu1 }
 0x447   :  { %v4163_v4 = vadd.f32 %v4162_v9, %v4161_v59  ;;  %v3967_v54 = vadd.f32 %v3966_v1, %v3965_v26  ;;  %v3830_v0 = vpop.f32.mrf.mxu0  ;;  %v3970_v26 = vsel %vm688_vm1, %v10326_v46, 0.0  ;;  %v10348_v59 = vadd.f32 %v6536_v56, %v3549_v24 }
 0x448   :  { %v4164_v19 = vsel %vm688_vm1, %v4048_v16, 0.0  ;;  %v10343_v51 = vadd.f32 %v3830_v0, %v3541_v18  ;;  %v3554_v47 = vpop.f32.mrf.mxu1  ;;  %v4168_v18 = vsel %vm688_vm1, %v4050_v35, 0.0 }
 0x449   :  { %v3969_v22 = vadd.f32 %v3968_v30, %v3967_v54  ;;  %v4165_v34 = vadd.f32 %v4164_v19, %v4163_v4  ;;  %v6537_v20 = vpop.f32.mrf.mxu0  ;;  %v4053_v56 = vmul.f32 %v10348_v59, %v10348_v59 }
 0x44a   :  { %v4051_v9 = vmul.f32 %v10343_v51, %v10343_v51  ;;  %v3972_v16 = vsel %vm688_vm1, %v10343_v51, 0.0  ;;  %v10355_v4 = vadd.f32 %v6537_v20, %v3552_v38 }
 0x44b   :  { %v4167_v1 = vadd.f32 %v4166_v53, %v4165_v34  ;;  %v3971_v11 = vadd.f32 %v3970_v26, %v3969_v22  ;;  %v3833_v49 = vpop.f32.mrf.mxu0 }
 0x44c   :  { %v10357_v54 = vadd.f32 %v3833_v49, %v3544_v45  ;;  %v3557_v55 = vpop.f32.mrf.mxu1  ;;  %v4170_v19 = vsel %vm688_vm1, %v4051_v9, 0.0  ;;  %v4054_v45 = vmul.f32 %v10355_v4, %v10355_v4 }
 0x44d   :  { %v3973_v0 = vadd.f32 %v3972_v16, %v3971_v11  ;;  %v4169_v30 = vadd.f32 %v4168_v18, %v4167_v1  ;;  %v6540_v24 = vpop.f32.mrf.mxu0  ;;  %v3976_v11 = vsel %vm688_vm1, %v10348_v59, 0.0  ;;  %v4174_v16 = vsel %vm688_vm1, %v4053_v56, 0.0 }
 0x44e   :  { %v3974_v47 = vsel %vm688_vm1, %v10357_v54, 0.0  ;;  %v4052_v35 = vmul.f32 %v10357_v54, %v10357_v54  ;;  %v3559_v22 = vpop.f32.mrf.mxu1 }
 0x44f   :  { %v4171_v38 = vadd.f32 %v4170_v19, %v4169_v30  ;;  %v3975_v34 = vadd.f32 %v3974_v47, %v3973_v0  ;;  %v3846_v49 = vpop.f32.mrf.mxu0  ;;  %v3978_v0 = vsel %vm688_vm1, %v10355_v4, 0.0 }
 0x450   :  { %v4172_v20 = vsel %vm688_vm1, %v4052_v35, 0.0  ;;  %v10371_v53 = vadd.f32 %v3846_v49, %v3557_v55  ;;  %v3560_v26 = vpop.f32.mrf.mxu1  ;;  %v4176_v35 = vsel %vm688_vm1, %v4054_v45, 0.0 }
 0x451   :  { %v3977_v9 = vadd.f32 %v3976_v11, %v3975_v34  ;;  %v4173_v1 = vadd.f32 %v4172_v20, %v4171_v38  ;;  %v6541_v18 = vpop.f32.mrf.mxu0 }
 0x452   :  { %v4055_v30 = vmul.f32 %v10371_v53, %v10371_v53  ;;  %v3562_v19 = vpop.f32.mrf.mxu1  ;;  %v3980_v55 = vsel %vm688_vm1, %v10371_v53, 0.0 }
 0x453   :  { %v4175_v47 = vadd.f32 %v4174_v16, %v4173_v1  ;;  %v3979_v22 = vadd.f32 %v3978_v0, %v3977_v9  ;;  %v3849_v44 = vpop.f32.mrf.mxu0 }
 0x454   :  { %v3850_v34 = vadd.f32 %v3849_v44, %v3560_v26  ;;  %v3565_v38 = vpop.f32.mrf.mxu1  ;;  %v4178_v20 = vsel %vm688_vm1, %v4055_v30, 0.0 }
 0x455   :  { %v3981_v49 = vadd.f32 %v3980_v55, %v3979_v22  ;;  %v4177_v11 = vadd.f32 %v4176_v35, %v4175_v47  ;;  %v3855_v56 = vadd.f32 %v6540_v24, %v3565_v38 }
 0x456   :  { %v3982_v63 = vsel %vm688_vm1, %v3850_v34, 0.0  ;;  %v4056_v10 = vmul.f32 %v3850_v34, %v3850_v34  ;;  %v3567_v52 = vpop.f32.mrf.mxu1 }
 0x457   :  { %v4179_v19 = vadd.f32 %v4178_v20, %v4177_v11  ;;  %v3983_v1 = vadd.f32 %v3982_v63, %v3981_v49  ;;  %v3984_v9 = vsel %vm688_vm1, %v3855_v56, 0.0  ;;  %v4057_v16 = vmul.f32 %v3855_v56, %v3855_v56 }
 0x458   :  { %v4180_v45 = vsel %vm688_vm1, %v4056_v10, 0.0  ;;  %v3568_v0 = vpop.f32.mrf.mxu1 }
 0x459   :  { %v4181_v14 = vadd.f32 %v4180_v45, %v4179_v19  ;;  %v3985_v44 = vadd.f32 %v3984_v9, %v3983_v1  ;;  %v4182_v26 = vsel %vm688_vm1, %v4057_v16, 0.0  ;;  %v3858_v47 = vadd.f32 %v6541_v18, %v3568_v0 }
 0x45a   :  { %v3570_v24 = vpop.f32.mrf.mxu1 }
 0x45b   :  { %v4183_v22 = vadd.f32 %v4182_v26, %v4181_v14  ;;  %v3986_v30 = vsel %vm688_vm1, %v3858_v47, 0.0  ;;  %v4058_v35 = vmul.f32 %v3858_v47, %v3858_v47 }
 0x45c   :  { %v3987_v55 = vadd.f32 %v3986_v30, %v3985_v44 }
 0x45d   :  { %v4184_v52 = vsel %vm688_vm1, %v4058_v35, 0.0 }
 0x45e   :  { %v3988_v63 = vrot.slane %v3987_v55, 4  ;;  %v4185_v38 = vadd.f32 %v4184_v52, %v4183_v22  ;;  %v4195_v22 = vld [vmem:[%s12737_s5] sm:$0x1]  ;;  %v13275_v52 = vld [vmem:[#allocation32_spill] sm:$0xff] }
 0x460   :  { %v3989_v49 = vadd.f32 %v3988_v63, %v3987_v55  ;;  %v4186_v11 = vrot.slane %v4185_v38, 4  ;;  %v4269_v55 = vld [vmem:[%s12738_s6] sm:$0x1] }
 0x462   :  { %v3990_v20 = vrot.slane %v3989_v49, 2  ;;  %v4187_v10 = vadd.f32 %v4186_v11, %v4185_v38 }
 0x464   :  { %v3991_v48 = vadd.f32 %v3990_v20, %v3989_v49  ;;  %v4188_v19 = vrot.slane %v4187_v10, 2 }
 0x466   :  { %v3992_v1 = vrot.slane %v3991_v48, 1  ;;  %v4189_v9 = vadd.f32 %v4188_v19, %v4187_v10 }
 0x468   :  { %v3993_v16 = vadd.f32 %v3992_v1, %v3991_v48  ;;  %v4190_v18 = vrot.slane %v4189_v9, 1 }
 0x46a   :  { %v3994_v45 = vmul.f32 0.001953125, %v3993_v16  ;;  %v4191_v14 = vadd.f32 %v4190_v18, %v4189_v9 }
 0x46c   :  { %v4192_v0 = vmul.f32 0.001953125, %v4191_v14  ;;  %v4193_v26 = vmul.f32 %v3994_v45, %v3994_v45 }
 0x46e   :  { %v4194_v24 = vsub.f32 %v4192_v0, %v4193_v26 }
 0x470   :  { %v4196_v44 = vadd.f32 1e-05, %v4194_v24 }
 0x472   :  { %6788 = vrsqrt.f32 %v4196_v44 }
 0x47f   :  { %v6789_v30 = vpop.eup %6788 }
 0x480   :  { %v4198_v35 = vmul.f32 %v6789_v30, %v4195_v22 }
 0x482   :  { %v10395_v48 = vrot.slane %v4198_v35, %v13275_v52  ;;  %v4270_v63 = vmul.f32 %v4198_v35, %v3994_v45 }
 0x484   :  { %v4267_v38 = vmul.f32 %v10395_v48, %v3855_v56  ;;  %v4268_v49 = vmul.f32 %v10395_v48, %v3858_v47  ;;  %v4271_v11 = vsub.f32 %v4269_v55, %v4270_v63  ;;  %v4266_v18 = vmul.f32 %v10395_v48, %v3850_v34 }
 0x485   :  { %v4239_v45 = vmul.f32 %v10395_v48, %v10148_v21  ;;  %v4240_v56 = vmul.f32 %v10395_v48, %v10158_v28  ;;  %v4241_v47 = vmul.f32 %v10395_v48, %v10178_v33  ;;  %v4242_v14 = vmul.f32 %v10395_v48, %v10197_v13 }
 0x486   :  { %v10400_v20 = vrot.slane %v4271_v11, %v13275_v52  ;;  %v4243_v0 = vmul.f32 %v10395_v48, %v10184_v27  ;;  %v4244_v26 = vmul.f32 %v10395_v48, %v10194_v61  ;;  %v4245_v34 = vmul.f32 %v10395_v48, %v10214_v62 }
 0x487   :  { %v4246_v21 = vmul.f32 %v10395_v48, %v10233_v60  ;;  %v4247_v28 = vmul.f32 %v10395_v48, %v10220_v17  ;;  %v4248_v33 = vmul.f32 %v10395_v48, %v10230_v29  ;;  %v4249_v13 = vmul.f32 %v10395_v48, %v10250_v8 }
 0x488   :  { %v4340_v10 = vadd.f32 %v10400_v20, %v4267_v38  ;;  %v4341_v19 = vadd.f32 %v10400_v20, %v4268_v49  ;;  %v4250_v27 = vmul.f32 %v10395_v48, %v10267_v3  ;;  %v4251_v61 = vmul.f32 %v10395_v48, %v10256_v36 }
 0x489   :  { %v4252_v62 = vmul.f32 %v10395_v48, %v10264_v6  ;;  %v4253_v60 = vmul.f32 %v10395_v48, %v10282_v40  ;;  %v4254_v17 = vmul.f32 %v10395_v48, %v10299_v57  ;;  %v4255_v29 = vmul.f32 %v10395_v48, %v10288_v12 }
 0x48a   :  { %v4404_v1 = vmax.f32 %v4340_v10, 0.0  ;;  %v4405_v9 = vmax.f32 %v4341_v19, 0.0  ;;  %v4256_v8 = vmul.f32 %v10395_v48, %v10296_v23  ;;  %v4257_v3 = vmul.f32 %v10395_v48, %v10314_v37 }
 0x48b   :  { %v4258_v36 = vmul.f32 %v10395_v48, %v10329_v39  ;;  %v4259_v6 = vmul.f32 %v10395_v48, %v10319_v42  ;;  %v4260_v40 = vmul.f32 %v10395_v48, %v10326_v46  ;;  %v4261_v57 = vmul.f32 %v10395_v48, %v10343_v51 }
 0x48c   :  { %v10404_v16 = vpack.c.bf16 %v4405_v9, %v4404_v1  ;;  %v4262_v12 = vmul.f32 %v10395_v48, %v10357_v54  ;;  %v4263_v23 = vmul.f32 %v10395_v48, %v10348_v59  ;;  %v4264_v37 = vmul.f32 %v10395_v48, %v10355_v4 }
 0x48d   :  { %v4265_v39 = vmul.f32 %v10395_v48, %v10371_v53  ;;  %v10462_v42 = vadd.f32 %v10400_v20, %v4239_v45  ;;  %v10465_v46 = vadd.f32 %v10400_v20, %v4240_v56  ;;  %v10468_v51 = vadd.f32 %v10400_v20, %v4241_v47 }
 0x48e   :  { %v10471_v54 = vadd.f32 %v10400_v20, %v4242_v14  ;;  %v10474_v59 = vadd.f32 %v10400_v20, %v4243_v0  ;;  %v10477_v4 = vadd.f32 %v10400_v20, %v4244_v26  ;;  %v10480_v53 = vadd.f32 %v10400_v20, %v4245_v34 }
 0x48f   :  { %v10483_v24 = vadd.f32 %v10400_v20, %v4246_v21  ;;  %v10486_v44 = vadd.f32 %v10400_v20, %v4247_v28  ;;  %v4321_v22 = vadd.f32 %v10400_v20, %v4248_v33  ;;  %v10490_v30 = vadd.f32 %v10400_v20, %v4249_v13 }
 0x490   :  { %v10493_v35 = vadd.f32 %v10400_v20, %v4250_v27  ;;  %v4324_v55 = vadd.f32 %v10400_v20, %v4251_v61  ;;  %v4325_v63 = vadd.f32 %v10400_v20, %v4252_v62  ;;  %v10498_v38 = vadd.f32 %v10400_v20, %v4253_v60 }
 0x491   :  { %v10501_v49 = vadd.f32 %v10400_v20, %v4254_v17  ;;  %v4328_v11 = vadd.f32 %v10400_v20, %v4255_v29  ;;  %v4329_v10 = vadd.f32 %v10400_v20, %v4256_v8  ;;  %v10506_v19 = vadd.f32 %v10400_v20, %v4257_v3 }
 0x492   :  { %v10509_v1 = vadd.f32 %v10400_v20, %v4258_v36  ;;  %v4332_v9 = vadd.f32 %v10400_v20, %v4259_v6  ;;  %v4333_v45 = vadd.f32 %v10400_v20, %v4260_v40  ;;  %v10514_v56 = vadd.f32 %v10400_v20, %v4261_v57 }
 0x493   :  { %v10517_v47 = vadd.f32 %v10400_v20, %v4262_v12  ;;  %v4336_v14 = vadd.f32 %v10400_v20, %v4263_v23  ;;  %v4337_v0 = vadd.f32 %v10400_v20, %v4264_v37  ;;  %v10522_v26 = vadd.f32 %v10400_v20, %v4265_v39 }
 0x494   :  { %v10525_v34 = vadd.f32 %v10400_v20, %v4266_v18  ;;  %v4205_v21 = vmul.f32 %v10395_v48, %v9803_v25  ;;  %v4206_v28 = vmul.f32 %v10395_v48, %v9813_v32  ;;  %v4207_v33 = vmul.f32 %v10395_v48, %v9807_v15 }
 0x495   :  { %v4208_v13 = vmul.f32 %v10395_v48, %v9811_v58  ;;  %v4209_v25 = vmul.f32 %v10395_v48, %v9839_v5  ;;  %v4210_v32 = vmul.f32 %v10395_v48, %v9857_v41  ;;  %v4211_v15 = vmul.f32 %v10395_v48, %v9847_v7 }
 0x496   :  { %v4278_v27 = vadd.f32 %v10400_v20, %v4205_v21  ;;  %v4279_v61 = vadd.f32 %v10400_v20, %v4206_v28  ;;  %v4280_v62 = vadd.f32 %v10400_v20, %v4207_v33  ;;  %v4212_v58 = vmul.f32 %v10395_v48, %v9855_v50 }
 0x497   :  { %v4281_v18 = vadd.f32 %v10400_v20, %v4208_v13  ;;  %v4282_v60 = vadd.f32 %v10400_v20, %v4209_v25  ;;  %v4283_v17 = vadd.f32 %v10400_v20, %v4210_v32  ;;  %v4376_v6 = vmax.f32 %v10462_v42, 0.0  ;;  %v10554_v13 = vpop.f32.mrf.mxu1 }
 0x498   :  { %v4342_v29 = vmax.f32 %v4278_v27, 0.0  ;;  %v4343_v8 = vmax.f32 %v4279_v61, 0.0  ;;  %v4344_v3 = vmax.f32 %v4280_v62, 0.0  ;;  %v4377_v5 = vmax.f32 %v10465_v46, 0.0 }
 0x499   :  { %v4345_v36 = vmax.f32 %v4281_v18, 0.0  ;;  %v4380_v41 = vmax.f32 %v10474_v59, 0.0  ;;  %v4381_v40 = vmax.f32 %v10477_v4, 0.0  ;;  %v4384_v7 = vmax.f32 %v10486_v44, 0.0  ;;  %v10577_v27 = vpop.f32.mrf.mxu1 }
 0x49a   :  { %v4385_v57 = vmax.f32 %v4321_v22, 0.0  ;;  %v4388_v50 = vmax.f32 %v4324_v55, 0.0  ;;  %v4389_v12 = vmax.f32 %v4325_v63, 0.0  ;;  %v4392_v23 = vmax.f32 %v4328_v11, 0.0 }
 0x49b   :  { %v4393_v37 = vmax.f32 %v4329_v10, 0.0  ;;  %v4396_v39 = vmax.f32 %v4332_v9, 0.0  ;;  %v4397_v21 = vmax.f32 %v4333_v45, 0.0  ;;  %v4400_v28 = vmax.f32 %v4336_v14, 0.0 }
 0x49c   :  { %v4401_v33 = vmax.f32 %v4337_v0, 0.0  ;;  %v4213_v42 = vmul.f32 %v10395_v48, %v9882_v43  ;;  %v4214_v46 = vmul.f32 %v10395_v48, %v9901_v2  ;;  %v4284_v59 = vadd.f32 %v10400_v20, %v4211_v15 }
 0x49d   :  { %v4346_v4 = vmax.f32 %v4282_v60, 0.0  ;;  %v4347_v44 = vmax.f32 %v4283_v17, 0.0  ;;  %v4378_v22 = vmax.f32 %v10468_v51, 0.0  ;;  %v4407_v55 = vpack.c.bf16 %v4345_v36, %v4344_v3  ;;  %v13276_v60 = vld [vmem:[#allocation91_spill] sm:$0xff]  ;;  %v10593_v17 = vpop.f32.mrf.mxu1 }
 0x49e   :  { %v10562_v63 = vpack.c.bf16 %v4377_v5, %v4376_v6  ;;  %v10564_v11 = vpack.c.bf16 %v4381_v40, %v4380_v41  ;;  %v10566_v10 = vpack.c.bf16 %v4385_v57, %v4384_v7  ;;  %v10568_v9 = vpack.c.bf16 %v4389_v12, %v4388_v50  ;;  %v13277_v41 = vld [vmem:[#allocation12_spill] sm:$0xff] }
 0x49f   :  { %v10570_v45 = vpack.c.bf16 %v4393_v37, %v4392_v23  ;;  %v4379_v43 = vmax.f32 %v10471_v54, 0.0  ;;  %v10573_v2 = vpack.c.bf16 %v4397_v21, %v4396_v39  ;;  %v10575_v14 = vpack.c.bf16 %v4401_v33, %v4400_v28  ;;  %v13278_v7 = vld [vmem:[#allocation16_spill] sm:$0xff]  ;;  %v10613_v37 = vpop.f32.mrf.mxu1 }
 0x4a0   :  { %v4406_v0 = vpack.c.bf16 %v4343_v8, %v4342_v29  ;;  %v4285_v51 = vadd.f32 %v10400_v20, %v4212_v58  ;;  %v4382_v61 = vmax.f32 %v10480_v53, 0.0  ;;  %v4383_v62 = vmax.f32 %v10483_v24, 0.0 }
 0x4a1   :  { %v4286_v18 = vadd.f32 %v10400_v20, %v4213_v42  ;;  %v4287_v25 = vadd.f32 %v10400_v20, %v4214_v46  ;;  %v4408_v54 = vpack.c.bf16 %v4347_v44, %v4346_v4  ;;  %v4386_v32 = vmax.f32 %v10490_v30, 0.0  ;;  %v10631_v4 = vpop.f32.mrf.mxu1 }
 0x4a2   :  { %6546 = vmatprep.mubr.msk.bf16.mxu0 %vm688_vm1, %v4406_v0  ;;  %v4387_v15 = vmax.f32 %v10493_v35, 0.0  ;;  %v4215_v58 = vmul.f32 %v10395_v48, %v9888_v31  ;;  %v4216_v53 = vmul.f32 %v10395_v48, %v13276_v60  ;;  %v4348_v24 = vmax.f32 %v4284_v59, 0.0 }
 0x4a3   :  { %6547 = vmatmul.mubr.msk.bf16.vlgmr.msra.gmra.mxu0 %vm688_vm1, %v4407_v55  ;;  %v10595_v29 = vpack.c.bf16 %v4379_v43, %v4378_v22  ;;  %v4349_v8 = vmax.f32 %v4285_v51, 0.0  ;;  %v4390_v30 = vmax.f32 %v10498_v38, 0.0  ;;  %v4391_v35 = vmax.f32 %v10501_v49, 0.0  ;;  %v13279_v51 = vld [vmem:[#allocation50_spill] sm:$0xff] }
 0x4a4   :  { %6550 = vmatprep.mubr.msk.bf16.mxu0 %vm688_vm1, %v4408_v54  ;;  %v10599_v3 = vpack.c.bf16 %v4383_v62, %v4382_v61  ;;  %v4350_v36 = vmax.f32 %v4286_v18, 0.0  ;;  %v4351_v6 = vmax.f32 %v4287_v25, 0.0  ;;  %v4394_v31 = vmax.f32 %v10506_v19, 0.0  ;;  %v13280_v62 = vld [vmem:[#allocation56_spill] sm:$0xff] }
 0x4a5   :  { %v4395_v5 = vmax.f32 %v10509_v1, 0.0  ;;  %v4217_v40 = vmul.f32 %v10395_v48, %v13277_v41  ;;  %v4218_v57 = vmul.f32 %v10395_v48, %v13278_v7  ;;  %v10607_v50 = vpack.c.bf16 %v4387_v15, %v4386_v32  ;;  %v13281_v32 = vld [vmem:[#allocation93_spill] sm:$0xff] }
 0x4a6   :  { %v4288_v38 = vadd.f32 %v10400_v20, %v4215_v58  ;;  %v4289_v49 = vadd.f32 %v10400_v20, %v4216_v53  ;;  %v4398_v12 = vmax.f32 %v10514_v56, 0.0  ;;  %v4399_v23 = vmax.f32 %v10517_v47, 0.0  ;;  %v13282_v58 = vld [vmem:[#allocation53_spill] sm:$0xff]  ;;  %v10648_v53 = vpop.f32.mrf.mxu1 }
 0x4a7   :  { %v4290_v19 = vadd.f32 %v10400_v20, %v4217_v40  ;;  %v4291_v1 = vadd.f32 %v10400_v20, %v4218_v57  ;;  %v4409_v39 = vpack.c.bf16 %v4349_v8, %v4348_v24  ;;  %v10617_v21 = vpack.c.bf16 %v4391_v35, %v4390_v30 }
 0x4a8   :  { %v4402_v28 = vmax.f32 %v10522_v26, 0.0  ;;  %v4403_v33 = vmax.f32 %v10525_v34, 0.0  ;;  %v4410_v42 = vpack.c.bf16 %v4351_v6, %v4350_v36  ;;  %v10621_v46 = vpack.c.bf16 %v4395_v5, %v4394_v31  ;;  %v10659_v40 = vpop.f32.mrf.mxu1 }
 0x4a9   :  { %v5583_v56 = vmul.f32 %v10577_v27, %v10577_v27  ;;  %v5513_v47 = vadd.f32 %v10613_v37, %v10577_v27  ;;  %v5584_v59 = vmul.f32 %v10613_v37, %v10613_v37  ;;  %v10633_v26 = vpack.c.bf16 %v4399_v23, %v4398_v12  ;;  %v13283_v23 = vld [vmem:[#allocation80_spill] sm:$0xff] }
 0x4aa   :  { %v4352_v34 = vmax.f32 %v4288_v38, 0.0  ;;  %v4353_v44 = vmax.f32 %v4289_v49, 0.0  ;;  %v4354_v22 = vmax.f32 %v4290_v19, 0.0  ;;  %v4355_v55 = vmax.f32 %v4291_v1, 0.0  ;;  %v13284_v1 = vld [vmem:[#allocation94_spill] sm:$0xff] }
 0x4ab   :  { %6551 = vmatmul.mubr.msk.bf16.gmra.mxu0 %vm688_vm1, %v4409_v39  ;;  %v5585_v43 = vmul.f32 %v10554_v13, %v10554_v13  ;;  %v10637_v0 = vpack.c.bf16 %v4403_v33, %v4402_v28  ;;  %v4219_v61 = vmul.f32 %v10395_v48, %v13279_v51  ;;  %v4220_v18 = vmul.f32 %v10395_v48, %v13280_v62 }
 0x4ac   :  { %6554 = vmatprep.mubr.msk.bf16.mxu0 %vm688_vm1, %v4410_v42  ;;  %v5514_v25 = vadd.f32 %v10554_v13, %v5513_v47  ;;  %v5647_v54 = vadd.f32 %v5584_v59, %v5583_v56  ;;  %v4221_v15 = vmul.f32 %v10395_v48, %v13281_v32  ;;  %v4222_v60 = vmul.f32 %v10395_v48, %v13282_v58  ;;  %v13285_v42 = vld [vmem:[#allocation60_spill] sm:$0xff]  ;;  %v13286_v47 = vld [vmem:[#allocation85_spill] sm:$0xff] }
 0x4ad   :  { %v4292_v24 = vadd.f32 %v10400_v20, %v4219_v61  ;;  %v4293_v8 = vadd.f32 %v10400_v20, %v4220_v18  ;;  %v4411_v30 = vpack.c.bf16 %v4353_v44, %v4352_v34  ;;  %v4412_v6 = vpack.c.bf16 %v4355_v55, %v4354_v22  ;;  %v10672_v34 = vpop.f32.mrf.mxu1 }
 0x4ae   :  { %v4294_v35 = vadd.f32 %v10400_v20, %v4221_v15  ;;  %v4295_v36 = vadd.f32 %v10400_v20, %v4222_v60  ;;  %v5586_v31 = vmul.f32 %v10593_v17, %v10593_v17  ;;  %v5648_v5 = vadd.f32 %v5647_v54, %v5585_v43 }
 0x4af   :  { %v5515_v41 = vadd.f32 %v10593_v17, %v5514_v25  ;;  %v4356_v7 = vmax.f32 %v4292_v24, 0.0  ;;  %v4357_v57 = vmax.f32 %v4293_v8, 0.0  ;;  %v5587_v12 = vmul.f32 %v10648_v53, %v10648_v53  ;;  %v10683_v54 = vpop.f32.mrf.mxu1  ;;  %v13287_v8 = vld [vmem:[#allocation29_spill] sm:$0xff] }
 0x4b0   :  { %v4358_v38 = vmax.f32 %v4294_v35, 0.0  ;;  %v4359_v49 = vmax.f32 %v4295_v36, 0.0  ;;  %v4223_v19 = vmul.f32 %v10395_v48, %v13283_v23  ;;  %v4224_v39 = vmul.f32 %v10395_v48, %v13284_v1  ;;  %v13288_v35 = vld [vmem:[#allocation95_spill] sm:$0xff] }
 0x4b1   :  { %v5516_v28 = vadd.f32 %v5515_v41, %v10648_v53  ;;  %v5649_v33 = vadd.f32 %v5648_v5, %v5586_v31  ;;  %v4225_v56 = vmul.f32 %v10395_v48, %v13285_v42  ;;  %v4226_v59 = vmul.f32 %v10395_v48, %v13286_v47  ;;  %v13289_v5 = vld [vmem:[#allocation96_spill] sm:$0xff] }
 0x4b2   :  { %v4296_v44 = vadd.f32 %v10400_v20, %v4223_v19  ;;  %v4297_v22 = vadd.f32 %v10400_v20, %v4224_v39  ;;  %v4413_v55 = vpack.c.bf16 %v4357_v57, %v4356_v7  ;;  %v4414_v61 = vpack.c.bf16 %v4359_v49, %v4358_v38  ;;  %v13290_v7 = vld [vmem:[#allocation62_spill] sm:$0xff]  ;;  %v10696_v38 = vpop.f32.mrf.mxu1 }
 0x4b3   :  { %6555 = vmatmul.mubr.msk.bf16.gmra.mxu0 %vm688_vm1, %v4411_v30  ;;  %v4298_v43 = vadd.f32 %v10400_v20, %v4225_v56  ;;  %v4299_v51 = vadd.f32 %v10400_v20, %v4226_v59  ;;  %v5650_v62 = vadd.f32 %v5649_v33, %v5587_v12  ;;  %v5517_v18 = vadd.f32 %v5516_v28, %v10672_v34 }
 0x4b4   :  { %6558 = vmatprep.mubr.msk.bf16.mxu0 %vm688_vm1, %v4412_v6  ;;  %v5588_v25 = vmul.f32 %v10672_v34, %v10672_v34  ;;  %v4360_v32 = vmax.f32 %v4296_v44, 0.0  ;;  %v4361_v15 = vmax.f32 %v4297_v22, 0.0  ;;  %v5589_v24 = vmul.f32 %v10631_v4, %v10631_v4  ;;  %v10707_v56 = vpop.f32.mrf.mxu1 }
 0x4b5   :  { %v4362_v58 = vmax.f32 %v4298_v43, 0.0  ;;  %v4363_v60 = vmax.f32 %v4299_v51, 0.0  ;;  %v4227_v30 = vmul.f32 %v10395_v48, %v13287_v8  ;;  %v4228_v36 = vmul.f32 %v10395_v48, %v13288_v35  ;;  %v13291_v43 = vld [vmem:[#allocation34_spill] sm:$0xff] }
 0x4b6   :  { %v5518_v6 = vadd.f32 %v10631_v4, %v5517_v18  ;;  %v5651_v31 = vadd.f32 %v5650_v62, %v5588_v25  ;;  %v4229_v41 = vmul.f32 %v10395_v48, %v13289_v5  ;;  %v4230_v57 = vmul.f32 %v10395_v48, %v13290_v7 }
 0x4b7   :  { %v4300_v49 = vadd.f32 %v10400_v20, %v4227_v30  ;;  %v4301_v12 = vadd.f32 %v10400_v20, %v4228_v36  ;;  %v4415_v23 = vpack.c.bf16 %v4361_v15, %v4360_v32  ;;  %v4416_v39 = vpack.c.bf16 %v4363_v60, %v4362_v58  ;;  %v13293_v32 = vld [vmem:[#allocation13_spill] sm:$0xff]  ;;  %v13294_v58 = vld [vmem:[#allocation64_spill] sm:$0xff] }
 0x4b8   :  { %v4302_v19 = vadd.f32 %v10400_v20, %v4229_v41  ;;  %v4303_v1 = vadd.f32 %v10400_v20, %v4230_v57  ;;  %v5590_v28 = vmul.f32 %v10659_v40, %v10659_v40  ;;  %v5652_v33 = vadd.f32 %v5651_v31, %v5589_v24  ;;  %v10720_v24 = vpop.f32.mrf.mxu1 }
 0x4b9   :  { %v5519_v42 = vadd.f32 %v10659_v40, %v5518_v6  ;;  %v4364_v47 = vmax.f32 %v4300_v49, 0.0  ;;  %v4365_v59 = vmax.f32 %v4301_v12, 0.0  ;;  %v4231_v51 = vmul.f32 %v10395_v48, %v13291_v43 }
 0x4ba   :  { %v4366_v44 = vmax.f32 %v4302_v19, 0.0  ;;  %v4367_v22 = vmax.f32 %v4303_v1, 0.0  ;;  %v5653_v25 = vadd.f32 %v5652_v33, %v5590_v28  ;;  %v4233_v15 = vmul.f32 %v10395_v48, %v13293_v32  ;;  %v10731_v57 = vpop.f32.mrf.mxu1  ;;  %v13296_v33 = vld [vmem:[#allocation59_spill] sm:$0xff] }
 0x4bb   :  { %6559 = vmatmul.mubr.msk.bf16.gmra.mxu0 %vm688_vm1, %v4413_v55  ;;  %v5591_v55 = vmul.f32 %v10696_v38, %v10696_v38  ;;  %v5520_v18 = vadd.f32 %v5519_v42, %v10696_v38  ;;  %v4234_v60 = vmul.f32 %v10395_v48, %v13294_v58  ;;  %v4304_v8 = vadd.f32 %v10400_v20, %v4231_v51 }
 0x4bc   :  { %6562 = vmatprep.mubr.msk.bf16.mxu0 %vm688_vm1, %v4414_v61  ;;  %v13292_v61 = vld [vmem:[#allocation55_spill] sm:$0xff]  ;;  %v4417_v35 = vpack.c.bf16 %v4365_v59, %v4364_v47  ;;  %v4306_v36 = vadd.f32 %v10400_v20, %v4233_v15  ;;  %v4418_v31 = vpack.c.bf16 %v4367_v22, %v4366_v44  ;;  %v5592_v7 = vmul.f32 %v10720_v24, %v10720_v24  ;;  %v10744_v51 = vpop.f32.mrf.mxu1 }
 0x4bd   :  { %v4232_v62 = vmul.f32 %v10395_v48, %v13292_v61  ;;  %v4307_v6 = vadd.f32 %v10400_v20, %v4234_v60  ;;  %v5654_v5 = vadd.f32 %v5653_v25, %v5591_v55  ;;  %v5521_v41 = vadd.f32 %v5520_v18, %v10720_v24  ;;  %v13297_v44 = vld [vmem:[#allocation15_spill] sm:$0xff]  ;;  %v13298_v55 = vld [vmem:[#allocation90_spill] sm:$0xff] }
 0x4be   :  { %v4368_v49 = vmax.f32 %v4304_v8, 0.0  ;;  %v5593_v1 = vmul.f32 %v10683_v54, %v10683_v54  ;;  %v4236_v42 = vmul.f32 %v10395_v48, %v13296_v33  ;;  %v4237_v22 = vmul.f32 %v10395_v48, %v13297_v44 }
 0x4bf   :  { %v4305_v30 = vadd.f32 %v10400_v20, %v4232_v62  ;;  %v4371_v19 = vmax.f32 %v4307_v6, 0.0  ;;  %v5522_v47 = vadd.f32 %v10683_v54, %v5521_v41  ;;  %v5655_v59 = vadd.f32 %v5654_v5, %v5592_v7 }
 0x4c0   :  { %v4238_v43 = vmul.f32 %v10395_v48, %v13298_v55  ;;  %v4309_v62 = vadd.f32 %v10400_v20, %v4236_v42  ;;  %v4310_v25 = vadd.f32 %v10400_v20, %v4237_v22  ;;  %v5594_v58 = vmul.f32 %v10707_v56, %v10707_v56 }
 0x4c1   :  { %v4369_v12 = vmax.f32 %v4305_v30, 0.0  ;;  %v5656_v60 = vadd.f32 %v5655_v59, %v5593_v1  ;;  %v5523_v8 = vadd.f32 %v10707_v56, %v5522_v47 }
 0x4c2   :  { %v4311_v32 = vadd.f32 %v10400_v20, %v4238_v43 }
 0x4c3   :  { %6563 = vmatmul.mubr.msk.bf16.gmra.mxu0 %vm688_vm1, %v4415_v23  ;;  %v4370_v23 = vmax.f32 %v4306_v36, 0.0  ;;  %v4419_v18 = vpack.c.bf16 %v4369_v12, %v4368_v49  ;;  %v4374_v36 = vmax.f32 %v4310_v25, 0.0  ;;  %v5657_v5 = vadd.f32 %v5656_v60, %v5594_v58 }
 0x4c4   :  { %6566 = vmatprep.mubr.msk.bf16.mxu0 %vm688_vm1, %v4416_v39  ;;  %v13295_v39 = vld [vmem:[#allocation88_spill] sm:$0xff]  ;;  %v4375_v6 = vmax.f32 %v4311_v32, 0.0 }
 0x4c5   :  { %v4235_v28 = vmul.f32 %v10395_v48, %v13295_v39  ;;  %v4420_v15 = vpack.c.bf16 %v4371_v19, %v4370_v23  ;;  %v10754_v48 = vpop.f32.mrf.mxu1  ;;  %v5597_v39 = vmul.f32 %v10731_v57, %v10731_v57 }
 0x4c6   :  { %v4422_v49 = vpack.c.bf16 %v4375_v6, %v4374_v36  ;;  %v5598_v47 = vmul.f32 %v10754_v48, %v10754_v48 }
 0x4c7   :  { %v4308_v61 = vadd.f32 %v10400_v20, %v4235_v28  ;;  %v5595_v20 = vmul.f32 %v10744_v51, %v10744_v51  ;;  %v10760_v41 = vpop.f32.mrf.mxu1 }
 0x4c8   :  { %v5596_v19 = vmul.f32 %v10760_v41, %v10760_v41 }
 0x4c9   :  { %v4372_v30 = vmax.f32 %v4308_v61, 0.0  ;;  %v5658_v12 = vadd.f32 %v5657_v5, %v5595_v20  ;;  %v10766_v1 = vpop.f32.mrf.mxu1 }
 0x4cb   :  { %6567 = vmatmul.mubr.msk.bf16.gmra.mxu0 %vm688_vm1, %v4417_v35  ;;  %v4373_v35 = vmax.f32 %v4309_v62, 0.0  ;;  %v5659_v33 = vadd.f32 %v5658_v12, %v5596_v19  ;;  %v10772_v42 = vpop.f32.mrf.mxu1 }
 0x4cc   :  { %6570 = vmatprep.mubr.msk.bf16.mxu0 %vm688_vm1, %v4418_v31  ;;  %v5524_v31 = vadd.f32 %v5523_v8, %v10744_v51  ;;  %v5599_v43 = vmul.f32 %v10772_v42, %v10772_v42 }
 0x4cd   :  { %v4421_v7 = vpack.c.bf16 %v4373_v35, %v4372_v30  ;;  %v5660_v59 = vadd.f32 %v5659_v33, %v5597_v39  ;;  %v10779_v22 = vpop.f32.mrf.mxu1 }
 0x4ce   :  { %v5525_v23 = vadd.f32 %v5524_v31, %v10760_v41  ;;  %v5602_v8 = vmul.f32 %v10779_v22, %v10779_v22 }
 0x4cf   :  { %v5661_v61 = vadd.f32 %v5660_v59, %v5598_v47  ;;  %v10786_v62 = vpop.f32.mrf.mxu1 }
 0x4d0   :  { %v5526_v28 = vadd.f32 %v10731_v57, %v5525_v23  ;;  %v5600_v32 = vmul.f32 %v10786_v62, %v10786_v62 }
 0x4d2   :  { %v5527_v44 = vadd.f32 %v10754_v48, %v5526_v28 }
 0x4d3   :  { %6571 = vmatmul.mubr.msk.bf16.gmra.mxu0 %vm688_vm1, %v4419_v18  ;;  %v5662_v18 = vadd.f32 %v5661_v61, %v5599_v43 }
 0x4d4   :  { %6574 = vmatprep.mubr.msk.bf16.mxu0 %vm688_vm1, %v4420_v15  ;;  %v5528_v55 = vadd.f32 %v5527_v44, %v10772_v42 }
 0x4d5   :  { %v5663_v58 = vadd.f32 %v5662_v18, %v5600_v32 }
 0x4d6   :  { %v5529_v25 = vadd.f32 %v5528_v55, %v10786_v62 }
 0x4d8   :  { %v5530_v15 = vadd.f32 %v10766_v1, %v5529_v25 }
 0x4da   :  { %v5531_v35 = vadd.f32 %v10779_v22, %v5530_v15 }
 0x4db   :  { %6575 = vmatmul.mubr.msk.bf16.gmra.mxu0 %vm688_vm1, %v4421_v7 }
 0x4dc   :  { %6578 = vmatprep.mubr.msk.bf16.mxu0 %vm688_vm1, %v4422_v49 }
 0x4e3   :  { %6579 = vmatmul.mubr.msk.bf16.gmra.mxu0 %vm688_vm1, %v10562_v63  ;;  %v10793_v63 = vpop.f32.mrf.mxu1 }
 0x4e4   :  { %6582 = vmatprep.mubr.msk.bf16.mxu0 %vm688_vm1, %v10595_v29  ;;  %v5601_v29 = vmul.f32 %v10766_v1, %v10766_v1 }
 0x4e5   :  { %v10800_v60 = vpop.f32.mrf.mxu1 }
 0x4e6   :  { %v5664_v30 = vadd.f32 %v5663_v58, %v5601_v29  ;;  %v5603_v36 = vmul.f32 %v10800_v60, %v10800_v60 }
 0x4e8   :  { %v5665_v6 = vadd.f32 %v5664_v30, %v5602_v8 }
 0x4ea   :  { %v5666_v20 = vadd.f32 %v5665_v6, %v5603_v36 }
 0x4eb   :  { %6583 = vmatmul.mubr.msk.bf16.gmra.mxu0 %vm688_vm1, %v10564_v11  ;;  %v10807_v11 = vpop.f32.mrf.mxu1 }
 0x4ec   :  { %6586 = vmatprep.mubr.msk.bf16.mxu0 %vm688_vm1, %v10599_v3  ;;  %v5532_v3 = vadd.f32 %v5531_v35, %v10800_v60  ;;  %v5606_v19 = vmul.f32 %v10807_v11, %v10807_v11 }
 0x4ed   :  { %v10814_v31 = vpop.f32.mrf.mxu1 }
 0x4ee   :  { %v5533_v5 = vadd.f32 %v5532_v3, %v10814_v31  ;;  %v5604_v7 = vmul.f32 %v10814_v31, %v10814_v31 }
 0x4f0   :  { %v5534_v49 = vadd.f32 %v10793_v63, %v5533_v5  ;;  %v5667_v12 = vadd.f32 %v5666_v20, %v5604_v7 }
 0x4f2   :  { %v5535_v28 = vadd.f32 %v10807_v11, %v5534_v49 }
 0x4f3   :  { %6587 = vmatmul.mubr.msk.bf16.gmra.mxu0 %vm688_vm1, %v10566_v10  ;;  %v10821_v10 = vpop.f32.mrf.mxu1 }
 0x4f4   :  { %6590 = vmatprep.mubr.msk.bf16.mxu0 %vm688_vm1, %v10607_v50  ;;  %v5605_v50 = vmul.f32 %v10793_v63, %v10793_v63 }
 0x4f5   :  { %v10828_v23 = vpop.f32.mrf.mxu1 }
 0x4f6   :  { %v5668_v39 = vadd.f32 %v5667_v12, %v5605_v50  ;;  %v5607_v33 = vmul.f32 %v10828_v23, %v10828_v23 }
 0x4f8   :  { %v5669_v47 = vadd.f32 %v5668_v39, %v5606_v19 }
 0x4fa   :  { %v5670_v44 = vadd.f32 %v5669_v47, %v5607_v33 }
 0x4fb   :  { %6591 = vmatmul.mubr.msk.bf16.gmra.mxu0 %vm688_vm1, %v10568_v9  ;;  %v10835_v9 = vpop.f32.mrf.mxu1 }
 0x4fc   :  { %6594 = vmatprep.mubr.msk.bf16.mxu0 %vm688_vm1, %v10617_v21  ;;  %v5536_v21 = vadd.f32 %v5535_v28, %v10828_v23  ;;  %v5610_v32 = vmul.f32 %v10835_v9, %v10835_v9 }
 0x4fd   :  { %v10842_v59 = vpop.f32.mrf.mxu1 }
 0x4fe   :  { %v5537_v55 = vadd.f32 %v5536_v21, %v10842_v59  ;;  %v5608_v43 = vmul.f32 %v10842_v59, %v10842_v59 }
 0x500   :  { %v5538_v61 = vadd.f32 %v10821_v10, %v5537_v55  ;;  %v5671_v18 = vadd.f32 %v5670_v44, %v5608_v43 }
 0x502   :  { %v5539_v15 = vadd.f32 %v10835_v9, %v5538_v61 }
 0x503   :  { %6595 = vmatmul.mubr.msk.bf16.gmra.mxu0 %vm688_vm1, %v10570_v45  ;;  %v10849_v45 = vpop.f32.mrf.mxu1 }
 0x504   :  { %6598 = vmatprep.mubr.msk.bf16.mxu0 %vm688_vm1, %v10621_v46  ;;  %v5609_v46 = vmul.f32 %v10821_v10, %v10821_v10 }
 0x505   :  { %v10856_v25 = vpop.f32.mrf.mxu1 }
 0x506   :  { %v5672_v29 = vadd.f32 %v5671_v18, %v5609_v46  ;;  %v5611_v58 = vmul.f32 %v10856_v25, %v10856_v25 }
 0x508   :  { %v5673_v8 = vadd.f32 %v5672_v29, %v5610_v32 }
 0x50a   :  { %v5674_v35 = vadd.f32 %v5673_v8, %v5611_v58 }
 0x50b   :  { %6599 = vmatmul.mubr.msk.bf16.gmra.mxu0 %vm688_vm1, %v10573_v2  ;;  %v10863_v2 = vpop.f32.mrf.mxu1 }
 0x50c   :  { %6602 = vmatprep.mubr.msk.bf16.mxu0 %vm688_vm1, %v10633_v26  ;;  %v5540_v26 = vadd.f32 %v5539_v15, %v10856_v25  ;;  %v5614_v7 = vmul.f32 %v10863_v2, %v10863_v2 }
 0x50d   :  { %v10870_v30 = vpop.f32.mrf.mxu1 }
 0x50e   :  { %v5541_v3 = vadd.f32 %v5540_v26, %v10870_v30  ;;  %v5612_v36 = vmul.f32 %v10870_v30, %v10870_v30 }
 0x510   :  { %v5542_v6 = vadd.f32 %v10849_v45, %v5541_v3  ;;  %v5675_v20 = vadd.f32 %v5674_v35, %v5612_v36 }
 0x512   :  { %v5543_v49 = vadd.f32 %v10863_v2, %v5542_v6 }
 0x513   :  { %6603 = vmatmul.mubr.msk.bf16.gmra.mxu0 %vm688_vm1, %v10575_v14  ;;  %v10877_v14 = vpop.f32.mrf.mxu1 }
 0x514   :  { %6606 = vmatprep.mubr.msk.bf16.mxu0 %vm688_vm1, %v10637_v0  ;;  %v5613_v0 = vmul.f32 %v10849_v45, %v10849_v45  ;;  %v5617_v55 = vmul.f32 %v10877_v14, %v10877_v14 }
 0x515   :  { %v10882_v5 = vpop.f32.mrf.mxu1 }
 0x516   :  { %v5676_v50 = vadd.f32 %v5675_v20, %v5613_v0  ;;  %v5615_v19 = vmul.f32 %v10882_v5, %v10882_v5 }
 0x517   :  { %v10887_v12 = vpop.f32.mrf.mxu1 }
 0x518   :  { %v5677_v39 = vadd.f32 %v5676_v50, %v5614_v7  ;;  %v5618_v18 = vmul.f32 %v10887_v12, %v10887_v12 }
 0x519   :  { %v10892_v28 = vpop.f32.mrf.mxu1 }
 0x51a   :  { %v5678_v21 = vadd.f32 %v5677_v39, %v5615_v19  ;;  %v5616_v47 = vmul.f32 %v10892_v28, %v10892_v28 }
 0x51b   :  { %6607 = vmatmul.mubr.msk.bf16.gmra.mxu0 %vm688_vm1, %v10404_v16  ;;  %v5544_v16 = vadd.f32 %v5543_v49, %v10882_v5  ;;  %v10897_v44 = vpop.f32.mrf.mxu1 }
 0x51c   :  { %v5679_v46 = vadd.f32 %v5678_v21, %v5616_v47  ;;  %v5621_v20 = vmul.f32 %v10897_v44, %v10897_v44 }
 0x51d   :  { %v5545_v33 = vadd.f32 %v5544_v16, %v10892_v28  ;;  %v10902_v61 = vpop.f32.mrf.mxu1 }
 0x51e   :  { %v5680_v32 = vadd.f32 %v5679_v46, %v5617_v55  ;;  %v5619_v58 = vmul.f32 %v10902_v61, %v10902_v61 }
 0x51f   :  { %v5546_v43 = vadd.f32 %v10877_v14, %v5545_v33  ;;  %v10907_v15 = vpop.f32.mrf.mxu1 }
 0x520   :  { %13299 = vst [vmem:[#allocation33_spill] sm:$0xff] %v10907_v15  ;;  %v5681_v8 = vadd.f32 %v5680_v32, %v5618_v18  ;;  %v5622_v16 = vmul.f32 %v10907_v15, %v10907_v15 }
 0x521   :  { %v5547_v29 = vadd.f32 %v10887_v12, %v5546_v43  ;;  %v10912_v35 = vpop.f32.mrf.mxu1 }
 0x522   :  { %v5682_v3 = vadd.f32 %v5681_v8, %v5619_v58  ;;  %v5620_v0 = vmul.f32 %v10912_v35, %v10912_v35 }
 0x523   :  { %v5548_v26 = vadd.f32 %v5547_v29, %v10902_v61  ;;  %v10917_v6 = vpop.f32.mrf.mxu1 }
 0x524   :  { %13300 = vst [vmem:[#allocation61_spill] sm:$0xff] %v10917_v6  ;;  %v5683_v50 = vadd.f32 %v5682_v3, %v5620_v0 }
 0x525   :  { %v5549_v36 = vadd.f32 %v5548_v26, %v10912_v35  ;;  %v10922_v49 = vpop.f32.mrf.mxu1  ;;  %v5625_v26 = vmul.f32 %v10917_v6, %v10917_v6 }
 0x526   :  { %13301 = vst [vmem:[#allocation65_spill] sm:$0xff] %v10922_v49  ;;  %v5684_v19 = vadd.f32 %v5683_v50, %v5621_v20  ;;  %v5623_v47 = vmul.f32 %v10922_v49, %v10922_v49 }
 0x527   :  { %v5550_v7 = vadd.f32 %v10897_v44, %v5549_v36  ;;  %v10927_v21 = vpop.f32.mrf.mxu1 }
 0x528   :  { %13302 = vst [vmem:[#allocation35_spill] sm:$0xff] %v10927_v21  ;;  %v5685_v55 = vadd.f32 %v5684_v19, %v5622_v16  ;;  %v5626_v36 = vmul.f32 %v10927_v21, %v10927_v21 }
 0x529   :  { %v5551_v39 = vadd.f32 %v10907_v15, %v5550_v7  ;;  %v10932_v43 = vpop.f32.mrf.mxu1 }
 0x52a   :  { %13303 = vst [vmem:[#allocation18_spill] sm:$0xff] %v10932_v43  ;;  %v5686_v46 = vadd.f32 %v5685_v55, %v5623_v47  ;;  %v5624_v32 = vmul.f32 %v10932_v43, %v10932_v43 }
 0x52b   :  { %v5552_v33 = vadd.f32 %v5551_v39, %v10922_v49  ;;  %v10937_v29 = vpop.f32.mrf.mxu1 }
 0x52c   :  { %13304 = vst [vmem:[#allocation63_spill] sm:$0xff] %v10937_v29  ;;  %v5687_v8 = vadd.f32 %v5686_v46, %v5624_v32 }
 0x52d   :  { %v5553_v18 = vadd.f32 %v5552_v33, %v10932_v43  ;;  %v10942_v3 = vpop.f32.mrf.mxu1 }
 0x52e   :  { %13305 = vst [vmem:[#allocation38_spill] sm:$0xff] %v10942_v3  ;;  %v5688_v0 = vadd.f32 %v5687_v8, %v5625_v26  ;;  %v5627_v16 = vmul.f32 %v10942_v3, %v10942_v3 }
 0x52f   :  { %v5554_v58 = vadd.f32 %v10917_v6, %v5553_v18  ;;  %v10947_v7 = vpop.f32.mrf.mxu1  ;;  %v5629_v18 = vmul.f32 %v10937_v29, %v10937_v29 }
 0x530   :  { %13306 = vst [vmem:[#allocation101_spill] sm:$0xff] %v10947_v7  ;;  %v5689_v19 = vadd.f32 %v5688_v0, %v5626_v36  ;;  %v5630_v8 = vmul.f32 %v10947_v7, %v10947_v7 }
 0x531   :  { %v5555_v20 = vadd.f32 %v10927_v21, %v5554_v58  ;;  %v10952_v39 = vpop.f32.mrf.mxu1 }
 0x532   :  { %13307 = vst [vmem:[#allocation104_spill] sm:$0xff] %v10952_v39  ;;  %v5690_v33 = vadd.f32 %v5689_v19, %v5627_v16  ;;  %v5628_v55 = vmul.f32 %v10952_v39, %v10952_v39 }
 0x533   :  { %v5556_v50 = vadd.f32 %v5555_v20, %v10942_v3  ;;  %v10957_v46 = vpop.f32.mrf.mxu1 }
 0x534   :  { %13308 = vst [vmem:[#allocation98_spill] sm:$0xff] %v10957_v46  ;;  %v5691_v26 = vadd.f32 %v5690_v33, %v5628_v55 }
 0x535   :  { %v5557_v47 = vadd.f32 %v5556_v50, %v10952_v39  ;;  %v10962_v58 = vpop.f32.mrf.mxu1 }
 0x536   :  { %13309 = vst [vmem:[#allocation68_spill] sm:$0xff] %v10962_v58  ;;  %v5692_v36 = vadd.f32 %v5691_v26, %v5629_v18 }
 0x537   :  { %v5558_v32 = vadd.f32 %v10937_v29, %v5557_v47  ;;  %v10969_v50 = vpop.f32.mrf.mxu1  ;;  %v5631_v47 = vmul.f32 %v10962_v58, %v10962_v58 }
 0x538   :  { %13311 = vst [vmem:[#allocation30_spill] sm:$0xff] %v10969_v50  ;;  %v5693_v33 = vadd.f32 %v5692_v36, %v5630_v8 }
 0x539   :  { %v5559_v0 = vadd.f32 %v10947_v7, %v5558_v32  ;;  %v10978_v29 = vpop.f32.mrf.mxu1 }
 0x53a   :  { %13314 = vst [vmem:[#allocation66_spill] sm:$0xff] %v10978_v29  ;;  %v5632_v8 = vmul.f32 %v10978_v29, %v10978_v29 }
 0x53b   :  { %v5560_v19 = vadd.f32 %v5559_v0, %v10962_v58  ;;  %v5694_v0 = vadd.f32 %v5693_v33, %v5631_v47  ;;  %v10993_v58 = vpop.f32.mrf.mxu1 }
 0x53c   :  { %13317 = vst [vmem:[#allocation106_spill] sm:$0xff] %v10993_v58 }
 0x53d   :  { %v5561_v7 = vadd.f32 %v5560_v19, %v10978_v29  ;;  %v5695_v43 = vadd.f32 %v5694_v0, %v5632_v8  ;;  %v11008_v15 = vpop.f32.mrf.mxu1 }
 0x53e   :  { %13320 = vst [vmem:[#allocation99_spill] sm:$0xff] %v11008_v15 }
 0x53f   :  { %v5562_v29 = vadd.f32 %v10957_v46, %v5561_v7  ;;  %v5634_v7 = vmul.f32 %v10969_v50, %v10969_v50 }
 0x541   :  { %v5563_v8 = vadd.f32 %v10969_v50, %v5562_v29 }
 0x543   :  { %v5564_v29 = vadd.f32 %v5563_v8, %v11008_v15 }
 0x563   :  { %v10967_v20 = vpop.f32.mrf.mxu0 }
 0x564   :  { %13310 = vst [vmem:[#allocation40_spill] sm:$0xff] %v10967_v20  ;;  %v4911_v3 = vmul.f32 %v10967_v20, %v10967_v20 }
 0x565   :  { %v10971_v16 = vpop.f32.mrf.mxu0 }
 0x566   :  { %13312 = vst [vmem:[#allocation20_spill] sm:$0xff] %v10971_v16  ;;  %v4909_v18 = vmul.f32 %v10971_v16, %v10971_v16 }
 0x567   :  { %v10976_v55 = vpop.f32.mrf.mxu0 }
 0x568   :  { %13313 = vst [vmem:[#allocation69_spill] sm:$0xff] %v10976_v55  ;;  %v4912_v47 = vmul.f32 %v10976_v55, %v10976_v55 }
 0x569   :  { %v10980_v39 = vpop.f32.mrf.mxu0 }
 0x56a   :  { %13315 = vst [vmem:[#allocation71_spill] sm:$0xff] %v10980_v39  ;;  %v4839_v32 = vadd.f32 %v10980_v39, %v10971_v16  ;;  %v4910_v26 = vmul.f32 %v10980_v39, %v10980_v39  ;;  %v5633_v39 = vmul.f32 %v10957_v46, %v10957_v46 }
 0x56b   :  { %v10991_v36 = vpop.f32.mrf.mxu0 }
 0x56c   :  { %13316 = vst [vmem:[#allocation102_spill] sm:$0xff] %v10991_v36  ;;  %v4840_v21 = vadd.f32 %v10967_v20, %v4839_v32  ;;  %v4973_v6 = vadd.f32 %v4910_v26, %v4909_v18  ;;  %v5696_v0 = vadd.f32 %v5695_v43, %v5633_v39  ;;  %v5635_v39 = vmul.f32 %v11008_v15, %v11008_v15 }
 0x56d   :  { %v10998_v16 = vpop.f32.mrf.mxu0 }
 0x56e   :  { %13318 = vst [vmem:[#allocation100_spill] sm:$0xff] %v10998_v16  ;;  %v4974_v33 = vadd.f32 %v4973_v6, %v4911_v3  ;;  %v4841_v19 = vadd.f32 %v10976_v55, %v4840_v21  ;;  %v4913_v32 = vmul.f32 %v10998_v16, %v10998_v16 }
 0x56f   :  { %v11006_v49 = vpop.f32.mrf.mxu0 }
 0x570   :  { %13319 = vst [vmem:[#allocation109_spill] sm:$0xff] %v11006_v49  ;;  %v4842_v18 = vadd.f32 %v4841_v19, %v10998_v16  ;;  %v4975_v26 = vadd.f32 %v4974_v33, %v4912_v47  ;;  %v11023_v19 = vpop.f32.mrf.mxu1  ;;  %v4915_v47 = vmul.f32 %v10991_v36, %v10991_v36  ;;  %v5697_v16 = vadd.f32 %v5696_v0, %v5634_v7 }
 0x571   :  { %v11013_v20 = vpop.f32.mrf.mxu0  ;;  %13323 = vst [vmem:[#allocation73_spill] sm:$0xff] %v11023_v19 }
 0x572   :  { %13321 = vst [vmem:[#allocation21_spill] sm:$0xff] %v11013_v20  ;;  %v4976_v6 = vadd.f32 %v4975_v26, %v4913_v32  ;;  %v4843_v21 = vadd.f32 %v4842_v18, %v11013_v20  ;;  %v4914_v3 = vmul.f32 %v11013_v20, %v11013_v20  ;;  %v4916_v26 = vmul.f32 %v11006_v49, %v11006_v49  ;;  %v11038_v46 = vpop.f32.mrf.mxu1 }
 0x573   :  { %v11021_v55 = vpop.f32.mrf.mxu0  ;;  %13326 = vst [vmem:[#allocation70_spill] sm:$0xff] %v11038_v46  ;;  %v5565_v7 = vadd.f32 %v5564_v29, %v11038_v46  ;;  %v5636_v0 = vmul.f32 %v11038_v46, %v11038_v46 }
 0x574   :  { %13322 = vst [vmem:[#allocation97_spill] sm:$0xff] %v11021_v55  ;;  %v4844_v33 = vadd.f32 %v10991_v36, %v4843_v21  ;;  %v4977_v32 = vadd.f32 %v4976_v6, %v4914_v3 }
 0x575   :  { %v11028_v18 = vpop.f32.mrf.mxu0 }
 0x576   :  { %13324 = vst [vmem:[#allocation17_spill] sm:$0xff] %v11028_v18  ;;  %v4978_v20 = vadd.f32 %v4977_v32, %v4915_v47  ;;  %v4845_v43 = vadd.f32 %v11006_v49, %v4844_v33  ;;  %v4917_v21 = vmul.f32 %v11028_v18, %v11028_v18  ;;  %v5698_v32 = vadd.f32 %v5697_v16, %v5635_v39 }
 0x577   :  { %v11036_v50 = vpop.f32.mrf.mxu0 }
 0x578   :  { %13325 = vst [vmem:[#allocation72_spill] sm:$0xff] %v11036_v50  ;;  %v4846_v6 = vadd.f32 %v4845_v43, %v11028_v18  ;;  %v4979_v3 = vadd.f32 %v4978_v20, %v4916_v26  ;;  %v11053_v43 = vpop.f32.mrf.mxu1  ;;  %v4919_v20 = vmul.f32 %v11021_v55, %v11021_v55  ;;  %v4920_v16 = vmul.f32 %v11036_v50, %v11036_v50 }
 0x579   :  { %v11043_v36 = vpop.f32.mrf.mxu0  ;;  %13329 = vst [vmem:[#allocation76_spill] sm:$0xff] %v11053_v43  ;;  %v5699_v18 = vadd.f32 %v5698_v32, %v5636_v0  ;;  %v5638_v32 = vmul.f32 %v11023_v19, %v11023_v19 }
 0x57a   :  { %13327 = vst [vmem:[#allocation103_spill] sm:$0xff] %v11043_v36  ;;  %v4980_v47 = vadd.f32 %v4979_v3, %v4917_v21  ;;  %v4847_v33 = vadd.f32 %v4846_v6, %v11043_v36  ;;  %v4918_v8 = vmul.f32 %v11043_v36, %v11043_v36  ;;  %v5637_v3 = vmul.f32 %v10993_v58, %v10993_v58  ;;  %v11068_v15 = vpop.f32.mrf.mxu1 }
 0x57b   :  { %v11051_v49 = vpop.f32.mrf.mxu0  ;;  %v5566_v36 = vadd.f32 %v10993_v58, %v5565_v7  ;;  %13332 = vst [vmem:[#allocation58_spill] sm:$0xff] %v11068_v15 }
 0x57c   :  { %13328 = vst [vmem:[#allocation26_spill] sm:$0xff] %v11051_v49  ;;  %v4848_v26 = vadd.f32 %v11021_v55, %v4847_v33  ;;  %v4981_v21 = vadd.f32 %v4980_v47, %v4918_v8  ;;  %v5700_v7 = vadd.f32 %v5699_v18, %v5637_v3  ;;  %v5639_v3 = vmul.f32 %v11068_v15, %v11068_v15 }
 0x57d   :  { %v11058_v6 = vpop.f32.mrf.mxu0  ;;  %v5567_v0 = vadd.f32 %v11023_v19, %v5566_v36 }
 0x57e   :  { %13330 = vst [vmem:[#allocation105_spill] sm:$0xff] %v11058_v6  ;;  %v4982_v39 = vadd.f32 %v4981_v21, %v4919_v20  ;;  %v4849_v29 = vadd.f32 %v11036_v50, %v4848_v26  ;;  %v4921_v33 = vmul.f32 %v11058_v6, %v11058_v6 }
 0x57f   :  { %v11066_v46 = vpop.f32.mrf.mxu0  ;;  %v5568_v36 = vadd.f32 %v5567_v0, %v11068_v15 }
 0x580   :  { %13331 = vst [vmem:[#allocation112_spill] sm:$0xff] %v11066_v46  ;;  %v4850_v47 = vadd.f32 %v4849_v29, %v11058_v6  ;;  %v4983_v8 = vadd.f32 %v4982_v39, %v4920_v16  ;;  %v11083_v29 = vpop.f32.mrf.mxu1  ;;  %v4923_v16 = vmul.f32 %v11051_v49, %v11051_v49  ;;  %v5701_v6 = vadd.f32 %v5700_v7, %v5638_v32 }
 0x581   :  { %v11073_v55 = vpop.f32.mrf.mxu0  ;;  %13335 = vst [vmem:[#allocation41_spill] sm:$0xff] %v11083_v29 }
 0x582   :  { %13333 = vst [vmem:[#allocation22_spill] sm:$0xff] %v11073_v55  ;;  %v4984_v20 = vadd.f32 %v4983_v8, %v4921_v33  ;;  %v4851_v26 = vadd.f32 %v4850_v47, %v11073_v55  ;;  %v4922_v21 = vmul.f32 %v11073_v55, %v11073_v55  ;;  %v4924_v8 = vmul.f32 %v11066_v46, %v11066_v46  ;;  %v11098_v58 = vpop.f32.mrf.mxu1 }
 0x583   :  { %v11081_v50 = vpop.f32.mrf.mxu0  ;;  %13338 = vst [vmem:[#allocation108_spill] sm:$0xff] %v11098_v58  ;;  %v5569_v32 = vadd.f32 %v5568_v36, %v11098_v58  ;;  %v5640_v7 = vmul.f32 %v11098_v58, %v11098_v58 }
 0x584   :  { %13334 = vst [vmem:[#allocation79_spill] sm:$0xff] %v11081_v50  ;;  %v4852_v39 = vadd.f32 %v11051_v49, %v4851_v26  ;;  %v4985_v33 = vadd.f32 %v4984_v20, %v4922_v21 }
 0x585   :  { %v11088_v47 = vpop.f32.mrf.mxu0 }
 0x586   :  { %13336 = vst [vmem:[#allocation24_spill] sm:$0xff] %v11088_v47  ;;  %v4986_v55 = vadd.f32 %v4985_v33, %v4923_v16  ;;  %v4853_v18 = vadd.f32 %v11066_v46, %v4852_v39  ;;  %v4925_v26 = vmul.f32 %v11088_v47, %v11088_v47  ;;  %v5702_v33 = vadd.f32 %v5701_v6, %v5639_v3 }
 0x587   :  { %v11096_v19 = vpop.f32.mrf.mxu0 }
 0x588   :  { %13337 = vst [vmem:[#allocation75_spill] sm:$0xff] %v11096_v19  ;;  %v4854_v20 = vadd.f32 %v4853_v18, %v11088_v47  ;;  %v4987_v21 = vadd.f32 %v4986_v55, %v4924_v8  ;;  %v11113_v18 = vpop.f32.mrf.mxu1  ;;  %v4927_v55 = vmul.f32 %v11081_v50, %v11081_v50  ;;  %v4928_v6 = vmul.f32 %v11096_v19, %v11096_v19 }
 0x589   :  { %v11103_v49 = vpop.f32.mrf.mxu0  ;;  %v5703_v47 = vadd.f32 %v5702_v33, %v5640_v7  ;;  %v5642_v33 = vmul.f32 %v11083_v29, %v11083_v29 }
 0x58a   :  { %13339 = vst [vmem:[#allocation82_spill] sm:$0xff] %v11103_v49  ;;  %v4988_v16 = vadd.f32 %v4987_v21, %v4925_v26  ;;  %v4855_v39 = vadd.f32 %v4854_v20, %v11103_v49  ;;  %v4926_v0 = vmul.f32 %v11103_v49, %v11103_v49  ;;  %v5641_v21 = vmul.f32 %v11053_v43, %v11053_v43  ;;  %v11128_v15 = vpop.f32.mrf.mxu1 }
 0x58b   :  { %v11111_v46 = vpop.f32.mrf.mxu0  ;;  %v5570_v49 = vadd.f32 %v11053_v43, %v5569_v32  ;;  %13343 = vst [vmem:[#allocation81_spill] sm:$0xff] %v11128_v15 }
 0x58c   :  { %13340 = vst [vmem:[#allocation111_spill] sm:$0xff] %v11111_v46  ;;  %v4856_v8 = vadd.f32 %v11081_v50, %v4855_v39  ;;  %v4989_v26 = vadd.f32 %v4988_v16, %v4926_v0  ;;  %v5704_v32 = vadd.f32 %v5703_v47, %v5641_v21  ;;  %v5643_v21 = vmul.f32 %v11128_v15, %v11128_v15 }
 0x58d   :  { %v11118_v20 = vpop.f32.mrf.mxu0  ;;  %v5571_v7 = vadd.f32 %v11083_v29, %v5570_v49 }
 0x58e   :  { %13341 = vst [vmem:[#allocation44_spill] sm:$0xff] %v11118_v20  ;;  %v4990_v3 = vadd.f32 %v4989_v26, %v4927_v55  ;;  %v4857_v36 = vadd.f32 %v11096_v19, %v4856_v8  ;;  %v4929_v39 = vmul.f32 %v11118_v20, %v11118_v20 }
 0x58f   :  { %v11126_v58 = vpop.f32.mrf.mxu0  ;;  %v5572_v49 = vadd.f32 %v5571_v7, %v11128_v15 }
 0x590   :  { %13342 = vst [vmem:[#allocation78_spill] sm:$0xff] %v11126_v58  ;;  %v4858_v16 = vadd.f32 %v4857_v36, %v11118_v20  ;;  %v4991_v0 = vadd.f32 %v4990_v3, %v4928_v6  ;;  %v11143_v36 = vpop.f32.mrf.mxu1  ;;  %v4931_v6 = vmul.f32 %v11111_v46, %v11111_v46  ;;  %v5705_v20 = vadd.f32 %v5704_v32, %v5642_v33 }
 0x591   :  { %v11133_v50 = vpop.f32.mrf.mxu0  ;;  %13346 = vst [vmem:[#allocation83_spill] sm:$0xff] %v11143_v36 }
 0x592   :  { %13344 = vst [vmem:[#allocation23_spill] sm:$0xff] %v11133_v50  ;;  %v4992_v55 = vadd.f32 %v4991_v0, %v4929_v39  ;;  %v4859_v8 = vadd.f32 %v4858_v16, %v11133_v50  ;;  %v4930_v26 = vmul.f32 %v11133_v50, %v11133_v50  ;;  %v4932_v0 = vmul.f32 %v11126_v58, %v11126_v58  ;;  %v11158_v43 = vpop.f32.mrf.mxu1 }
 0x593   :  { %v11141_v19 = vpop.f32.mrf.mxu0  ;;  %v5573_v33 = vadd.f32 %v5572_v49, %v11158_v43  ;;  %v5644_v32 = vmul.f32 %v11158_v43, %v11158_v43  ;;  %v5645_v49 = vmul.f32 %v11113_v18, %v11113_v18 }
 0x594   :  { %13345 = vst [vmem:[#allocation5_spill] sm:$0xff] %v11141_v19  ;;  %v4860_v3 = vadd.f32 %v11111_v46, %v4859_v8  ;;  %v4993_v39 = vadd.f32 %v4992_v55, %v4930_v26 }
 0x595   :  { %v11148_v16 = vpop.f32.mrf.mxu0 }
 0x596   :  { %13347 = vst [vmem:[#allocation84_spill] sm:$0xff] %v11148_v16  ;;  %v4994_v50 = vadd.f32 %v4993_v39, %v4931_v6  ;;  %v4861_v47 = vadd.f32 %v11126_v58, %v4860_v3  ;;  %v4933_v8 = vmul.f32 %v11148_v16, %v11148_v16  ;;  %v5706_v39 = vadd.f32 %v5705_v20, %v5643_v21 }
 0x597   :  { %v11156_v29 = vpop.f32.mrf.mxu0  ;;  %v5574_v21 = vadd.f32 %v11113_v18, %v5573_v33  ;;  %v5646_v33 = vmul.f32 %v11143_v36, %v11143_v36 }
 0x598   :  { %13348 = vst [vmem:[#allocation7_spill] sm:$0xff] %v11156_v29  ;;  %v4862_v55 = vadd.f32 %v4861_v47, %v11148_v16  ;;  %v4995_v26 = vadd.f32 %v4994_v50, %v4932_v0  ;;  %v4935_v47 = vmul.f32 %v11141_v19, %v11141_v19 }
 0x599   :  { %v11163_v46 = vpop.f32.mrf.mxu0 }
 0x59a   :  { %13349 = vst [vmem:[#allocation6_spill] sm:$0xff] %v11163_v46  ;;  %v4996_v6 = vadd.f32 %v4995_v26, %v4933_v8  ;;  %v4863_v3 = vadd.f32 %v4862_v55, %v11163_v46  ;;  %v4934_v7 = vmul.f32 %v11163_v46, %v11163_v46  ;;  %v4936_v55 = vmul.f32 %v11156_v29, %v11156_v29 }
 0x59b   :  { %v11171_v58 = vpop.f32.mrf.mxu0  ;;  %v5707_v46 = vadd.f32 %v5706_v39, %v5644_v32  ;;  %v5575_v39 = vadd.f32 %v11143_v36, %v5574_v21 }
 0x59c   :  { %13350 = vst [vmem:[#allocation8_spill] sm:$0xff] %v11171_v58  ;;  %v4864_v50 = vadd.f32 %v11141_v19, %v4863_v3  ;;  %v4997_v0 = vadd.f32 %v4996_v6, %v4934_v7 }
 0x59d   :  { %v11176_v8 = vpop.f32.mrf.mxu0  ;;  %v5708_v32 = vadd.f32 %v5707_v46, %v5645_v49 }
 0x59e   :  { %13351 = vst [vmem:[#allocation28_spill] sm:$0xff] %v11176_v8  ;;  %v4998_v26 = vadd.f32 %v4997_v0, %v4935_v47  ;;  %v4865_v20 = vadd.f32 %v11156_v29, %v4864_v50  ;;  %v4937_v6 = vmul.f32 %v11176_v8, %v11176_v8 }
 0x59f   :  { %v11184_v16 = vpop.f32.mrf.mxu0  ;;  %v5709_v29 = vadd.f32 %v5708_v32, %v5646_v33 }
 0x5a0   :  { %13352 = vst [vmem:[#allocation25_spill] sm:$0xff] %v11184_v16  ;;  %v4866_v15 = vadd.f32 %v4865_v20, %v11176_v8  ;;  %v4999_v3 = vadd.f32 %v4998_v26, %v4936_v55  ;;  %v4939_v20 = vmul.f32 %v11171_v58, %v11171_v58  ;;  %v5576_v8 = vrot.slane %v5575_v39, 4 }
 0x5a1   :  { %v11189_v7 = vpop.f32.mrf.mxu0 }
 0x5a2   :  { %13353 = vst [vmem:[#allocation9_spill] sm:$0xff] %v11189_v7  ;;  %v5000_v19 = vadd.f32 %v4999_v3, %v4937_v6  ;;  %v4867_v47 = vadd.f32 %v4866_v15, %v11189_v7  ;;  %v4938_v50 = vmul.f32 %v11189_v7, %v11189_v7  ;;  %v4940_v15 = vmul.f32 %v11184_v16, %v11184_v16 }
 0x5a3   :  { %v11197_v0 = vpop.f32.mrf.mxu0 }
 0x5a4   :  { %13354 = vst [vmem:[#allocation10_spill] sm:$0xff] %v11197_v0  ;;  %v4868_v55 = vadd.f32 %v11171_v58, %v4867_v47  ;;  %v5001_v26 = vadd.f32 %v5000_v19, %v4938_v50  ;;  %v4943_v33 = vmul.f32 %v11197_v0, %v11197_v0 }
 0x5a5   :  { %v11202_v6 = vpop.f32.mrf.mxu0 }
 0x5a6   :  { %13355 = vst [vmem:[#allocation27_spill] sm:$0xff] %v11202_v6  ;;  %v5002_v3 = vadd.f32 %v5001_v26, %v4939_v20  ;;  %v4869_v7 = vadd.f32 %v11184_v16, %v4868_v55  ;;  %v4941_v49 = vmul.f32 %v11202_v6, %v11202_v6  ;;  %v5577_v26 = vadd.f32 %v5576_v8, %v5575_v39 }
 0x5a7   :  { %v11207_v21 = vpop.f32.mrf.mxu0  ;;  %v5710_v55 = vrot.slane %v5709_v29, 4 }
 0x5a8   :  { %13356 = vst [vmem:[#allocation36_spill] sm:$0xff] %v11207_v21  ;;  %v4870_v46 = vadd.f32 %v4869_v7, %v11202_v6  ;;  %v5003_v36 = vadd.f32 %v5002_v3, %v4940_v15 }
 0x5a9   :  { %v11212_v47 = vpop.f32.mrf.mxu0 }
 0x5aa   :  { %13357 = vst [vmem:[#allocation37_spill] sm:$0xff] %v11212_v47  ;;  %v5004_v19 = vadd.f32 %v5003_v36, %v4941_v49  ;;  %v4871_v50 = vadd.f32 %v4870_v46, %v11212_v47  ;;  %v4942_v20 = vmul.f32 %v11212_v47, %v11212_v47  ;;  %v4944_v36 = vmul.f32 %v11207_v21, %v11207_v21 }
 0x5ab   :  { %v11217_v16 = vpop.f32.mrf.mxu0  ;;  %v5578_v46 = vrot.slane %v5577_v26, 2  ;;  %v5711_v49 = vadd.f32 %v5710_v55, %v5709_v29 }
 0x5ac   :  { %13358 = vst [vmem:[#allocation39_spill] sm:$0xff] %v11217_v16  ;;  %v4872_v7 = vadd.f32 %v11197_v0, %v4871_v50  ;;  %v5005_v32 = vadd.f32 %v5004_v19, %v4942_v20  ;;  %v4947_v29 = vmul.f32 %v11217_v16, %v11217_v16 }
 0x5ad   :  { %v11222_v6 = vpop.f32.mrf.mxu0 }
 0x5ae   :  { %13359 = vst [vmem:[#allocation42_spill] sm:$0xff] %v11222_v6  ;;  %v5006_v15 = vadd.f32 %v5005_v32, %v4943_v33  ;;  %v4873_v3 = vadd.f32 %v11207_v21, %v4872_v7  ;;  %v4945_v47 = vmul.f32 %v11222_v6, %v11222_v6  ;;  %v5579_v32 = vadd.f32 %v5578_v46, %v5577_v26 }
 0x5af   :  { %v11227_v8 = vpop.f32.mrf.mxu0  ;;  %v5712_v7 = vrot.slane %v5711_v49, 2 }
 0x5b0   :  { %13360 = vst [vmem:[#allocation47_spill] sm:$0xff] %v11227_v8  ;;  %v4874_v39 = vadd.f32 %v4873_v3, %v11222_v6  ;;  %v5007_v58 = vadd.f32 %v5006_v15, %v4944_v36  ;;  %v5580_v15 = vrot.slane %v5579_v32, 1 }
 0x5b1   :  { %v11232_v50 = vpop.f32.mrf.mxu0 }
 0x5b2   :  { %13361 = vst [vmem:[#allocation19_spill] sm:$0xff] %v11232_v50  ;;  %v5008_v19 = vadd.f32 %v5007_v58, %v4945_v47  ;;  %v4875_v20 = vadd.f32 %v4874_v39, %v11232_v50  ;;  %v4946_v33 = vmul.f32 %v11232_v50, %v11232_v50  ;;  %v4948_v58 = vmul.f32 %v11227_v8, %v11227_v8 }
 0x5b3   :  { %v11237_v21 = vpop.f32.mrf.mxu0  ;;  %v5713_v39 = vadd.f32 %v5712_v7, %v5711_v49 }
 0x5b4   :  { %13362 = vst [vmem:[#allocation31_spill] sm:$0xff] %v11237_v21  ;;  %v4876_v55 = vadd.f32 %v11217_v16, %v4875_v20  ;;  %v5009_v3 = vadd.f32 %v5008_v19, %v4946_v33  ;;  %v4951_v49 = vmul.f32 %v11237_v21, %v11237_v21 }
 0x5b5   :  { %v11242_v6 = vpop.f32.mrf.mxu0 }
 0x5b6   :  { %13363 = vst [vmem:[#allocation52_spill] sm:$0xff] %v11242_v6  ;;  %v5010_v47 = vadd.f32 %v5009_v3, %v4947_v29  ;;  %v4877_v36 = vadd.f32 %v11227_v8, %v4876_v55  ;;  %v4949_v50 = vmul.f32 %v11242_v6, %v11242_v6  ;;  %v5581_v3 = vadd.f32 %v5580_v15, %v5579_v32 }
 0x5b7   :  { %v11247_v26 = vpop.f32.mrf.mxu0  ;;  %v5714_v55 = vrot.slane %v5713_v39, 1 }
 0x5b8   :  { %13364 = vst [vmem:[#allocation87_spill] sm:$0xff] %v11247_v26  ;;  %v4878_v46 = vadd.f32 %v4877_v36, %v11242_v6  ;;  %v5011_v0 = vadd.f32 %v5010_v47, %v4948_v58  ;;  %v11267_v47 = vmul.f32 0.001953125, %v5581_v3 }
 0x5b9   :  { %v11252_v20 = vpop.f32.mrf.mxu0  ;;  %v5715_v32 = vadd.f32 %v5714_v55, %v5713_v39 }
 0x5ba   :  { %13365 = vst [vmem:[#allocation45_spill] sm:$0xff] %v11252_v20  ;;  %v5012_v19 = vadd.f32 %v5011_v0, %v4949_v50  ;;  %v4879_v33 = vadd.f32 %v4878_v46, %v11252_v20  ;;  %v4950_v29 = vmul.f32 %v11252_v20, %v11252_v20  ;;  %v4952_v0 = vmul.f32 %v11247_v26, %v11247_v26 }
 0x5bb   :  { %v11257_v8 = vpop.f32.mrf.mxu0  ;;  %v5717_v39 = vmul.f32 %v11267_v47, %v11267_v47 }
 0x5bc   :  { %13366 = vst [vmem:[#allocation57_spill] sm:$0xff] %v11257_v8  ;;  %v4880_v7 = vadd.f32 %v11237_v21, %v4879_v33  ;;  %v5013_v36 = vadd.f32 %v5012_v19, %v4950_v29  ;;  %v4955_v55 = vmul.f32 %v11257_v8, %v11257_v8 }
 0x5bd   :  { %v11262_v6 = vpop.f32.mrf.mxu0 }
 0x5be   :  { %13367 = vst [vmem:[#allocation67_spill] sm:$0xff] %v11262_v6  ;;  %v5014_v50 = vadd.f32 %v5013_v36, %v4951_v49  ;;  %v4881_v58 = vadd.f32 %v11247_v26, %v4880_v7  ;;  %v4953_v20 = vmul.f32 %v11262_v6, %v11262_v6  ;;  %v5716_v7 = vmul.f32 0.001953125, %v5715_v32 }
 0x5bf   :  { %v11269_v15 = vpop.f32.mrf.mxu0 }
 0x5c0   :  { %13368 = vst [vmem:[#allocation92_spill] sm:$0xff] %v11269_v15  ;;  %v4882_v46 = vadd.f32 %v4881_v58, %v11262_v6  ;;  %v5015_v33 = vadd.f32 %v5014_v50, %v4952_v0  ;;  %v5718_v32 = vsub.f32 %v5716_v7, %v5717_v39 }
 0x5c1   :  { %v11274_v19 = vpop.f32.mrf.mxu0 }
 0x5c2   :  { %13369 = vst [vmem:[#allocation48_spill] sm:$0xff] %v11274_v19  ;;  %v5016_v29 = vadd.f32 %v5015_v33, %v4953_v20  ;;  %v4883_v21 = vadd.f32 %v4882_v46, %v11274_v19  ;;  %v4954_v49 = vmul.f32 %v11274_v19, %v11274_v19  ;;  %v4956_v20 = vmul.f32 %v11269_v15, %v11269_v15 }
 0x5c3   :  { %v11281_v3 = vpop.f32.mrf.mxu0 }
 0x5c4   :  { %13370 = vst [vmem:[#allocation77_spill] sm:$0xff] %v11281_v3  ;;  %v4884_v36 = vadd.f32 %v11257_v8, %v4883_v21  ;;  %v5017_v0 = vadd.f32 %v5016_v29, %v4954_v49  ;;  %v4959_v7 = vmul.f32 %v11281_v3, %v11281_v3 }
 0x5c5   :  { %v11286_v50 = vpop.f32.mrf.mxu0 }
 0x5c6   :  { %13371 = vst [vmem:[#allocation86_spill] sm:$0xff] %v11286_v50  ;;  %v5018_v58 = vadd.f32 %v5017_v0, %v4955_v55  ;;  %v4885_v46 = vadd.f32 %v11269_v15, %v4884_v36  ;;  %v4957_v6 = vmul.f32 %v11286_v50, %v11286_v50  ;;  %v5720_v55 = vadd.f32 1e-05, %v5718_v32 }
 0x5c7   :  { %v11291_v33 = vpop.f32.mrf.mxu0 }
 0x5c8   :  { %13372 = vst [vmem:[#allocation110_spill] sm:$0xff] %v11291_v33  ;;  %v4886_v19 = vadd.f32 %v4885_v46, %v11286_v50  ;;  %v5019_v26 = vadd.f32 %v5018_v58, %v4956_v20  ;;  %v4960_v20 = vmul.f32 %v11291_v33, %v11291_v33  ;;  %6790 = vrsqrt.f32 %v5720_v55 }
 0x5c9   :  { %v11296_v16 = vpop.f32.mrf.mxu0 }
 0x5ca   :  { %13373 = vst [vmem:[#allocation74_spill] sm:$0xff] %v11296_v16  ;;  %v5020_v21 = vadd.f32 %v5019_v26, %v4957_v6  ;;  %v4887_v29 = vadd.f32 %v4886_v19, %v11296_v16  ;;  %v4958_v49 = vmul.f32 %v11296_v16, %v11296_v16 }
 0x5cb   :  { %v11301_v0 = vpop.f32.mrf.mxu0 }
 0x5cc   :  { %13374 = vst [vmem:[#allocation89_spill] sm:$0xff] %v11301_v0  ;;  %v4888_v39 = vadd.f32 %v11281_v3, %v4887_v29  ;;  %v5021_v36 = vadd.f32 %v5020_v21, %v4958_v49  ;;  %v4963_v55 = vmul.f32 %v11301_v0, %v11301_v0 }
 0x5cd   :  { %v11306_v46 = vpop.f32.mrf.mxu0 }
 0x5ce   :  { %13375 = vst [vmem:[#allocation107_spill] sm:$0xff] %v11306_v46  ;;  %v5022_v6 = vadd.f32 %v5021_v36, %v4959_v7  ;;  %v4889_v26 = vadd.f32 %v11291_v33, %v4888_v39  ;;  %v4961_v32 = vmul.f32 %v11306_v46, %v11306_v46 }
 0x5cf   :  { %v11311_v19 = vpop.f32.mrf.mxu0 }
 0x5d0   :  { %13376 = vst [vmem:[#allocation114_spill] sm:$0xff] %v11311_v19  ;;  %v4890_v58 = vadd.f32 %v4889_v26, %v11306_v46  ;;  %v5023_v16 = vadd.f32 %v5022_v6, %v4960_v20  ;;  %v4964_v20 = vmul.f32 %v11311_v19, %v11311_v19 }
 0x5d1   :  { %v11316_v50 = vpop.f32.mrf.mxu0 }
 0x5d2   :  { %13377 = vst [vmem:[#allocation113_spill] sm:$0xff] %v11316_v50  ;;  %v5024_v21 = vadd.f32 %v5023_v16, %v4961_v32  ;;  %v4891_v29 = vadd.f32 %v4890_v58, %v11316_v50  ;;  %v4962_v49 = vmul.f32 %v11316_v50, %v11316_v50 }
 0x5d3   :  { %v11321_v7 = vpop.f32.mrf.mxu0 }
 0x5d4   :  { %13378 = vst [vmem:[#allocation46_spill] sm:$0xff] %v11321_v7  ;;  %v4892_v39 = vadd.f32 %v11301_v0, %v4891_v29  ;;  %v5025_v36 = vadd.f32 %v5024_v21, %v4962_v49 }
 0x5d5   :  { %v11326_v26 = vpop.f32.mrf.mxu0 }
 0x5d6   :  { %13379 = vst [vmem:[#allocation14_spill] sm:$0xff] %v11326_v26  ;;  %v5026_v6 = vadd.f32 %v5025_v36, %v4963_v55  ;;  %v4893_v16 = vadd.f32 %v11311_v19, %v4892_v39  ;;  %v4965_v50 = vmul.f32 %v11326_v26, %v11326_v26  ;;  %v6791_v55 = vpop.eup %6790  ;;  %v5719_v39 = vld [vmem:[%s12743_s11] sm:$0x1]  ;;  %v4967_v36 = vmul.f32 %v11321_v7, %v11321_v7 }
 0x5d7   :  { %v11331_v58 = vpop.f32.mrf.mxu0 }
 0x5d8   :  { %13380 = vst [vmem:[#allocation43_spill] sm:$0xff] %v11331_v58  ;;  %v4894_v32 = vadd.f32 %v4893_v16, %v11326_v26  ;;  %v5027_v46 = vadd.f32 %v5026_v6, %v4964_v20 }
 0x5d9   :  { %v11336_v33 = vpop.f32.mrf.mxu0 }
 0x5da   :  { %13381 = vst [vmem:[#allocation11_spill] sm:$0xff] %v11336_v33  ;;  %v5028_v29 = vadd.f32 %v5027_v46, %v4965_v50  ;;  %v4895_v21 = vadd.f32 %v4894_v32, %v11336_v33  ;;  %v4966_v49 = vmul.f32 %v11336_v33, %v11336_v33  ;;  %v4968_v50 = vmul.f32 %v11331_v58, %v11331_v58 }
 0x5db   :  { %v11341_v0 = vpop.f32.mrf.mxu0  ;;  %v5722_v33 = vmul.f32 %v6791_v55, %v5719_v39  ;;  %v5793_v55 = vld [vmem:[%s12744_s12] sm:$0x1] }
 0x5dc   :  { %13382 = vst [vmem:[#allocation49_spill] sm:$0xff] %v11341_v0  ;;  %v4896_v20 = vadd.f32 %v11321_v7, %v4895_v21  ;;  %v5029_v6 = vadd.f32 %v5028_v29, %v4966_v49  ;;  %v4971_v39 = vmul.f32 %v11341_v0, %v11341_v0  ;;  %v13397_v7 = vld [vmem:[#allocation68_spill] sm:$0xff] }
 0x5dd   :  { %v11349_v16 = vpop.f32.mrf.mxu0 }
 0x5de   :  { %13383 = vst [vmem:[#allocation54_spill] sm:$0xff] %v11349_v16  ;;  %v5030_v46 = vadd.f32 %v5029_v6, %v4967_v36  ;;  %v4897_v32 = vadd.f32 %v11331_v58, %v4896_v20  ;;  %v4969_v3 = vmul.f32 %v11349_v16, %v11349_v16  ;;  %v5794_v36 = vmul.f32 %v5722_v33, %v11267_v47 }
 0x5df   :  { %v11354_v26 = vpop.f32.mrf.mxu0 }
 0x5e0   :  { %13384 = vst [vmem:[#allocation51_spill] sm:$0xff] %v11354_v26  ;;  %v4898_v19 = vadd.f32 %v4897_v32, %v11349_v16  ;;  %v5031_v15 = vadd.f32 %v5030_v46, %v4968_v50  ;;  %v11372_v50 = vrot.slane %v5722_v33, %v13275_v52  ;;  %v5795_v47 = vsub.f32 %v5793_v55, %v5794_v36 }
 0x5e1   :  { %v11359_v8 = vpop.f32.mrf.mxu0 }
 0x5e2   :  { %13385 = vst [vmem:[#allocation91_spill] sm:$0xff] %v11359_v8  ;;  %v5032_v29 = vadd.f32 %v5031_v15, %v4969_v3  ;;  %v4899_v21 = vadd.f32 %v4898_v19, %v11359_v8  ;;  %v4970_v49 = vmul.f32 %v11359_v8, %v11359_v8  ;;  %v4972_v15 = vmul.f32 %v11354_v26, %v11354_v26 }
 0x5e3   :  { %v5790_v46 = vmul.f32 %v11372_v50, %v11158_v43  ;;  %v11381_v58 = vmul.f32 %v11372_v50, %v10577_v27  ;;  %v11385_v33 = vmul.f32 %v11372_v50, %v10613_v37  ;;  %v11397_v43 = vmul.f32 %v11372_v50, %v10648_v53 }
 0x5e4   :  { %v4900_v20 = vadd.f32 %v11341_v0, %v4899_v21  ;;  %v5033_v6 = vadd.f32 %v5032_v29, %v4970_v49  ;;  %v11389_v29 = vmul.f32 %v10554_v13, %v11372_v50  ;;  %v11393_v21 = vmul.f32 %v10593_v17, %v11372_v50 }
 0x5e5   :  { %v11401_v27 = vmul.f32 %v11372_v50, %v10672_v34  ;;  %v11404_v37 = vrot.slane %v5795_v47, %v13275_v52  ;;  %v11408_v13 = vmul.f32 %v10631_v4, %v11372_v50  ;;  %v11412_v17 = vmul.f32 %v10659_v40, %v11372_v50 }
 0x5e6   :  { %v4901_v3 = vadd.f32 %v11354_v26, %v4900_v20  ;;  %v5034_v19 = vadd.f32 %v5033_v6, %v4971_v39  ;;  %v11416_v53 = vmul.f32 %v11372_v50, %v10696_v38  ;;  %v11420_v34 = vmul.f32 %v11372_v50, %v10720_v24 }
 0x5e7   :  { %v11424_v55 = vmul.f32 %v10683_v54, %v11372_v50  ;;  %v11427_v4 = vadd.f32 %v11404_v37, %v5790_v46  ;;  %v11431_v40 = vmul.f32 %v10707_v56, %v11372_v50  ;;  %v11435_v38 = vmul.f32 %v11372_v50, %v10744_v51 }
 0x5e8   :  { %v4902_v32 = vrot.slane %v4901_v3, 4  ;;  %v5035_v16 = vadd.f32 %v5034_v19, %v4972_v15  ;;  %v11439_v24 = vmul.f32 %v11372_v50, %v10760_v41  ;;  %v11443_v54 = vmul.f32 %v10731_v57, %v11372_v50 }
 0x5e9   :  { %13386 = vst [vmem:[#allocation12_spill] sm:$0xff] %v11427_v4  ;;  %v11451_v56 = vmul.f32 %v11372_v50, %v10772_v42  ;;  %v11455_v51 = vmul.f32 %v11372_v50, %v10786_v62  ;;  %v11459_v41 = vmul.f32 %v10766_v1, %v11372_v50  ;;  %v11463_v57 = vmul.f32 %v10779_v22, %v11372_v50  ;;  %v13399_v4 = vld [vmem:[#allocation66_spill] sm:$0xff] }
 0x5ea   :  { %v4903_v49 = vadd.f32 %v4902_v32, %v4901_v3  ;;  %v5036_v36 = vrot.slane %v5035_v16, 4  ;;  %v11471_v42 = vmul.f32 %v11372_v50, %v10814_v31  ;;  %v11475_v62 = vmul.f32 %v10793_v63, %v11372_v50 }
 0x5eb   :  { %v11479_v1 = vmul.f32 %v10807_v11, %v11372_v50  ;;  %v11483_v22 = vmul.f32 %v11372_v50, %v10828_v23  ;;  %v11491_v31 = vmul.f32 %v10821_v10, %v11372_v50  ;;  %v11495_v63 = vmul.f32 %v10835_v9, %v11372_v50 }
 0x5ec   :  { %v4904_v39 = vrot.slane %v4903_v49, 2  ;;  %v5037_v20 = vadd.f32 %v5036_v36, %v5035_v16  ;;  %v11447_v16 = vmul.f32 %v10754_v48, %v11372_v50  ;;  %v11467_v48 = vmul.f32 %v11372_v50, %v10800_v60  ;;  %v13388_v36 = vld [vmem:[#allocation33_spill] sm:$0xff] }
 0x5ed   :  { %v11487_v60 = vmul.f32 %v11372_v50, %v10842_v59  ;;  %v11499_v11 = vmul.f32 %v11372_v50, %v10856_v25  ;;  %v11503_v23 = vmul.f32 %v11372_v50, %v10870_v30  ;;  %v11507_v59 = vmul.f32 %v10849_v45, %v11372_v50 }
 0x5ee   :  { %v4905_v6 = vadd.f32 %v4904_v39, %v4903_v49  ;;  %v5038_v15 = vrot.slane %v5037_v20, 2  ;;  %v11511_v10 = vmul.f32 %v10863_v2, %v11372_v50  ;;  %v11515_v9 = vmul.f32 %v11372_v50, %v10882_v5 }
 0x5ef   :  { %v11519_v25 = vmul.f32 %v11372_v50, %v10892_v28  ;;  %v11525_v49 = vmul.f32 %v10877_v14, %v11372_v50  ;;  %v11529_v45 = vmul.f32 %v10887_v12, %v11372_v50  ;;  %v11533_v2 = vmul.f32 %v11372_v50, %v10902_v61 }
 0x5f0   :  { %v4906_v3 = vrot.slane %v4905_v6, 1  ;;  %v5039_v19 = vadd.f32 %v5038_v15, %v5037_v20  ;;  %v11537_v5 = vmul.f32 %v11372_v50, %v10912_v35  ;;  %v11541_v28 = vmul.f32 %v10897_v44, %v11372_v50  ;;  %v13389_v20 = vld [vmem:[#allocation65_spill] sm:$0xff] }
 0x5f1   :  { %v11545_v14 = vmul.f32 %v13388_v36, %v11372_v50  ;;  %v11551_v61 = vmul.f32 %v11372_v50, %v13389_v20  ;;  %v13391_v15 = vld [vmem:[#allocation61_spill] sm:$0xff]  ;;  %v13395_v20 = vld [vmem:[#allocation63_spill] sm:$0xff] }
 0x5f2   :  { %v4907_v47 = vadd.f32 %v4906_v3, %v4905_v6  ;;  %v5040_v46 = vrot.slane %v5039_v19, 1  ;;  %v13390_v6 = vld [vmem:[#allocation18_spill] sm:$0xff]  ;;  %v11559_v44 = vmul.f32 %v13391_v15, %v11372_v50  ;;  %v13392_v3 = vld [vmem:[#allocation35_spill] sm:$0xff]  ;;  %v13396_v15 = vld [vmem:[#allocation101_spill] sm:$0xff] }
 0x5f3   :  { %v11555_v35 = vmul.f32 %v11372_v50, %v13390_v6  ;;  %v11575_v6 = vmul.f32 %v13395_v20, %v11372_v50  ;;  %v11579_v0 = vmul.f32 %v13396_v15, %v11372_v50  ;;  %v13403_v20 = vld [vmem:[#allocation30_spill] sm:$0xff] }
 0x5f4   :  { %v11521_v32 = vmul.f32 0.001953125, %v4907_v47  ;;  %v5041_v30 = vadd.f32 %v5040_v46, %v5039_v19  ;;  %v11563_v19 = vmul.f32 %v13392_v3, %v11372_v50  ;;  %v13393_v47 = vld [vmem:[#allocation38_spill] sm:$0xff]  ;;  %v11583_v3 = vmul.f32 %v11372_v50, %v13397_v7 }
 0x5f5   :  { %v11567_v46 = vmul.f32 %v11372_v50, %v13393_v47  ;;  %v11587_v47 = vmul.f32 %v11372_v50, %v13399_v4  ;;  %v13406_v15 = vld [vmem:[#allocation70_spill] sm:$0xff] }
 0x5f6   :  { %13387 = vst [vmem:[#allocation16_spill] sm:$0xff] %v11521_v32  ;;  %v5042_v39 = vmul.f32 0.001953125, %v5041_v30  ;;  %v5043_v12 = vmul.f32 %v11521_v32, %v11521_v32  ;;  %v13394_v30 = vld [vmem:[#allocation104_spill] sm:$0xff]  ;;  %13398 = vst [vmem:[#allocation50_spill] sm:$0xff] %v11583_v3  ;;  %v11595_v32 = vmul.f32 %v13403_v20, %v11372_v50  ;;  %v11603_v7 = vmul.f32 %v11372_v50, %v13406_v15  ;;  %v13408_v4 = vld [vmem:[#allocation106_spill] sm:$0xff] }
 0x5f7   :  { %v11571_v36 = vmul.f32 %v11372_v50, %v13394_v30  ;;  %13400 = vst [vmem:[#allocation56_spill] sm:$0xff] %v11587_v47  ;;  %v13401_v30 = vld [vmem:[#allocation98_spill] sm:$0xff]  ;;  %v11607_v47 = vmul.f32 %v13408_v4, %v11372_v50  ;;  %v13414_v15 = vld [vmem:[#allocation76_spill] sm:$0xff] }
 0x5f8   :  { %v5044_v26 = vsub.f32 %v5042_v39, %v5043_v12  ;;  %v11591_v8 = vmul.f32 %v13401_v30, %v11372_v50  ;;  %13404 = vst [vmem:[#allocation53_spill] sm:$0xff] %v11595_v32  ;;  %v13405_v39 = vld [vmem:[#allocation99_spill] sm:$0xff]  ;;  %13407 = vst [vmem:[#allocation80_spill] sm:$0xff] %v11603_v7  ;;  %v13410_v30 = vld [vmem:[#allocation73_spill] sm:$0xff]  ;;  %v11623_v7 = vmul.f32 %v13414_v15, %v11372_v50 }
 0x5f9   :  { %v11599_v12 = vmul.f32 %v11372_v50, %v13405_v39  ;;  %13409 = vst [vmem:[#allocation94_spill] sm:$0xff] %v11607_v47  ;;  %v13411_v3 = vld [vmem:[#allocation58_spill] sm:$0xff]  ;;  %v13412_v32 = vld [vmem:[#allocation108_spill] sm:$0xff]  ;;  %v13416_v47 = vld [vmem:[#allocation81_spill] sm:$0xff]  ;;  %v11643_v15 = vadd.f32 %v11404_v37, %v11381_v58  ;;  %v11663_v58 = vadd.f32 %v11404_v37, %v11401_v27  ;;  %v11687_v27 = vadd.f32 %v11404_v37, %v11431_v40 }
 0x5fa   :  { %13402 = vst [vmem:[#allocation93_spill] sm:$0xff] %v11591_v8  ;;  %v5046_v52 = vadd.f32 1e-05, %v5044_v26  ;;  %v11611_v8 = vmul.f32 %v13410_v30, %v11372_v50  ;;  %v11615_v20 = vmul.f32 %v11372_v50, %v13411_v3  ;;  %v11619_v39 = vmul.f32 %v11372_v50, %v13412_v32  ;;  %v13415_v26 = vld [vmem:[#allocation41_spill] sm:$0xff]  ;;  %v13417_v32 = vld [vmem:[#allocation83_spill] sm:$0xff] }
 0x5fb   :  { %v11627_v4 = vmul.f32 %v13415_v26, %v11372_v50  ;;  %v11631_v30 = vmul.f32 %v11372_v50, %v13416_v47  ;;  %v11635_v3 = vmul.f32 %v11113_v18, %v11372_v50  ;;  %13418 = vst [vmem:[#allocation85_spill] sm:$0xff] %v11643_v15  ;;  %v11647_v26 = vadd.f32 %v11404_v37, %v11385_v33  ;;  %v13553_v15 = vld [vmem:[#allocation14_spill] sm:$0xff] }
 0x5fc   :  { %13413 = vst [vmem:[#allocation60_spill] sm:$0xff] %v11619_v39  ;;  %6792 = vrsqrt.f32 %v5046_v52  ;;  %v11639_v39 = vmul.f32 %v13417_v32, %v11372_v50  ;;  %v11651_v47 = vadd.f32 %v11404_v37, %v11389_v29  ;;  %v11655_v52 = vadd.f32 %v11404_v37, %v11393_v21  ;;  %13423 = vst [vmem:[#allocation34_spill] sm:$0xff] %v11663_v58  ;;  %v13543_v58 = vld [vmem:[#allocation110_spill] sm:$0xff] }
 0x5fd   :  { %13419 = vst [vmem:[#allocation29_spill] sm:$0xff] %v11647_v26  ;;  %v11659_v18 = vadd.f32 %v11404_v37, %v11397_v43  ;;  %v11667_v50 = vadd.f32 %v11404_v37, %v11408_v13  ;;  %v11671_v33 = vadd.f32 %v11404_v37, %v11412_v17  ;;  %v11675_v29 = vadd.f32 %v11404_v37, %v11416_v53  ;;  %v13551_v26 = vld [vmem:[#allocation114_spill] sm:$0xff] }
 0x5fe   :  { %13420 = vst [vmem:[#allocation95_spill] sm:$0xff] %v11651_v47  ;;  %13421 = vst [vmem:[#allocation96_spill] sm:$0xff] %v11655_v52  ;;  %v11679_v21 = vadd.f32 %v11404_v37, %v11420_v34  ;;  %v11683_v43 = vadd.f32 %v11404_v37, %v11424_v55  ;;  %v11691_v13 = vadd.f32 %v11404_v37, %v11435_v38  ;;  %v13547_v52 = vld [vmem:[#allocation113_spill] sm:$0xff] }
 0x5ff   :  { %13422 = vst [vmem:[#allocation62_spill] sm:$0xff] %v11659_v18  ;;  %13424 = vst [vmem:[#allocation55_spill] sm:$0xff] %v11667_v50  ;;  %v11695_v17 = vadd.f32 %v11404_v37, %v11439_v24  ;;  %v11699_v53 = vadd.f32 %v11404_v37, %v11443_v54  ;;  %v11703_v34 = vadd.f32 %v11404_v37, %v11447_v16  ;;  %v13542_v50 = vld [vmem:[#allocation77_spill] sm:$0xff]  ;;  %v13545_v18 = vld [vmem:[#allocation107_spill] sm:$0xff] }
 0x600   :  { %13425 = vst [vmem:[#allocation13_spill] sm:$0xff] %v11671_v33  ;;  %13426 = vst [vmem:[#allocation64_spill] sm:$0xff] %v11675_v29  ;;  %v11707_v55 = vadd.f32 %v11404_v37, %v11451_v56  ;;  %v11711_v40 = vadd.f32 %v11404_v37, %v11455_v51  ;;  %v11715_v38 = vadd.f32 %v11404_v37, %v11459_v41  ;;  %v13540_v29 = vld [vmem:[#allocation86_spill] sm:$0xff]  ;;  %v13549_v47 = vld [vmem:[#allocation89_spill] sm:$0xff] }
 0x601   :  { %13427 = vst [vmem:[#allocation88_spill] sm:$0xff] %v11679_v21  ;;  %13428 = vst [vmem:[#allocation59_spill] sm:$0xff] %v11683_v43  ;;  %v11719_v24 = vadd.f32 %v11404_v37, %v11463_v57  ;;  %v11723_v54 = vadd.f32 %v11404_v37, %v11467_v48  ;;  %v11727_v16 = vadd.f32 %v11404_v37, %v11471_v42  ;;  %v13538_v43 = vld [vmem:[#allocation57_spill] sm:$0xff]  ;;  %v13539_v21 = vld [vmem:[#allocation92_spill] sm:$0xff] }
 0x602   :  { %13429 = vst [vmem:[#allocation15_spill] sm:$0xff] %v11687_v27  ;;  %13430 = vst [vmem:[#allocation90_spill] sm:$0xff] %v11691_v13  ;;  %v11731_v56 = vadd.f32 %v11404_v37, %v11475_v62  ;;  %v11735_v51 = vadd.f32 %v11404_v37, %v11479_v1  ;;  %v11739_v41 = vadd.f32 %v11404_v37, %v11483_v22  ;;  %v13536_v13 = vld [vmem:[#allocation67_spill] sm:$0xff]  ;;  %v13537_v27 = vld [vmem:[#allocation48_spill] sm:$0xff] }
 0x603   :  { %13431 = vst [vmem:[#allocation33_spill] sm:$0xff] %v11695_v17  ;;  %13432 = vst [vmem:[#allocation65_spill] sm:$0xff] %v11699_v53  ;;  %v11743_v57 = vadd.f32 %v11404_v37, %v11487_v60  ;;  %v11747_v48 = vadd.f32 %v11404_v37, %v11491_v31  ;;  %v11751_v42 = vadd.f32 %v11404_v37, %v11495_v63  ;;  %v13534_v53 = vld [vmem:[#allocation31_spill] sm:$0xff]  ;;  %v13541_v33 = vld [vmem:[#allocation74_spill] sm:$0xff] }
 0x604   :  { %13433 = vst [vmem:[#allocation18_spill] sm:$0xff] %v11703_v34  ;;  %13434 = vst [vmem:[#allocation61_spill] sm:$0xff] %v11707_v55  ;;  %v11755_v62 = vadd.f32 %v11404_v37, %v11499_v11  ;;  %v11759_v1 = vadd.f32 %v11404_v37, %v11503_v23  ;;  %v11763_v22 = vadd.f32 %v11404_v37, %v11507_v59  ;;  %v13532_v55 = vld [vmem:[#allocation52_spill] sm:$0xff]  ;;  %v13533_v34 = vld [vmem:[#allocation45_spill] sm:$0xff] }
 0x605   :  { %13435 = vst [vmem:[#allocation35_spill] sm:$0xff] %v11711_v40  ;;  %13436 = vst [vmem:[#allocation38_spill] sm:$0xff] %v11715_v38  ;;  %v11767_v60 = vadd.f32 %v11404_v37, %v11511_v10  ;;  %v11771_v31 = vadd.f32 %v11404_v37, %v11515_v9  ;;  %v11775_v63 = vadd.f32 %v11404_v37, %v11519_v25  ;;  %v13529_v38 = vld [vmem:[#allocation19_spill] sm:$0xff] }
 0x606   :  { %13437 = vst [vmem:[#allocation104_spill] sm:$0xff] %v11719_v24  ;;  %13438 = vst [vmem:[#allocation63_spill] sm:$0xff] %v11723_v54  ;;  %v11779_v11 = vadd.f32 %v11404_v37, %v11525_v49  ;;  %v11783_v23 = vadd.f32 %v11404_v37, %v11529_v45  ;;  %v11787_v59 = vadd.f32 %v11404_v37, %v11533_v2  ;;  %v5045_v2 = vld [vmem:[%s12740_s8] sm:$0x1]  ;;  %v13528_v24 = vld [vmem:[#allocation42_spill] sm:$0xff] }
 0x607   :  { %13439 = vst [vmem:[#allocation101_spill] sm:$0xff] %v11727_v16  ;;  %13440 = vst [vmem:[#allocation68_spill] sm:$0xff] %v11731_v56  ;;  %v11791_v10 = vadd.f32 %v11404_v37, %v11537_v5  ;;  %v11795_v9 = vadd.f32 %v11404_v37, %v11541_v28  ;;  %v11799_v25 = vadd.f32 %v11404_v37, %v11545_v14  ;;  %v13525_v56 = vld [vmem:[#allocation37_spill] sm:$0xff]  ;;  %v13535_v17 = vld [vmem:[#allocation87_spill] sm:$0xff] }
 0x608   :  { %13441 = vst [vmem:[#allocation66_spill] sm:$0xff] %v11735_v51  ;;  %13442 = vst [vmem:[#allocation98_spill] sm:$0xff] %v11739_v41  ;;  %v11803_v49 = vadd.f32 %v11404_v37, %v11551_v61  ;;  %v11807_v45 = vadd.f32 %v11404_v37, %v11555_v35  ;;  %v11814_v5 = vadd.f32 %v11404_v37, %v11559_v44 }
 0x609   :  { %13443 = vst [vmem:[#allocation30_spill] sm:$0xff] %v11743_v57  ;;  %13444 = vst [vmem:[#allocation99_spill] sm:$0xff] %v11747_v48  ;;  %v11818_v28 = vadd.f32 %v11404_v37, %v11563_v19  ;;  %v11822_v14 = vadd.f32 %v11404_v37, %v11567_v46  ;;  %v11826_v61 = vadd.f32 %v11404_v37, %v11571_v36  ;;  %v6793_v35 = vpop.eup %6792  ;;  %v13520_v48 = vld [vmem:[#allocation28_spill] sm:$0xff]  ;;  %v13521_v57 = vld [vmem:[#allocation9_spill] sm:$0xff] }
 0x60a   :  { %13445 = vst [vmem:[#allocation70_spill] sm:$0xff] %v11751_v42  ;;  %13446 = vst [vmem:[#allocation106_spill] sm:$0xff] %v11755_v62  ;;  %v11830_v32 = vadd.f32 %v11404_v37, %v11575_v6  ;;  %v11834_v44 = vadd.f32 %v11404_v37, %v11579_v0  ;;  %v11854_v0 = vadd.f32 %v11404_v37, %v11599_v12  ;;  %v5119_v12 = vld [vmem:[%s12741_s9] sm:$0x1]  ;;  %s6852_s9 = smov [#allocation2]  }
 0x60b   :  { %13447 = vst [vmem:[#allocation73_spill] sm:$0xff] %v11759_v1  ;;  %13448 = vst [vmem:[#allocation58_spill] sm:$0xff] %v11763_v22  ;;  %s6063_s1 = sshll.u32 %s6852_s9, 4  ;;  %s6064_s1 = int_to_ptr.vmem [resolvable:$true] %s6063_s1 }
 0x60c   :  { %13449 = vst [vmem:[#allocation108_spill] sm:$0xff] %v11767_v60  ;;  %13450 = vst [vmem:[#allocation76_spill] sm:$0xff] %v11771_v31  ;;  %s6826_s24 = scalar_lea.vmem %s6064_s1, 8192  ;;  %p6831_p1 = scmp.lt.s32.totalorder %s6064_s1, %s6064_s1 }
 0x60d   :  { %13451 = vst [vmem:[#allocation41_spill] sm:$0xff] %v11775_v63  ;;  %13452 = vst [vmem:[#allocation81_spill] sm:$0xff] %v11779_v11  ;;  %p6827_p0 = scmp.ne.s32.totalorder %s6064_s1, %s6826_s24  ;;  %p6832_p2 = scmp.lt.s32.totalorder %s6826_s24, %s6826_s24 }
 0x60e   :  { %13453 = vst [vmem:[#allocation83_spill] sm:$0xff] %v11783_v23  ;;  %13454 = vst [vmem:[#allocation115_spill] sm:$0xff] %v11787_v59  ;;  %v13510_v59 = vld [vmem:[#allocation75_spill] sm:$0xff]  ;;  %v13511_v23 = vld [vmem:[#allocation12_spill] sm:$0xff] }
 0x60f   :  { %13455 = vst [vmem:[#allocation116_spill] sm:$0xff] %v11791_v10  ;;  %13456 = vst [vmem:[#allocation117_spill] sm:$0xff] %v11795_v9  ;;  %p6833_p3 = por %p6832_p2, %p6831_p1 }
 0x610   :  { %13457 = vst [vmem:[#allocation118_spill] sm:$0xff] %v11799_v25  ;;  %13458 = vst [vmem:[#allocation119_spill] sm:$0xff] %v11803_v49 }
 0x611   :  { %13459 = vst [vmem:[#allocation120_spill] sm:$0xff] %v11807_v45  ;;  %13460 = vst [vmem:[#allocation121_spill] sm:$0xff] %v11814_v5  ;;  %v13466_v5 = vld [vmem:[#allocation50_spill] sm:$0xff]  ;;  %p6834_p4 = pnand %p6833_p3, %p6827_p0 }
 0x612   :  { %13461 = vst [vmem:[#allocation122_spill] sm:$0xff] %v11818_v28  ;;  %13462 = vst [vmem:[#allocation123_spill] sm:$0xff] %v11822_v14  ;;  %v11838_v19 = vadd.f32 %v11404_v37, %v13466_v5  ;;  %v13468_v28 = vld [vmem:[#allocation56_spill] sm:$0xff]  ;;  %v13470_v14 = vld [vmem:[#allocation93_spill] sm:$0xff] }
 0x613   :  { %13463 = vst [vmem:[#allocation124_spill] sm:$0xff] %v11826_v61  ;;  %13464 = vst [vmem:[#allocation125_spill] sm:$0xff] %v11830_v32  ;;  %v11842_v46 = vadd.f32 %v11404_v37, %v13468_v28  ;;  %v11846_v36 = vadd.f32 %v11404_v37, %v13470_v14  ;;  %v13472_v61 = vld [vmem:[#allocation53_spill] sm:$0xff]  ;;  %v13475_v32 = vld [vmem:[#allocation80_spill] sm:$0xff]  ;;  %v11866_v14 = vadd.f32 %v11404_v37, %v11611_v8 }
 0x614   :  { %13465 = vst [vmem:[#allocation126_spill] sm:$0xff] %v11834_v44  ;;  %13467 = vst [vmem:[#allocation50_spill] sm:$0xff] %v11838_v19  ;;  %v11850_v6 = vadd.f32 %v11404_v37, %v13472_v61  ;;  %v5048_v44 = vmul.f32 %v6793_v35, %v5045_v2  ;;  %v11858_v5 = vadd.f32 %v11404_v37, %v13475_v32  ;;  %v13477_v19 = vld [vmem:[#allocation94_spill] sm:$0xff]  ;;  %v13481_v2 = vld [vmem:[#allocation60_spill] sm:$0xff] }
 0x615   :  { %13469 = vst [vmem:[#allocation56_spill] sm:$0xff] %v11842_v46  ;;  %13471 = vst [vmem:[#allocation93_spill] sm:$0xff] %v11846_v36  ;;  %v11862_v28 = vadd.f32 %v11404_v37, %v13477_v19  ;;  %v11870_v61 = vadd.f32 %v11404_v37, %v11615_v20  ;;  %v11877_v35 = vadd.f32 %v11404_v37, %v13481_v2  ;;  %v13484_v19 = vld [vmem:[#allocation32_spill] sm:$0xff]  ;;  %v13503_v36 = vld [vmem:[#allocation105_spill] sm:$0xff] }
 0x616   :  { %13473 = vst [vmem:[#allocation53_spill] sm:$0xff] %v11850_v6  ;;  %13474 = vst [vmem:[#allocation127_spill] sm:$0xff] %v11854_v0  ;;  %v11881_v32 = vadd.f32 %v11404_v37, %v11623_v7  ;;  %v13485_v8 = vld [vmem:[#allocation16_spill] sm:$0xff]  ;;  %v11889_v20 = vadd.f32 %v11404_v37, %v11627_v4  ;;  %v11897_v2 = vadd.f32 %v11404_v37, %v11635_v3 }
 0x617   :  { %13476 = vst [vmem:[#allocation80_spill] sm:$0xff] %v11858_v5  ;;  %13478 = vst [vmem:[#allocation94_spill] sm:$0xff] %v11862_v28  ;;  %v11884_v28 = vrot.slane %v5048_v44, %v13484_v19  ;;  %v11901_v7 = vadd.f32 %v11404_v37, %v11639_v39  ;;  %v13495_v39 = vld [vmem:[#allocation100_spill] sm:$0xff] }
 0x618   :  { %13479 = vst [vmem:[#allocation128_spill] sm:$0xff] %v11866_v14  ;;  %13480 = vst [vmem:[#allocation129_spill] sm:$0xff] %v11870_v61  ;;  %v5120_v14 = vmul.f32 %v5048_v44, %v13485_v8  ;;  %v11893_v61 = vadd.f32 %v11404_v37, %v11631_v30  ;;  %v13491_v8 = vld [vmem:[#allocation20_spill] sm:$0xff] }
 0x619   :  { %13482 = vst [vmem:[#allocation60_spill] sm:$0xff] %v11877_v35  ;;  %13483 = vst [vmem:[#allocation130_spill] sm:$0xff] %v11881_v32  ;;  %v13490_v32 = vld [vmem:[#allocation91_spill] sm:$0xff]  ;;  %v11907_v4 = vmul.f32 %v11884_v28, %v13491_v8 }
 0x61a   :  { %13486 = vst [vmem:[#allocation32_spill] sm:$0xff] %v11889_v20  ;;  %13487 = vst [vmem:[#allocation16_spill] sm:$0xff] %v11893_v61  ;;  %v5116_v35 = vmul.f32 %v11884_v28, %v13490_v32  ;;  %v5121_v44 = vsub.f32 %v5119_v12, %v5120_v14  ;;  %v13492_v20 = vld [vmem:[#allocation71_spill] sm:$0xff]  ;;  %v13493_v61 = vld [vmem:[#allocation40_spill] sm:$0xff]  ;;  %v11923_v32 = vmul.f32 %v11884_v28, %v13495_v39 }
 0x61b   :  { %13488 = vst [vmem:[#allocation131_spill] sm:$0xff] %v11897_v2  ;;  %13489 = vst [vmem:[#allocation132_spill] sm:$0xff] %v11901_v7  ;;  %v11911_v30 = vmul.f32 %v11884_v28, %v13492_v20  ;;  %v11915_v3 = vmul.f32 %v13493_v61, %v11884_v28  ;;  %v13494_v2 = vld [vmem:[#allocation69_spill] sm:$0xff]  ;;  %v13497_v20 = vld [vmem:[#allocation102_spill] sm:$0xff] }
 0x61c   :  { %v11919_v37 = vmul.f32 %v13494_v2, %v11884_v28  ;;  %v13496_v14 = vld [vmem:[#allocation21_spill] sm:$0xff]  ;;  %v11930_v8 = vrot.slane %v5121_v44, %v13484_v19  ;;  %v11934_v7 = vmul.f32 %v13497_v20, %v11884_v28  ;;  %v13500_v39 = vld [vmem:[#allocation103_spill] sm:$0xff]  ;;  %v13502_v44 = vld [vmem:[#allocation72_spill] sm:$0xff] }
 0x61d   :  { %v11927_v12 = vmul.f32 %v11884_v28, %v13496_v14  ;;  %v13498_v61 = vld [vmem:[#allocation109_spill] sm:$0xff]  ;;  %v11946_v6 = vmul.f32 %v11884_v28, %v13500_v39  ;;  %v11954_v20 = vmul.f32 %v13502_v44, %v11884_v28  ;;  %v13505_v39 = vld [vmem:[#allocation26_spill] sm:$0xff]  ;;  %v13507_v44 = vld [vmem:[#allocation24_spill] sm:$0xff] }
 0x61e   :  { %v11938_v5 = vmul.f32 %v13498_v61, %v11884_v28  ;;  %v13499_v2 = vld [vmem:[#allocation17_spill] sm:$0xff]  ;;  %v11958_v61 = vmul.f32 %v11884_v28, %v13503_v36  ;;  %v5189_v46 = vadd.f32 %v11930_v8, %v5116_v35  ;;  %v11967_v49 = vmul.f32 %v13505_v39, %v11884_v28  ;;  %v13508_v36 = vld [vmem:[#allocation82_spill] sm:$0xff]  ;;  %v13509_v35 = vld [vmem:[#allocation79_spill] sm:$0xff] }
 0x61f   :  { %v11942_v0 = vmul.f32 %v11884_v28, %v13499_v2  ;;  %v13501_v14 = vld [vmem:[#allocation97_spill] sm:$0xff]  ;;  %v13504_v2 = vld [vmem:[#allocation22_spill] sm:$0xff]  ;;  %v11975_v9 = vmul.f32 %v11884_v28, %v13507_v44  ;;  %v11979_v10 = vmul.f32 %v11884_v28, %v13508_v36  ;;  %v11987_v39 = vmul.f32 %v13510_v59, %v11884_v28  ;;  %v13513_v44 = vld [vmem:[#allocation23_spill] sm:$0xff] }
 0x620   :  { %v11950_v19 = vmul.f32 %v13501_v14, %v11884_v28  ;;  %v11963_v45 = vmul.f32 %v11884_v28, %v13504_v2  ;;  %v13506_v14 = vld [vmem:[#allocation112_spill] sm:$0xff]  ;;  %v11983_v2 = vmul.f32 %v13509_v35, %v11884_v28  ;;  %v5927_v11 = vadd.f32 %v13511_v23, %v5189_v46  ;;  %v13514_v36 = vld [vmem:[#allocation111_spill] sm:$0xff]  ;;  %v13515_v35 = vld [vmem:[#allocation78_spill] sm:$0xff] }
 0x621   :  { %v11971_v25 = vmul.f32 %v13506_v14, %v11884_v28  ;;  %v13512_v14 = vld [vmem:[#allocation44_spill] sm:$0xff]  ;;  %v11996_v31 = vmul.f32 %v11884_v28, %v13513_v44  ;;  %v12000_v60 = vmul.f32 %v13514_v36, %v11884_v28  ;;  %v12004_v22 = vmul.f32 %v13515_v35, %v11884_v28  ;;  %v13517_v23 = vld [vmem:[#allocation6_spill] sm:$0xff]  ;;  %v13519_v36 = vld [vmem:[#allocation7_spill] sm:$0xff] }
 0x622   :  { %v11992_v63 = vmul.f32 %v11884_v28, %v13512_v14  ;;  %v13516_v59 = vld [vmem:[#allocation84_spill] sm:$0xff]  ;;  %v12012_v46 = vmul.f32 %v11884_v28, %v13517_v23  ;;  %v13518_v14 = vld [vmem:[#allocation5_spill] sm:$0xff]  ;;  %v5991_v62 = vmax.f32 %v5927_v11, 0.0  ;;  %v12020_v42 = vmul.f32 %v13519_v36, %v11884_v28  ;;  %v13524_v11 = vld [vmem:[#allocation27_spill] sm:$0xff] }
 0x623   :  { %v12008_v1 = vmul.f32 %v11884_v28, %v13516_v59  ;;  %v12016_v44 = vmul.f32 %v13518_v14, %v11884_v28  ;;  %v12024_v35 = vmul.f32 %v11884_v28, %v13520_v48  ;;  %v12028_v59 = vmul.f32 %v11884_v28, %v13521_v57  ;;  %v13522_v23 = vld [vmem:[#allocation8_spill] sm:$0xff]  ;;  %v13523_v14 = vld [vmem:[#allocation25_spill] sm:$0xff]  ;;  %v13526_v57 = vld [vmem:[#allocation10_spill] sm:$0xff] }
 0x624   :  { %v12032_v41 = vmul.f32 %v13522_v23, %v11884_v28  ;;  %v12036_v51 = vmul.f32 %v13523_v14, %v11884_v28  ;;  %v12040_v36 = vmul.f32 %v11884_v28, %v13524_v11  ;;  %v12044_v48 = vmul.f32 %v11884_v28, %v13525_v56  ;;  %6055 = vst [vmem:[#allocation2 + $0x1e8] sm:$0xff] %v5991_v62  ;;  %v13527_v23 = vld [vmem:[#allocation36_spill] sm:$0xff]  ;;  %v13530_v56 = vld [vmem:[#allocation39_spill] sm:$0xff] }
 0x625   :  { %v12048_v16 = vmul.f32 %v13526_v57, %v11884_v28  ;;  %v12052_v54 = vmul.f32 %v13527_v23, %v11884_v28  ;;  %v12056_v14 = vmul.f32 %v11884_v28, %v13528_v24  ;;  %v12060_v11 = vmul.f32 %v11884_v28, %v13529_v38  ;;  %v13531_v62 = vld [vmem:[#allocation47_spill] sm:$0xff] }
 0x626   :  { %v12064_v40 = vmul.f32 %v13530_v56, %v11884_v28  ;;  %v12068_v57 = vmul.f32 %v13531_v62, %v11884_v28  ;;  %v12072_v23 = vmul.f32 %v11884_v28, %v13532_v55  ;;  %v12076_v24 = vmul.f32 %v11884_v28, %v13533_v34 }
 0x627   :  { %v12080_v38 = vmul.f32 %v13534_v53, %v11884_v28  ;;  %v12084_v56 = vmul.f32 %v13535_v17, %v11884_v28  ;;  %v12088_v62 = vmul.f32 %v11884_v28, %v13536_v13  ;;  %v12092_v55 = vmul.f32 %v11884_v28, %v13537_v27 }
 0x628   :  { %v12096_v34 = vmul.f32 %v13538_v43, %v11884_v28  ;;  %v12100_v53 = vmul.f32 %v13539_v21, %v11884_v28  ;;  %v12104_v17 = vmul.f32 %v11884_v28, %v13540_v29  ;;  %v12108_v13 = vmul.f32 %v11884_v28, %v13541_v33 }
 0x629   :  { %v12112_v27 = vmul.f32 %v13542_v50, %v11884_v28  ;;  %v12116_v43 = vmul.f32 %v13543_v58, %v11884_v28  ;;  %v12120_v21 = vmul.f32 %v11884_v28, %v13545_v18  ;;  %v12124_v29 = vmul.f32 %v11884_v28, %v13547_v52 }
 0x62a   :  { %v12128_v33 = vmul.f32 %v13549_v47, %v11884_v28  ;;  %v12132_v50 = vmul.f32 %v13551_v26, %v11884_v28  ;;  %v12136_v58 = vmul.f32 %v11884_v28, %v13553_v15 }
 0x62b   :  { %13544 = vst [vmem:[#allocation91_spill] sm:$0xff] %v12116_v43  ;;  %13546 = vst [vmem:[#allocation20_spill] sm:$0xff] %v12120_v21  ;;  %v13555_v43 = vld [vmem:[#allocation11_spill] sm:$0xff]  ;;  %v13556_v21 = vld [vmem:[#allocation46_spill] sm:$0xff] }
 0x62c   :  { %13548 = vst [vmem:[#allocation71_spill] sm:$0xff] %v12124_v29  ;;  %13550 = vst [vmem:[#allocation40_spill] sm:$0xff] %v12128_v33  ;;  %v12140_v18 = vmul.f32 %v11884_v28, %v13555_v43  ;;  %v12144_v52 = vmul.f32 %v13556_v21, %v11884_v28  ;;  %v13557_v29 = vld [vmem:[#allocation43_spill] sm:$0xff]  ;;  %v13558_v33 = vld [vmem:[#allocation54_spill] sm:$0xff]  ;;  %v12164_v21 = vadd.f32 %v11930_v8, %v11907_v4 }
 0x62d   :  { %13552 = vst [vmem:[#allocation69_spill] sm:$0xff] %v12132_v50  ;;  %13554 = vst [vmem:[#allocation100_spill] sm:$0xff] %v12136_v58  ;;  %v12148_v47 = vmul.f32 %v13557_v29, %v11884_v28  ;;  %v12152_v26 = vmul.f32 %v11884_v28, %v13558_v33  ;;  %v13559_v50 = vld [vmem:[#allocation49_spill] sm:$0xff]  ;;  %v13560_v58 = vld [vmem:[#allocation51_spill] sm:$0xff]  ;;  %v12168_v29 = vadd.f32 %v11930_v8, %v11911_v30 }
 0x62e   :  { %v12156_v15 = vmul.f32 %v13559_v50, %v11884_v28  ;;  %v12160_v43 = vmul.f32 %v13560_v58, %v11884_v28  ;;  %v12172_v33 = vadd.f32 %v11930_v8, %v11915_v3  ;;  %v12176_v50 = vadd.f32 %v11930_v8, %v11919_v37 }
 0x62f   :  { %v12180_v28 = vadd.f32 %v11930_v8, %v11923_v32  ;;  %v12184_v4 = vadd.f32 %v11930_v8, %v11927_v12  ;;  %v12188_v30 = vadd.f32 %v11930_v8, %v11934_v7  ;;  %v12192_v3 = vadd.f32 %v11930_v8, %v11938_v5 }
 0x630   :  { %v12196_v37 = vadd.f32 %v11930_v8, %v11942_v0  ;;  %v12200_v32 = vadd.f32 %v11930_v8, %v11946_v6  ;;  %v12204_v12 = vadd.f32 %v11930_v8, %v11950_v19  ;;  %v12208_v7 = vadd.f32 %v11930_v8, %v11954_v20 }
 0x631   :  { %v12212_v5 = vadd.f32 %v11930_v8, %v11958_v61  ;;  %v12216_v0 = vadd.f32 %v11930_v8, %v11963_v45  ;;  %v12220_v6 = vadd.f32 %v11930_v8, %v11967_v49  ;;  %v12224_v19 = vadd.f32 %v11930_v8, %v11971_v25 }
 0x632   :  { %v12228_v20 = vadd.f32 %v11930_v8, %v11975_v9  ;;  %v12232_v61 = vadd.f32 %v11930_v8, %v11979_v10  ;;  %v12236_v45 = vadd.f32 %v11930_v8, %v11983_v2  ;;  %v12240_v49 = vadd.f32 %v11930_v8, %v11987_v39  ;;  %v13566_v58 = vld [vmem:[#allocation91_spill] sm:$0xff] }
 0x633   :  { %v12244_v25 = vadd.f32 %v11930_v8, %v11992_v63  ;;  %v12248_v9 = vadd.f32 %v11930_v8, %v11996_v31  ;;  %v12252_v10 = vadd.f32 %v11930_v8, %v12000_v60  ;;  %v12256_v2 = vadd.f32 %v11930_v8, %v12004_v22 }
 0x634   :  { %v12260_v39 = vadd.f32 %v11930_v8, %v12008_v1  ;;  %v12264_v63 = vadd.f32 %v11930_v8, %v12012_v46  ;;  %v12268_v31 = vadd.f32 %v11930_v8, %v12016_v44  ;;  %v12272_v60 = vadd.f32 %v11930_v8, %v12020_v42 }
 0x635   :  { %v12276_v22 = vadd.f32 %v11930_v8, %v12024_v35  ;;  %v12280_v1 = vadd.f32 %v11930_v8, %v12028_v59  ;;  %v12284_v46 = vadd.f32 %v11930_v8, %v12032_v41  ;;  %v12288_v44 = vadd.f32 %v11930_v8, %v12036_v51 }
 0x636   :  { %v12292_v42 = vadd.f32 %v11930_v8, %v12040_v36  ;;  %v12296_v35 = vadd.f32 %v11930_v8, %v12044_v48  ;;  %v12300_v59 = vadd.f32 %v11930_v8, %v12048_v16  ;;  %v12304_v41 = vadd.f32 %v11930_v8, %v12052_v54 }
 0x637   :  { %v12308_v51 = vadd.f32 %v11930_v8, %v12056_v14  ;;  %v12312_v36 = vadd.f32 %v11930_v8, %v12060_v11  ;;  %v12316_v48 = vadd.f32 %v11930_v8, %v12064_v40  ;;  %v12320_v16 = vadd.f32 %v11930_v8, %v12068_v57 }
 0x638   :  { %v12324_v54 = vadd.f32 %v11930_v8, %v12072_v23  ;;  %v12328_v14 = vadd.f32 %v11930_v8, %v12076_v24  ;;  %v12332_v11 = vadd.f32 %v11930_v8, %v12080_v38  ;;  %v12336_v40 = vadd.f32 %v11930_v8, %v12084_v56 }
 0x639   :  { %v12340_v57 = vadd.f32 %v11930_v8, %v12088_v62  ;;  %v12344_v23 = vadd.f32 %v11930_v8, %v12092_v55  ;;  %v12348_v24 = vadd.f32 %v11930_v8, %v12096_v34  ;;  %v12352_v38 = vadd.f32 %v11930_v8, %v12100_v53 }
 0x63a   :  { %v12356_v56 = vadd.f32 %v11930_v8, %v12104_v17  ;;  %v12360_v62 = vadd.f32 %v11930_v8, %v12108_v13  ;;  %v12364_v55 = vadd.f32 %v11930_v8, %v12112_v27  ;;  %v12368_v34 = vadd.f32 %v11930_v8, %v13566_v58 }
 0x63b   :  { %13561 = vst [vmem:[#allocation21_spill] sm:$0xff] %v12348_v24  ;;  %13562 = vst [vmem:[#allocation102_spill] sm:$0xff] %v12352_v38  ;;  %v13567_v24 = vld [vmem:[#allocation20_spill] sm:$0xff]  ;;  %v13568_v38 = vld [vmem:[#allocation71_spill] sm:$0xff] }
 0x63c   :  { %13563 = vst [vmem:[#allocation109_spill] sm:$0xff] %v12356_v56  ;;  %13564 = vst [vmem:[#allocation17_spill] sm:$0xff] %v12360_v62  ;;  %v12372_v53 = vadd.f32 %v11930_v8, %v13567_v24  ;;  %v12376_v17 = vadd.f32 %v11930_v8, %v13568_v38  ;;  %v13569_v56 = vld [vmem:[#allocation40_spill] sm:$0xff]  ;;  %v13570_v62 = vld [vmem:[#allocation69_spill] sm:$0xff]  ;;  %v12392_v24 = vadd.f32 %v11930_v8, %v12140_v18 }
 0x63d   :  { %13565 = vst [vmem:[#allocation103_spill] sm:$0xff] %v12364_v55  ;;  %v12380_v13 = vadd.f32 %v11930_v8, %v13569_v56  ;;  %v12384_v27 = vadd.f32 %v11930_v8, %v13570_v62  ;;  %v13571_v55 = vld [vmem:[#allocation100_spill] sm:$0xff]  ;;  %v12396_v38 = vadd.f32 %v11930_v8, %v12144_v52  ;;  %v12400_v56 = vadd.f32 %v11930_v8, %v12148_v47 }
 0x63e   :  { %v12388_v58 = vadd.f32 %v11930_v8, %v13571_v55  ;;  %13572 = vst [vmem:[#allocation97_spill] sm:$0xff] %v12392_v24  ;;  %v12404_v62 = vadd.f32 %v11930_v8, %v12152_v26  ;;  %v12408_v55 = vadd.f32 %v11930_v8, %v12156_v15  ;;  %v12412_v18 = vadd.f32 %v11930_v8, %v12160_v43  ;;  %v13577_v24 = vld [vmem:[#allocation85_spill] sm:$0xff]  ;;  %v13582_v43 = vld [vmem:[#allocation34_spill] sm:$0xff] }
 0x63f   :  { %13573 = vst [vmem:[#allocation72_spill] sm:$0xff] %v12396_v38  ;;  %13574 = vst [vmem:[#allocation105_spill] sm:$0xff] %v12400_v56  ;;  %v12416_v52 = vadd.f32 %v13577_v24, %v12164_v21  ;;  %v13578_v38 = vld [vmem:[#allocation29_spill] sm:$0xff]  ;;  %v13579_v56 = vld [vmem:[#allocation95_spill] sm:$0xff]  ;;  %v12436_v21 = vadd.f32 %v13582_v43, %v12184_v4 }
 0x640   :  { %13575 = vst [vmem:[#allocation22_spill] sm:$0xff] %v12404_v62  ;;  %13576 = vst [vmem:[#allocation26_spill] sm:$0xff] %v12408_v55  ;;  %v12420_v47 = vadd.f32 %v13578_v38, %v12168_v29  ;;  %v12424_v26 = vadd.f32 %v13579_v56, %v12172_v33  ;;  %v13580_v62 = vld [vmem:[#allocation96_spill] sm:$0xff]  ;;  %v13581_v55 = vld [vmem:[#allocation62_spill] sm:$0xff] }
 0x641   :  { %v12428_v15 = vadd.f32 %v13580_v62, %v12176_v50  ;;  %v12432_v8 = vadd.f32 %v13581_v55, %v12180_v28  ;;  %v13583_v24 = vld [vmem:[#allocation55_spill] sm:$0xff]  ;;  %v13584_v38 = vld [vmem:[#allocation13_spill] sm:$0xff]  ;;  %v13585_v56 = vld [vmem:[#allocation64_spill] sm:$0xff] }
 0x642   :  { %v12440_v29 = vadd.f32 %v13583_v24, %v12188_v30  ;;  %v12444_v33 = vadd.f32 %v13584_v38, %v12192_v3  ;;  %v12448_v50 = vadd.f32 %v13585_v56, %v12196_v37  ;;  %v13586_v62 = vld [vmem:[#allocation88_spill] sm:$0xff]  ;;  %v13587_v55 = vld [vmem:[#allocation59_spill] sm:$0xff]  ;;  %v13589_v24 = vld [vmem:[#allocation90_spill] sm:$0xff] }
 0x643   :  { %v12452_v28 = vadd.f32 %v13586_v62, %v12200_v32  ;;  %v12456_v4 = vadd.f32 %v13587_v55, %v12204_v12  ;;  %v13588_v43 = vld [vmem:[#allocation15_spill] sm:$0xff]  ;;  %v12464_v3 = vadd.f32 %v13589_v24, %v12212_v5  ;;  %v13590_v38 = vld [vmem:[#allocation33_spill] sm:$0xff]  ;;  %v13592_v62 = vld [vmem:[#allocation18_spill] sm:$0xff] }
 0x644   :  { %v12460_v30 = vadd.f32 %v13588_v43, %v12208_v7  ;;  %v12468_v37 = vadd.f32 %v13590_v38, %v12216_v0  ;;  %v13591_v56 = vld [vmem:[#allocation65_spill] sm:$0xff]  ;;  %v12476_v12 = vadd.f32 %v13592_v62, %v12224_v19  ;;  %v13594_v43 = vld [vmem:[#allocation35_spill] sm:$0xff]  ;;  %v13595_v24 = vld [vmem:[#allocation38_spill] sm:$0xff] }
 0x645   :  { %v12472_v32 = vadd.f32 %v13591_v56, %v12220_v6  ;;  %v13593_v55 = vld [vmem:[#allocation61_spill] sm:$0xff]  ;;  %v12484_v5 = vadd.f32 %v13594_v43, %v12232_v61  ;;  %v12488_v0 = vadd.f32 %v13595_v24, %v12236_v45  ;;  %v13596_v38 = vld [vmem:[#allocation104_spill] sm:$0xff]  ;;  %v13597_v56 = vld [vmem:[#allocation63_spill] sm:$0xff] }
 0x646   :  { %v12480_v7 = vadd.f32 %v13593_v55, %v12228_v20  ;;  %v12492_v6 = vadd.f32 %v13596_v38, %v12240_v49  ;;  %v12496_v19 = vadd.f32 %v13597_v56, %v12244_v25  ;;  %v13598_v62 = vld [vmem:[#allocation101_spill] sm:$0xff]  ;;  %v13599_v55 = vld [vmem:[#allocation68_spill] sm:$0xff]  ;;  %v13600_v43 = vld [vmem:[#allocation66_spill] sm:$0xff] }
 0x647   :  { %v12500_v20 = vadd.f32 %v13598_v62, %v12248_v9  ;;  %v12504_v61 = vadd.f32 %v13599_v55, %v12252_v10  ;;  %v12508_v45 = vadd.f32 %v13600_v43, %v12256_v2  ;;  %v13601_v24 = vld [vmem:[#allocation98_spill] sm:$0xff]  ;;  %v13603_v56 = vld [vmem:[#allocation99_spill] sm:$0xff]  ;;  %v13606_v43 = vld [vmem:[#allocation73_spill] sm:$0xff] }
 0x648   :  { %v12512_v49 = vadd.f32 %v13601_v24, %v12260_v39  ;;  %v13602_v38 = vld [vmem:[#allocation30_spill] sm:$0xff]  ;;  %v12520_v9 = vadd.f32 %v13603_v56, %v12268_v31  ;;  %v12532_v39 = vadd.f32 %v13606_v43, %v12280_v1  ;;  %v13609_v56 = vld [vmem:[#allocation76_spill] sm:$0xff]  ;;  %v13612_v43 = vld [vmem:[#allocation83_spill] sm:$0xff] }
 0x649   :  { %v12516_v25 = vadd.f32 %v13602_v38, %v12264_v63  ;;  %v13604_v62 = vld [vmem:[#allocation70_spill] sm:$0xff]  ;;  %v13608_v38 = vld [vmem:[#allocation108_spill] sm:$0xff] }
 0x64a   :  { %v12524_v10 = vadd.f32 %v13604_v62, %v12272_v60  ;;  %v13605_v55 = vld [vmem:[#allocation106_spill] sm:$0xff]  ;;  %v12540_v31 = vadd.f32 %v13608_v38, %v12288_v44  ;;  %v12544_v60 = vadd.f32 %v13609_v56, %v12292_v42  ;;  %v13610_v62 = vld [vmem:[#allocation41_spill] sm:$0xff]  ;;  %v13614_v38 = vld [vmem:[#allocation116_spill] sm:$0xff] }
 0x64b   :  { %v12528_v2 = vadd.f32 %v13605_v55, %v12276_v22  ;;  %v13607_v24 = vld [vmem:[#allocation58_spill] sm:$0xff]  ;;  %v12548_v22 = vadd.f32 %v13610_v62, %v12296_v35  ;;  %v13611_v55 = vld [vmem:[#allocation81_spill] sm:$0xff]  ;;  %v12564_v42 = vadd.f32 %v13614_v38, %v12312_v36 }
 0x64c   :  { %v12536_v63 = vadd.f32 %v13607_v24, %v12284_v46  ;;  %v12552_v1 = vadd.f32 %v13611_v55, %v12300_v59  ;;  %v12556_v46 = vadd.f32 %v13612_v43, %v12304_v41  ;;  %v13613_v24 = vld [vmem:[#allocation115_spill] sm:$0xff]  ;;  %v13615_v56 = vld [vmem:[#allocation117_spill] sm:$0xff]  ;;  %v13616_v62 = vld [vmem:[#allocation118_spill] sm:$0xff] }
 0x64d   :  { %v12560_v44 = vadd.f32 %v13613_v24, %v12308_v51  ;;  %v12568_v35 = vadd.f32 %v13615_v56, %v12316_v48  ;;  %v12572_v59 = vadd.f32 %v13616_v62, %v12320_v16  ;;  %v13617_v55 = vld [vmem:[#allocation119_spill] sm:$0xff]  ;;  %v13619_v43 = vld [vmem:[#allocation120_spill] sm:$0xff]  ;;  %v13621_v24 = vld [vmem:[#allocation121_spill] sm:$0xff] }
 0x64e   :  { %v12576_v41 = vadd.f32 %v13617_v55, %v12324_v54  ;;  %v12580_v51 = vadd.f32 %v13619_v43, %v12328_v14  ;;  %v12584_v36 = vadd.f32 %v13621_v24, %v12332_v11  ;;  %v13623_v38 = vld [vmem:[#allocation122_spill] sm:$0xff]  ;;  %v13625_v56 = vld [vmem:[#allocation123_spill] sm:$0xff]  ;;  %v13627_v62 = vld [vmem:[#allocation124_spill] sm:$0xff] }
 0x64f   :  { %v12588_v48 = vadd.f32 %v13623_v38, %v12336_v40  ;;  %v12592_v16 = vadd.f32 %v13625_v56, %v12340_v57  ;;  %v12596_v54 = vadd.f32 %v13627_v62, %v12344_v23  ;;  %v13628_v55 = vld [vmem:[#allocation21_spill] sm:$0xff]  ;;  %v13630_v43 = vld [vmem:[#allocation102_spill] sm:$0xff]  ;;  %v13636_v56 = vld [vmem:[#allocation103_spill] sm:$0xff] }
 0x650   :  { %13618 = vst [vmem:[#allocation112_spill] sm:$0xff] %v12576_v41  ;;  %13620 = vst [vmem:[#allocation24_spill] sm:$0xff] %v12580_v51  ;;  %v13629_v41 = vld [vmem:[#allocation125_spill] sm:$0xff]  ;;  %v13631_v51 = vld [vmem:[#allocation126_spill] sm:$0xff] }
 0x651   :  { %13622 = vst [vmem:[#allocation82_spill] sm:$0xff] %v12584_v36  ;;  %13624 = vst [vmem:[#allocation79_spill] sm:$0xff] %v12588_v48  ;;  %v12600_v14 = vadd.f32 %v13629_v41, %v13628_v55  ;;  %v12604_v11 = vadd.f32 %v13631_v51, %v13630_v43  ;;  %v13632_v24 = vld [vmem:[#allocation109_spill] sm:$0xff]  ;;  %v13633_v36 = vld [vmem:[#allocation50_spill] sm:$0xff] }
 0x652   :  { %13626 = vst [vmem:[#allocation75_spill] sm:$0xff] %v12592_v16  ;;  %v12608_v40 = vadd.f32 %v13633_v36, %v13632_v24  ;;  %v13634_v38 = vld [vmem:[#allocation17_spill] sm:$0xff]  ;;  %v13635_v48 = vld [vmem:[#allocation56_spill] sm:$0xff]  ;;  %v13640_v55 = vld [vmem:[#allocation127_spill] sm:$0xff] }
 0x653   :  { %v12612_v57 = vadd.f32 %v13635_v48, %v13634_v38  ;;  %v13637_v16 = vld [vmem:[#allocation93_spill] sm:$0xff]  ;;  %v12624_v51 = vadd.f32 %v13640_v55, %v12372_v53  ;;  %v13642_v43 = vld [vmem:[#allocation80_spill] sm:$0xff]  ;;  %v13644_v24 = vld [vmem:[#allocation94_spill] sm:$0xff] }
 0x654   :  { %v12616_v23 = vadd.f32 %v13637_v16, %v13636_v56  ;;  %v13638_v62 = vld [vmem:[#allocation53_spill] sm:$0xff]  ;;  %v12628_v36 = vadd.f32 %v13642_v43, %v12376_v17  ;;  %v12632_v48 = vadd.f32 %v13644_v24, %v12380_v13  ;;  %v13646_v38 = vld [vmem:[#allocation128_spill] sm:$0xff]  ;;  %v13655_v24 = vld [vmem:[#allocation22_spill] sm:$0xff] }
 0x655   :  { %v12620_v41 = vadd.f32 %v13638_v62, %v12368_v34  ;;  %13641 = vst [vmem:[#allocation44_spill] sm:$0xff] %v12624_v51  ;;  %v12636_v16 = vadd.f32 %v13646_v38, %v12384_v27  ;;  %v13648_v56 = vld [vmem:[#allocation129_spill] sm:$0xff]  ;;  %v13651_v55 = vld [vmem:[#allocation72_spill] sm:$0xff]  ;;  %v13652_v51 = vld [vmem:[#allocation130_spill] sm:$0xff] }
 0x656   :  { %13643 = vst [vmem:[#allocation23_spill] sm:$0xff] %v12628_v36  ;;  %13645 = vst [vmem:[#allocation111_spill] sm:$0xff] %v12632_v48  ;;  %v12640_v34 = vadd.f32 %v13648_v56, %v12388_v58  ;;  %v13649_v62 = vld [vmem:[#allocation97_spill] sm:$0xff]  ;;  %v12648_v17 = vadd.f32 %v13652_v51, %v13651_v55  ;;  %v13654_v36 = vld [vmem:[#allocation32_spill] sm:$0xff]  ;;  %v5931_v51 = vmax.f32 %v12420_v47, 0.0  ;;  %v5932_v55 = vmax.f32 %v12424_v26, 0.0 }
 0x657   :  { %13639 = vst [vmem:[#allocation12_spill] sm:$0xff] %v12620_v41  ;;  %13647 = vst [vmem:[#allocation78_spill] sm:$0xff] %v12636_v16  ;;  %v13650_v41 = vld [vmem:[#allocation60_spill] sm:$0xff]  ;;  %v13653_v43 = vld [vmem:[#allocation105_spill] sm:$0xff]  ;;  %v5941_v47 = vmax.f32 %v12460_v30, 0.0  ;;  %v5942_v26 = vmax.f32 %v12464_v3, 0.0 }
 0x658   :  { %v12644_v53 = vadd.f32 %v13650_v41, %v13649_v62  ;;  %v12652_v13 = vadd.f32 %v13654_v36, %v13653_v43  ;;  %v13656_v48 = vld [vmem:[#allocation16_spill] sm:$0xff]  ;;  %v13657_v38 = vld [vmem:[#allocation26_spill] sm:$0xff]  ;;  %v13658_v16 = vld [vmem:[#allocation131_spill] sm:$0xff]  ;;  %v5930_v62 = vmax.f32 %v12416_v52, 0.0  ;;  %v5933_v36 = vmax.f32 %v12428_v15, 0.0  ;;  %5995 = vst [vmem:[#allocation2 + $0x8] sm:$0xff] %v5931_v51 }
 0x659   :  { %v12656_v27 = vadd.f32 %v13656_v48, %v13655_v24  ;;  %v12660_v58 = vadd.f32 %v13658_v16, %v13657_v38  ;;  %v13659_v56 = vld [vmem:[#allocation132_spill] sm:$0xff]  ;;  %v5934_v43 = vmax.f32 %v12432_v8, 0.0  ;;  %v5935_v48 = vmax.f32 %v12436_v21, 0.0  ;;  %5996 = vst [vmem:[#allocation2 + $0x10] sm:$0xff] %v5932_v55  ;;  %6005 = vst [vmem:[#allocation2 + $0x58] sm:$0xff] %v5941_v47 }
 0x65a   :  { %v12664_v41 = vadd.f32 %v13659_v56, %v12412_v18  ;;  %v5936_v24 = vmax.f32 %v12440_v29, 0.0  ;;  %v5937_v16 = vmax.f32 %v12444_v33, 0.0  ;;  %v5938_v38 = vmax.f32 %v12448_v50, 0.0  ;;  %5994 = vst [vmem:[#allocation2] sm:$0xff] %v5930_v62  ;;  %5997 = vst [vmem:[#allocation2 + $0x18] sm:$0xff] %v5933_v36  ;;  %v13664_v62 = vld [vmem:[#allocation75_spill] sm:$0xff] }
 0x65b   :  { %v5939_v18 = vmax.f32 %v12452_v28, 0.0  ;;  %v5940_v52 = vmax.f32 %v12456_v4, 0.0  ;;  %5998 = vst [vmem:[#allocation2 + $0x20] sm:$0xff] %v5934_v43  ;;  %v5943_v15 = vmax.f32 %v12468_v37, 0.0  ;;  %v5944_v8 = vmax.f32 %v12472_v32, 0.0  ;;  %5999 = vst [vmem:[#allocation2 + $0x28] sm:$0xff] %v5935_v48 }
 0x65c   :  { %v5945_v21 = vmax.f32 %v12476_v12, 0.0  ;;  %v5946_v29 = vmax.f32 %v12480_v7, 0.0  ;;  %6000 = vst [vmem:[#allocation2 + $0x30] sm:$0xff] %v5936_v24  ;;  %6001 = vst [vmem:[#allocation2 + $0x38] sm:$0xff] %v5937_v16  ;;  %v5947_v33 = vmax.f32 %v12484_v5, 0.0  ;;  %v5948_v50 = vmax.f32 %v12488_v0, 0.0 }
 0x65d   :  { %6002 = vst [vmem:[#allocation2 + $0x40] sm:$0xff] %v5938_v38  ;;  %v5949_v28 = vmax.f32 %v12492_v6, 0.0  ;;  %v5950_v4 = vmax.f32 %v12496_v19, 0.0  ;;  %6003 = vst [vmem:[#allocation2 + $0x48] sm:$0xff] %v5939_v18  ;;  %v5951_v30 = vmax.f32 %v12500_v20, 0.0  ;;  %v5952_v3 = vmax.f32 %v12504_v61, 0.0 }
 0x65e   :  { %6004 = vst [vmem:[#allocation2 + $0x50] sm:$0xff] %v5940_v52  ;;  %6006 = vst [vmem:[#allocation2 + $0x60] sm:$0xff] %v5942_v26  ;;  %v5953_v37 = vmax.f32 %v12508_v45, 0.0  ;;  %v5954_v32 = vmax.f32 %v12512_v49, 0.0  ;;  %v5955_v12 = vmax.f32 %v12516_v25, 0.0  ;;  %v5956_v7 = vmax.f32 %v12520_v9, 0.0 }
 0x65f   :  { %6007 = vst [vmem:[#allocation2 + $0x68] sm:$0xff] %v5943_v15  ;;  %6008 = vst [vmem:[#allocation2 + $0x70] sm:$0xff] %v5944_v8  ;;  %v5957_v5 = vmax.f32 %v12524_v10, 0.0  ;;  %v5958_v0 = vmax.f32 %v12528_v2, 0.0  ;;  %v5959_v6 = vmax.f32 %v12532_v39, 0.0  ;;  %v5960_v19 = vmax.f32 %v12536_v63, 0.0 }
 0x660   :  { %6009 = vst [vmem:[#allocation2 + $0x78] sm:$0xff] %v5945_v21  ;;  %6010 = vst [vmem:[#allocation2 + $0x80] sm:$0xff] %v5946_v29  ;;  %v5961_v20 = vmax.f32 %v12540_v31, 0.0  ;;  %v5962_v61 = vmax.f32 %v12544_v60, 0.0  ;;  %v5963_v45 = vmax.f32 %v12548_v22, 0.0  ;;  %v5964_v49 = vmax.f32 %v12552_v1, 0.0 }
 0x661   :  { %6011 = vst [vmem:[#allocation2 + $0x88] sm:$0xff] %v5947_v33  ;;  %6012 = vst [vmem:[#allocation2 + $0x90] sm:$0xff] %v5948_v50  ;;  %v5965_v25 = vmax.f32 %v12556_v46, 0.0  ;;  %v5966_v9 = vmax.f32 %v12560_v44, 0.0  ;;  %v5967_v10 = vmax.f32 %v12564_v42, 0.0  ;;  %v5968_v2 = vmax.f32 %v12568_v35, 0.0 }
 0x662   :  { %6013 = vst [vmem:[#allocation2 + $0x98] sm:$0xff] %v5949_v28  ;;  %6014 = vst [vmem:[#allocation2 + $0xa0] sm:$0xff] %v5950_v4  ;;  %v5969_v39 = vmax.f32 %v12572_v59, 0.0  ;;  %v13660_v63 = vld [vmem:[#allocation112_spill] sm:$0xff]  ;;  %v13662_v1 = vld [vmem:[#allocation82_spill] sm:$0xff]  ;;  %v5974_v51 = vmax.f32 %v13664_v62, 0.0 }
 0x663   :  { %6015 = vst [vmem:[#allocation2 + $0xa8] sm:$0xff] %v5951_v30  ;;  %6016 = vst [vmem:[#allocation2 + $0xb0] sm:$0xff] %v5952_v3  ;;  %v5970_v31 = vmax.f32 %v13660_v63, 0.0  ;;  %v13661_v60 = vld [vmem:[#allocation24_spill] sm:$0xff]  ;;  %v5972_v46 = vmax.f32 %v13662_v1, 0.0  ;;  %v13663_v44 = vld [vmem:[#allocation79_spill] sm:$0xff] }
 0x664   :  { %6017 = vst [vmem:[#allocation2 + $0xb8] sm:$0xff] %v5953_v37  ;;  %6018 = vst [vmem:[#allocation2 + $0xc0] sm:$0xff] %v5954_v32  ;;  %v5971_v22 = vmax.f32 %v13661_v60, 0.0  ;;  %v5973_v56 = vmax.f32 %v13663_v44, 0.0  ;;  %v5975_v42 = vmax.f32 %v12596_v54, 0.0  ;;  %v5976_v35 = vmax.f32 %v12600_v14, 0.0 }
 0x665   :  { %6019 = vst [vmem:[#allocation2 + $0xc8] sm:$0xff] %v5955_v12  ;;  %6020 = vst [vmem:[#allocation2 + $0xd0] sm:$0xff] %v5956_v7  ;;  %v5977_v59 = vmax.f32 %v12604_v11, 0.0  ;;  %v5978_v55 = vmax.f32 %v12608_v40, 0.0  ;;  %v5979_v36 = vmax.f32 %v12612_v57, 0.0  ;;  %v5980_v43 = vmax.f32 %v12616_v23, 0.0 }
 0x666   :  { %6021 = vst [vmem:[#allocation2 + $0xd8] sm:$0xff] %v5957_v5  ;;  %6022 = vst [vmem:[#allocation2 + $0xe0] sm:$0xff] %v5958_v0  ;;  %v13665_v48 = vld [vmem:[#allocation12_spill] sm:$0xff]  ;;  %v13667_v54 = vld [vmem:[#allocation23_spill] sm:$0xff]  ;;  %v5986_v57 = vmax.f32 %v12640_v34, 0.0  ;;  %v5987_v23 = vmax.f32 %v12644_v53, 0.0 }
 0x667   :  { %6023 = vst [vmem:[#allocation2 + $0xe8] sm:$0xff] %v5959_v6  ;;  %6024 = vst [vmem:[#allocation2 + $0xf0] sm:$0xff] %v5960_v19  ;;  %v5981_v24 = vmax.f32 %v13665_v48, 0.0  ;;  %v13666_v16 = vld [vmem:[#allocation44_spill] sm:$0xff]  ;;  %v5983_v14 = vmax.f32 %v13667_v54, 0.0  ;;  %v13668_v11 = vld [vmem:[#allocation111_spill] sm:$0xff] }
 0x668   :  { %6025 = vst [vmem:[#allocation2 + $0xf8] sm:$0xff] %v5961_v20  ;;  %6026 = vst [vmem:[#allocation2 + $0x100] sm:$0xff] %v5962_v61  ;;  %v5982_v38 = vmax.f32 %v13666_v16, 0.0  ;;  %v5984_v40 = vmax.f32 %v13668_v11, 0.0  ;;  %v13669_v18 = vld [vmem:[#allocation78_spill] sm:$0xff]  ;;  %v5988_v47 = vmax.f32 %v12648_v17, 0.0 }
 0x669   :  { %6027 = vst [vmem:[#allocation2 + $0x108] sm:$0xff] %v5963_v45  ;;  %6028 = vst [vmem:[#allocation2 + $0x110] sm:$0xff] %v5964_v49  ;;  %v5985_v52 = vmax.f32 %v13669_v18, 0.0  ;;  %v5989_v26 = vmax.f32 %v12652_v13, 0.0  ;;  %v5990_v15 = vmax.f32 %v12656_v27, 0.0  ;;  %v5992_v8 = vmax.f32 %v12660_v58, 0.0 }
 0x66a   :  { %6029 = vst [vmem:[#allocation2 + $0x118] sm:$0xff] %v5965_v25  ;;  %6030 = vst [vmem:[#allocation2 + $0x120] sm:$0xff] %v5966_v9  ;;  %v5993_v34 = vmax.f32 %v12664_v41, 0.0 }
 0x66b   :  { %6031 = vst [vmem:[#allocation2 + $0x128] sm:$0xff] %v5967_v10  ;;  %6032 = vst [vmem:[#allocation2 + $0x130] sm:$0xff] %v5968_v2 }
 0x66c   :  { %6033 = vst [vmem:[#allocation2 + $0x138] sm:$0xff] %v5969_v39  ;;  %6034 = vst [vmem:[#allocation2 + $0x140] sm:$0xff] %v5970_v31 }
 0x66d   :  { %6035 = vst [vmem:[#allocation2 + $0x148] sm:$0xff] %v5971_v22  ;;  %6036 = vst [vmem:[#allocation2 + $0x150] sm:$0xff] %v5972_v46 }
 0x66e   :  { %6037 = vst [vmem:[#allocation2 + $0x158] sm:$0xff] %v5973_v56  ;;  %6038 = vst [vmem:[#allocation2 + $0x160] sm:$0xff] %v5974_v51 }
 0x66f   :  { %6039 = vst [vmem:[#allocation2 + $0x168] sm:$0xff] %v5975_v42  ;;  %6040 = vst [vmem:[#allocation2 + $0x170] sm:$0xff] %v5976_v35 }
 0x670   :  { %6041 = vst [vmem:[#allocation2 + $0x178] sm:$0xff] %v5977_v59  ;;  %6042 = vst [vmem:[#allocation2 + $0x180] sm:$0xff] %v5978_v55 }
 0x671   :  { %6043 = vst [vmem:[#allocation2 + $0x188] sm:$0xff] %v5979_v36  ;;  %6044 = vst [vmem:[#allocation2 + $0x190] sm:$0xff] %v5980_v43 }
 0x672   :  { %6045 = vst [vmem:[#allocation2 + $0x198] sm:$0xff] %v5981_v24  ;;  %6046 = vst [vmem:[#allocation2 + $0x1a0] sm:$0xff] %v5982_v38 }
 0x673   :  { %6047 = vst [vmem:[#allocation2 + $0x1a8] sm:$0xff] %v5983_v14  ;;  %6048 = vst [vmem:[#allocation2 + $0x1b0] sm:$0xff] %v5984_v40 }
 0x674   :  { %6049 = vst [vmem:[#allocation2 + $0x1b8] sm:$0xff] %v5985_v52  ;;  %6050 = vst [vmem:[#allocation2 + $0x1c0] sm:$0xff] %v5986_v57 }
 0x675   :  { %6051 = vst [vmem:[#allocation2 + $0x1c8] sm:$0xff] %v5987_v23  ;;  %6052 = vst [vmem:[#allocation2 + $0x1d0] sm:$0xff] %v5988_v47 }
 0x676   :  { %6053 = vst [vmem:[#allocation2 + $0x1d8] sm:$0xff] %v5989_v26  ;;  %6054 = vst [vmem:[#allocation2 + $0x1e0] sm:$0xff] %v5990_v15 }
 0x677   :  { %6056 = vst [vmem:[#allocation2 + $0x1f0] sm:$0xff] %v5992_v8  ;;  %6057 = vst [vmem:[#allocation2 + $0x1f8] sm:$0xff] %v5993_v34 }
 0x678   :  { %6837 = shalt.err (!%p6834_p4)
}
 0x679   :  { %s6853_s28 = smov 128   ;;  %s6854_s29 = smov 8  }
 0x67a   :  { %6069 = dma.vmem_to_hbm [thread:$0]  %s6064_s1, 8192, %s12745_s13, [#allocation3], %s6853_s28, %s6853_s28, %s6854_s29  }
 0x67b   :  { %6846 = dma.done.wait [#allocation3], 8192  }
 0x67c   :  { %6847 = vsyncadd [#allocation3], 4294959104 }
 0x67d   :  { %6073 = vsyncpa [#allocation3], 1 }

</bundles_post_ra>
